<compile_context>
chip_gen: v7x
topology: tpu7x:2x2x1
jax: 0.10.0
libtpu: 0.0.40
codegen_flags: <defaults>
</compile_context>

<pallas_src>
import functools

import jax
import jax.numpy as jnp
from jax.experimental import pallas as pl
from jax.experimental.pallas import tpu as pltpu


def _round_up(x, m):
    return (x + m - 1) // m * m


def _pad2(x, rows, cols):
    if rows == 0 and cols == 0:
        return x
    return jnp.pad(x, ((0, rows), (0, cols)))


# ----------------------------------------------------------------------------
# Pallas kernels: fused matmul   out = [relu](A @ W + bias) [+ residual]
# ----------------------------------------------------------------------------
def _matmul_kernel_single_k(*refs, relu, has_res):
    """Whole contraction in one tile: no reduction axis, no scratch."""
    if has_res:
        a_ref, w_ref, b_ref, res_ref, o_ref = refs
    else:
        a_ref, w_ref, b_ref, o_ref = refs
        res_ref = None
    out = jnp.dot(a_ref[...], w_ref[...], preferred_element_type=jnp.float32)
    out = out + b_ref[...]
    if relu:
        out = jnp.maximum(out, 0.0)
    if has_res:
        out = out + res_ref[...].astype(jnp.float32)   # skip-add AFTER the ReLU
    o_ref[...] = out.astype(o_ref.dtype)


def _matmul_kernel_multi_k(*refs, relu, has_res):
    """K split across the innermost 'arbitrary' grid axis, f32 VMEM acc."""
    if has_res:
        a_ref, w_ref, b_ref, res_ref, o_ref, acc_ref = refs
    else:
        a_ref, w_ref, b_ref, o_ref, acc_ref = refs
        res_ref = None
    k = pl.program_id(1)

    @pl.when(k == 0)
    def _():
        acc_ref[...] = jnp.zeros_like(acc_ref)

    acc_ref[...] += jnp.dot(a_ref[...], w_ref[...],
                            preferred_element_type=jnp.float32)

    @pl.when(k == pl.num_programs(1) - 1)
    def _():
        out = acc_ref[...] + b_ref[...]
        if relu:
            out = jnp.maximum(out, 0.0)
        if has_res:
            out = out + res_ref[...].astype(jnp.float32)
        o_ref[...] = out.astype(o_ref.dtype)


def fused_matmul(a, w, bias, residual=None, *, relu=True, out_dtype=jnp.float32):
    """a: (M, K), w: (K, N), bias: (N,), residual: (M, N) or None -> (M, N)."""
    M, K = a.shape
    Kw, N = w.shape
    assert K == Kw

    # Lane-dense padding: N and K to multiples of 128, M to a multiple of tm.
    Npad = _round_up(N, 128)
    Kpad = _round_up(K, 128)
    tk = Kpad if Kpad <= 2048 else 1024
    Kpad = _round_up(Kpad, tk)
    tm = min(512, _round_up(M, 8))
    Mpad = _round_up(M, tm)
    k_tiles = Kpad // tk

    a_p = _pad2(a.astype(jnp.bfloat16), Mpad - M, Kpad - K)
    w_p = _pad2(w.astype(jnp.bfloat16), Kpad - K, Npad - N)
    b_p = _pad2(bias.astype(jnp.float32).reshape(1, N), 0, Npad - N)

    has_res = residual is not None
    operands = [a_p, w_p, b_p]
    if has_res:
        operands.append(_pad2(residual, Mpad - M, Npad - N))

    if k_tiles == 1:
        # Fast path: single contraction step, fully parallel 1-D grid.
        in_specs = [
            pl.BlockSpec((tm, Kpad), lambda i: (i, 0)),
            pl.BlockSpec((Kpad, Npad), lambda i: (0, 0)),
            pl.BlockSpec((1, Npad), lambda i: (0, 0)),
        ]
        if has_res:
            in_specs.append(pl.BlockSpec((tm, Npad), lambda i: (i, 0)))
        kernel = functools.partial(_matmul_kernel_single_k,
                                   relu=relu, has_res=has_res)
        out = pl.pallas_call(
            kernel,
            out_shape=jax.ShapeDtypeStruct((Mpad, Npad), out_dtype),
            grid_spec=pltpu.PrefetchScalarGridSpec(
                num_scalar_prefetch=0,
                grid=(Mpad // tm,),
                in_specs=in_specs,
                out_specs=pl.BlockSpec((tm, Npad), lambda i: (i, 0)),
            ),
            compiler_params=pltpu.CompilerParams(
                dimension_semantics=("parallel",)),
        )(*operands)
    else:
        # General path: K tiled along the innermost 'arbitrary' axis.
        in_specs = [
            pl.BlockSpec((tm, tk), lambda i, k: (i, k)),
            pl.BlockSpec((tk, Npad), lambda i, k: (k, 0)),
            pl.BlockSpec((1, Npad), lambda i, k: (0, 0)),
        ]
        if has_res:
            in_specs.append(pl.BlockSpec((tm, Npad), lambda i, k: (i, 0)))
        kernel = functools.partial(_matmul_kernel_multi_k,
                                   relu=relu, has_res=has_res)
        out = pl.pallas_call(
            kernel,
            out_shape=jax.ShapeDtypeStruct((Mpad, Npad), out_dtype),
            grid_spec=pltpu.PrefetchScalarGridSpec(
                num_scalar_prefetch=0,
                grid=(Mpad // tm, k_tiles),
                in_specs=in_specs,
                out_specs=pl.BlockSpec((tm, Npad), lambda i, k: (i, 0)),
                scratch_shapes=[pltpu.VMEM((tm, Npad), jnp.float32)],
            ),
            compiler_params=pltpu.CompilerParams(
                dimension_semantics=("parallel", "arbitrary")),
        )(*operands)

    if Mpad == M and Npad == N:
        return out
    return out[:M, :N]


# ----------------------------------------------------------------------------
# JAX glue: conv / transposed-conv lowering onto the fused matmul kernel
# ----------------------------------------------------------------------------
def conv3d_block(x, w, bias, *, stride=1, pad=1, relu=True,
                 out_dtype=jnp.bfloat16):
    """x: (B, D, H, W, Cin); w: (k,k,k,Cin,Cout) with the BN scale pre-folded."""
    k = w.shape[0]
    cout = w.shape[-1]
    B, D, H, W, C = x.shape
    xb = x.astype(jnp.bfloat16)          # MXU feed dtype; halves im2col bytes
    xp = jnp.pad(xb, ((0, 0), (pad, pad), (pad, pad), (pad, pad), (0, 0)))
    Do = (D + 2 * pad - k) // stride + 1
    Ho = (H + 2 * pad - k) // stride + 1
    Wo = (W + 2 * pad - k) // stride + 1
    # TODO(synk): im2col still materializes k^3-amplified patches in HBM; a
    # halo-tiled in-kernel tap reduction would remove this read amplification.
    cols = []
    for kd in range(k):
        for kh in range(k):
            for kw in range(k):
                cols.append(xp[:, kd:kd + (Do - 1) * stride + 1:stride,
                                  kh:kh + (Ho - 1) * stride + 1:stride,
                                  kw:kw + (Wo - 1) * stride + 1:stride, :])
    patches = jnp.concatenate(cols, axis=-1).reshape(B * Do * Ho * Wo, k ** 3 * C)
    y = fused_matmul(patches, w.reshape(k ** 3 * C, cout), bias,
                     relu=relu, out_dtype=out_dtype)
    return y.reshape(B, Do, Ho, Wo, cout)


def deconv3d_block(x, w_big, bias_big, residual, *, out_dtype=jnp.bfloat16):
    """ConvTranspose3d(k=3, s=2, p=1, output_padding=1) + BN + ReLU, then
    `residual + result`, all in ONE fused Pallas matmul (parity decomposition).

    x: (B, D, H, W, Cin); w_big: (8*Cin, 8*Cout); residual: (B, 2D, 2H, 2W, Cout).
    """
    B, D, H, W, Cin = x.shape
    cout = w_big.shape[1] // 8
    xb = x.astype(jnp.bfloat16)
    xp = jnp.pad(xb, ((0, 0), (0, 1), (0, 1), (0, 1), (0, 0)))  # high-side halo
    cols = []
    for td in range(2):
        for th in range(2):
            for tw in range(2):
                cols.append(xp[:, td:td + D, th:th + H, tw:tw + W, :])
    patches = jnp.concatenate(cols, axis=-1).reshape(B * D * H * W, 8 * Cin)

    # Skip tensor -> interleaved (row = input voxel, col = (parity, channel)).
    res = residual.reshape(B, D, 2, H, 2, W, 2, cout)
    res = res.transpose(0, 1, 3, 5, 2, 4, 6, 7).reshape(B * D * H * W, 8 * cout)

    y = fused_matmul(patches, w_big, bias_big, residual=res, relu=True,
                     out_dtype=out_dtype)

    # De-interleave the 8 output parities back to the 2x spatial volume.
    y = y.reshape(B, D, H, W, 2, 2, 2, cout)
    y = y.transpose(0, 1, 4, 2, 5, 3, 6, 7)
    return y.reshape(B, 2 * D, 2 * H, 2 * W, cout)


# ----------------------------------------------------------------------------
# Deterministic synthetic parameters (eval-mode BN folded, scale into weights)
# ----------------------------------------------------------------------------
def _xavier(key, shape, fan_in, fan_out):
    limit = (6.0 / (fan_in + fan_out)) ** 0.5
    return jax.random.uniform(key, shape, jnp.float32, -limit, limit)


def _make_conv_bn(key, cin, cout, k=3):
    kw_key, kg, kb = jax.random.split(key, 3)
    w = _xavier(kw_key, (k, k, k, cin, cout), k ** 3 * cin, k ** 3 * cout)
    gamma = jax.random.uniform(kg, (cout,), jnp.float32, 0.8, 1.2)
    beta = jax.random.uniform(kb, (cout,), jnp.float32, -0.1, 0.1)
    mean = jnp.zeros((cout,), jnp.float32)
    var = jnp.ones((cout,), jnp.float32)
    scale = gamma / jnp.sqrt(var + 1e-5)
    bias = beta - mean * scale
    return {"w": w * scale, "b": bias}   # BN scale folded into the weights


def _build_deconv_matrix(w, scale, bias):
    """w: (3,3,3,Cin,Cout) transposed-conv taps -> (8*Cin, 8*Cout) parity matrix.

    Rows index the 2x2x2 input neighbourhood tap (td,th,tw,ci); columns index
    the output parity (pd,ph,pw,co). out[2i+p] = sum_t in[i+t] * w[kmap(p,t)].
    """
    cin, cout = w.shape[3], w.shape[4]
    kmap = {(0, 0): 1, (1, 0): 2, (1, 1): 0}   # (parity, tap offset) -> k index
    w_big = jnp.zeros((2, 2, 2, cin, 2, 2, 2, cout), jnp.float32)
    for pd in range(2):
        for ph in range(2):
            for pw in range(2):
                for td in range(2):
                    for th in range(2):
                        for tw in range(2):
                            kd = kmap.get((pd, td))
                            kh = kmap.get((ph, th))
                            kw = kmap.get((pw, tw))
                            if kd is None or kh is None or kw is None:
                                continue
                            w_big = w_big.at[td, th, tw, :, pd, ph, pw, :].set(
                                w[kd, kh, kw] * scale[None, :])
    return w_big.reshape(8 * cin, 8 * cout), jnp.tile(bias, 8)


def _make_deconv_bn(key, cin, cout):
    kw_key, kg, kb = jax.random.split(key, 3)
    w = _xavier(kw_key, (3, 3, 3, cin, cout), 27 * cin, 27 * cout)
    gamma = jax.random.uniform(kg, (cout,), jnp.float32, 0.8, 1.2)
    beta = jax.random.uniform(kb, (cout,), jnp.float32, -0.1, 0.1)
    scale = gamma / jnp.sqrt(jnp.ones((cout,), jnp.float32) + 1e-5)
    w_big, bias_big = _build_deconv_matrix(w, scale, beta)
    return {"w": w_big, "b": bias_big}


def init_reg3d_params(key, in_channels, base_channels):
    C = base_channels
    keys = jax.random.split(key, 11)
    return {
        "conv0": _make_conv_bn(keys[0], in_channels, C),
        "conv1": _make_conv_bn(keys[1], C, 2 * C),
        "conv2": _make_conv_bn(keys[2], 2 * C, 2 * C),
        "conv3": _make_conv_bn(keys[3], 2 * C, 4 * C),
        "conv4": _make_conv_bn(keys[4], 4 * C, 4 * C),
        "conv5": _make_conv_bn(keys[5], 4 * C, 8 * C),
        "conv6": _make_conv_bn(keys[6], 8 * C, 8 * C),
        "conv7": _make_deconv_bn(keys[7], 8 * C, 4 * C),
        "conv9": _make_deconv_bn(keys[8], 4 * C, 2 * C),
        "conv11": _make_deconv_bn(keys[9], 2 * C, C),
        # prob head: Conv3d(C, 1, 3, pad=1, bias=False), no BN, no ReLU
        "prob": {"w": _xavier(keys[10], (3, 3, 3, C, 1), 27 * C, 27),
                 "b": jnp.zeros((1,), jnp.float32)},
    }


# ----------------------------------------------------------------------------
# reg3d forward (down_size=3, eval-mode BN)
# ----------------------------------------------------------------------------
def reg3d_forward(params, inputs):
    """inputs: (B, D, Cin, H, W) as in the PyTorch module; returns (B, D, H, W)."""
    # permute(0,2,1,3,4) in PyTorch == convolve over (D, H, W) with Cin channels;
    # internally we use channels-last (B, D, H, W, C).
    x = jnp.transpose(inputs, (0, 1, 3, 4, 2)).astype(jnp.float32)

    conv0 = conv3d_block(x, params["conv0"]["w"], params["conv0"]["b"], stride=1)
    h = conv3d_block(conv0, params["conv1"]["w"], params["conv1"]["b"], stride=2)
    conv2 = conv3d_block(h, params["conv2"]["w"], params["conv2"]["b"], stride=1)
    h = conv3d_block(conv2, params["conv3"]["w"], params["conv3"]["b"], stride=2)
    conv4 = conv3d_block(h, params["conv4"]["w"], params["conv4"]["b"], stride=1)
    h = conv3d_block(conv4, params["conv5"]["w"], params["conv5"]["b"], stride=2)
    h = conv3d_block(h, params["conv6"]["w"], params["conv6"]["b"], stride=1)

    # x = conv4 + relu(bn(convT7(x)))  -> skip add fused as kernel residual
    h = deconv3d_block(h, params["conv7"]["w"], params["conv7"]["b"], residual=conv4)
    # x = conv2 + relu(bn(convT9(x)))
    h = deconv3d_block(h, params["conv9"]["w"], params["conv9"]["b"], residual=conv2)
    # x = conv0 + relu(bn(convT11(x)))
    h = deconv3d_block(h, params["conv11"]["w"], params["conv11"]["b"], residual=conv0)

    out = conv3d_block(h, params["prob"]["w"], params["prob"]["b"],
                       stride=1, relu=False, out_dtype=jnp.float32)
    return out[..., 0]   # == squeeze(1) of the (B, 1, D, H, W) PyTorch output


if __name__ == "__main__":
    base_channels = 8
    in_channels = 4
    B, D, H, W = 2, 8, 16, 16   # D, H, W divisible by 8 (three stride-2 stages)

    key = jax.random.PRNGKey(0)
    k_param, k_x = jax.random.split(key)
    params = init_reg3d_params(k_param, in_channels, base_channels)
    x = jax.random.normal(k_x, (B, D, in_channels, H, W), dtype=jnp.float32)

    fwd = jax.jit(reg3d_forward)
    out = fwd(params, x)
    jax.block_until_ready(out)

    assert out.shape == (B, D, H, W), out.shape
    assert bool(jnp.all(jnp.isfinite(out)))
    print("KERNEL_OK")
</pallas_src>

<mosaic_0001>
module attributes {stable_mosaic.version = 11 : i64} {
  func.func @_matmul_kernel_single_k(%arg0: i32, %arg1: memref<512x128xbf16, #tpu.memory_space<vmem>>, %arg2: memref<128x128xbf16, #tpu.memory_space<vmem>>, %arg3: memref<1x128xf32, #tpu.memory_space<vmem>>, %arg4: memref<512x128xbf16, #tpu.memory_space<vmem>>) attributes {dimension_semantics = [#tpu.dimension_semantics<parallel>], iteration_bounds = array<i64: 8>, scalar_prefetch = 0 : i64, scratch_operands = 0 : i64, tpu.core_type = #tpu.core_type<tc>, window_params = [{transform_indices = @transform_0, window_bounds = array<i64: 512, 128>}, {pipeline_mode = #tpu.pipeline_mode<synchronous>, transform_indices = @transform_1, window_bounds = array<i64: 128, 128>}, {pipeline_mode = #tpu.pipeline_mode<synchronous>, transform_indices = @transform_2, window_bounds = array<i64: 1, 128>}, {transform_indices = @transform_3, window_bounds = array<i64: 512, 128>}]} {
    %c0 = arith.constant 0 : index
    %c0_0 = arith.constant 0 : index
    %0 = vector.load %arg1[%c0, %c0_0] : memref<512x128xbf16, #tpu.memory_space<vmem>>, vector<512x128xbf16>
    %c0_1 = arith.constant 0 : index
    %c0_2 = arith.constant 0 : index
    %1 = vector.load %arg2[%c0_1, %c0_2] : memref<128x128xbf16, #tpu.memory_space<vmem>>, vector<128x128xbf16>
    %cst = arith.constant dense<0.000000e+00> : vector<512x128xf32>
    %2 = tpu.matmul %0, %1, %cst {dimension_numbers = #tpu.dot_dimension_numbers<[1], [0], [0], [1], [0, 0, 1, 1], [], []>} : vector<512x128xbf16>, vector<128x128xbf16>, vector<512x128xf32> -> vector<512x128xf32>
    %c0_3 = arith.constant 0 : index
    %c0_4 = arith.constant 0 : index
    %3 = vector.load %arg3[%c0_3, %c0_4] : memref<1x128xf32, #tpu.memory_space<vmem>>, vector<1x128xf32>
    %4 = vector.broadcast %3 : vector<1x128xf32> to vector<512x128xf32>
    %5 = arith.addf %2, %4 : vector<512x128xf32>
    %cst_5 = arith.constant 0.000000e+00 : f32
    %6 = vector.broadcast %cst_5 : f32 to vector<512x128xf32>
    %7 = arith.maximumf %5, %6 : vector<512x128xf32>
    %8 = arith.truncf %7 : vector<512x128xf32> to vector<512x128xbf16>
    %c0_6 = arith.constant 0 : index
    %c0_7 = arith.constant 0 : index
    %9 = vector.load %arg4[%c0_6, %c0_7] : memref<512x128xbf16, #tpu.memory_space<vmem>>, vector<512x128xbf16>
    tpu.vector_store %arg4[%c0_6, %c0_7], %8 {strides = array<i32>} : memref<512x128xbf16, #tpu.memory_space<vmem>>, vector<512x128xbf16>,
    return
  }
  func.func @transform_0(%arg0: i32) -> (i32, i32) {
    %c0_i32 = arith.constant 0 : i32
    %c0_i32_0 = arith.constant 0 : i32
    return %arg0, %c0_i32 : i32, i32
  }
  func.func @transform_1(%arg0: i32) -> (i32, i32) {
    %c0_i32 = arith.constant 0 : i32
    %c0_i32_0 = arith.constant 0 : i32
    %c0_i32_1 = arith.constant 0 : i32
    return %c0_i32, %c0_i32_0 : i32, i32
  }
  func.func @transform_2(%arg0: i32) -> (i32, i32) {
    %c0_i32 = arith.constant 0 : i32
    %c0_i32_0 = arith.constant 0 : i32
    %c0_i32_1 = arith.constant 0 : i32
    return %c0_i32, %c0_i32_0 : i32, i32
  }
  func.func @transform_3(%arg0: i32) -> (i32, i32) {
    %c0_i32 = arith.constant 0 : i32
    %c0_i32_0 = arith.constant 0 : i32
    return %arg0, %c0_i32 : i32, i32
  }
}

module attributes {stable_mosaic.version = 11 : i64} {
  func.func @_matmul_kernel_single_k(%arg0: i32, %arg1: memref<512x256xbf16, #tpu.memory_space<vmem>>, %arg2: memref<256x128xbf16, #tpu.memory_space<vmem>>, %arg3: memref<1x128xf32, #tpu.memory_space<vmem>>, %arg4: memref<512x128xbf16, #tpu.memory_space<vmem>>) attributes {dimension_semantics = [#tpu.dimension_semantics<parallel>], iteration_bounds = array<i64: 1>, scalar_prefetch = 0 : i64, scratch_operands = 0 : i64, tpu.core_type = #tpu.core_type<tc>, window_params = [{transform_indices = @transform_0, window_bounds = array<i64: 512, 256>}, {pipeline_mode = #tpu.pipeline_mode<synchronous>, transform_indices = @transform_1, window_bounds = array<i64: 256, 128>}, {pipeline_mode = #tpu.pipeline_mode<synchronous>, transform_indices = @transform_2, window_bounds = array<i64: 1, 128>}, {transform_indices = @transform_3, window_bounds = array<i64: 512, 128>}]} {
    %c0 = arith.constant 0 : index
    %c0_0 = arith.constant 0 : index
    %0 = vector.load %arg1[%c0, %c0_0] : memref<512x256xbf16, #tpu.memory_space<vmem>>, vector<512x256xbf16>
    %c0_1 = arith.constant 0 : index
    %c0_2 = arith.constant 0 : index
    %1 = vector.load %arg2[%c0_1, %c0_2] : memref<256x128xbf16, #tpu.memory_space<vmem>>, vector<256x128xbf16>
    %cst = arith.constant dense<0.000000e+00> : vector<512x128xf32>
    %2 = tpu.matmul %0, %1, %cst {dimension_numbers = #tpu.dot_dimension_numbers<[1], [0], [0], [1], [0, 0, 1, 1], [], []>} : vector<512x256xbf16>, vector<256x128xbf16>, vector<512x128xf32> -> vector<512x128xf32>
    %c0_3 = arith.constant 0 : index
    %c0_4 = arith.constant 0 : index
    %3 = vector.load %arg3[%c0_3, %c0_4] : memref<1x128xf32, #tpu.memory_space<vmem>>, vector<1x128xf32>
    %4 = vector.broadcast %3 : vector<1x128xf32> to vector<512x128xf32>
    %5 = arith.addf %2, %4 : vector<512x128xf32>
    %cst_5 = arith.constant 0.000000e+00 : f32
    %6 = vector.broadcast %cst_5 : f32 to vector<512x128xf32>
    %7 = arith.maximumf %5, %6 : vector<512x128xf32>
    %8 = arith.truncf %7 : vector<512x128xf32> to vector<512x128xbf16>
    %c0_6 = arith.constant 0 : index
    %c0_7 = arith.constant 0 : index
    %9 = vector.load %arg4[%c0_6, %c0_7] : memref<512x128xbf16, #tpu.memory_space<vmem>>, vector<512x128xbf16>
    tpu.vector_store %arg4[%c0_6, %c0_7], %8 {strides = array<i32>} : memref<512x128xbf16, #tpu.memory_space<vmem>>, vector<512x128xbf16>,
    return
  }
  func.func @transform_0(%arg0: i32) -> (i32, i32) {
    %c0_i32 = arith.constant 0 : i32
    %c0_i32_0 = arith.constant 0 : i32
    return %arg0, %c0_i32 : i32, i32
  }
  func.func @transform_1(%arg0: i32) -> (i32, i32) {
    %c0_i32 = arith.constant 0 : i32
    %c0_i32_0 = arith.constant 0 : i32
    %c0_i32_1 = arith.constant 0 : i32
    return %c0_i32, %c0_i32_0 : i32, i32
  }
  func.func @transform_2(%arg0: i32) -> (i32, i32) {
    %c0_i32 = arith.constant 0 : i32
    %c0_i32_0 = arith.constant 0 : i32
    %c0_i32_1 = arith.constant 0 : i32
    return %c0_i32, %c0_i32_0 : i32, i32
  }
  func.func @transform_3(%arg0: i32) -> (i32, i32) {
    %c0_i32 = arith.constant 0 : i32
    %c0_i32_0 = arith.constant 0 : i32
    return %arg0, %c0_i32 : i32, i32
  }
}

module attributes {stable_mosaic.version = 11 : i64} {
  func.func @_matmul_kernel_single_k(%arg0: i32, %arg1: memref<512x512xbf16, #tpu.memory_space<vmem>>, %arg2: memref<512x128xbf16, #tpu.memory_space<vmem>>, %arg3: memref<1x128xf32, #tpu.memory_space<vmem>>, %arg4: memref<512x128xbf16, #tpu.memory_space<vmem>>) attributes {dimension_semantics = [#tpu.dimension_semantics<parallel>], iteration_bounds = array<i64: 1>, scalar_prefetch = 0 : i64, scratch_operands = 0 : i64, tpu.core_type = #tpu.core_type<tc>, window_params = [{transform_indices = @transform_0, window_bounds = array<i64: 512, 512>}, {pipeline_mode = #tpu.pipeline_mode<synchronous>, transform_indices = @transform_1, window_bounds = array<i64: 512, 128>}, {pipeline_mode = #tpu.pipeline_mode<synchronous>, transform_indices = @transform_2, window_bounds = array<i64: 1, 128>}, {transform_indices = @transform_3, window_bounds = array<i64: 512, 128>}]} {
    %c0 = arith.constant 0 : index
    %c0_0 = arith.constant 0 : index
    %0 = vector.load %arg1[%c0, %c0_0] : memref<512x512xbf16, #tpu.memory_space<vmem>>, vector<512x512xbf16>
    %c0_1 = arith.constant 0 : index
    %c0_2 = arith.constant 0 : index
    %1 = vector.load %arg2[%c0_1, %c0_2] : memref<512x128xbf16, #tpu.memory_space<vmem>>, vector<512x128xbf16>
    %cst = arith.constant dense<0.000000e+00> : vector<512x128xf32>
    %2 = tpu.matmul %0, %1, %cst {dimension_numbers = #tpu.dot_dimension_numbers<[1], [0], [0], [1], [0, 0, 1, 1], [], []>} : vector<512x512xbf16>, vector<512x128xbf16>, vector<512x128xf32> -> vector<512x128xf32>
    %c0_3 = arith.constant 0 : index
    %c0_4 = arith.constant 0 : index
    %3 = vector.load %arg3[%c0_3, %c0_4] : memref<1x128xf32, #tpu.memory_space<vmem>>, vector<1x128xf32>
    %4 = vector.broadcast %3 : vector<1x128xf32> to vector<512x128xf32>
    %5 = arith.addf %2, %4 : vector<512x128xf32>
    %cst_5 = arith.constant 0.000000e+00 : f32
    %6 = vector.broadcast %cst_5 : f32 to vector<512x128xf32>
    %7 = arith.maximumf %5, %6 : vector<512x128xf32>
    %8 = arith.truncf %7 : vector<512x128xf32> to vector<512x128xbf16>
    %c0_6 = arith.constant 0 : index
    %c0_7 = arith.constant 0 : index
    %9 = vector.load %arg4[%c0_6, %c0_7] : memref<512x128xbf16, #tpu.memory_space<vmem>>, vector<512x128xbf16>
    tpu.vector_store %arg4[%c0_6, %c0_7], %8 {strides = array<i32>} : memref<512x128xbf16, #tpu.memory_space<vmem>>, vector<512x128xbf16>,
    return
  }
  func.func @transform_0(%arg0: i32) -> (i32, i32) {
    %c0_i32 = arith.constant 0 : i32
    %c0_i32_0 = arith.constant 0 : i32
    return %arg0, %c0_i32 : i32, i32
  }
  func.func @transform_1(%arg0: i32) -> (i32, i32) {
    %c0_i32 = arith.constant 0 : i32
    %c0_i32_0 = arith.constant 0 : i32
    %c0_i32_1 = arith.constant 0 : i32
    return %c0_i32, %c0_i32_0 : i32, i32
  }
  func.func @transform_2(%arg0: i32) -> (i32, i32) {
    %c0_i32 = arith.constant 0 : i32
    %c0_i32_0 = arith.constant 0 : i32
    %c0_i32_1 = arith.constant 0 : i32
    return %c0_i32, %c0_i32_0 : i32, i32
  }
  func.func @transform_3(%arg0: i32) -> (i32, i32) {
    %c0_i32 = arith.constant 0 : i32
    %c0_i32_0 = arith.constant 0 : i32
    return %arg0, %c0_i32 : i32, i32
  }
}

module attributes {stable_mosaic.version = 11 : i64} {
  func.func @_matmul_kernel_single_k(%arg0: i32, %arg1: memref<64x512xbf16, #tpu.memory_space<vmem>>, %arg2: memref<512x128xbf16, #tpu.memory_space<vmem>>, %arg3: memref<1x128xf32, #tpu.memory_space<vmem>>, %arg4: memref<64x128xbf16, #tpu.memory_space<vmem>>) attributes {dimension_semantics = [#tpu.dimension_semantics<parallel>], iteration_bounds = array<i64: 1>, scalar_prefetch = 0 : i64, scratch_operands = 0 : i64, tpu.core_type = #tpu.core_type<tc>, window_params = [{transform_indices = @transform_0, window_bounds = array<i64: 64, 512>}, {pipeline_mode = #tpu.pipeline_mode<synchronous>, transform_indices = @transform_1, window_bounds = array<i64: 512, 128>}, {pipeline_mode = #tpu.pipeline_mode<synchronous>, transform_indices = @transform_2, window_bounds = array<i64: 1, 128>}, {transform_indices = @transform_3, window_bounds = array<i64: 64, 128>}]} {
    %c0 = arith.constant 0 : index
    %c0_0 = arith.constant 0 : index
    %0 = vector.load %arg1[%c0, %c0_0] : memref<64x512xbf16, #tpu.memory_space<vmem>>, vector<64x512xbf16>
    %c0_1 = arith.constant 0 : index
    %c0_2 = arith.constant 0 : index
    %1 = vector.load %arg2[%c0_1, %c0_2] : memref<512x128xbf16, #tpu.memory_space<vmem>>, vector<512x128xbf16>
    %cst = arith.constant dense<0.000000e+00> : vector<64x128xf32>
    %2 = tpu.matmul %0, %1, %cst {dimension_numbers = #tpu.dot_dimension_numbers<[1], [0], [0], [1], [0, 0, 1, 1], [], []>} : vector<64x512xbf16>, vector<512x128xbf16>, vector<64x128xf32> -> vector<64x128xf32>
    %c0_3 = arith.constant 0 : index
    %c0_4 = arith.constant 0 : index
    %3 = vector.load %arg3[%c0_3, %c0_4] : memref<1x128xf32, #tpu.memory_space<vmem>>, vector<1x128xf32>
    %4 = vector.broadcast %3 : vector<1x128xf32> to vector<64x128xf32>
    %5 = arith.addf %2, %4 : vector<64x128xf32>
    %cst_5 = arith.constant 0.000000e+00 : f32
    %6 = vector.broadcast %cst_5 : f32 to vector<64x128xf32>
    %7 = arith.maximumf %5, %6 : vector<64x128xf32>
    %8 = arith.truncf %7 : vector<64x128xf32> to vector<64x128xbf16>
    %c0_6 = arith.constant 0 : index
    %c0_7 = arith.constant 0 : index
    %9 = vector.load %arg4[%c0_6, %c0_7] : memref<64x128xbf16, #tpu.memory_space<vmem>>, vector<64x128xbf16>
    tpu.vector_store %arg4[%c0_6, %c0_7], %8 {strides = array<i32>} : memref<64x128xbf16, #tpu.memory_space<vmem>>, vector<64x128xbf16>,
    return
  }
  func.func @transform_0(%arg0: i32) -> (i32, i32) {
    %c0_i32 = arith.constant 0 : i32
    %c0_i32_0 = arith.constant 0 : i32
    return %arg0, %c0_i32 : i32, i32
  }
  func.func @transform_1(%arg0: i32) -> (i32, i32) {
    %c0_i32 = arith.constant 0 : i32
    %c0_i32_0 = arith.constant 0 : i32
    %c0_i32_1 = arith.constant 0 : i32
    return %c0_i32, %c0_i32_0 : i32, i32
  }
  func.func @transform_2(%arg0: i32) -> (i32, i32) {
    %c0_i32 = arith.constant 0 : i32
    %c0_i32_0 = arith.constant 0 : i32
    %c0_i32_1 = arith.constant 0 : i32
    return %c0_i32, %c0_i32_0 : i32, i32
  }
  func.func @transform_3(%arg0: i32) -> (i32, i32) {
    %c0_i32 = arith.constant 0 : i32
    %c0_i32_0 = arith.constant 0 : i32
    return %arg0, %c0_i32 : i32, i32
  }
}

module attributes {stable_mosaic.version = 11 : i64} {
  func.func @_matmul_kernel_single_k(%arg0: i32, %arg1: memref<64x896xbf16, #tpu.memory_space<vmem>>, %arg2: memref<896x128xbf16, #tpu.memory_space<vmem>>, %arg3: memref<1x128xf32, #tpu.memory_space<vmem>>, %arg4: memref<64x128xbf16, #tpu.memory_space<vmem>>) attributes {dimension_semantics = [#tpu.dimension_semantics<parallel>], iteration_bounds = array<i64: 1>, scalar_prefetch = 0 : i64, scratch_operands = 0 : i64, tpu.core_type = #tpu.core_type<tc>, window_params = [{transform_indices = @transform_0, window_bounds = array<i64: 64, 896>}, {pipeline_mode = #tpu.pipeline_mode<synchronous>, transform_indices = @transform_1, window_bounds = array<i64: 896, 128>}, {pipeline_mode = #tpu.pipeline_mode<synchronous>, transform_indices = @transform_2, window_bounds = array<i64: 1, 128>}, {transform_indices = @transform_3, window_bounds = array<i64: 64, 128>}]} {
    %c0 = arith.constant 0 : index
    %c0_0 = arith.constant 0 : index
    %0 = vector.load %arg1[%c0, %c0_0] : memref<64x896xbf16, #tpu.memory_space<vmem>>, vector<64x896xbf16>
    %c0_1 = arith.constant 0 : index
    %c0_2 = arith.constant 0 : index
    %1 = vector.load %arg2[%c0_1, %c0_2] : memref<896x128xbf16, #tpu.memory_space<vmem>>, vector<896x128xbf16>
    %cst = arith.constant dense<0.000000e+00> : vector<64x128xf32>
    %2 = tpu.matmul %0, %1, %cst {dimension_numbers = #tpu.dot_dimension_numbers<[1], [0], [0], [1], [0, 0, 1, 1], [], []>} : vector<64x896xbf16>, vector<896x128xbf16>, vector<64x128xf32> -> vector<64x128xf32>
    %c0_3 = arith.constant 0 : index
    %c0_4 = arith.constant 0 : index
    %3 = vector.load %arg3[%c0_3, %c0_4] : memref<1x128xf32, #tpu.memory_space<vmem>>, vector<1x128xf32>
    %4 = vector.broadcast %3 : vector<1x128xf32> to vector<64x128xf32>
    %5 = arith.addf %2, %4 : vector<64x128xf32>
    %cst_5 = arith.constant 0.000000e+00 : f32
    %6 = vector.broadcast %cst_5 : f32 to vector<64x128xf32>
    %7 = arith.maximumf %5, %6 : vector<64x128xf32>
    %8 = arith.truncf %7 : vector<64x128xf32> to vector<64x128xbf16>
    %c0_6 = arith.constant 0 : index
    %c0_7 = arith.constant 0 : index
    %9 = vector.load %arg4[%c0_6, %c0_7] : memref<64x128xbf16, #tpu.memory_space<vmem>>, vector<64x128xbf16>
    tpu.vector_store %arg4[%c0_6, %c0_7], %8 {strides = array<i32>} : memref<64x128xbf16, #tpu.memory_space<vmem>>, vector<64x128xbf16>,
    return
  }
  func.func @transform_0(%arg0: i32) -> (i32, i32) {
    %c0_i32 = arith.constant 0 : i32
    %c0_i32_0 = arith.constant 0 : i32
    return %arg0, %c0_i32 : i32, i32
  }
  func.func @transform_1(%arg0: i32) -> (i32, i32) {
    %c0_i32 = arith.constant 0 : i32
    %c0_i32_0 = arith.constant 0 : i32
    %c0_i32_1 = arith.constant 0 : i32
    return %c0_i32, %c0_i32_0 : i32, i32
  }
  func.func @transform_2(%arg0: i32) -> (i32, i32) {
    %c0_i32 = arith.constant 0 : i32
    %c0_i32_0 = arith.constant 0 : i32
    %c0_i32_1 = arith.constant 0 : i32
    return %c0_i32, %c0_i32_0 : i32, i32
  }
  func.func @transform_3(%arg0: i32) -> (i32, i32) {
    %c0_i32 = arith.constant 0 : i32
    %c0_i32_0 = arith.constant 0 : i32
    return %arg0, %c0_i32 : i32, i32
  }
}

module attributes {stable_mosaic.version = 11 : i64} {
  func.func @_matmul_kernel_single_k(%arg0: i32, %arg1: memref<8x896xbf16, #tpu.memory_space<vmem>>, %arg2: memref<896x128xbf16, #tpu.memory_space<vmem>>, %arg3: memref<1x128xf32, #tpu.memory_space<vmem>>, %arg4: memref<8x128xbf16, #tpu.memory_space<vmem>>) attributes {dimension_semantics = [#tpu.dimension_semantics<parallel>], iteration_bounds = array<i64: 1>, scalar_prefetch = 0 : i64, scratch_operands = 0 : i64, tpu.core_type = #tpu.core_type<tc>, window_params = [{transform_indices = @transform_0, window_bounds = array<i64: 8, 896>}, {pipeline_mode = #tpu.pipeline_mode<synchronous>, transform_indices = @transform_1, window_bounds = array<i64: 896, 128>}, {pipeline_mode = #tpu.pipeline_mode<synchronous>, transform_indices = @transform_2, window_bounds = array<i64: 1, 128>}, {transform_indices = @transform_3, window_bounds = array<i64: 8, 128>}]} {
    %c0 = arith.constant 0 : index
    %c0_0 = arith.constant 0 : index
    %0 = vector.load %arg1[%c0, %c0_0] : memref<8x896xbf16, #tpu.memory_space<vmem>>, vector<8x896xbf16>
    %c0_1 = arith.constant 0 : index
    %c0_2 = arith.constant 0 : index
    %1 = vector.load %arg2[%c0_1, %c0_2] : memref<896x128xbf16, #tpu.memory_space<vmem>>, vector<896x128xbf16>
    %cst = arith.constant dense<0.000000e+00> : vector<8x128xf32>
    %2 = tpu.matmul %0, %1, %cst {dimension_numbers = #tpu.dot_dimension_numbers<[1], [0], [0], [1], [0, 0, 1, 1], [], []>} : vector<8x896xbf16>, vector<896x128xbf16>, vector<8x128xf32> -> vector<8x128xf32>
    %c0_3 = arith.constant 0 : index
    %c0_4 = arith.constant 0 : index
    %3 = vector.load %arg3[%c0_3, %c0_4] : memref<1x128xf32, #tpu.memory_space<vmem>>, vector<1x128xf32>
    %4 = vector.broadcast %3 : vector<1x128xf32> to vector<8x128xf32>
    %5 = arith.addf %2, %4 : vector<8x128xf32>
    %cst_5 = arith.constant 0.000000e+00 : f32
    %6 = vector.broadcast %cst_5 : f32 to vector<8x128xf32>
    %7 = arith.maximumf %5, %6 : vector<8x128xf32>
    %8 = arith.truncf %7 : vector<8x128xf32> to vector<8x128xbf16>
    %c0_6 = arith.constant 0 : index
    %c0_7 = arith.constant 0 : index
    %9 = vector.load %arg4[%c0_6, %c0_7] : memref<8x128xbf16, #tpu.memory_space<vmem>>, vector<8x128xbf16>
    tpu.vector_store %arg4[%c0_6, %c0_7], %8 {strides = array<i32>} : memref<8x128xbf16, #tpu.memory_space<vmem>>, vector<8x128xbf16>,
    return
  }
  func.func @transform_0(%arg0: i32) -> (i32, i32) {
    %c0_i32 = arith.constant 0 : i32
    %c0_i32_0 = arith.constant 0 : i32
    return %arg0, %c0_i32 : i32, i32
  }
  func.func @transform_1(%arg0: i32) -> (i32, i32) {
    %c0_i32 = arith.constant 0 : i32
    %c0_i32_0 = arith.constant 0 : i32
    %c0_i32_1 = arith.constant 0 : i32
    return %c0_i32, %c0_i32_0 : i32, i32
  }
  func.func @transform_2(%arg0: i32) -> (i32, i32) {
    %c0_i32 = arith.constant 0 : i32
    %c0_i32_0 = arith.constant 0 : i32
    %c0_i32_1 = arith.constant 0 : i32
    return %c0_i32, %c0_i32_0 : i32, i32
  }
  func.func @transform_3(%arg0: i32) -> (i32, i32) {
    %c0_i32 = arith.constant 0 : i32
    %c0_i32_0 = arith.constant 0 : i32
    return %arg0, %c0_i32 : i32, i32
  }
}

module attributes {stable_mosaic.version = 11 : i64} {
  func.func @_matmul_kernel_single_k(%arg0: i32, %arg1: memref<8x1792xbf16, #tpu.memory_space<vmem>>, %arg2: memref<1792x128xbf16, #tpu.memory_space<vmem>>, %arg3: memref<1x128xf32, #tpu.memory_space<vmem>>, %arg4: memref<8x128xbf16, #tpu.memory_space<vmem>>) attributes {dimension_semantics = [#tpu.dimension_semantics<parallel>], iteration_bounds = array<i64: 1>, scalar_prefetch = 0 : i64, scratch_operands = 0 : i64, tpu.core_type = #tpu.core_type<tc>, window_params = [{transform_indices = @transform_0, window_bounds = array<i64: 8, 1792>}, {pipeline_mode = #tpu.pipeline_mode<synchronous>, transform_indices = @transform_1, window_bounds = array<i64: 1792, 128>}, {pipeline_mode = #tpu.pipeline_mode<synchronous>, transform_indices = @transform_2, window_bounds = array<i64: 1, 128>}, {transform_indices = @transform_3, window_bounds = array<i64: 8, 128>}]} {
    %c0 = arith.constant 0 : index
    %c0_0 = arith.constant 0 : index
    %0 = vector.load %arg1[%c0, %c0_0] : memref<8x1792xbf16, #tpu.memory_space<vmem>>, vector<8x1792xbf16>
    %c0_1 = arith.constant 0 : index
    %c0_2 = arith.constant 0 : index
    %1 = vector.load %arg2[%c0_1, %c0_2] : memref<1792x128xbf16, #tpu.memory_space<vmem>>, vector<1792x128xbf16>
    %cst = arith.constant dense<0.000000e+00> : vector<8x128xf32>
    %2 = tpu.matmul %0, %1, %cst {dimension_numbers = #tpu.dot_dimension_numbers<[1], [0], [0], [1], [0, 0, 1, 1], [], []>} : vector<8x1792xbf16>, vector<1792x128xbf16>, vector<8x128xf32> -> vector<8x128xf32>
    %c0_3 = arith.constant 0 : index
    %c0_4 = arith.constant 0 : index
    %3 = vector.load %arg3[%c0_3, %c0_4] : memref<1x128xf32, #tpu.memory_space<vmem>>, vector<1x128xf32>
    %4 = vector.broadcast %3 : vector<1x128xf32> to vector<8x128xf32>
    %5 = arith.addf %2, %4 : vector<8x128xf32>
    %cst_5 = arith.constant 0.000000e+00 : f32
    %6 = vector.broadcast %cst_5 : f32 to vector<8x128xf32>
    %7 = arith.maximumf %5, %6 : vector<8x128xf32>
    %8 = arith.truncf %7 : vector<8x128xf32> to vector<8x128xbf16>
    %c0_6 = arith.constant 0 : index
    %c0_7 = arith.constant 0 : index
    %9 = vector.load %arg4[%c0_6, %c0_7] : memref<8x128xbf16, #tpu.memory_space<vmem>>, vector<8x128xbf16>
    tpu.vector_store %arg4[%c0_6, %c0_7], %8 {strides = array<i32>} : memref<8x128xbf16, #tpu.memory_space<vmem>>, vector<8x128xbf16>,
    return
  }
  func.func @transform_0(%arg0: i32) -> (i32, i32) {
    %c0_i32 = arith.constant 0 : i32
    %c0_i32_0 = arith.constant 0 : i32
    return %arg0, %c0_i32 : i32, i32
  }
  func.func @transform_1(%arg0: i32) -> (i32, i32) {
    %c0_i32 = arith.constant 0 : i32
    %c0_i32_0 = arith.constant 0 : i32
    %c0_i32_1 = arith.constant 0 : i32
    return %c0_i32, %c0_i32_0 : i32, i32
  }
  func.func @transform_2(%arg0: i32) -> (i32, i32) {
    %c0_i32 = arith.constant 0 : i32
    %c0_i32_0 = arith.constant 0 : i32
    %c0_i32_1 = arith.constant 0 : i32
    return %c0_i32, %c0_i32_0 : i32, i32
  }
  func.func @transform_3(%arg0: i32) -> (i32, i32) {
    %c0_i32 = arith.constant 0 : i32
    %c0_i32_0 = arith.constant 0 : i32
    return %arg0, %c0_i32 : i32, i32
  }
}

module attributes {stable_mosaic.version = 11 : i64} {
  func.func @_matmul_kernel_single_k(%arg0: i32, %arg1: memref<8x512xbf16, #tpu.memory_space<vmem>>, %arg2: memref<512x256xbf16, #tpu.memory_space<vmem>>, %arg3: memref<1x256xf32, #tpu.memory_space<vmem>>, %arg4: memref<8x256xbf16, #tpu.memory_space<vmem>>, %arg5: memref<8x256xbf16, #tpu.memory_space<vmem>>) attributes {dimension_semantics = [#tpu.dimension_semantics<parallel>], iteration_bounds = array<i64: 1>, scalar_prefetch = 0 : i64, scratch_operands = 0 : i64, tpu.core_type = #tpu.core_type<tc>, window_params = [{transform_indices = @transform_0, window_bounds = array<i64: 8, 512>}, {pipeline_mode = #tpu.pipeline_mode<synchronous>, transform_indices = @transform_1, window_bounds = array<i64: 512, 256>}, {pipeline_mode = #tpu.pipeline_mode<synchronous>, transform_indices = @transform_2, window_bounds = array<i64: 1, 256>}, {transform_indices = @transform_3, window_bounds = array<i64: 8, 256>}, {transform_indices = @transform_4, window_bounds = array<i64: 8, 256>}]} {
    %c0 = arith.constant 0 : index
    %c0_0 = arith.constant 0 : index
    %0 = vector.load %arg1[%c0, %c0_0] : memref<8x512xbf16, #tpu.memory_space<vmem>>, vector<8x512xbf16>
    %c0_1 = arith.constant 0 : index
    %c0_2 = arith.constant 0 : index
    %1 = vector.load %arg2[%c0_1, %c0_2] : memref<512x256xbf16, #tpu.memory_space<vmem>>, vector<512x256xbf16>
    %cst = arith.constant dense<0.000000e+00> : vector<8x256xf32>
    %2 = tpu.matmul %0, %1, %cst {dimension_numbers = #tpu.dot_dimension_numbers<[1], [0], [0], [1], [0, 0, 1, 1], [], []>} : vector<8x512xbf16>, vector<512x256xbf16>, vector<8x256xf32> -> vector<8x256xf32>
    %c0_3 = arith.constant 0 : index
    %c0_4 = arith.constant 0 : index
    %3 = vector.load %arg3[%c0_3, %c0_4] : memref<1x256xf32, #tpu.memory_space<vmem>>, vector<1x256xf32>
    %4 = vector.broadcast %3 : vector<1x256xf32> to vector<8x256xf32>
    %5 = arith.addf %2, %4 : vector<8x256xf32>
    %cst_5 = arith.constant 0.000000e+00 : f32
    %6 = vector.broadcast %cst_5 : f32 to vector<8x256xf32>
    %7 = arith.maximumf %5, %6 : vector<8x256xf32>
    %c0_6 = arith.constant 0 : index
    %c0_7 = arith.constant 0 : index
    %8 = vector.load %arg4[%c0_6, %c0_7] : memref<8x256xbf16, #tpu.memory_space<vmem>>, vector<8x256xbf16>
    %9 = arith.extf %8 : vector<8x256xbf16> to vector<8x256xf32>
    %10 = arith.addf %7, %9 : vector<8x256xf32>
    %11 = arith.truncf %10 : vector<8x256xf32> to vector<8x256xbf16>
    %c0_8 = arith.constant 0 : index
    %c0_9 = arith.constant 0 : index
    %12 = vector.load %arg5[%c0_8, %c0_9] : memref<8x256xbf16, #tpu.memory_space<vmem>>, vector<8x256xbf16>
    tpu.vector_store %arg5[%c0_8, %c0_9], %11 {strides = array<i32>} : memref<8x256xbf16, #tpu.memory_space<vmem>>, vector<8x256xbf16>,
    return
  }
  func.func @transform_0(%arg0: i32) -> (i32, i32) {
    %c0_i32 = arith.constant 0 : i32
    %c0_i32_0 = arith.constant 0 : i32
    return %arg0, %c0_i32 : i32, i32
  }
  func.func @transform_1(%arg0: i32) -> (i32, i32) {
    %c0_i32 = arith.constant 0 : i32
    %c0_i32_0 = arith.constant 0 : i32
    %c0_i32_1 = arith.constant 0 : i32
    return %c0_i32, %c0_i32_0 : i32, i32
  }
  func.func @transform_2(%arg0: i32) -> (i32, i32) {
    %c0_i32 = arith.constant 0 : i32
    %c0_i32_0 = arith.constant 0 : i32
    %c0_i32_1 = arith.constant 0 : i32
    return %c0_i32, %c0_i32_0 : i32, i32
  }
  func.func @transform_3(%arg0: i32) -> (i32, i32) {
    %c0_i32 = arith.constant 0 : i32
    %c0_i32_0 = arith.constant 0 : i32
    return %arg0, %c0_i32 : i32, i32
  }
  func.func @transform_4(%arg0: i32) -> (i32, i32) {
    %c0_i32 = arith.constant 0 : i32
    %c0_i32_0 = arith.constant 0 : i32
    return %arg0, %c0_i32 : i32, i32
  }
}

module attributes {stable_mosaic.version = 11 : i64} {
  func.func @_matmul_kernel_single_k(%arg0: i32, %arg1: memref<64x256xbf16, #tpu.memory_space<vmem>>, %arg2: memref<256x128xbf16, #tpu.memory_space<vmem>>, %arg3: memref<1x128xf32, #tpu.memory_space<vmem>>, %arg4: memref<64x128xbf16, #tpu.memory_space<vmem>>, %arg5: memref<64x128xbf16, #tpu.memory_space<vmem>>) attributes {dimension_semantics = [#tpu.dimension_semantics<parallel>], iteration_bounds = array<i64: 1>, scalar_prefetch = 0 : i64, scratch_operands = 0 : i64, tpu.core_type = #tpu.core_type<tc>, window_params = [{transform_indices = @transform_0, window_bounds = array<i64: 64, 256>}, {pipeline_mode = #tpu.pipeline_mode<synchronous>, transform_indices = @transform_1, window_bounds = array<i64: 256, 128>}, {pipeline_mode = #tpu.pipeline_mode<synchronous>, transform_indices = @transform_2, window_bounds = array<i64: 1, 128>}, {transform_indices = @transform_3, window_bounds = array<i64: 64, 128>}, {transform_indices = @transform_4, window_bounds = array<i64: 64, 128>}]} {
    %c0 = arith.constant 0 : index
    %c0_0 = arith.constant 0 : index
    %0 = vector.load %arg1[%c0, %c0_0] : memref<64x256xbf16, #tpu.memory_space<vmem>>, vector<64x256xbf16>
    %c0_1 = arith.constant 0 : index
    %c0_2 = arith.constant 0 : index
    %1 = vector.load %arg2[%c0_1, %c0_2] : memref<256x128xbf16, #tpu.memory_space<vmem>>, vector<256x128xbf16>
    %cst = arith.constant dense<0.000000e+00> : vector<64x128xf32>
    %2 = tpu.matmul %0, %1, %cst {dimension_numbers = #tpu.dot_dimension_numbers<[1], [0], [0], [1], [0, 0, 1, 1], [], []>} : vector<64x256xbf16>, vector<256x128xbf16>, vector<64x128xf32> -> vector<64x128xf32>
    %c0_3 = arith.constant 0 : index
    %c0_4 = arith.constant 0 : index
    %3 = vector.load %arg3[%c0_3, %c0_4] : memref<1x128xf32, #tpu.memory_space<vmem>>, vector<1x128xf32>
    %4 = vector.broadcast %3 : vector<1x128xf32> to vector<64x128xf32>
    %5 = arith.addf %2, %4 : vector<64x128xf32>
    %cst_5 = arith.constant 0.000000e+00 : f32
    %6 = vector.broadcast %cst_5 : f32 to vector<64x128xf32>
    %7 = arith.maximumf %5, %6 : vector<64x128xf32>
    %c0_6 = arith.constant 0 : index
    %c0_7 = arith.constant 0 : index
    %8 = vector.load %arg4[%c0_6, %c0_7] : memref<64x128xbf16, #tpu.memory_space<vmem>>, vector<64x128xbf16>
    %9 = arith.extf %8 : vector<64x128xbf16> to vector<64x128xf32>
    %10 = arith.addf %7, %9 : vector<64x128xf32>
    %11 = arith.truncf %10 : vector<64x128xf32> to vector<64x128xbf16>
    %c0_8 = arith.constant 0 : index
    %c0_9 = arith.constant 0 : index
    %12 = vector.load %arg5[%c0_8, %c0_9] : memref<64x128xbf16, #tpu.memory_space<vmem>>, vector<64x128xbf16>
    tpu.vector_store %arg5[%c0_8, %c0_9], %11 {strides = array<i32>} : memref<64x128xbf16, #tpu.memory_space<vmem>>, vector<64x128xbf16>,
    return
  }
  func.func @transform_0(%arg0: i32) -> (i32, i32) {
    %c0_i32 = arith.constant 0 : i32
    %c0_i32_0 = arith.constant 0 : i32
    return %arg0, %c0_i32 : i32, i32
  }
  func.func @transform_1(%arg0: i32) -> (i32, i32) {
    %c0_i32 = arith.constant 0 : i32
    %c0_i32_0 = arith.constant 0 : i32
    %c0_i32_1 = arith.constant 0 : i32
    return %c0_i32, %c0_i32_0 : i32, i32
  }
  func.func @transform_2(%arg0: i32) -> (i32, i32) {
    %c0_i32 = arith.constant 0 : i32
    %c0_i32_0 = arith.constant 0 : i32
    %c0_i32_1 = arith.constant 0 : i32
    return %c0_i32, %c0_i32_0 : i32, i32
  }
  func.func @transform_3(%arg0: i32) -> (i32, i32) {
    %c0_i32 = arith.constant 0 : i32
    %c0_i32_0 = arith.constant 0 : i32
    return %arg0, %c0_i32 : i32, i32
  }
  func.func @transform_4(%arg0: i32) -> (i32, i32) {
    %c0_i32 = arith.constant 0 : i32
    %c0_i32_0 = arith.constant 0 : i32
    return %arg0, %c0_i32 : i32, i32
  }
}

module attributes {stable_mosaic.version = 11 : i64} {
  func.func @_matmul_kernel_single_k(%arg0: i32, %arg1: memref<512x128xbf16, #tpu.memory_space<vmem>>, %arg2: memref<128x128xbf16, #tpu.memory_space<vmem>>, %arg3: memref<1x128xf32, #tpu.memory_space<vmem>>, %arg4: memref<512x128xbf16, #tpu.memory_space<vmem>>, %arg5: memref<512x128xbf16, #tpu.memory_space<vmem>>) attributes {dimension_semantics = [#tpu.dimension_semantics<parallel>], iteration_bounds = array<i64: 1>, scalar_prefetch = 0 : i64, scratch_operands = 0 : i64, tpu.core_type = #tpu.core_type<tc>, window_params = [{transform_indices = @transform_0, window_bounds = array<i64: 512, 128>}, {pipeline_mode = #tpu.pipeline_mode<synchronous>, transform_indices = @transform_1, window_bounds = array<i64: 128, 128>}, {pipeline_mode = #tpu.pipeline_mode<synchronous>, transform_indices = @transform_2, window_bounds = array<i64: 1, 128>}, {transform_indices = @transform_3, window_bounds = array<i64: 512, 128>}, {transform_indices = @transform_4, window_bounds = array<i64: 512, 128>}]} {
    %c0 = arith.constant 0 : index
    %c0_0 = arith.constant 0 : index
    %0 = vector.load %arg1[%c0, %c0_0] : memref<512x128xbf16, #tpu.memory_space<vmem>>, vector<512x128xbf16>
    %c0_1 = arith.constant 0 : index
    %c0_2 = arith.constant 0 : index
    %1 = vector.load %arg2[%c0_1, %c0_2] : memref<128x128xbf16, #tpu.memory_space<vmem>>, vector<128x128xbf16>
    %cst = arith.constant dense<0.000000e+00> : vector<512x128xf32>
    %2 = tpu.matmul %0, %1, %cst {dimension_numbers = #tpu.dot_dimension_numbers<[1], [0], [0], [1], [0, 0, 1, 1], [], []>} : vector<512x128xbf16>, vector<128x128xbf16>, vector<512x128xf32> -> vector<512x128xf32>
    %c0_3 = arith.constant 0 : index
    %c0_4 = arith.constant 0 : index
    %3 = vector.load %arg3[%c0_3, %c0_4] : memref<1x128xf32, #tpu.memory_space<vmem>>, vector<1x128xf32>
    %4 = vector.broadcast %3 : vector<1x128xf32> to vector<512x128xf32>
    %5 = arith.addf %2, %4 : vector<512x128xf32>
    %cst_5 = arith.constant 0.000000e+00 : f32
    %6 = vector.broadcast %cst_5 : f32 to vector<512x128xf32>
    %7 = arith.maximumf %5, %6 : vector<512x128xf32>
    %c0_6 = arith.constant 0 : index
    %c0_7 = arith.constant 0 : index
    %8 = vector.load %arg4[%c0_6, %c0_7] : memref<512x128xbf16, #tpu.memory_space<vmem>>, vector<512x128xbf16>
    %9 = arith.extf %8 : vector<512x128xbf16> to vector<512x128xf32>
    %10 = arith.addf %7, %9 : vector<512x128xf32>
    %11 = arith.truncf %10 : vector<512x128xf32> to vector<512x128xbf16>
    %c0_8 = arith.constant 0 : index
    %c0_9 = arith.constant 0 : index
    %12 = vector.load %arg5[%c0_8, %c0_9] : memref<512x128xbf16, #tpu.memory_space<vmem>>, vector<512x128xbf16>
    tpu.vector_store %arg5[%c0_8, %c0_9], %11 {strides = array<i32>} : memref<512x128xbf16, #tpu.memory_space<vmem>>, vector<512x128xbf16>,
    return
  }
  func.func @transform_0(%arg0: i32) -> (i32, i32) {
    %c0_i32 = arith.constant 0 : i32
    %c0_i32_0 = arith.constant 0 : i32
    return %arg0, %c0_i32 : i32, i32
  }
  func.func @transform_1(%arg0: i32) -> (i32, i32) {
    %c0_i32 = arith.constant 0 : i32
    %c0_i32_0 = arith.constant 0 : i32
    %c0_i32_1 = arith.constant 0 : i32
    return %c0_i32, %c0_i32_0 : i32, i32
  }
  func.func @transform_2(%arg0: i32) -> (i32, i32) {
    %c0_i32 = arith.constant 0 : i32
    %c0_i32_0 = arith.constant 0 : i32
    %c0_i32_1 = arith.constant 0 : i32
    return %c0_i32, %c0_i32_0 : i32, i32
  }
  func.func @transform_3(%arg0: i32) -> (i32, i32) {
    %c0_i32 = arith.constant 0 : i32
    %c0_i32_0 = arith.constant 0 : i32
    return %arg0, %c0_i32 : i32, i32
  }
  func.func @transform_4(%arg0: i32) -> (i32, i32) {
    %c0_i32 = arith.constant 0 : i32
    %c0_i32_0 = arith.constant 0 : i32
    return %arg0, %c0_i32 : i32, i32
  }
}

module attributes {stable_mosaic.version = 11 : i64} {
  func.func @_matmul_kernel_single_k(%arg0: i32, %arg1: memref<512x256xbf16, #tpu.memory_space<vmem>>, %arg2: memref<256x128xbf16, #tpu.memory_space<vmem>>, %arg3: memref<1x128xf32, #tpu.memory_space<vmem>>, %arg4: memref<512x128xf32, #tpu.memory_space<vmem>>) attributes {dimension_semantics = [#tpu.dimension_semantics<parallel>], iteration_bounds = array<i64: 8>, scalar_prefetch = 0 : i64, scratch_operands = 0 : i64, tpu.core_type = #tpu.core_type<tc>, window_params = [{transform_indices = @transform_0, window_bounds = array<i64: 512, 256>}, {pipeline_mode = #tpu.pipeline_mode<synchronous>, transform_indices = @transform_1, window_bounds = array<i64: 256, 128>}, {pipeline_mode = #tpu.pipeline_mode<synchronous>, transform_indices = @transform_2, window_bounds = array<i64: 1, 128>}, {transform_indices = @transform_3, window_bounds = array<i64: 512, 128>}]} {
    %c0 = arith.constant 0 : index
    %c0_0 = arith.constant 0 : index
    %0 = vector.load %arg1[%c0, %c0_0] : memref<512x256xbf16, #tpu.memory_space<vmem>>, vector<512x256xbf16>
    %c0_1 = arith.constant 0 : index
    %c0_2 = arith.constant 0 : index
    %1 = vector.load %arg2[%c0_1, %c0_2] : memref<256x128xbf16, #tpu.memory_space<vmem>>, vector<256x128xbf16>
    %cst = arith.constant dense<0.000000e+00> : vector<512x128xf32>
    %2 = tpu.matmul %0, %1, %cst {dimension_numbers = #tpu.dot_dimension_numbers<[1], [0], [0], [1], [0, 0, 1, 1], [], []>} : vector<512x256xbf16>, vector<256x128xbf16>, vector<512x128xf32> -> vector<512x128xf32>
    %c0_3 = arith.constant 0 : index
    %c0_4 = arith.constant 0 : index
    %3 = vector.load %arg3[%c0_3, %c0_4] : memref<1x128xf32, #tpu.memory_space<vmem>>, vector<1x128xf32>
    %4 = vector.broadcast %3 : vector<1x128xf32> to vector<512x128xf32>
    %5 = arith.addf %2, %4 : vector<512x128xf32>
    %c0_5 = arith.constant 0 : index
    %c0_6 = arith.constant 0 : index
    %6 = vector.load %arg4[%c0_5, %c0_6] : memref<512x128xf32, #tpu.memory_space<vmem>>, vector<512x128xf32>
    tpu.vector_store %arg4[%c0_5, %c0_6], %5 {strides = array<i32>} : memref<512x128xf32, #tpu.memory_space<vmem>>, vector<512x128xf32>,
    return
  }
  func.func @transform_0(%arg0: i32) -> (i32, i32) {
    %c0_i32 = arith.constant 0 : i32
    %c0_i32_0 = arith.constant 0 : i32
    return %arg0, %c0_i32 : i32, i32
  }
  func.func @transform_1(%arg0: i32) -> (i32, i32) {
    %c0_i32 = arith.constant 0 : i32
    %c0_i32_0 = arith.constant 0 : i32
    %c0_i32_1 = arith.constant 0 : i32
    return %c0_i32, %c0_i32_0 : i32, i32
  }
  func.func @transform_2(%arg0: i32) -> (i32, i32) {
    %c0_i32 = arith.constant 0 : i32
    %c0_i32_0 = arith.constant 0 : i32
    %c0_i32_1 = arith.constant 0 : i32
    return %c0_i32, %c0_i32_0 : i32, i32
  }
  func.func @transform_3(%arg0: i32) -> (i32, i32) {
    %c0_i32 = arith.constant 0 : i32
    %c0_i32_0 = arith.constant 0 : i32
    return %arg0, %c0_i32 : i32, i32
  }
}

</mosaic_0001>

<bundles_post_ra>
// kernel: reg3d_forward.11
= control target key start
LH: loop header
LB: loop body
LE: loop exit
PB: predicated region body
PF: predicated region fallthrough
CT: control target
= control target key end

     0   :  { %s1814_s12 = smov 0   ;;  %s1999_s0 = inlined_call_operand.vmem [shape: bf16[4096,128], index: 0, kind: input, shape index: {}]   ;;  %s2000_s1 = inlined_call_operand.vmem [shape: bf16[128,128], index: 1, kind: input, shape index: {}]   ;;  %s2001_s2 = inlined_call_operand.vmem [shape: f32[1,128], index: 2, kind: input, shape index: {}]   ;;  %s2002_s3 = inlined_call_operand.vmem [shape: bf16[4096,128], index: 3, kind: output, shape index: {}]  }
   0x1 LB: > { %s1231_s13 = sadd.s32 4294967295, %s1792_s12   ;;  %p1235_p0 = scmp.ge.s32.totalorder %s1792_s12, 1  ;;  %s1792_s12 = sphi %s1814_s12, %s13_s12  }
   0x2   : > { %p138_p1 = scmp.lt.s32.totalorder %s1792_s12, 9 }
   0x4   : > { %p139_p2 = pnand %p1235_p0, %p138_p1 }
   0x5   : > { %v1746_v0 = vld [vmem:[%s2000_s1] sm:$0xff] (!%p139_p2)   ;;  %s1236_s16 = sshll.u32 (!%p139_p2), %s1231_s13, 6  ;;  %v1747_v1 = vld [vmem:[%s2000_s1 + $0x8] sm:$0xff] (!%p139_p2)   ;;  %v1748_v2 = vld [vmem:[%s2000_s1 + $0x10] sm:$0xff] (!%p139_p2)  }
   0x6   : > { %142 = sbr.rel (%p139_p2) target bundleno = 316 (0x13c), region = 32  ;;  %p163_p3 = scmp.lt.s32.totalorder (!%p139_p2), %s1236_s16, 511  ;;  %1642 = vmatprep.subr.bf16.mxu0 (!%p139_p2), %v1746_v0  ;;  %1722 = vmatprep.subr.bf16.mxu1 (!%p139_p2), %v1746_v0  ;;  %v1749_v3 = vld [vmem:[%s2000_s1 + $0x18] sm:$0xff] (!%p139_p2)   ;;  %v1750_v6 = vld [vmem:[%s2000_s1 + $0x20] sm:$0xff] (!%p139_p2)   ;;  %v1751_v7 = vld [vmem:[%s2000_s1 + $0x28] sm:$0xff] (!%p139_p2)  }
   0x7   : > { %1643 = vmatpush3.bf16.msra.mxu0 (!%p139_p2), %v1746_v0  ;;  %1730 = vmatpush3.bf16.msra.mxu1 (!%p139_p2), %v1746_v0  ;;  %v1752_v8 = vld [vmem:[%s2000_s1 + $0x30] sm:$0xff] (!%p139_p2)   ;;  %v1753_v9 = vld [vmem:[%s2000_s1 + $0x38] sm:$0xff] (!%p139_p2)   ;;  %v1891_v40 = vld [vmem:[%s2001_s2] ss:$0 sm:$0xff] (!%p139_p2) }
   0x8   : > { %1644 = vmatprep.subr.bf16.mxu0 (!%p139_p2), %v1747_v1  ;;  %1723 = vmatprep.subr.bf16.mxu1 (!%p139_p2), %v1747_v1 }
   0xb   : > { %1645 = vmatpush3.bf16.msra.mxu0 (!%p139_p2), %v1747_v1  ;;  %1731 = vmatpush3.bf16.msra.mxu1 (!%p139_p2), %v1747_v1 }
   0xc   : > { %1646 = vmatprep.subr.bf16.mxu0 (!%p139_p2), %v1748_v2  ;;  %1724 = vmatprep.subr.bf16.mxu1 (!%p139_p2), %v1748_v2 }
   0xd   : > { %s2004_s16 = smov (!%p163_p3, %s1236_s16), 511 }
   0xe   : > { %s1237_s21 = sshll.u32 %s2004_s16, 2 }
   0xf   : > { %s1839_s24 = scalar_lea.vmem %s1999_s0, %s1237_s21  ;;  %1647 = vmatpush3.bf16.msra.mxu0 %v1748_v2  ;;  %1732 = vmatpush3.bf16.msra.mxu1 %v1748_v2  ;;  %s1906_s13 = scalar_lea.vmem %s2002_s3, %s1237_s21 }
  0x10   : > { %v1754_v4 = vld [vmem:[%s1839_s24] sm:$0xff]   ;;  %1648 = vmatprep.subr.bf16.mxu0 %v1749_v3  ;;  %1725 = vmatprep.subr.bf16.mxu1 %v1749_v3  ;;  %v1756_v10 = vld [vmem:[%s1839_s24 + $0x8] sm:$0xff]   ;;  %v1758_v12 = vld [vmem:[%s1839_s24 + $0x10] sm:$0xff]  }
  0x11   : > { %v1755_v5 = vld [vmem:[%s1839_s24 + $0x80] sm:$0xff]   ;;  %1658 = vmatprep.mubr.bf16.mxu0 %v1754_v4  ;;  %v1757_v11 = vld [vmem:[%s1839_s24 + $0x88] sm:$0xff]   ;;  %v1759_v13 = vld [vmem:[%s1839_s24 + $0x90] sm:$0xff]  }
  0x12   : > { %1690 = vmatprep.mubr.bf16.mxu1 %v1755_v5  ;;  %v1760_v14 = vld [vmem:[%s1839_s24 + $0x18] sm:$0xff]   ;;  %v1762_v16 = vld [vmem:[%s1839_s24 + $0x20] sm:$0xff]   ;;  %v1764_v18 = vld [vmem:[%s1839_s24 + $0x28] sm:$0xff]  }
  0x13   : > { %1649 = vmatpush3.bf16.msra.mxu0 %v1749_v3  ;;  %1733 = vmatpush3.bf16.msra.mxu1 %v1749_v3  ;;  %v1761_v15 = vld [vmem:[%s1839_s24 + $0x98] sm:$0xff]   ;;  %v1763_v17 = vld [vmem:[%s1839_s24 + $0xa0] sm:$0xff]   ;;  %v1765_v19 = vld [vmem:[%s1839_s24 + $0xa8] sm:$0xff]  }
  0x14   : > { %1650 = vmatprep.subr.bf16.mxu0 %v1750_v6  ;;  %1726 = vmatprep.subr.bf16.mxu1 %v1750_v6  ;;  %v1766_v20 = vld [vmem:[%s1839_s24 + $0x30] sm:$0xff]   ;;  %v1768_v22 = vld [vmem:[%s1839_s24 + $0x38] sm:$0xff]   ;;  %v1770_v24 = vld [vmem:[%s1839_s24 + $0x40] sm:$0xff]  }
  0x15   : > { %v1767_v21 = vld [vmem:[%s1839_s24 + $0xb0] sm:$0xff]   ;;  %v1769_v23 = vld [vmem:[%s1839_s24 + $0xb8] sm:$0xff]   ;;  %v1771_v25 = vld [vmem:[%s1839_s24 + $0xc0] sm:$0xff]  }
  0x16   : > { %v1772_v26 = vld [vmem:[%s1839_s24 + $0x48] sm:$0xff]   ;;  %v1774_v28 = vld [vmem:[%s1839_s24 + $0x50] sm:$0xff]   ;;  %v1776_v30 = vld [vmem:[%s1839_s24 + $0x58] sm:$0xff]  }
  0x17   : > { %1651 = vmatpush3.bf16.msra.mxu0 %v1750_v6  ;;  %1734 = vmatpush3.bf16.msra.mxu1 %v1750_v6  ;;  %v1773_v27 = vld [vmem:[%s1839_s24 + $0xc8] sm:$0xff]   ;;  %v1775_v29 = vld [vmem:[%s1839_s24 + $0xd0] sm:$0xff]   ;;  %v1777_v31 = vld [vmem:[%s1839_s24 + $0xd8] sm:$0xff]  }
  0x18   : > { %1652 = vmatprep.subr.bf16.mxu0 %v1751_v7  ;;  %1727 = vmatprep.subr.bf16.mxu1 %v1751_v7  ;;  %v1778_v32 = vld [vmem:[%s1839_s24 + $0x60] sm:$0xff]   ;;  %v1780_v34 = vld [vmem:[%s1839_s24 + $0x68] sm:$0xff]   ;;  %v1782_v36 = vld [vmem:[%s1839_s24 + $0x70] sm:$0xff]  }
  0x19   : > { %v1779_v33 = vld [vmem:[%s1839_s24 + $0xe0] sm:$0xff]   ;;  %v1781_v35 = vld [vmem:[%s1839_s24 + $0xe8] sm:$0xff]   ;;  %v1783_v37 = vld [vmem:[%s1839_s24 + $0xf0] sm:$0xff]  }
  0x1a   : > { %v1784_v38 = vld [vmem:[%s1839_s24 + $0x78] sm:$0xff]  }
  0x1b   : > { %1653 = vmatpush3.bf16.msra.mxu0 %v1751_v7  ;;  %1735 = vmatpush3.bf16.msra.mxu1 %v1751_v7  ;;  %v1785_v39 = vld [vmem:[%s1839_s24 + $0xf8] sm:$0xff]  }
  0x1c   : > { %1654 = vmatprep.subr.bf16.mxu0 %v1752_v8  ;;  %1728 = vmatprep.subr.bf16.mxu1 %v1752_v8 }
  0x1f   : > { %1655 = vmatpush3.bf16.msra.mxu0 %v1752_v8  ;;  %1736 = vmatpush3.bf16.msra.mxu1 %v1752_v8 }
  0x20   : > { %1656 = vmatprep.subr.bf16.mxu0 %v1753_v9  ;;  %1729 = vmatprep.subr.bf16.mxu1 %v1753_v9 }
  0x23   : > { %1657 = vmatpush3.bf16.msra.mxu0 %v1753_v9  ;;  %1737 = vmatpush3.bf16.msra.mxu1 %v1753_v9 }
  0x26   : > { %1659 = vmatmul.mubr.bf16.vlgmr.msra.gmra.mrb[0].mxu0 %v1756_v10  ;;  %1691 = vmatmul.mubr.bf16.vlgmr.msra.gmra.mrb[0].mxu1 %v1757_v11 }
  0x27   : > { %1662 = vmatprep.mubr.bf16.mxu0 %v1758_v12  ;;  %1694 = vmatprep.mubr.bf16.mxu1 %v1759_v13 }
  0x2e   : > { %1663 = vmatmul.mubr.bf16.gmra.mrb[4].mxu0 %v1760_v14  ;;  %1695 = vmatmul.mubr.bf16.gmra.mrb[4].mxu1 %v1761_v15 }
  0x2f   : > { %1666 = vmatprep.mubr.bf16.mxu0 %v1762_v16  ;;  %1698 = vmatprep.mubr.bf16.mxu1 %v1763_v17 }
  0x36   : > { %1667 = vmatmul.mubr.bf16.gmra.mrb[8].mxu0 %v1764_v18  ;;  %1699 = vmatmul.mubr.bf16.gmra.mrb[8].mxu1 %v1765_v19 }
  0x37   : > { %1670 = vmatprep.mubr.bf16.mxu0 %v1766_v20  ;;  %1702 = vmatprep.mubr.bf16.mxu1 %v1767_v21 }
  0x3e   : > { %1671 = vmatmul.mubr.bf16.gmra.mrb[12].mxu0 %v1768_v22  ;;  %1703 = vmatmul.mubr.bf16.gmra.mrb[12].mxu1 %v1769_v23 }
  0x3f   : > { %1674 = vmatprep.mubr.bf16.mxu0 %v1770_v24  ;;  %1706 = vmatprep.mubr.bf16.mxu1 %v1771_v25 }
  0x46   : > { %1675 = vmatmul.mubr.bf16.gmra.mrb[16].mxu0 %v1772_v26  ;;  %1707 = vmatmul.mubr.bf16.gmra.mrb[16].mxu1 %v1773_v27 }
  0x47   : > { %1678 = vmatprep.mubr.bf16.mxu0 %v1774_v28  ;;  %1710 = vmatprep.mubr.bf16.mxu1 %v1775_v29 }
  0x4e   : > { %1679 = vmatmul.mubr.bf16.gmra.mrb[20].mxu0 %v1776_v30  ;;  %1711 = vmatmul.mubr.bf16.gmra.mrb[20].mxu1 %v1777_v31 }
  0x4f   : > { %1682 = vmatprep.mubr.bf16.mxu0 %v1778_v32  ;;  %1714 = vmatprep.mubr.bf16.mxu1 %v1779_v33 }
  0x56   : > { %1683 = vmatmul.mubr.bf16.gmra.mrb[24].mxu0 %v1780_v34  ;;  %1715 = vmatmul.mubr.bf16.gmra.mrb[24].mxu1 %v1781_v35 }
  0x57   : > { %1686 = vmatprep.mubr.bf16.mxu0 %v1782_v36  ;;  %1718 = vmatprep.mubr.bf16.mxu1 %v1783_v37 }
  0x5e   : > { %1687 = vmatmul.mubr.bf16.gmra.mrb[28].mxu0 %v1784_v38  ;;  %1719 = vmatmul.mubr.bf16.gmra.mrb[28].mxu1 %v1785_v39 }
  0xf9   : > { %v1660_v41 = vpop.f32.mrb[0].mxu0  ;;  %v1692_v42 = vpop.f32.mrb[0].mxu1 }
  0xfa   : > { %v545_v43 = vadd.f32 %v1660_v41, %v1891_v40  ;;  %v673_v44 = vadd.f32 %v1692_v42, %v1891_v40  ;;  %v536_v45 = vpop.f32.mrb[1].mxu0  ;;  %v664_v46 = vpop.f32.mrb[1].mxu1 }
  0xfb   : > { %v537_v47 = vadd.f32 %v1891_v40, %v536_v45  ;;  %v665_v48 = vadd.f32 %v1891_v40, %v664_v46  ;;  %v1661_v49 = vpop.f32.mrb[2].mxu0  ;;  %v1693_v50 = vpop.f32.mrb[2].mxu1 }
  0xfc   : > { %v548_v51 = vadd.f32 %v1661_v49, %v1891_v40  ;;  %v676_v52 = vadd.f32 %v1693_v50, %v1891_v40  ;;  %v539_v53 = vpop.f32.mrb[3].mxu0  ;;  %v667_v54 = vpop.f32.mrb[3].mxu1  ;;  %v793_v57 = vmax.f32 %v545_v43, 0.0  ;;  %v825_v58 = vmax.f32 %v673_v44, 0.0 }
  0xfd   : > { %v540_v55 = vadd.f32 %v1891_v40, %v539_v53  ;;  %v668_v56 = vadd.f32 %v1891_v40, %v667_v54  ;;  %v791_v61 = vmax.f32 %v537_v47, 0.0  ;;  %v823_v62 = vmax.f32 %v665_v48, 0.0 }
  0xfe   : > { %v794_v59 = vmax.f32 %v548_v51, 0.0  ;;  %v826_v60 = vmax.f32 %v676_v52, 0.0 }
  0xff   : > { %v792_v63 = vmax.f32 %v540_v55, 0.0  ;;  %v824_v0 = vmax.f32 %v668_v56, 0.0 }
 0x100   : > { %v1419_v1 = vpack.c.bf16 %v794_v59, %v793_v57  ;;  %v1499_v2 = vpack.c.bf16 %v826_v60, %v825_v58 }
 0x101   : > { %v1414_v3 = vpack.c.bf16 %v792_v63, %v791_v61  ;;  %v1494_v4 = vpack.c.bf16 %v824_v0, %v823_v62  ;;  %v1664_v5 = vpop.f32.mrb[4].mxu0  ;;  %v1696_v6 = vpop.f32.mrb[4].mxu1 }
 0x102   : > { %1571 = vst [vmem:[%s1906_s13 + $0x8] sm:$0xff] %v1419_v1   ;;  %1587 = vst [vmem:[%s1906_s13 + $0x88] sm:$0xff] %v1499_v2   ;;  %v561_v7 = vadd.f32 %v1664_v5, %v1891_v40  ;;  %v689_v8 = vadd.f32 %v1696_v6, %v1891_v40  ;;  %v552_v9 = vpop.f32.mrb[5].mxu0  ;;  %v680_v10 = vpop.f32.mrb[5].mxu1 }
 0x103   : > { %1415 = vst [vmem:[%s1906_s13] sm:$0xff] %v1414_v3   ;;  %1586 = vst [vmem:[%s1906_s13 + $0x80] sm:$0xff] %v1494_v4   ;;  %v553_v11 = vadd.f32 %v1891_v40, %v552_v9  ;;  %v681_v12 = vadd.f32 %v1891_v40, %v680_v10  ;;  %v1665_v13 = vpop.f32.mrb[6].mxu0  ;;  %v1697_v14 = vpop.f32.mrb[6].mxu1 }
 0x104   : > { %v564_v15 = vadd.f32 %v1665_v13, %v1891_v40  ;;  %v692_v16 = vadd.f32 %v1697_v14, %v1891_v40  ;;  %v555_v17 = vpop.f32.mrb[7].mxu0  ;;  %v683_v18 = vpop.f32.mrb[7].mxu1  ;;  %v797_v21 = vmax.f32 %v561_v7, 0.0  ;;  %v829_v22 = vmax.f32 %v689_v8, 0.0 }
 0x105   : > { %v556_v19 = vadd.f32 %v1891_v40, %v555_v17  ;;  %v684_v20 = vadd.f32 %v1891_v40, %v683_v18  ;;  %v795_v25 = vmax.f32 %v553_v11, 0.0  ;;  %v827_v26 = vmax.f32 %v681_v12, 0.0 }
 0x106   : > { %v798_v23 = vmax.f32 %v564_v15, 0.0  ;;  %v830_v24 = vmax.f32 %v692_v16, 0.0 }
 0x107   : > { %v796_v27 = vmax.f32 %v556_v19, 0.0  ;;  %v828_v28 = vmax.f32 %v684_v20, 0.0 }
 0x108   : > { %v1429_v29 = vpack.c.bf16 %v798_v23, %v797_v21  ;;  %v1509_v30 = vpack.c.bf16 %v830_v24, %v829_v22 }
 0x109   : > { %v1424_v31 = vpack.c.bf16 %v796_v27, %v795_v25  ;;  %v1504_v32 = vpack.c.bf16 %v828_v28, %v827_v26  ;;  %v1668_v33 = vpop.f32.mrb[8].mxu0  ;;  %v1700_v34 = vpop.f32.mrb[8].mxu1 }
 0x10a   : > { %1573 = vst [vmem:[%s1906_s13 + $0x18] sm:$0xff] %v1429_v29   ;;  %1589 = vst [vmem:[%s1906_s13 + $0x98] sm:$0xff] %v1509_v30   ;;  %v577_v35 = vadd.f32 %v1668_v33, %v1891_v40  ;;  %v705_v36 = vadd.f32 %v1700_v34, %v1891_v40  ;;  %v568_v37 = vpop.f32.mrb[9].mxu0  ;;  %v696_v38 = vpop.f32.mrb[9].mxu1 }
 0x10b   : > { %1572 = vst [vmem:[%s1906_s13 + $0x10] sm:$0xff] %v1424_v31   ;;  %1588 = vst [vmem:[%s1906_s13 + $0x90] sm:$0xff] %v1504_v32   ;;  %v569_v39 = vadd.f32 %v1891_v40, %v568_v37  ;;  %v697_v41 = vadd.f32 %v1891_v40, %v696_v38  ;;  %v1669_v42 = vpop.f32.mrb[10].mxu0  ;;  %v1701_v43 = vpop.f32.mrb[10].mxu1 }
 0x10c   : > { %v580_v44 = vadd.f32 %v1669_v42, %v1891_v40  ;;  %v708_v45 = vadd.f32 %v1701_v43, %v1891_v40  ;;  %v571_v46 = vpop.f32.mrb[11].mxu0  ;;  %v699_v47 = vpop.f32.mrb[11].mxu1  ;;  %v801_v50 = vmax.f32 %v577_v35, 0.0  ;;  %v833_v51 = vmax.f32 %v705_v36, 0.0 }
 0x10d   : > { %v572_v48 = vadd.f32 %v1891_v40, %v571_v46  ;;  %v700_v49 = vadd.f32 %v1891_v40, %v699_v47  ;;  %v799_v54 = vmax.f32 %v569_v39, 0.0  ;;  %v831_v55 = vmax.f32 %v697_v41, 0.0 }
 0x10e   : > { %v802_v52 = vmax.f32 %v580_v44, 0.0  ;;  %v834_v53 = vmax.f32 %v708_v45, 0.0 }
 0x10f   : > { %v800_v56 = vmax.f32 %v572_v48, 0.0  ;;  %v832_v57 = vmax.f32 %v700_v49, 0.0 }
 0x110   : > { %v1439_v58 = vpack.c.bf16 %v802_v52, %v801_v50  ;;  %v1519_v59 = vpack.c.bf16 %v834_v53, %v833_v51 }
 0x111   : > { %v1434_v60 = vpack.c.bf16 %v800_v56, %v799_v54  ;;  %v1514_v61 = vpack.c.bf16 %v832_v57, %v831_v55  ;;  %v1672_v62 = vpop.f32.mrb[12].mxu0  ;;  %v1704_v63 = vpop.f32.mrb[12].mxu1 }
 0x112   : > { %1575 = vst [vmem:[%s1906_s13 + $0x28] sm:$0xff] %v1439_v58   ;;  %1591 = vst [vmem:[%s1906_s13 + $0xa8] sm:$0xff] %v1519_v59   ;;  %v593_v0 = vadd.f32 %v1672_v62, %v1891_v40  ;;  %v721_v1 = vadd.f32 %v1704_v63, %v1891_v40  ;;  %v584_v2 = vpop.f32.mrb[13].mxu0  ;;  %v712_v3 = vpop.f32.mrb[13].mxu1 }
 0x113   : > { %1574 = vst [vmem:[%s1906_s13 + $0x20] sm:$0xff] %v1434_v60   ;;  %1590 = vst [vmem:[%s1906_s13 + $0xa0] sm:$0xff] %v1514_v61   ;;  %v585_v4 = vadd.f32 %v1891_v40, %v584_v2  ;;  %v713_v5 = vadd.f32 %v1891_v40, %v712_v3  ;;  %v1673_v6 = vpop.f32.mrb[14].mxu0  ;;  %v1705_v7 = vpop.f32.mrb[14].mxu1 }
 0x114   : > { %v596_v8 = vadd.f32 %v1673_v6, %v1891_v40  ;;  %v724_v9 = vadd.f32 %v1705_v7, %v1891_v40  ;;  %v587_v10 = vpop.f32.mrb[15].mxu0  ;;  %v715_v11 = vpop.f32.mrb[15].mxu1  ;;  %v805_v14 = vmax.f32 %v593_v0, 0.0  ;;  %v837_v15 = vmax.f32 %v721_v1, 0.0 }
 0x115   : > { %v588_v12 = vadd.f32 %v1891_v40, %v587_v10  ;;  %v716_v13 = vadd.f32 %v1891_v40, %v715_v11  ;;  %v803_v18 = vmax.f32 %v585_v4, 0.0  ;;  %v835_v19 = vmax.f32 %v713_v5, 0.0 }
 0x116   : > { %v806_v16 = vmax.f32 %v596_v8, 0.0  ;;  %v838_v17 = vmax.f32 %v724_v9, 0.0 }
 0x117   : > { %v804_v20 = vmax.f32 %v588_v12, 0.0  ;;  %v836_v21 = vmax.f32 %v716_v13, 0.0 }
 0x118   : > { %v1449_v22 = vpack.c.bf16 %v806_v16, %v805_v14  ;;  %v1529_v23 = vpack.c.bf16 %v838_v17, %v837_v15 }
 0x119   : > { %v1444_v24 = vpack.c.bf16 %v804_v20, %v803_v18  ;;  %v1524_v25 = vpack.c.bf16 %v836_v21, %v835_v19  ;;  %v1676_v26 = vpop.f32.mrb[16].mxu0  ;;  %v1708_v27 = vpop.f32.mrb[16].mxu1 }
 0x11a   : > { %1577 = vst [vmem:[%s1906_s13 + $0x38] sm:$0xff] %v1449_v22   ;;  %1593 = vst [vmem:[%s1906_s13 + $0xb8] sm:$0xff] %v1529_v23   ;;  %v609_v28 = vadd.f32 %v1676_v26, %v1891_v40  ;;  %v737_v29 = vadd.f32 %v1708_v27, %v1891_v40  ;;  %v600_v30 = vpop.f32.mrb[17].mxu0  ;;  %v728_v31 = vpop.f32.mrb[17].mxu1 }
 0x11b   : > { %1576 = vst [vmem:[%s1906_s13 + $0x30] sm:$0xff] %v1444_v24   ;;  %1592 = vst [vmem:[%s1906_s13 + $0xb0] sm:$0xff] %v1524_v25   ;;  %v601_v32 = vadd.f32 %v1891_v40, %v600_v30  ;;  %v729_v33 = vadd.f32 %v1891_v40, %v728_v31  ;;  %v1677_v34 = vpop.f32.mrb[18].mxu0  ;;  %v1709_v35 = vpop.f32.mrb[18].mxu1 }
 0x11c   : > { %v612_v36 = vadd.f32 %v1677_v34, %v1891_v40  ;;  %v740_v37 = vadd.f32 %v1709_v35, %v1891_v40  ;;  %v603_v38 = vpop.f32.mrb[19].mxu0  ;;  %v731_v39 = vpop.f32.mrb[19].mxu1  ;;  %v809_v43 = vmax.f32 %v609_v28, 0.0  ;;  %v841_v44 = vmax.f32 %v737_v29, 0.0 }
 0x11d   : > { %v604_v41 = vadd.f32 %v1891_v40, %v603_v38  ;;  %v732_v42 = vadd.f32 %v1891_v40, %v731_v39  ;;  %v807_v47 = vmax.f32 %v601_v32, 0.0  ;;  %v839_v48 = vmax.f32 %v729_v33, 0.0 }
 0x11e   : > { %v810_v45 = vmax.f32 %v612_v36, 0.0  ;;  %v842_v46 = vmax.f32 %v740_v37, 0.0 }
 0x11f   : > { %v808_v49 = vmax.f32 %v604_v41, 0.0  ;;  %v840_v50 = vmax.f32 %v732_v42, 0.0 }
 0x120   : > { %v1459_v51 = vpack.c.bf16 %v810_v45, %v809_v43  ;;  %v1539_v52 = vpack.c.bf16 %v842_v46, %v841_v44 }
 0x121   : > { %v1454_v53 = vpack.c.bf16 %v808_v49, %v807_v47  ;;  %v1534_v54 = vpack.c.bf16 %v840_v50, %v839_v48  ;;  %v1680_v55 = vpop.f32.mrb[20].mxu0  ;;  %v1712_v56 = vpop.f32.mrb[20].mxu1 }
 0x122   : > { %1579 = vst [vmem:[%s1906_s13 + $0x48] sm:$0xff] %v1459_v51   ;;  %1595 = vst [vmem:[%s1906_s13 + $0xc8] sm:$0xff] %v1539_v52   ;;  %v625_v57 = vadd.f32 %v1680_v55, %v1891_v40  ;;  %v753_v58 = vadd.f32 %v1712_v56, %v1891_v40  ;;  %v616_v59 = vpop.f32.mrb[21].mxu0  ;;  %v744_v60 = vpop.f32.mrb[21].mxu1 }
 0x123   : > { %1578 = vst [vmem:[%s1906_s13 + $0x40] sm:$0xff] %v1454_v53   ;;  %1594 = vst [vmem:[%s1906_s13 + $0xc0] sm:$0xff] %v1534_v54   ;;  %v617_v61 = vadd.f32 %v1891_v40, %v616_v59  ;;  %v745_v62 = vadd.f32 %v1891_v40, %v744_v60  ;;  %v1681_v63 = vpop.f32.mrb[22].mxu0  ;;  %v1713_v0 = vpop.f32.mrb[22].mxu1 }
 0x124   : > { %v628_v1 = vadd.f32 %v1681_v63, %v1891_v40  ;;  %v756_v2 = vadd.f32 %v1713_v0, %v1891_v40  ;;  %v619_v3 = vpop.f32.mrb[23].mxu0  ;;  %v747_v4 = vpop.f32.mrb[23].mxu1  ;;  %v813_v7 = vmax.f32 %v625_v57, 0.0  ;;  %v845_v8 = vmax.f32 %v753_v58, 0.0 }
 0x125   : > { %v620_v5 = vadd.f32 %v1891_v40, %v619_v3  ;;  %v748_v6 = vadd.f32 %v1891_v40, %v747_v4  ;;  %v811_v11 = vmax.f32 %v617_v61, 0.0  ;;  %v843_v12 = vmax.f32 %v745_v62, 0.0 }
 0x126   : > { %v814_v9 = vmax.f32 %v628_v1, 0.0  ;;  %v846_v10 = vmax.f32 %v756_v2, 0.0 }
 0x127   : > { %v812_v13 = vmax.f32 %v620_v5, 0.0  ;;  %v844_v14 = vmax.f32 %v748_v6, 0.0 }
 0x128   : > { %v1469_v15 = vpack.c.bf16 %v814_v9, %v813_v7  ;;  %v1549_v16 = vpack.c.bf16 %v846_v10, %v845_v8 }
 0x129   : > { %v1464_v17 = vpack.c.bf16 %v812_v13, %v811_v11  ;;  %v1544_v18 = vpack.c.bf16 %v844_v14, %v843_v12  ;;  %v1684_v19 = vpop.f32.mrb[24].mxu0  ;;  %v1716_v20 = vpop.f32.mrb[24].mxu1 }
 0x12a   : > { %1581 = vst [vmem:[%s1906_s13 + $0x58] sm:$0xff] %v1469_v15   ;;  %1597 = vst [vmem:[%s1906_s13 + $0xd8] sm:$0xff] %v1549_v16   ;;  %v641_v21 = vadd.f32 %v1684_v19, %v1891_v40  ;;  %v769_v22 = vadd.f32 %v1716_v20, %v1891_v40  ;;  %v632_v23 = vpop.f32.mrb[25].mxu0  ;;  %v760_v24 = vpop.f32.mrb[25].mxu1 }
 0x12b   : > { %1580 = vst [vmem:[%s1906_s13 + $0x50] sm:$0xff] %v1464_v17   ;;  %1596 = vst [vmem:[%s1906_s13 + $0xd0] sm:$0xff] %v1544_v18   ;;  %v633_v25 = vadd.f32 %v1891_v40, %v632_v23  ;;  %v761_v26 = vadd.f32 %v1891_v40, %v760_v24  ;;  %v1685_v27 = vpop.f32.mrb[26].mxu0  ;;  %v1717_v28 = vpop.f32.mrb[26].mxu1 }
 0x12c   : > { %v644_v29 = vadd.f32 %v1685_v27, %v1891_v40  ;;  %v772_v30 = vadd.f32 %v1717_v28, %v1891_v40  ;;  %v635_v31 = vpop.f32.mrb[27].mxu0  ;;  %v763_v32 = vpop.f32.mrb[27].mxu1  ;;  %v817_v35 = vmax.f32 %v641_v21, 0.0  ;;  %v849_v36 = vmax.f32 %v769_v22, 0.0 }
 0x12d   : > { %v636_v33 = vadd.f32 %v1891_v40, %v635_v31  ;;  %v764_v34 = vadd.f32 %v1891_v40, %v763_v32  ;;  %v815_v39 = vmax.f32 %v633_v25, 0.0  ;;  %v847_v41 = vmax.f32 %v761_v26, 0.0 }
 0x12e   : > { %v818_v37 = vmax.f32 %v644_v29, 0.0  ;;  %v850_v38 = vmax.f32 %v772_v30, 0.0 }
 0x12f   : > { %v816_v42 = vmax.f32 %v636_v33, 0.0  ;;  %v848_v43 = vmax.f32 %v764_v34, 0.0 }
 0x130   : > { %v1479_v44 = vpack.c.bf16 %v818_v37, %v817_v35  ;;  %v1559_v45 = vpack.c.bf16 %v850_v38, %v849_v36 }
 0x131   : > { %v1474_v46 = vpack.c.bf16 %v816_v42, %v815_v39  ;;  %v1554_v47 = vpack.c.bf16 %v848_v43, %v847_v41  ;;  %v1688_v48 = vpop.f32.mrb[28].mxu0  ;;  %v1720_v49 = vpop.f32.mrb[28].mxu1 }
 0x132   : > { %1583 = vst [vmem:[%s1906_s13 + $0x68] sm:$0xff] %v1479_v44   ;;  %1599 = vst [vmem:[%s1906_s13 + $0xe8] sm:$0xff] %v1559_v45   ;;  %v657_v50 = vadd.f32 %v1688_v48, %v1891_v40  ;;  %v785_v51 = vadd.f32 %v1720_v49, %v1891_v40  ;;  %v648_v52 = vpop.f32.mrb[29].mxu0  ;;  %v776_v53 = vpop.f32.mrb[29].mxu1 }
 0x133   : > { %1582 = vst [vmem:[%s1906_s13 + $0x60] sm:$0xff] %v1474_v46   ;;  %1598 = vst [vmem:[%s1906_s13 + $0xe0] sm:$0xff] %v1554_v47   ;;  %v649_v54 = vadd.f32 %v1891_v40, %v648_v52  ;;  %v777_v55 = vadd.f32 %v1891_v40, %v776_v53  ;;  %v1689_v56 = vpop.f32.mrb[30].mxu0  ;;  %v1721_v57 = vpop.f32.mrb[30].mxu1 }
 0x134   : > { %v660_v58 = vadd.f32 %v1689_v56, %v1891_v40  ;;  %v788_v59 = vadd.f32 %v1721_v57, %v1891_v40  ;;  %v651_v60 = vpop.f32.mrb[31].mxu0  ;;  %v779_v61 = vpop.f32.mrb[31].mxu1  ;;  %v821_v0 = vmax.f32 %v657_v50, 0.0  ;;  %v853_v1 = vmax.f32 %v785_v51, 0.0 }
 0x135   : > { %v652_v62 = vadd.f32 %v1891_v40, %v651_v60  ;;  %v780_v63 = vadd.f32 %v1891_v40, %v779_v61  ;;  %v819_v4 = vmax.f32 %v649_v54, 0.0  ;;  %v851_v5 = vmax.f32 %v777_v55, 0.0 }
 0x136   : > { %v822_v2 = vmax.f32 %v660_v58, 0.0  ;;  %v854_v3 = vmax.f32 %v788_v59, 0.0 }
 0x137   : > { %v820_v6 = vmax.f32 %v652_v62, 0.0  ;;  %v852_v7 = vmax.f32 %v780_v63, 0.0 }
 0x138   : > { %v1489_v8 = vpack.c.bf16 %v822_v2, %v821_v0  ;;  %v1569_v9 = vpack.c.bf16 %v854_v3, %v853_v1 }
 0x139   : > { %v1484_v10 = vpack.c.bf16 %v820_v6, %v819_v4  ;;  %v1564_v11 = vpack.c.bf16 %v852_v7, %v851_v5 }
 0x13a   : > { %1585 = vst [vmem:[%s1906_s13 + $0x78] sm:$0xff] %v1489_v8   ;;  %1601 = vst [vmem:[%s1906_s13 + $0xf8] sm:$0xff] %v1569_v9  }
 0x13b   : > { %1584 = vst [vmem:[%s1906_s13 + $0x70] sm:$0xff] %v1484_v10   ;;  %1600 = vst [vmem:[%s1906_s13 + $0xf0] sm:$0xff] %v1564_v11  }
 0x13c PF: > { %s13_s12 = sadd.s32 1, %s1792_s12  }
 0x13d   : > { %p10_p4 = scmp.ge.s32.totalorder %s13_s12, 10  }
 0x13f   :  { %12 = sbr.rel (!%p10_p4) target bundleno = 1 (0x1), region = 62 }

// kernel: reg3d_forward.12
= control target key start
LH: loop header
LB: loop body
LE: loop exit
PB: predicated region body
PF: predicated region fallthrough
CT: control target
= control target key end

     0   :  { %v1756_v0 = vmov 0   ;;  %s2214_s1 = inlined_call_operand.vmem [shape: bf16[256,128], index: 1, kind: input, shape index: {}]   ;;  %s2215_s0 = inlined_call_operand.vmem [shape: bf16[512,256], index: 0, kind: input, shape index: {}]   ;;  %s2216_s2 = inlined_call_operand.vmem [shape: f32[1,128], index: 2, kind: input, shape index: {}]   ;;  %s2217_s3 = inlined_call_operand.vmem [shape: bf16[512,128], index: 3, kind: output, shape index: {}]  }
   0x1   :  { %534 = vmatprep.subr.bf16.mxu0 %v1756_v0  ;;  %1611 = vmatprep.subr.bf16.mxu1 %v1756_v0  ;;  %v1644_v1 = vld [vmem:[%s2214_s1] sm:$0xff]   ;;  %v1645_v2 = vld [vmem:[%s2214_s1 + $0x8] sm:$0xff]   ;;  %v1646_v3 = vld [vmem:[%s2214_s1 + $0x10] sm:$0xff]  }
   0x2   :  { %535 = vmatpush1.bf16.msra.mxu0 %v1644_v1  ;;  %1627 = vmatpush1.bf16.msra.mxu1 %v1644_v1  ;;  %v1647_v4 = vld [vmem:[%s2214_s1 + $0x18] sm:$0xff]   ;;  %v1648_v5 = vld [vmem:[%s2214_s1 + $0x20] sm:$0xff]   ;;  %v1649_v7 = vld [vmem:[%s2214_s1 + $0x28] sm:$0xff]  }
   0x3   :  { %536 = vmatprep.subr.bf16.mxu0 %v1756_v0  ;;  %1612 = vmatprep.subr.bf16.mxu1 %v1756_v0  ;;  %v1662_v6 = vld [vmem:[%s2215_s0 + $0x4] ss:$8 sps:$4 sm:$0xff]   ;;  %v1650_v9 = vld [vmem:[%s2214_s1 + $0x30] sm:$0xff]   ;;  %v1651_v10 = vld [vmem:[%s2214_s1 + $0x38] sm:$0xff]  }
   0x4   :  { %v1665_v8 = vld [vmem:[%s2215_s0 + $0x104] ss:$8 sps:$4 sm:$0xff]   ;;  %566 = vmatprep.mubr.bf16.mxu0 %v1662_v6  ;;  %v1654_v13 = vld [vmem:[%s2214_s1 + $0x50] sm:$0xff]   ;;  %v1655_v14 = vld [vmem:[%s2214_s1 + $0x58] sm:$0xff]  }
   0x5   :  { %694 = vmatprep.mubr.bf16.mxu1 %v1665_v8  ;;  %v1652_v11 = vld [vmem:[%s2214_s1 + $0x40] sm:$0xff]   ;;  %v1653_v12 = vld [vmem:[%s2214_s1 + $0x48] sm:$0xff]   ;;  %v1658_v17 = vld [vmem:[%s2214_s1 + $0x70] sm:$0xff]  }
   0x6   :  { %537 = vmatpush1.bf16.msra.mxu0 %v1645_v2  ;;  %1628 = vmatpush1.bf16.msra.mxu1 %v1645_v2  ;;  %v1656_v15 = vld [vmem:[%s2214_s1 + $0x60] sm:$0xff]   ;;  %v1657_v16 = vld [vmem:[%s2214_s1 + $0x68] sm:$0xff]   ;;  %v1659_v18 = vld [vmem:[%s2214_s1 + $0x78] sm:$0xff]  }
   0x7   :  { %538 = vmatprep.subr.bf16.mxu0 %v1756_v0  ;;  %1613 = vmatprep.subr.bf16.mxu1 %v1756_v0  ;;  %v1660_v19 = vld [vmem:[%s2215_s0] ss:$8 sps:$4 sm:$0xff]   ;;  %v1666_v21 = vld [vmem:[%s2215_s0 + $0x14] ss:$8 sps:$4 sm:$0xff]   ;;  %v1670_v23 = vld [vmem:[%s2215_s0 + $0x10] ss:$8 sps:$4 sm:$0xff]  }
   0x8   :  { %v1663_v20 = vld [vmem:[%s2215_s0 + $0x100] ss:$8 sps:$4 sm:$0xff]   ;;  %v1668_v22 = vld [vmem:[%s2215_s0 + $0x114] ss:$8 sps:$4 sm:$0xff]   ;;  %v1671_v24 = vld [vmem:[%s2215_s0 + $0x110] ss:$8 sps:$4 sm:$0xff]  }
   0x9   :  { %v1672_v25 = vld [vmem:[%s2215_s0 + $0x24] ss:$8 sps:$4 sm:$0xff]   ;;  %v1676_v27 = vld [vmem:[%s2215_s0 + $0x20] ss:$8 sps:$4 sm:$0xff]   ;;  %v1678_v29 = vld [vmem:[%s2215_s0 + $0x34] ss:$8 sps:$4 sm:$0xff]  }
   0xa   :  { %539 = vmatpush1.bf16.msra.mxu0 %v1646_v3  ;;  %1629 = vmatpush1.bf16.msra.mxu1 %v1646_v3  ;;  %v1674_v26 = vld [vmem:[%s2215_s0 + $0x124] ss:$8 sps:$4 sm:$0xff]   ;;  %v1677_v28 = vld [vmem:[%s2215_s0 + $0x120] ss:$8 sps:$4 sm:$0xff]   ;;  %v1680_v30 = vld [vmem:[%s2215_s0 + $0x134] ss:$8 sps:$4 sm:$0xff]  }
   0xb   :  { %540 = vmatprep.subr.bf16.mxu0 %v1756_v0  ;;  %1614 = vmatprep.subr.bf16.mxu1 %v1756_v0  ;;  %v1682_v31 = vld [vmem:[%s2215_s0 + $0x30] ss:$8 sps:$4 sm:$0xff]   ;;  %v1684_v33 = vld [vmem:[%s2215_s0 + $0x44] ss:$8 sps:$4 sm:$0xff]   ;;  %v1688_v35 = vld [vmem:[%s2215_s0 + $0x40] ss:$8 sps:$4 sm:$0xff]  }
   0xc   :  { %v1683_v32 = vld [vmem:[%s2215_s0 + $0x130] ss:$8 sps:$4 sm:$0xff]   ;;  %v1686_v34 = vld [vmem:[%s2215_s0 + $0x144] ss:$8 sps:$4 sm:$0xff]   ;;  %v1689_v36 = vld [vmem:[%s2215_s0 + $0x140] ss:$8 sps:$4 sm:$0xff]  }
   0xd   :  { %v1690_v37 = vld [vmem:[%s2215_s0 + $0x54] ss:$8 sps:$4 sm:$0xff]   ;;  %v1694_v39 = vld [vmem:[%s2215_s0 + $0x50] ss:$8 sps:$4 sm:$0xff]   ;;  %v1696_v41 = vld [vmem:[%s2215_s0 + $0x64] ss:$8 sps:$4 sm:$0xff]  }
   0xe   :  { %541 = vmatpush1.bf16.msra.mxu0 %v1647_v4  ;;  %1630 = vmatpush1.bf16.msra.mxu1 %v1647_v4  ;;  %v1692_v38 = vld [vmem:[%s2215_s0 + $0x154] ss:$8 sps:$4 sm:$0xff]   ;;  %v1695_v40 = vld [vmem:[%s2215_s0 + $0x150] ss:$8 sps:$4 sm:$0xff]   ;;  %v1698_v42 = vld [vmem:[%s2215_s0 + $0x164] ss:$8 sps:$4 sm:$0xff]  }
   0xf   :  { %542 = vmatprep.subr.bf16.mxu0 %v1756_v0  ;;  %1615 = vmatprep.subr.bf16.mxu1 %v1756_v0  ;;  %v1700_v43 = vld [vmem:[%s2215_s0 + $0x60] ss:$8 sps:$4 sm:$0xff]   ;;  %v1702_v45 = vld [vmem:[%s2215_s0 + $0x74] ss:$8 sps:$4 sm:$0xff]   ;;  %v1706_v47 = vld [vmem:[%s2215_s0 + $0x70] ss:$8 sps:$4 sm:$0xff]  }
  0x10   :  { %v1701_v44 = vld [vmem:[%s2215_s0 + $0x160] ss:$8 sps:$4 sm:$0xff]   ;;  %v1704_v46 = vld [vmem:[%s2215_s0 + $0x174] ss:$8 sps:$4 sm:$0xff]   ;;  %v1707_v48 = vld [vmem:[%s2215_s0 + $0x170] ss:$8 sps:$4 sm:$0xff]  }
  0x11   :  { %v1708_v49 = vld [vmem:[%s2215_s0 + $0x84] ss:$8 sps:$4 sm:$0xff]   ;;  %v1712_v51 = vld [vmem:[%s2215_s0 + $0x80] ss:$8 sps:$4 sm:$0xff]   ;;  %v1714_v53 = vld [vmem:[%s2215_s0 + $0x94] ss:$8 sps:$4 sm:$0xff]  }
  0x12   :  { %543 = vmatpush1.bf16.msra.mxu0 %v1648_v5  ;;  %1631 = vmatpush1.bf16.msra.mxu1 %v1648_v5  ;;  %v1710_v50 = vld [vmem:[%s2215_s0 + $0x184] ss:$8 sps:$4 sm:$0xff]   ;;  %v1713_v52 = vld [vmem:[%s2215_s0 + $0x180] ss:$8 sps:$4 sm:$0xff]   ;;  %v1716_v54 = vld [vmem:[%s2215_s0 + $0x194] ss:$8 sps:$4 sm:$0xff]  }
  0x13   :  { %544 = vmatprep.subr.bf16.mxu0 %v1756_v0  ;;  %1616 = vmatprep.subr.bf16.mxu1 %v1756_v0  ;;  %v1718_v55 = vld [vmem:[%s2215_s0 + $0x90] ss:$8 sps:$4 sm:$0xff]   ;;  %v1720_v57 = vld [vmem:[%s2215_s0 + $0xa4] ss:$8 sps:$4 sm:$0xff]   ;;  %v1724_v59 = vld [vmem:[%s2215_s0 + $0xa0] ss:$8 sps:$4 sm:$0xff]  }
  0x14   :  { %v1719_v56 = vld [vmem:[%s2215_s0 + $0x190] ss:$8 sps:$4 sm:$0xff]   ;;  %v1722_v58 = vld [vmem:[%s2215_s0 + $0x1a4] ss:$8 sps:$4 sm:$0xff]   ;;  %v1725_v60 = vld [vmem:[%s2215_s0 + $0x1a0] ss:$8 sps:$4 sm:$0xff]  }
  0x15   :  { %v1726_v61 = vld [vmem:[%s2215_s0 + $0xb4] ss:$8 sps:$4 sm:$0xff]   ;;  %v1730_v63 = vld [vmem:[%s2215_s0 + $0xb0] ss:$8 sps:$4 sm:$0xff]   ;;  %v1732_v1 = vld [vmem:[%s2215_s0 + $0xc4] ss:$8 sps:$4 sm:$0xff]  }
  0x16   :  { %545 = vmatpush1.bf16.msra.mxu0 %v1649_v7  ;;  %1632 = vmatpush1.bf16.msra.mxu1 %v1649_v7  ;;  %v1728_v62 = vld [vmem:[%s2215_s0 + $0x1b4] ss:$8 sps:$4 sm:$0xff]   ;;  %v1734_v2 = vld [vmem:[%s2215_s0 + $0x1c4] ss:$8 sps:$4 sm:$0xff]   ;;  %v1736_v3 = vld [vmem:[%s2215_s0 + $0xc0] ss:$8 sps:$4 sm:$0xff]  }
  0x17   :  { %546 = vmatprep.subr.bf16.mxu0 %v1756_v0  ;;  %1617 = vmatprep.subr.bf16.mxu1 %v1756_v0  ;;  %v1737_v4 = vld [vmem:[%s2215_s0 + $0x1c0] ss:$8 sps:$4 sm:$0xff]   ;;  %v1738_v5 = vld [vmem:[%s2215_s0 + $0xd4] ss:$8 sps:$4 sm:$0xff]   ;;  %v1742_v7 = vld [vmem:[%s2215_s0 + $0xd0] ss:$8 sps:$4 sm:$0xff]  }
  0x18   :  { %v1740_v6 = vld [vmem:[%s2215_s0 + $0x1d4] ss:$8 sps:$4 sm:$0xff]   ;;  %v1743_v8 = vld [vmem:[%s2215_s0 + $0x1d0] ss:$8 sps:$4 sm:$0xff]  }
  0x1a   :  { %547 = vmatpush1.bf16.msra.mxu0 %v1650_v9  ;;  %1633 = vmatpush1.bf16.msra.mxu1 %v1650_v9  ;;  %v1744_v9 = vld [vmem:[%s2215_s0 + $0xe4] ss:$8 sps:$4 sm:$0xff]  }
  0x1b   :  { %548 = vmatprep.subr.bf16.mxu0 %v1756_v0  ;;  %1618 = vmatprep.subr.bf16.mxu1 %v1756_v0 }
  0x1e   :  { %549 = vmatpush1.bf16.msra.mxu0 %v1651_v10  ;;  %1634 = vmatpush1.bf16.msra.mxu1 %v1651_v10  ;;  %v1746_v10 = vld [vmem:[%s2215_s0 + $0x1e4] ss:$8 sps:$4 sm:$0xff]  }
  0x1f   :  { %550 = vmatprep.subr.bf16.mxu0 %v1756_v0  ;;  %1619 = vmatprep.subr.bf16.mxu1 %v1756_v0 }
  0x22   :  { %551 = vmatpush1.bf16.msra.mxu0 %v1652_v11  ;;  %1635 = vmatpush1.bf16.msra.mxu1 %v1652_v11  ;;  %v1748_v11 = vld [vmem:[%s2215_s0 + $0xe0] ss:$8 sps:$4 sm:$0xff]  }
  0x23   :  { %552 = vmatprep.subr.bf16.mxu0 %v1756_v0  ;;  %1620 = vmatprep.subr.bf16.mxu1 %v1756_v0 }
  0x26   :  { %553 = vmatpush1.bf16.msra.mxu0 %v1653_v12  ;;  %1636 = vmatpush1.bf16.msra.mxu1 %v1653_v12  ;;  %v1749_v12 = vld [vmem:[%s2215_s0 + $0x1e0] ss:$8 sps:$4 sm:$0xff]  }
  0x27   :  { %554 = vmatprep.subr.bf16.mxu0 %v1756_v0  ;;  %1621 = vmatprep.subr.bf16.mxu1 %v1756_v0 }
  0x2a   :  { %555 = vmatpush1.bf16.msra.mxu0 %v1654_v13  ;;  %1637 = vmatpush1.bf16.msra.mxu1 %v1654_v13  ;;  %v1750_v13 = vld [vmem:[%s2215_s0 + $0xf4] ss:$8 sps:$4 sm:$0xff]  }
  0x2b   :  { %556 = vmatprep.subr.bf16.mxu0 %v1756_v0  ;;  %1622 = vmatprep.subr.bf16.mxu1 %v1756_v0 }
  0x2e   :  { %557 = vmatpush1.bf16.msra.mxu0 %v1655_v14  ;;  %1638 = vmatpush1.bf16.msra.mxu1 %v1655_v14  ;;  %v1752_v14 = vld [vmem:[%s2215_s0 + $0x1f4] ss:$8 sps:$4 sm:$0xff]  }
  0x2f   :  { %558 = vmatprep.subr.bf16.mxu0 %v1756_v0  ;;  %1623 = vmatprep.subr.bf16.mxu1 %v1756_v0 }
  0x32   :  { %559 = vmatpush1.bf16.msra.mxu0 %v1656_v15  ;;  %1639 = vmatpush1.bf16.msra.mxu1 %v1656_v15  ;;  %v1754_v15 = vld [vmem:[%s2215_s0 + $0xf0] ss:$8 sps:$4 sm:$0xff]  }
  0x33   :  { %560 = vmatprep.subr.bf16.mxu0 %v1756_v0  ;;  %1624 = vmatprep.subr.bf16.mxu1 %v1756_v0 }
  0x36   :  { %561 = vmatpush1.bf16.msra.mxu0 %v1657_v16  ;;  %1640 = vmatpush1.bf16.msra.mxu1 %v1657_v16  ;;  %v1755_v16 = vld [vmem:[%s2215_s0 + $0x1f0] ss:$8 sps:$4 sm:$0xff]  }
  0x37   :  { %562 = vmatprep.subr.bf16.mxu0 %v1756_v0  ;;  %1625 = vmatprep.subr.bf16.mxu1 %v1756_v0 }
  0x3a   :  { %563 = vmatpush1.bf16.msra.mxu0 %v1658_v17  ;;  %1641 = vmatpush1.bf16.msra.mxu1 %v1658_v17  ;;  %v2052_v17 = vld [vmem:[%s2216_s2] ss:$0 sm:$0xff] }
  0x3b   :  { %564 = vmatprep.subr.bf16.mxu0 %v1756_v0  ;;  %1626 = vmatprep.subr.bf16.mxu1 %v1756_v0  ;;  %v1731_v0 = vld [vmem:[%s2215_s0 + $0x1b0] ss:$8 sps:$4 sm:$0xff]  }
  0x3e   :  { %565 = vmatpush1.bf16.msra.mxu0 %v1659_v18  ;;  %1642 = vmatpush1.bf16.msra.mxu1 %v1659_v18 }
  0x41   :  { %567 = vmatmul.mubr.bf16.vlgmr.msra.gmra.mrb[0].mxu0 %v1660_v19  ;;  %695 = vmatmul.mubr.bf16.vlgmr.msra.gmra.mrb[0].mxu1 %v1663_v20 }
  0x42   :  { %574 = vmatprep.mubr.bf16.mxu0 %v1666_v21  ;;  %702 = vmatprep.mubr.bf16.mxu1 %v1668_v22 }
  0x49   :  { %575 = vmatmul.mubr.bf16.gmra.mrb[4].mxu0 %v1670_v23  ;;  %703 = vmatmul.mubr.bf16.gmra.mrb[4].mxu1 %v1671_v24 }
  0x4a   :  { %582 = vmatprep.mubr.bf16.mxu0 %v1672_v25  ;;  %710 = vmatprep.mubr.bf16.mxu1 %v1674_v26 }
  0x51   :  { %583 = vmatmul.mubr.bf16.gmra.mrb[8].mxu0 %v1676_v27  ;;  %711 = vmatmul.mubr.bf16.gmra.mrb[8].mxu1 %v1677_v28 }
  0x52   :  { %590 = vmatprep.mubr.bf16.mxu0 %v1678_v29  ;;  %718 = vmatprep.mubr.bf16.mxu1 %v1680_v30 }
  0x59   :  { %591 = vmatmul.mubr.bf16.gmra.mrb[12].mxu0 %v1682_v31  ;;  %719 = vmatmul.mubr.bf16.gmra.mrb[12].mxu1 %v1683_v32 }
  0x5a   :  { %598 = vmatprep.mubr.bf16.mxu0 %v1684_v33  ;;  %726 = vmatprep.mubr.bf16.mxu1 %v1686_v34 }
  0x61   :  { %599 = vmatmul.mubr.bf16.gmra.mrb[16].mxu0 %v1688_v35  ;;  %727 = vmatmul.mubr.bf16.gmra.mrb[16].mxu1 %v1689_v36 }
  0x62   :  { %606 = vmatprep.mubr.bf16.mxu0 %v1690_v37  ;;  %734 = vmatprep.mubr.bf16.mxu1 %v1692_v38 }
  0x69   :  { %607 = vmatmul.mubr.bf16.gmra.mrb[20].mxu0 %v1694_v39  ;;  %735 = vmatmul.mubr.bf16.gmra.mrb[20].mxu1 %v1695_v40 }
  0x6a   :  { %614 = vmatprep.mubr.bf16.mxu0 %v1696_v41  ;;  %742 = vmatprep.mubr.bf16.mxu1 %v1698_v42 }
  0x71   :  { %615 = vmatmul.mubr.bf16.gmra.mrb[24].mxu0 %v1700_v43  ;;  %743 = vmatmul.mubr.bf16.gmra.mrb[24].mxu1 %v1701_v44 }
  0x72   :  { %622 = vmatprep.mubr.bf16.mxu0 %v1702_v45  ;;  %750 = vmatprep.mubr.bf16.mxu1 %v1704_v46 }
  0x79   :  { %623 = vmatmul.mubr.bf16.gmra.mrb[28].mxu0 %v1706_v47  ;;  %751 = vmatmul.mubr.bf16.gmra.mrb[28].mxu1 %v1707_v48 }
  0x7a   :  { %630 = vmatprep.mubr.bf16.mxu0 %v1708_v49  ;;  %758 = vmatprep.mubr.bf16.mxu1 %v1710_v50 }
  0x81   :  { %631 = vmatmul.mubr.bf16.gmra.mrb[32].mxu0 %v1712_v51  ;;  %759 = vmatmul.mubr.bf16.gmra.mrb[32].mxu1 %v1713_v52 }
  0x82   :  { %638 = vmatprep.mubr.bf16.mxu0 %v1714_v53  ;;  %766 = vmatprep.mubr.bf16.mxu1 %v1716_v54 }
  0x89   :  { %639 = vmatmul.mubr.bf16.gmra.mrb[36].mxu0 %v1718_v55  ;;  %767 = vmatmul.mubr.bf16.gmra.mrb[36].mxu1 %v1719_v56 }
  0x8a   :  { %646 = vmatprep.mubr.bf16.mxu0 %v1720_v57  ;;  %774 = vmatprep.mubr.bf16.mxu1 %v1722_v58 }
  0x91   :  { %647 = vmatmul.mubr.bf16.gmra.mrb[40].mxu0 %v1724_v59  ;;  %775 = vmatmul.mubr.bf16.gmra.mrb[40].mxu1 %v1725_v60 }
  0x92   :  { %654 = vmatprep.mubr.bf16.mxu0 %v1726_v61  ;;  %782 = vmatprep.mubr.bf16.mxu1 %v1728_v62 }
  0x99   :  { %655 = vmatmul.mubr.bf16.gmra.mrb[44].mxu0 %v1730_v63  ;;  %783 = vmatmul.mubr.bf16.gmra.mrb[44].mxu1 %v1731_v0 }
  0x9a   :  { %662 = vmatprep.mubr.bf16.mxu0 %v1732_v1  ;;  %790 = vmatprep.mubr.bf16.mxu1 %v1734_v2 }
  0xa1   :  { %663 = vmatmul.mubr.bf16.gmra.mrb[48].mxu0 %v1736_v3  ;;  %791 = vmatmul.mubr.bf16.gmra.mrb[48].mxu1 %v1737_v4 }
  0xa2   :  { %670 = vmatprep.mubr.bf16.mxu0 %v1738_v5  ;;  %798 = vmatprep.mubr.bf16.mxu1 %v1740_v6 }
  0xa9   :  { %671 = vmatmul.mubr.bf16.gmra.mrb[52].mxu0 %v1742_v7  ;;  %799 = vmatmul.mubr.bf16.gmra.mrb[52].mxu1 %v1743_v8 }
  0xaa   :  { %678 = vmatprep.mubr.bf16.mxu0 %v1744_v9  ;;  %806 = vmatprep.mubr.bf16.mxu1 %v1746_v10 }
  0xb1   :  { %679 = vmatmul.mubr.bf16.gmra.mrb[56].mxu0 %v1748_v11  ;;  %807 = vmatmul.mubr.bf16.gmra.mrb[56].mxu1 %v1749_v12 }
  0xb2   :  { %686 = vmatprep.mubr.bf16.mxu0 %v1750_v13  ;;  %814 = vmatprep.mubr.bf16.mxu1 %v1752_v14 }
  0xb9   :  { %687 = vmatmul.mubr.bf16.gmra.mrb[60].mxu0 %v1754_v15  ;;  %815 = vmatmul.mubr.bf16.gmra.mrb[60].mxu1 %v1755_v16 }
 0x114   :  { %v568_v18 = vpop.f32.mrb[0].mxu0  ;;  %v696_v19 = vpop.f32.mrb[0].mxu1 }
 0x115   :  { %v569_v20 = vadd.f32 %v2052_v17, %v568_v18  ;;  %v697_v21 = vadd.f32 %v2052_v17, %v696_v19  ;;  %v570_v22 = vpop.f32.mrb[1].mxu0  ;;  %v698_v23 = vpop.f32.mrb[1].mxu1 }
 0x116   :  { %v571_v24 = vpop.f32.mrb[2].mxu0  ;;  %v699_v25 = vpop.f32.mrb[2].mxu1 }
 0x117   :  { %v572_v26 = vadd.f32 %v2052_v17, %v571_v24  ;;  %v700_v27 = vadd.f32 %v2052_v17, %v699_v25  ;;  %v573_v28 = vpop.f32.mrb[3].mxu0  ;;  %v701_v29 = vpop.f32.mrb[3].mxu1  ;;  %v823_v30 = vmax.f32 %v569_v20, 0.0  ;;  %v855_v31 = vmax.f32 %v697_v21, 0.0 }
 0x119   :  { %v824_v32 = vmax.f32 %v572_v26, 0.0  ;;  %v856_v33 = vmax.f32 %v700_v27, 0.0 }
 0x11b   :  { %v1423_v34 = vpack.c.bf16 %v824_v32, %v823_v30  ;;  %v1503_v35 = vpack.c.bf16 %v856_v33, %v855_v31 }
 0x11c   :  { %v576_v36 = vpop.f32.mrb[4].mxu0  ;;  %v704_v37 = vpop.f32.mrb[4].mxu1 }
 0x11d   :  { %1424 = vst [vmem:[%s2217_s3] sm:$0xff] %v1423_v34   ;;  %1595 = vst [vmem:[%s2217_s3 + $0x80] sm:$0xff] %v1503_v35   ;;  %v577_v38 = vadd.f32 %v2052_v17, %v576_v36  ;;  %v705_v39 = vadd.f32 %v2052_v17, %v704_v37  ;;  %v578_v40 = vpop.f32.mrb[5].mxu0  ;;  %v706_v41 = vpop.f32.mrb[5].mxu1 }
 0x11e   :  { %v579_v42 = vpop.f32.mrb[6].mxu0  ;;  %v707_v43 = vpop.f32.mrb[6].mxu1 }
 0x11f   :  { %v580_v44 = vadd.f32 %v2052_v17, %v579_v42  ;;  %v708_v45 = vadd.f32 %v2052_v17, %v707_v43  ;;  %v581_v46 = vpop.f32.mrb[7].mxu0  ;;  %v709_v47 = vpop.f32.mrb[7].mxu1  ;;  %v825_v48 = vmax.f32 %v577_v38, 0.0  ;;  %v857_v49 = vmax.f32 %v705_v39, 0.0 }
 0x121   :  { %v826_v50 = vmax.f32 %v580_v44, 0.0  ;;  %v858_v51 = vmax.f32 %v708_v45, 0.0 }
 0x123   :  { %v1428_v52 = vpack.c.bf16 %v826_v50, %v825_v48  ;;  %v1508_v53 = vpack.c.bf16 %v858_v51, %v857_v49 }
 0x124   :  { %v584_v54 = vpop.f32.mrb[8].mxu0  ;;  %v712_v55 = vpop.f32.mrb[8].mxu1 }
 0x125   :  { %1580 = vst [vmem:[%s2217_s3 + $0x8] sm:$0xff] %v1428_v52   ;;  %1596 = vst [vmem:[%s2217_s3 + $0x88] sm:$0xff] %v1508_v53   ;;  %v585_v56 = vadd.f32 %v2052_v17, %v584_v54  ;;  %v713_v57 = vadd.f32 %v2052_v17, %v712_v55  ;;  %v586_v58 = vpop.f32.mrb[9].mxu0  ;;  %v714_v59 = vpop.f32.mrb[9].mxu1 }
 0x126   :  { %v587_v60 = vpop.f32.mrb[10].mxu0  ;;  %v715_v61 = vpop.f32.mrb[10].mxu1 }
 0x127   :  { %v588_v62 = vadd.f32 %v2052_v17, %v587_v60  ;;  %v716_v63 = vadd.f32 %v2052_v17, %v715_v61  ;;  %v589_v0 = vpop.f32.mrb[11].mxu0  ;;  %v717_v1 = vpop.f32.mrb[11].mxu1  ;;  %v827_v2 = vmax.f32 %v585_v56, 0.0  ;;  %v859_v3 = vmax.f32 %v713_v57, 0.0 }
 0x129   :  { %v828_v4 = vmax.f32 %v588_v62, 0.0  ;;  %v860_v5 = vmax.f32 %v716_v63, 0.0 }
 0x12b   :  { %v1433_v6 = vpack.c.bf16 %v828_v4, %v827_v2  ;;  %v1513_v7 = vpack.c.bf16 %v860_v5, %v859_v3 }
 0x12c   :  { %v592_v8 = vpop.f32.mrb[12].mxu0  ;;  %v720_v9 = vpop.f32.mrb[12].mxu1 }
 0x12d   :  { %1581 = vst [vmem:[%s2217_s3 + $0x10] sm:$0xff] %v1433_v6   ;;  %1597 = vst [vmem:[%s2217_s3 + $0x90] sm:$0xff] %v1513_v7   ;;  %v593_v10 = vadd.f32 %v2052_v17, %v592_v8  ;;  %v721_v11 = vadd.f32 %v2052_v17, %v720_v9  ;;  %v594_v12 = vpop.f32.mrb[13].mxu0  ;;  %v722_v13 = vpop.f32.mrb[13].mxu1 }
 0x12e   :  { %v595_v14 = vpop.f32.mrb[14].mxu0  ;;  %v723_v15 = vpop.f32.mrb[14].mxu1 }
 0x12f   :  { %v596_v16 = vadd.f32 %v2052_v17, %v595_v14  ;;  %v724_v18 = vadd.f32 %v2052_v17, %v723_v15  ;;  %v597_v19 = vpop.f32.mrb[15].mxu0  ;;  %v725_v20 = vpop.f32.mrb[15].mxu1  ;;  %v829_v21 = vmax.f32 %v593_v10, 0.0  ;;  %v861_v22 = vmax.f32 %v721_v11, 0.0 }
 0x131   :  { %v830_v23 = vmax.f32 %v596_v16, 0.0  ;;  %v862_v24 = vmax.f32 %v724_v18, 0.0 }
 0x133   :  { %v1438_v25 = vpack.c.bf16 %v830_v23, %v829_v21  ;;  %v1518_v26 = vpack.c.bf16 %v862_v24, %v861_v22 }
 0x134   :  { %v600_v27 = vpop.f32.mrb[16].mxu0  ;;  %v728_v28 = vpop.f32.mrb[16].mxu1 }
 0x135   :  { %1582 = vst [vmem:[%s2217_s3 + $0x18] sm:$0xff] %v1438_v25   ;;  %1598 = vst [vmem:[%s2217_s3 + $0x98] sm:$0xff] %v1518_v26   ;;  %v601_v29 = vadd.f32 %v2052_v17, %v600_v27  ;;  %v729_v30 = vadd.f32 %v2052_v17, %v728_v28  ;;  %v602_v31 = vpop.f32.mrb[17].mxu0  ;;  %v730_v32 = vpop.f32.mrb[17].mxu1 }
 0x136   :  { %v603_v33 = vpop.f32.mrb[18].mxu0  ;;  %v731_v34 = vpop.f32.mrb[18].mxu1 }
 0x137   :  { %v604_v35 = vadd.f32 %v2052_v17, %v603_v33  ;;  %v732_v36 = vadd.f32 %v2052_v17, %v731_v34  ;;  %v605_v37 = vpop.f32.mrb[19].mxu0  ;;  %v733_v38 = vpop.f32.mrb[19].mxu1  ;;  %v831_v39 = vmax.f32 %v601_v29, 0.0  ;;  %v863_v40 = vmax.f32 %v729_v30, 0.0 }
 0x139   :  { %v832_v41 = vmax.f32 %v604_v35, 0.0  ;;  %v864_v42 = vmax.f32 %v732_v36, 0.0 }
 0x13b   :  { %v1443_v43 = vpack.c.bf16 %v832_v41, %v831_v39  ;;  %v1523_v44 = vpack.c.bf16 %v864_v42, %v863_v40 }
 0x13c   :  { %v608_v45 = vpop.f32.mrb[20].mxu0  ;;  %v736_v46 = vpop.f32.mrb[20].mxu1 }
 0x13d   :  { %1583 = vst [vmem:[%s2217_s3 + $0x20] sm:$0xff] %v1443_v43   ;;  %1599 = vst [vmem:[%s2217_s3 + $0xa0] sm:$0xff] %v1523_v44   ;;  %v609_v47 = vadd.f32 %v2052_v17, %v608_v45  ;;  %v737_v48 = vadd.f32 %v2052_v17, %v736_v46  ;;  %v610_v49 = vpop.f32.mrb[21].mxu0  ;;  %v738_v50 = vpop.f32.mrb[21].mxu1 }
 0x13e   :  { %v611_v51 = vpop.f32.mrb[22].mxu0  ;;  %v739_v52 = vpop.f32.mrb[22].mxu1 }
 0x13f   :  { %v612_v53 = vadd.f32 %v2052_v17, %v611_v51  ;;  %v740_v54 = vadd.f32 %v2052_v17, %v739_v52  ;;  %v613_v55 = vpop.f32.mrb[23].mxu0  ;;  %v741_v56 = vpop.f32.mrb[23].mxu1  ;;  %v833_v57 = vmax.f32 %v609_v47, 0.0  ;;  %v865_v58 = vmax.f32 %v737_v48, 0.0 }
 0x141   :  { %v834_v59 = vmax.f32 %v612_v53, 0.0  ;;  %v866_v60 = vmax.f32 %v740_v54, 0.0 }
 0x143   :  { %v1448_v61 = vpack.c.bf16 %v834_v59, %v833_v57  ;;  %v1528_v62 = vpack.c.bf16 %v866_v60, %v865_v58 }
 0x144   :  { %v616_v63 = vpop.f32.mrb[24].mxu0  ;;  %v744_v0 = vpop.f32.mrb[24].mxu1 }
 0x145   :  { %1584 = vst [vmem:[%s2217_s3 + $0x28] sm:$0xff] %v1448_v61   ;;  %1600 = vst [vmem:[%s2217_s3 + $0xa8] sm:$0xff] %v1528_v62   ;;  %v617_v1 = vadd.f32 %v2052_v17, %v616_v63  ;;  %v745_v2 = vadd.f32 %v2052_v17, %v744_v0  ;;  %v618_v3 = vpop.f32.mrb[25].mxu0  ;;  %v746_v4 = vpop.f32.mrb[25].mxu1 }
 0x146   :  { %v619_v5 = vpop.f32.mrb[26].mxu0  ;;  %v747_v6 = vpop.f32.mrb[26].mxu1 }
 0x147   :  { %v620_v7 = vadd.f32 %v2052_v17, %v619_v5  ;;  %v748_v8 = vadd.f32 %v2052_v17, %v747_v6  ;;  %v621_v9 = vpop.f32.mrb[27].mxu0  ;;  %v749_v10 = vpop.f32.mrb[27].mxu1  ;;  %v835_v11 = vmax.f32 %v617_v1, 0.0  ;;  %v867_v12 = vmax.f32 %v745_v2, 0.0 }
 0x149   :  { %v836_v13 = vmax.f32 %v620_v7, 0.0  ;;  %v868_v14 = vmax.f32 %v748_v8, 0.0 }
 0x14b   :  { %v1453_v15 = vpack.c.bf16 %v836_v13, %v835_v11  ;;  %v1533_v16 = vpack.c.bf16 %v868_v14, %v867_v12 }
 0x14c   :  { %v624_v18 = vpop.f32.mrb[28].mxu0  ;;  %v752_v19 = vpop.f32.mrb[28].mxu1 }
 0x14d   :  { %1585 = vst [vmem:[%s2217_s3 + $0x30] sm:$0xff] %v1453_v15   ;;  %1601 = vst [vmem:[%s2217_s3 + $0xb0] sm:$0xff] %v1533_v16   ;;  %v625_v20 = vadd.f32 %v2052_v17, %v624_v18  ;;  %v753_v21 = vadd.f32 %v2052_v17, %v752_v19  ;;  %v626_v22 = vpop.f32.mrb[29].mxu0  ;;  %v754_v23 = vpop.f32.mrb[29].mxu1 }
 0x14e   :  { %v627_v24 = vpop.f32.mrb[30].mxu0  ;;  %v755_v25 = vpop.f32.mrb[30].mxu1 }
 0x14f   :  { %v628_v26 = vadd.f32 %v2052_v17, %v627_v24  ;;  %v756_v27 = vadd.f32 %v2052_v17, %v755_v25  ;;  %v629_v28 = vpop.f32.mrb[31].mxu0  ;;  %v757_v29 = vpop.f32.mrb[31].mxu1  ;;  %v837_v30 = vmax.f32 %v625_v20, 0.0  ;;  %v869_v31 = vmax.f32 %v753_v21, 0.0 }
 0x151   :  { %v838_v32 = vmax.f32 %v628_v26, 0.0  ;;  %v870_v33 = vmax.f32 %v756_v27, 0.0 }
 0x153   :  { %v1458_v34 = vpack.c.bf16 %v838_v32, %v837_v30  ;;  %v1538_v35 = vpack.c.bf16 %v870_v33, %v869_v31 }
 0x154   :  { %v632_v36 = vpop.f32.mrb[32].mxu0  ;;  %v760_v37 = vpop.f32.mrb[32].mxu1 }
 0x155   :  { %1586 = vst [vmem:[%s2217_s3 + $0x38] sm:$0xff] %v1458_v34   ;;  %1602 = vst [vmem:[%s2217_s3 + $0xb8] sm:$0xff] %v1538_v35   ;;  %v633_v38 = vadd.f32 %v2052_v17, %v632_v36  ;;  %v761_v39 = vadd.f32 %v2052_v17, %v760_v37  ;;  %v634_v40 = vpop.f32.mrb[33].mxu0  ;;  %v762_v41 = vpop.f32.mrb[33].mxu1 }
 0x156   :  { %v635_v42 = vpop.f32.mrb[34].mxu0  ;;  %v763_v43 = vpop.f32.mrb[34].mxu1 }
 0x157   :  { %v636_v44 = vadd.f32 %v2052_v17, %v635_v42  ;;  %v764_v45 = vadd.f32 %v2052_v17, %v763_v43  ;;  %v637_v46 = vpop.f32.mrb[35].mxu0  ;;  %v765_v47 = vpop.f32.mrb[35].mxu1  ;;  %v839_v48 = vmax.f32 %v633_v38, 0.0  ;;  %v871_v49 = vmax.f32 %v761_v39, 0.0 }
 0x159   :  { %v840_v50 = vmax.f32 %v636_v44, 0.0  ;;  %v872_v51 = vmax.f32 %v764_v45, 0.0 }
 0x15b   :  { %v1463_v52 = vpack.c.bf16 %v840_v50, %v839_v48  ;;  %v1543_v53 = vpack.c.bf16 %v872_v51, %v871_v49 }
 0x15c   :  { %v640_v54 = vpop.f32.mrb[36].mxu0  ;;  %v768_v55 = vpop.f32.mrb[36].mxu1 }
 0x15d   :  { %1587 = vst [vmem:[%s2217_s3 + $0x40] sm:$0xff] %v1463_v52   ;;  %1603 = vst [vmem:[%s2217_s3 + $0xc0] sm:$0xff] %v1543_v53   ;;  %v641_v56 = vadd.f32 %v2052_v17, %v640_v54  ;;  %v769_v57 = vadd.f32 %v2052_v17, %v768_v55  ;;  %v642_v58 = vpop.f32.mrb[37].mxu0  ;;  %v770_v59 = vpop.f32.mrb[37].mxu1 }
 0x15e   :  { %v643_v60 = vpop.f32.mrb[38].mxu0  ;;  %v771_v61 = vpop.f32.mrb[38].mxu1 }
 0x15f   :  { %v644_v62 = vadd.f32 %v2052_v17, %v643_v60  ;;  %v772_v63 = vadd.f32 %v2052_v17, %v771_v61  ;;  %v645_v0 = vpop.f32.mrb[39].mxu0  ;;  %v773_v1 = vpop.f32.mrb[39].mxu1  ;;  %v841_v2 = vmax.f32 %v641_v56, 0.0  ;;  %v873_v3 = vmax.f32 %v769_v57, 0.0 }
 0x161   :  { %v842_v4 = vmax.f32 %v644_v62, 0.0  ;;  %v874_v5 = vmax.f32 %v772_v63, 0.0 }
 0x163   :  { %v1468_v6 = vpack.c.bf16 %v842_v4, %v841_v2  ;;  %v1548_v7 = vpack.c.bf16 %v874_v5, %v873_v3 }
 0x164   :  { %v648_v8 = vpop.f32.mrb[40].mxu0  ;;  %v776_v9 = vpop.f32.mrb[40].mxu1 }
 0x165   :  { %1588 = vst [vmem:[%s2217_s3 + $0x48] sm:$0xff] %v1468_v6   ;;  %1604 = vst [vmem:[%s2217_s3 + $0xc8] sm:$0xff] %v1548_v7   ;;  %v649_v10 = vadd.f32 %v2052_v17, %v648_v8  ;;  %v777_v11 = vadd.f32 %v2052_v17, %v776_v9  ;;  %v650_v12 = vpop.f32.mrb[41].mxu0  ;;  %v778_v13 = vpop.f32.mrb[41].mxu1 }
 0x166   :  { %v651_v14 = vpop.f32.mrb[42].mxu0  ;;  %v779_v15 = vpop.f32.mrb[42].mxu1 }
 0x167   :  { %v652_v16 = vadd.f32 %v2052_v17, %v651_v14  ;;  %v780_v18 = vadd.f32 %v2052_v17, %v779_v15  ;;  %v653_v19 = vpop.f32.mrb[43].mxu0  ;;  %v781_v20 = vpop.f32.mrb[43].mxu1  ;;  %v843_v21 = vmax.f32 %v649_v10, 0.0  ;;  %v875_v22 = vmax.f32 %v777_v11, 0.0 }
 0x169   :  { %v844_v23 = vmax.f32 %v652_v16, 0.0  ;;  %v876_v24 = vmax.f32 %v780_v18, 0.0 }
 0x16b   :  { %v1473_v25 = vpack.c.bf16 %v844_v23, %v843_v21  ;;  %v1553_v26 = vpack.c.bf16 %v876_v24, %v875_v22 }
 0x16c   :  { %v656_v27 = vpop.f32.mrb[44].mxu0  ;;  %v784_v28 = vpop.f32.mrb[44].mxu1 }
 0x16d   :  { %1589 = vst [vmem:[%s2217_s3 + $0x50] sm:$0xff] %v1473_v25   ;;  %1605 = vst [vmem:[%s2217_s3 + $0xd0] sm:$0xff] %v1553_v26   ;;  %v657_v29 = vadd.f32 %v2052_v17, %v656_v27  ;;  %v785_v30 = vadd.f32 %v2052_v17, %v784_v28  ;;  %v658_v31 = vpop.f32.mrb[45].mxu0  ;;  %v786_v32 = vpop.f32.mrb[45].mxu1 }
 0x16e   :  { %v659_v33 = vpop.f32.mrb[46].mxu0  ;;  %v787_v34 = vpop.f32.mrb[46].mxu1 }
 0x16f   :  { %v660_v35 = vadd.f32 %v2052_v17, %v659_v33  ;;  %v788_v36 = vadd.f32 %v2052_v17, %v787_v34  ;;  %v661_v37 = vpop.f32.mrb[47].mxu0  ;;  %v789_v38 = vpop.f32.mrb[47].mxu1  ;;  %v845_v39 = vmax.f32 %v657_v29, 0.0  ;;  %v877_v40 = vmax.f32 %v785_v30, 0.0 }
 0x171   :  { %v846_v41 = vmax.f32 %v660_v35, 0.0  ;;  %v878_v42 = vmax.f32 %v788_v36, 0.0 }
 0x173   :  { %v1478_v43 = vpack.c.bf16 %v846_v41, %v845_v39  ;;  %v1558_v44 = vpack.c.bf16 %v878_v42, %v877_v40 }
 0x174   :  { %v664_v45 = vpop.f32.mrb[48].mxu0  ;;  %v792_v46 = vpop.f32.mrb[48].mxu1 }
 0x175   :  { %1590 = vst [vmem:[%s2217_s3 + $0x58] sm:$0xff] %v1478_v43   ;;  %1606 = vst [vmem:[%s2217_s3 + $0xd8] sm:$0xff] %v1558_v44   ;;  %v665_v47 = vadd.f32 %v2052_v17, %v664_v45  ;;  %v793_v48 = vadd.f32 %v2052_v17, %v792_v46  ;;  %v666_v49 = vpop.f32.mrb[49].mxu0  ;;  %v794_v50 = vpop.f32.mrb[49].mxu1 }
 0x176   :  { %v667_v51 = vpop.f32.mrb[50].mxu0  ;;  %v795_v52 = vpop.f32.mrb[50].mxu1 }
 0x177   :  { %v668_v53 = vadd.f32 %v2052_v17, %v667_v51  ;;  %v796_v54 = vadd.f32 %v2052_v17, %v795_v52  ;;  %v669_v55 = vpop.f32.mrb[51].mxu0  ;;  %v797_v56 = vpop.f32.mrb[51].mxu1  ;;  %v847_v57 = vmax.f32 %v665_v47, 0.0  ;;  %v879_v58 = vmax.f32 %v793_v48, 0.0 }
 0x179   :  { %v848_v59 = vmax.f32 %v668_v53, 0.0  ;;  %v880_v60 = vmax.f32 %v796_v54, 0.0 }
 0x17b   :  { %v1483_v61 = vpack.c.bf16 %v848_v59, %v847_v57  ;;  %v1563_v62 = vpack.c.bf16 %v880_v60, %v879_v58 }
 0x17c   :  { %v672_v63 = vpop.f32.mrb[52].mxu0  ;;  %v800_v0 = vpop.f32.mrb[52].mxu1 }
 0x17d   :  { %1591 = vst [vmem:[%s2217_s3 + $0x60] sm:$0xff] %v1483_v61   ;;  %1607 = vst [vmem:[%s2217_s3 + $0xe0] sm:$0xff] %v1563_v62   ;;  %v673_v1 = vadd.f32 %v2052_v17, %v672_v63  ;;  %v801_v2 = vadd.f32 %v2052_v17, %v800_v0  ;;  %v674_v3 = vpop.f32.mrb[53].mxu0  ;;  %v802_v4 = vpop.f32.mrb[53].mxu1 }
 0x17e   :  { %v675_v5 = vpop.f32.mrb[54].mxu0  ;;  %v803_v6 = vpop.f32.mrb[54].mxu1 }
 0x17f   :  { %v676_v7 = vadd.f32 %v2052_v17, %v675_v5  ;;  %v804_v8 = vadd.f32 %v2052_v17, %v803_v6  ;;  %v677_v9 = vpop.f32.mrb[55].mxu0  ;;  %v805_v10 = vpop.f32.mrb[55].mxu1  ;;  %v849_v11 = vmax.f32 %v673_v1, 0.0  ;;  %v881_v12 = vmax.f32 %v801_v2, 0.0 }
 0x181   :  { %v850_v13 = vmax.f32 %v676_v7, 0.0  ;;  %v882_v14 = vmax.f32 %v804_v8, 0.0 }
 0x183   :  { %v1488_v15 = vpack.c.bf16 %v850_v13, %v849_v11  ;;  %v1568_v16 = vpack.c.bf16 %v882_v14, %v881_v12 }
 0x184   :  { %v680_v18 = vpop.f32.mrb[56].mxu0  ;;  %v808_v19 = vpop.f32.mrb[56].mxu1 }
 0x185   :  { %1592 = vst [vmem:[%s2217_s3 + $0x68] sm:$0xff] %v1488_v15   ;;  %1608 = vst [vmem:[%s2217_s3 + $0xe8] sm:$0xff] %v1568_v16   ;;  %v681_v20 = vadd.f32 %v2052_v17, %v680_v18  ;;  %v809_v21 = vadd.f32 %v2052_v17, %v808_v19  ;;  %v682_v22 = vpop.f32.mrb[57].mxu0  ;;  %v810_v23 = vpop.f32.mrb[57].mxu1 }
 0x186   :  { %v683_v24 = vpop.f32.mrb[58].mxu0  ;;  %v811_v25 = vpop.f32.mrb[58].mxu1 }
 0x187   :  { %v684_v26 = vadd.f32 %v2052_v17, %v683_v24  ;;  %v812_v27 = vadd.f32 %v2052_v17, %v811_v25  ;;  %v685_v28 = vpop.f32.mrb[59].mxu0  ;;  %v813_v29 = vpop.f32.mrb[59].mxu1  ;;  %v851_v30 = vmax.f32 %v681_v20, 0.0  ;;  %v883_v31 = vmax.f32 %v809_v21, 0.0 }
 0x189   :  { %v852_v32 = vmax.f32 %v684_v26, 0.0  ;;  %v884_v33 = vmax.f32 %v812_v27, 0.0 }
 0x18b   :  { %v1493_v34 = vpack.c.bf16 %v852_v32, %v851_v30  ;;  %v1573_v35 = vpack.c.bf16 %v884_v33, %v883_v31 }
 0x18c   :  { %v688_v36 = vpop.f32.mrb[60].mxu0  ;;  %v816_v37 = vpop.f32.mrb[60].mxu1 }
 0x18d   :  { %1593 = vst [vmem:[%s2217_s3 + $0x70] sm:$0xff] %v1493_v34   ;;  %1609 = vst [vmem:[%s2217_s3 + $0xf0] sm:$0xff] %v1573_v35   ;;  %v689_v38 = vadd.f32 %v2052_v17, %v688_v36  ;;  %v817_v39 = vadd.f32 %v2052_v17, %v816_v37  ;;  %v690_v40 = vpop.f32.mrb[61].mxu0  ;;  %v818_v41 = vpop.f32.mrb[61].mxu1 }
 0x18e   :  { %v691_v42 = vpop.f32.mrb[62].mxu0  ;;  %v819_v43 = vpop.f32.mrb[62].mxu1 }
 0x18f   :  { %v692_v44 = vadd.f32 %v2052_v17, %v691_v42  ;;  %v820_v45 = vadd.f32 %v2052_v17, %v819_v43  ;;  %v693_v46 = vpop.f32.mrb[63].mxu0  ;;  %v821_v47 = vpop.f32.mrb[63].mxu1  ;;  %v853_v48 = vmax.f32 %v689_v38, 0.0  ;;  %v885_v49 = vmax.f32 %v817_v39, 0.0 }
 0x191   :  { %v854_v50 = vmax.f32 %v692_v44, 0.0  ;;  %v886_v51 = vmax.f32 %v820_v45, 0.0 }
 0x193   :  { %v1498_v52 = vpack.c.bf16 %v854_v50, %v853_v48  ;;  %v1578_v53 = vpack.c.bf16 %v886_v51, %v885_v49 }
 0x195   :  { %1594 = vst [vmem:[%s2217_s3 + $0x78] sm:$0xff] %v1498_v52   ;;  %1610 = vst [vmem:[%s2217_s3 + $0xf8] sm:$0xff] %v1578_v53  }

// kernel: reg3d_forward.13
= control target key start
LH: loop header
LB: loop body
LE: loop exit
PB: predicated region body
PF: predicated region fallthrough
CT: control target
= control target key end

     0   :  { %v2846_v0 = vmov 0   ;;  %s3543_s1 = inlined_call_operand.vmem [shape: bf16[512,128], index: 1, kind: input, shape index: {}]   ;;  %s3544_s0 = inlined_call_operand.vmem [shape: bf16[512,512], index: 0, kind: input, shape index: {}]   ;;  %s3545_s2 = inlined_call_operand.vmem [shape: f32[1,128], index: 2, kind: input, shape index: {}]   ;;  %s3546_s3 = inlined_call_operand.vmem [shape: bf16[512,128], index: 3, kind: output, shape index: {}]  }
   0x1   :  { %1046 = vmatprep.subr.bf16.mxu1 %v2846_v0  ;;  %1335 = vmatprep.subr.bf16.mxu0 %v2846_v0  ;;  %v2621_v1 = vld [vmem:[%s3543_s1] sm:$0xff]   ;;  %v2623_v3 = vld [vmem:[%s3543_s1 + $0x8] sm:$0xff]   ;;  %v2625_v5 = vld [vmem:[%s3543_s1 + $0x10] sm:$0xff]  }
   0x2   :  { %v2622_v2 = vld [vmem:[%s3543_s1 + $0x80] sm:$0xff]   ;;  %1047 = vmatpush1.bf16.msra.mxu1 %v2621_v1  ;;  %v2624_v4 = vld [vmem:[%s3543_s1 + $0x88] sm:$0xff]   ;;  %v2626_v6 = vld [vmem:[%s3543_s1 + $0x90] sm:$0xff]  }
   0x3   :  { %1336 = vmatpush1.bf16.msra.mxu0 %v2622_v2  ;;  %1048 = vmatprep.subr.bf16.mxu1 %v2846_v0  ;;  %v2627_v7 = vld [vmem:[%s3543_s1 + $0x18] sm:$0xff]   ;;  %v2629_v9 = vld [vmem:[%s3543_s1 + $0x20] sm:$0xff]   ;;  %v2631_v11 = vld [vmem:[%s3543_s1 + $0x28] sm:$0xff]  }
   0x4   :  { %1337 = vmatprep.subr.bf16.mxu0 %v2846_v0  ;;  %v2628_v8 = vld [vmem:[%s3543_s1 + $0x98] sm:$0xff]   ;;  %v2630_v10 = vld [vmem:[%s3543_s1 + $0xa0] sm:$0xff]   ;;  %v2632_v12 = vld [vmem:[%s3543_s1 + $0xa8] sm:$0xff]  }
   0x5   :  { %v2633_v13 = vld [vmem:[%s3543_s1 + $0x30] sm:$0xff]   ;;  %v2635_v15 = vld [vmem:[%s3543_s1 + $0x38] sm:$0xff]   ;;  %v2637_v17 = vld [vmem:[%s3543_s1 + $0x40] sm:$0xff]  }
   0x6   :  { %1049 = vmatpush1.bf16.msra.mxu1 %v2623_v3  ;;  %v2634_v14 = vld [vmem:[%s3543_s1 + $0xb0] sm:$0xff]   ;;  %v2636_v16 = vld [vmem:[%s3543_s1 + $0xb8] sm:$0xff]   ;;  %v2638_v18 = vld [vmem:[%s3543_s1 + $0xc0] sm:$0xff]  }
   0x7   :  { %1338 = vmatpush1.bf16.msra.mxu0 %v2624_v4  ;;  %1050 = vmatprep.subr.bf16.mxu1 %v2846_v0  ;;  %v2655_v19 = vld [vmem:[%s3544_s0 + $0x4] ss:$16 sps:$4 sm:$0xff]   ;;  %v2639_v20 = vld [vmem:[%s3543_s1 + $0x48] sm:$0xff]   ;;  %v2643_v25 = vld [vmem:[%s3543_s1 + $0x58] sm:$0xff]  }
   0x8   :  { %1339 = vmatprep.subr.bf16.mxu0 %v2846_v0  ;;  %v2658_v21 = vld [vmem:[%s3544_s0 + $0xc] ss:$16 sps:$4 sm:$0xff]   ;;  %1078 = vmatprep.mubr.bf16.mxu1 %v2655_v19  ;;  %v2641_v23 = vld [vmem:[%s3543_s1 + $0x50] sm:$0xff]   ;;  %v2645_v27 = vld [vmem:[%s3543_s1 + $0x60] sm:$0xff]  }
   0x9   :  { %v2640_v22 = vld [vmem:[%s3543_s1 + $0xc8] sm:$0xff]   ;;  %1367 = vmatprep.mubr.bf16.mxu0 %v2658_v21  ;;  %v2642_v24 = vld [vmem:[%s3543_s1 + $0xd0] sm:$0xff]   ;;  %v2644_v26 = vld [vmem:[%s3543_s1 + $0xd8] sm:$0xff]  }
   0xa   :  { %1051 = vmatpush1.bf16.msra.mxu1 %v2625_v5  ;;  %v2646_v28 = vld [vmem:[%s3543_s1 + $0xe0] sm:$0xff]   ;;  %v2647_v29 = vld [vmem:[%s3543_s1 + $0x68] sm:$0xff]   ;;  %v2649_v31 = vld [vmem:[%s3543_s1 + $0x70] sm:$0xff]  }
   0xb   :  { %1340 = vmatpush1.bf16.msra.mxu0 %v2626_v6  ;;  %1052 = vmatprep.subr.bf16.mxu1 %v2846_v0  ;;  %v2648_v30 = vld [vmem:[%s3543_s1 + $0xe8] sm:$0xff]   ;;  %v2650_v32 = vld [vmem:[%s3543_s1 + $0xf0] sm:$0xff]   ;;  %v2651_v33 = vld [vmem:[%s3543_s1 + $0x78] sm:$0xff]  }
   0xc   :  { %1341 = vmatprep.subr.bf16.mxu0 %v2846_v0  ;;  %v2652_v34 = vld [vmem:[%s3543_s1 + $0xf8] sm:$0xff]   ;;  %v2653_v35 = vld [vmem:[%s3544_s0] ss:$16 sps:$4 sm:$0xff]   ;;  %v2659_v37 = vld [vmem:[%s3544_s0 + $0x24] ss:$16 sps:$4 sm:$0xff]  }
   0xd   :  { %v2656_v36 = vld [vmem:[%s3544_s0 + $0x8] ss:$16 sps:$4 sm:$0xff]   ;;  %v2661_v38 = vld [vmem:[%s3544_s0 + $0x2c] ss:$16 sps:$4 sm:$0xff]   ;;  %v2663_v39 = vld [vmem:[%s3544_s0 + $0x20] ss:$16 sps:$4 sm:$0xff]  }
   0xe   :  { %1053 = vmatpush1.bf16.msra.mxu1 %v2627_v7  ;;  %v2664_v40 = vld [vmem:[%s3544_s0 + $0x28] ss:$16 sps:$4 sm:$0xff]   ;;  %v2665_v41 = vld [vmem:[%s3544_s0 + $0x44] ss:$16 sps:$4 sm:$0xff]   ;;  %v2667_v42 = vld [vmem:[%s3544_s0 + $0x4c] ss:$16 sps:$4 sm:$0xff]  }
   0xf   :  { %1342 = vmatpush1.bf16.msra.mxu0 %v2628_v8  ;;  %1054 = vmatprep.subr.bf16.mxu1 %v2846_v0  ;;  %v2669_v43 = vld [vmem:[%s3544_s0 + $0x40] ss:$16 sps:$4 sm:$0xff]   ;;  %v2670_v44 = vld [vmem:[%s3544_s0 + $0x48] ss:$16 sps:$4 sm:$0xff]   ;;  %v2671_v45 = vld [vmem:[%s3544_s0 + $0x64] ss:$16 sps:$4 sm:$0xff]  }
  0x10   :  { %1343 = vmatprep.subr.bf16.mxu0 %v2846_v0  ;;  %v2673_v46 = vld [vmem:[%s3544_s0 + $0x6c] ss:$16 sps:$4 sm:$0xff]   ;;  %v2675_v47 = vld [vmem:[%s3544_s0 + $0x60] ss:$16 sps:$4 sm:$0xff]   ;;  %v2676_v48 = vld [vmem:[%s3544_s0 + $0x68] ss:$16 sps:$4 sm:$0xff]  }
  0x11   :  { %v2677_v49 = vld [vmem:[%s3544_s0 + $0x84] ss:$16 sps:$4 sm:$0xff]   ;;  %v2679_v50 = vld [vmem:[%s3544_s0 + $0x8c] ss:$16 sps:$4 sm:$0xff]   ;;  %v2681_v51 = vld [vmem:[%s3544_s0 + $0x80] ss:$16 sps:$4 sm:$0xff]  }
  0x12   :  { %1055 = vmatpush1.bf16.msra.mxu1 %v2629_v9  ;;  %v2682_v52 = vld [vmem:[%s3544_s0 + $0x88] ss:$16 sps:$4 sm:$0xff]   ;;  %v2683_v53 = vld [vmem:[%s3544_s0 + $0xa4] ss:$16 sps:$4 sm:$0xff]   ;;  %v2685_v54 = vld [vmem:[%s3544_s0 + $0xac] ss:$16 sps:$4 sm:$0xff]  }
  0x13   :  { %1344 = vmatpush1.bf16.msra.mxu0 %v2630_v10  ;;  %1056 = vmatprep.subr.bf16.mxu1 %v2846_v0  ;;  %v2687_v55 = vld [vmem:[%s3544_s0 + $0xa0] ss:$16 sps:$4 sm:$0xff]   ;;  %v2688_v56 = vld [vmem:[%s3544_s0 + $0xa8] ss:$16 sps:$4 sm:$0xff]   ;;  %v2689_v57 = vld [vmem:[%s3544_s0 + $0xc4] ss:$16 sps:$4 sm:$0xff]  }
  0x14   :  { %1345 = vmatprep.subr.bf16.mxu0 %v2846_v0  ;;  %v2691_v58 = vld [vmem:[%s3544_s0 + $0xcc] ss:$16 sps:$4 sm:$0xff]   ;;  %v2693_v59 = vld [vmem:[%s3544_s0 + $0xc0] ss:$16 sps:$4 sm:$0xff]   ;;  %v2694_v60 = vld [vmem:[%s3544_s0 + $0xc8] ss:$16 sps:$4 sm:$0xff]  }
  0x15   :  { %v2695_v61 = vld [vmem:[%s3544_s0 + $0xe4] ss:$16 sps:$4 sm:$0xff]   ;;  %v2697_v62 = vld [vmem:[%s3544_s0 + $0xec] ss:$16 sps:$4 sm:$0xff]   ;;  %v2699_v63 = vld [vmem:[%s3544_s0 + $0xe0] ss:$16 sps:$4 sm:$0xff]  }
  0x16   :  { %1057 = vmatpush1.bf16.msra.mxu1 %v2631_v11  ;;  %v2701_v1 = vld [vmem:[%s3544_s0 + $0x104] ss:$16 sps:$4 sm:$0xff]   ;;  %v2703_v2 = vld [vmem:[%s3544_s0 + $0x10c] ss:$16 sps:$4 sm:$0xff]   ;;  %v2705_v3 = vld [vmem:[%s3544_s0 + $0x100] ss:$16 sps:$4 sm:$0xff]  }
  0x17   :  { %1346 = vmatpush1.bf16.msra.mxu0 %v2632_v12  ;;  %1058 = vmatprep.subr.bf16.mxu1 %v2846_v0  ;;  %v2706_v4 = vld [vmem:[%s3544_s0 + $0x108] ss:$16 sps:$4 sm:$0xff]   ;;  %v2707_v5 = vld [vmem:[%s3544_s0 + $0x124] ss:$16 sps:$4 sm:$0xff]   ;;  %v2709_v6 = vld [vmem:[%s3544_s0 + $0x12c] ss:$16 sps:$4 sm:$0xff]  }
  0x18   :  { %1347 = vmatprep.subr.bf16.mxu0 %v2846_v0  ;;  %v2711_v7 = vld [vmem:[%s3544_s0 + $0x120] ss:$16 sps:$4 sm:$0xff]   ;;  %v2712_v8 = vld [vmem:[%s3544_s0 + $0x128] ss:$16 sps:$4 sm:$0xff]   ;;  %v2713_v9 = vld [vmem:[%s3544_s0 + $0x144] ss:$16 sps:$4 sm:$0xff]  }
  0x19   :  { %v2715_v10 = vld [vmem:[%s3544_s0 + $0x14c] ss:$16 sps:$4 sm:$0xff]   ;;  %v2717_v11 = vld [vmem:[%s3544_s0 + $0x140] ss:$16 sps:$4 sm:$0xff]   ;;  %v2718_v12 = vld [vmem:[%s3544_s0 + $0x148] ss:$16 sps:$4 sm:$0xff]  }
  0x1a   :  { %1059 = vmatpush1.bf16.msra.mxu1 %v2633_v13  ;;  %v2719_v13 = vld [vmem:[%s3544_s0 + $0x164] ss:$16 sps:$4 sm:$0xff]   ;;  %v2729_v19 = vld [vmem:[%s3544_s0 + $0x180] ss:$16 sps:$4 sm:$0xff]  }
  0x1b   :  { %1348 = vmatpush1.bf16.msra.mxu0 %v2634_v14  ;;  %1060 = vmatprep.subr.bf16.mxu1 %v2846_v0  ;;  %v2721_v14 = vld [vmem:[%s3544_s0 + $0x16c] ss:$16 sps:$4 sm:$0xff]   ;;  %v2731_v21 = vld [vmem:[%s3544_s0 + $0x1a4] ss:$16 sps:$4 sm:$0xff]  }
  0x1c   :  { %1349 = vmatprep.subr.bf16.mxu0 %v2846_v0 }
  0x1e   :  { %1061 = vmatpush1.bf16.msra.mxu1 %v2635_v15  ;;  %v2723_v15 = vld [vmem:[%s3544_s0 + $0x160] ss:$16 sps:$4 sm:$0xff]  }
  0x1f   :  { %1350 = vmatpush1.bf16.msra.mxu0 %v2636_v16  ;;  %1062 = vmatprep.subr.bf16.mxu1 %v2846_v0  ;;  %v2724_v16 = vld [vmem:[%s3544_s0 + $0x168] ss:$16 sps:$4 sm:$0xff]  }
  0x20   :  { %1351 = vmatprep.subr.bf16.mxu0 %v2846_v0 }
  0x22   :  { %1063 = vmatpush1.bf16.msra.mxu1 %v2637_v17  ;;  %v2725_v17 = vld [vmem:[%s3544_s0 + $0x184] ss:$16 sps:$4 sm:$0xff]  }
  0x23   :  { %1352 = vmatpush1.bf16.msra.mxu0 %v2638_v18  ;;  %1064 = vmatprep.subr.bf16.mxu1 %v2846_v0  ;;  %v2727_v18 = vld [vmem:[%s3544_s0 + $0x18c] ss:$16 sps:$4 sm:$0xff]  }
  0x24   :  { %1353 = vmatprep.subr.bf16.mxu0 %v2846_v0 }
  0x26   :  { %1065 = vmatpush1.bf16.msra.mxu1 %v2639_v20  ;;  %v2730_v20 = vld [vmem:[%s3544_s0 + $0x188] ss:$16 sps:$4 sm:$0xff]  }
  0x27   :  { %1354 = vmatpush1.bf16.msra.mxu0 %v2640_v22  ;;  %1066 = vmatprep.subr.bf16.mxu1 %v2846_v0  ;;  %v2733_v22 = vld [vmem:[%s3544_s0 + $0x1ac] ss:$16 sps:$4 sm:$0xff]  }
  0x28   :  { %1355 = vmatprep.subr.bf16.mxu0 %v2846_v0 }
  0x2a   :  { %1067 = vmatpush1.bf16.msra.mxu1 %v2641_v23  ;;  %v2735_v23 = vld [vmem:[%s3544_s0 + $0x1a0] ss:$16 sps:$4 sm:$0xff]  }
  0x2b   :  { %1356 = vmatpush1.bf16.msra.mxu0 %v2642_v24  ;;  %1068 = vmatprep.subr.bf16.mxu1 %v2846_v0  ;;  %v2736_v24 = vld [vmem:[%s3544_s0 + $0x1a8] ss:$16 sps:$4 sm:$0xff]  }
  0x2c   :  { %1357 = vmatprep.subr.bf16.mxu0 %v2846_v0 }
  0x2e   :  { %1069 = vmatpush1.bf16.msra.mxu1 %v2643_v25  ;;  %v2737_v25 = vld [vmem:[%s3544_s0 + $0x1c4] ss:$16 sps:$4 sm:$0xff]  }
  0x2f   :  { %1358 = vmatpush1.bf16.msra.mxu0 %v2644_v26  ;;  %1070 = vmatprep.subr.bf16.mxu1 %v2846_v0  ;;  %v2739_v26 = vld [vmem:[%s3544_s0 + $0x1cc] ss:$16 sps:$4 sm:$0xff]  }
  0x30   :  { %1359 = vmatprep.subr.bf16.mxu0 %v2846_v0 }
  0x32   :  { %1071 = vmatpush1.bf16.msra.mxu1 %v2645_v27  ;;  %v2741_v27 = vld [vmem:[%s3544_s0 + $0x1c0] ss:$16 sps:$4 sm:$0xff]  }
  0x33   :  { %1360 = vmatpush1.bf16.msra.mxu0 %v2646_v28  ;;  %1072 = vmatprep.subr.bf16.mxu1 %v2846_v0  ;;  %v2742_v28 = vld [vmem:[%s3544_s0 + $0x1c8] ss:$16 sps:$4 sm:$0xff]  }
  0x34   :  { %1361 = vmatprep.subr.bf16.mxu0 %v2846_v0 }
  0x36   :  { %1073 = vmatpush1.bf16.msra.mxu1 %v2647_v29  ;;  %v2743_v29 = vld [vmem:[%s3544_s0 + $0x1e4] ss:$16 sps:$4 sm:$0xff]  }
  0x37   :  { %1362 = vmatpush1.bf16.msra.mxu0 %v2648_v30  ;;  %1074 = vmatprep.subr.bf16.mxu1 %v2846_v0  ;;  %v2745_v30 = vld [vmem:[%s3544_s0 + $0x1ec] ss:$16 sps:$4 sm:$0xff]  }
  0x38   :  { %1363 = vmatprep.subr.bf16.mxu0 %v2846_v0 }
  0x3a   :  { %1075 = vmatpush1.bf16.msra.mxu1 %v2649_v31  ;;  %v2747_v31 = vld [vmem:[%s3544_s0 + $0x1e0] ss:$16 sps:$4 sm:$0xff]  }
  0x3b   :  { %1364 = vmatpush1.bf16.msra.mxu0 %v2650_v32  ;;  %1076 = vmatprep.subr.bf16.mxu1 %v2846_v0  ;;  %v2748_v32 = vld [vmem:[%s3544_s0 + $0x1e8] ss:$16 sps:$4 sm:$0xff]  }
  0x3c   :  { %1365 = vmatprep.subr.bf16.mxu0 %v2846_v0  ;;  %v2700_v0 = vld [vmem:[%s3544_s0 + $0xe8] ss:$16 sps:$4 sm:$0xff]  }
  0x3e   :  { %1077 = vmatpush1.bf16.msra.mxu1 %v2651_v33  ;;  %v2749_v33 = vld [vmem:[%s3544_s0 + $0x204] ss:$16 sps:$4 sm:$0xff]  }
  0x3f   :  { %1366 = vmatpush1.bf16.msra.mxu0 %v2652_v34  ;;  %v2751_v34 = vld [vmem:[%s3544_s0 + $0x20c] ss:$16 sps:$4 sm:$0xff]  }
  0x41   :  { %1079 = vmatmul.mubr.bf16.vlgmr.msra.gmra.mrb[0].mxu1 %v2653_v35  ;;  %v2753_v35 = vld [vmem:[%s3544_s0 + $0x200] ss:$16 sps:$4 sm:$0xff]  }
  0x42   :  { %1368 = vmatmul.mubr.bf16.vlgmr.msra.gmra.mrb[0].mxu0 %v2656_v36  ;;  %1086 = vmatprep.mubr.bf16.mxu1 %v2659_v37  ;;  %v2754_v36 = vld [vmem:[%s3544_s0 + $0x208] ss:$16 sps:$4 sm:$0xff]   ;;  %v2755_v37 = vld [vmem:[%s3544_s0 + $0x224] ss:$16 sps:$4 sm:$0xff]  }
  0x43   :  { %1375 = vmatprep.mubr.bf16.mxu0 %v2661_v38  ;;  %v2757_v38 = vld [vmem:[%s3544_s0 + $0x22c] ss:$16 sps:$4 sm:$0xff]  }
  0x49   :  { %1087 = vmatmul.mubr.bf16.gmra.mrb[4].mxu1 %v2663_v39  ;;  %v2759_v39 = vld [vmem:[%s3544_s0 + $0x220] ss:$16 sps:$4 sm:$0xff]  }
  0x4a   :  { %1376 = vmatmul.mubr.bf16.gmra.mrb[4].mxu0 %v2664_v40  ;;  %1094 = vmatprep.mubr.bf16.mxu1 %v2665_v41  ;;  %v2760_v40 = vld [vmem:[%s3544_s0 + $0x228] ss:$16 sps:$4 sm:$0xff]   ;;  %v2761_v41 = vld [vmem:[%s3544_s0 + $0x244] ss:$16 sps:$4 sm:$0xff]  }
  0x4b   :  { %1383 = vmatprep.mubr.bf16.mxu0 %v2667_v42  ;;  %v2763_v42 = vld [vmem:[%s3544_s0 + $0x24c] ss:$16 sps:$4 sm:$0xff]  }
  0x51   :  { %1095 = vmatmul.mubr.bf16.gmra.mrb[8].mxu1 %v2669_v43  ;;  %v2765_v43 = vld [vmem:[%s3544_s0 + $0x240] ss:$16 sps:$4 sm:$0xff]  }
  0x52   :  { %1384 = vmatmul.mubr.bf16.gmra.mrb[8].mxu0 %v2670_v44  ;;  %1102 = vmatprep.mubr.bf16.mxu1 %v2671_v45  ;;  %v2766_v44 = vld [vmem:[%s3544_s0 + $0x248] ss:$16 sps:$4 sm:$0xff]   ;;  %v2767_v45 = vld [vmem:[%s3544_s0 + $0x264] ss:$16 sps:$4 sm:$0xff]  }
  0x53   :  { %1391 = vmatprep.mubr.bf16.mxu0 %v2673_v46  ;;  %v2769_v46 = vld [vmem:[%s3544_s0 + $0x26c] ss:$16 sps:$4 sm:$0xff]  }
  0x59   :  { %1103 = vmatmul.mubr.bf16.gmra.mrb[12].mxu1 %v2675_v47  ;;  %v2771_v47 = vld [vmem:[%s3544_s0 + $0x260] ss:$16 sps:$4 sm:$0xff]  }
  0x5a   :  { %1392 = vmatmul.mubr.bf16.gmra.mrb[12].mxu0 %v2676_v48  ;;  %1110 = vmatprep.mubr.bf16.mxu1 %v2677_v49  ;;  %v2772_v48 = vld [vmem:[%s3544_s0 + $0x268] ss:$16 sps:$4 sm:$0xff]   ;;  %v2773_v49 = vld [vmem:[%s3544_s0 + $0x284] ss:$16 sps:$4 sm:$0xff]  }
  0x5b   :  { %1399 = vmatprep.mubr.bf16.mxu0 %v2679_v50  ;;  %v2775_v50 = vld [vmem:[%s3544_s0 + $0x28c] ss:$16 sps:$4 sm:$0xff]  }
  0x61   :  { %1111 = vmatmul.mubr.bf16.gmra.mrb[16].mxu1 %v2681_v51  ;;  %v2777_v51 = vld [vmem:[%s3544_s0 + $0x280] ss:$16 sps:$4 sm:$0xff]  }
  0x62   :  { %1400 = vmatmul.mubr.bf16.gmra.mrb[16].mxu0 %v2682_v52  ;;  %1118 = vmatprep.mubr.bf16.mxu1 %v2683_v53  ;;  %v2778_v52 = vld [vmem:[%s3544_s0 + $0x288] ss:$16 sps:$4 sm:$0xff]   ;;  %v2779_v53 = vld [vmem:[%s3544_s0 + $0x2a4] ss:$16 sps:$4 sm:$0xff]  }
  0x63   :  { %1407 = vmatprep.mubr.bf16.mxu0 %v2685_v54  ;;  %v2781_v54 = vld [vmem:[%s3544_s0 + $0x2ac] ss:$16 sps:$4 sm:$0xff]  }
  0x69   :  { %1119 = vmatmul.mubr.bf16.gmra.mrb[20].mxu1 %v2687_v55  ;;  %v2783_v55 = vld [vmem:[%s3544_s0 + $0x2a0] ss:$16 sps:$4 sm:$0xff]  }
  0x6a   :  { %1408 = vmatmul.mubr.bf16.gmra.mrb[20].mxu0 %v2688_v56  ;;  %1126 = vmatprep.mubr.bf16.mxu1 %v2689_v57  ;;  %v2784_v56 = vld [vmem:[%s3544_s0 + $0x2a8] ss:$16 sps:$4 sm:$0xff]   ;;  %v2785_v57 = vld [vmem:[%s3544_s0 + $0x2c4] ss:$16 sps:$4 sm:$0xff]  }
  0x6b   :  { %1415 = vmatprep.mubr.bf16.mxu0 %v2691_v58  ;;  %v2787_v58 = vld [vmem:[%s3544_s0 + $0x2cc] ss:$16 sps:$4 sm:$0xff]  }
  0x71   :  { %1127 = vmatmul.mubr.bf16.gmra.mrb[24].mxu1 %v2693_v59  ;;  %v2789_v59 = vld [vmem:[%s3544_s0 + $0x2c0] ss:$16 sps:$4 sm:$0xff]  }
  0x72   :  { %1416 = vmatmul.mubr.bf16.gmra.mrb[24].mxu0 %v2694_v60  ;;  %1134 = vmatprep.mubr.bf16.mxu1 %v2695_v61  ;;  %v2790_v60 = vld [vmem:[%s3544_s0 + $0x2c8] ss:$16 sps:$4 sm:$0xff]   ;;  %v2791_v61 = vld [vmem:[%s3544_s0 + $0x2e4] ss:$16 sps:$4 sm:$0xff]  }
  0x73   :  { %1423 = vmatprep.mubr.bf16.mxu0 %v2697_v62  ;;  %v2793_v62 = vld [vmem:[%s3544_s0 + $0x2ec] ss:$16 sps:$4 sm:$0xff]  }
  0x79   :  { %1135 = vmatmul.mubr.bf16.gmra.mrb[28].mxu1 %v2699_v63  ;;  %v2795_v63 = vld [vmem:[%s3544_s0 + $0x2e0] ss:$16 sps:$4 sm:$0xff]  }
  0x7a   :  { %1424 = vmatmul.mubr.bf16.gmra.mrb[28].mxu0 %v2700_v0  ;;  %1142 = vmatprep.mubr.bf16.mxu1 %v2701_v1  ;;  %v2796_v0 = vld [vmem:[%s3544_s0 + $0x2e8] ss:$16 sps:$4 sm:$0xff]   ;;  %v2797_v1 = vld [vmem:[%s3544_s0 + $0x304] ss:$16 sps:$4 sm:$0xff]  }
  0x7b   :  { %1431 = vmatprep.mubr.bf16.mxu0 %v2703_v2  ;;  %v2799_v2 = vld [vmem:[%s3544_s0 + $0x30c] ss:$16 sps:$4 sm:$0xff]  }
  0x81   :  { %1143 = vmatmul.mubr.bf16.gmra.mrb[32].mxu1 %v2705_v3  ;;  %v2801_v3 = vld [vmem:[%s3544_s0 + $0x300] ss:$16 sps:$4 sm:$0xff]  }
  0x82   :  { %1432 = vmatmul.mubr.bf16.gmra.mrb[32].mxu0 %v2706_v4  ;;  %1150 = vmatprep.mubr.bf16.mxu1 %v2707_v5  ;;  %v2802_v4 = vld [vmem:[%s3544_s0 + $0x308] ss:$16 sps:$4 sm:$0xff]   ;;  %v2803_v5 = vld [vmem:[%s3544_s0 + $0x324] ss:$16 sps:$4 sm:$0xff]  }
  0x83   :  { %1439 = vmatprep.mubr.bf16.mxu0 %v2709_v6  ;;  %v2805_v6 = vld [vmem:[%s3544_s0 + $0x32c] ss:$16 sps:$4 sm:$0xff]  }
  0x89   :  { %1151 = vmatmul.mubr.bf16.gmra.mrb[36].mxu1 %v2711_v7  ;;  %v2807_v7 = vld [vmem:[%s3544_s0 + $0x320] ss:$16 sps:$4 sm:$0xff]  }
  0x8a   :  { %1440 = vmatmul.mubr.bf16.gmra.mrb[36].mxu0 %v2712_v8  ;;  %1158 = vmatprep.mubr.bf16.mxu1 %v2713_v9  ;;  %v2808_v8 = vld [vmem:[%s3544_s0 + $0x328] ss:$16 sps:$4 sm:$0xff]   ;;  %v2809_v9 = vld [vmem:[%s3544_s0 + $0x344] ss:$16 sps:$4 sm:$0xff]  }
  0x8b   :  { %1447 = vmatprep.mubr.bf16.mxu0 %v2715_v10  ;;  %v2811_v10 = vld [vmem:[%s3544_s0 + $0x34c] ss:$16 sps:$4 sm:$0xff]  }
  0x91   :  { %1159 = vmatmul.mubr.bf16.gmra.mrb[40].mxu1 %v2717_v11  ;;  %v2813_v11 = vld [vmem:[%s3544_s0 + $0x340] ss:$16 sps:$4 sm:$0xff]  }
  0x92   :  { %1448 = vmatmul.mubr.bf16.gmra.mrb[40].mxu0 %v2718_v12  ;;  %1166 = vmatprep.mubr.bf16.mxu1 %v2719_v13  ;;  %v2814_v12 = vld [vmem:[%s3544_s0 + $0x348] ss:$16 sps:$4 sm:$0xff]   ;;  %v2815_v13 = vld [vmem:[%s3544_s0 + $0x364] ss:$16 sps:$4 sm:$0xff]  }
  0x93   :  { %1455 = vmatprep.mubr.bf16.mxu0 %v2721_v14  ;;  %v2817_v14 = vld [vmem:[%s3544_s0 + $0x36c] ss:$16 sps:$4 sm:$0xff]  }
  0x99   :  { %1167 = vmatmul.mubr.bf16.gmra.mrb[44].mxu1 %v2723_v15  ;;  %v3328_v15 = vld [vmem:[%s3545_s2] ss:$0 sm:$0xff] }
  0x9a   :  { %1456 = vmatmul.mubr.bf16.gmra.mrb[44].mxu0 %v2724_v16  ;;  %1174 = vmatprep.mubr.bf16.mxu1 %v2725_v17 }
  0x9b   :  { %1463 = vmatprep.mubr.bf16.mxu0 %v2727_v18 }
  0xa1   :  { %1175 = vmatmul.mubr.bf16.gmra.mrb[48].mxu1 %v2729_v19 }
  0xa2   :  { %1464 = vmatmul.mubr.bf16.gmra.mrb[48].mxu0 %v2730_v20  ;;  %1182 = vmatprep.mubr.bf16.mxu1 %v2731_v21  ;;  %v2819_v20 = vld [vmem:[%s3544_s0 + $0x360] ss:$16 sps:$4 sm:$0xff]  }
  0xa3   :  { %1471 = vmatprep.mubr.bf16.mxu0 %v2733_v22 }
  0xa9   :  { %1183 = vmatmul.mubr.bf16.gmra.mrb[52].mxu1 %v2735_v23  ;;  %v2820_v23 = vld [vmem:[%s3544_s0 + $0x368] ss:$16 sps:$4 sm:$0xff]  }
  0xaa   :  { %1472 = vmatmul.mubr.bf16.gmra.mrb[52].mxu0 %v2736_v24  ;;  %1190 = vmatprep.mubr.bf16.mxu1 %v2737_v25  ;;  %v2821_v24 = vld [vmem:[%s3544_s0 + $0x384] ss:$16 sps:$4 sm:$0xff]  }
  0xab   :  { %1479 = vmatprep.mubr.bf16.mxu0 %v2739_v26 }
  0xb1   :  { %1191 = vmatmul.mubr.bf16.gmra.mrb[56].mxu1 %v2741_v27 }
  0xb2   :  { %1480 = vmatmul.mubr.bf16.gmra.mrb[56].mxu0 %v2742_v28  ;;  %1198 = vmatprep.mubr.bf16.mxu1 %v2743_v29  ;;  %v2823_v29 = vld [vmem:[%s3544_s0 + $0x38c] ss:$16 sps:$4 sm:$0xff]  }
  0xb3   :  { %1487 = vmatprep.mubr.bf16.mxu0 %v2745_v30 }
  0xb9   :  { %1199 = vmatmul.mubr.bf16.gmra.mrb[60].mxu1 %v2747_v31 }
  0xba   :  { %1488 = vmatmul.mubr.bf16.gmra.mrb[60].mxu0 %v2748_v32  ;;  %1206 = vmatprep.mubr.bf16.mxu1 %v2749_v33 }
  0xbb   :  { %1495 = vmatprep.mubr.bf16.mxu0 %v2751_v34 }
  0xc1   :  { %1207 = vmatmul.mubr.bf16.gmra.mrb[64].mxu1 %v2753_v35 }
  0xc2   :  { %1496 = vmatmul.mubr.bf16.gmra.mrb[64].mxu0 %v2754_v36  ;;  %1214 = vmatprep.mubr.bf16.mxu1 %v2755_v37 }
  0xc3   :  { %1503 = vmatprep.mubr.bf16.mxu0 %v2757_v38 }
  0xc9   :  { %1215 = vmatmul.mubr.bf16.gmra.mrb[68].mxu1 %v2759_v39  ;;  %v2825_v39 = vld [vmem:[%s3544_s0 + $0x380] ss:$16 sps:$4 sm:$0xff]  }
  0xca   :  { %1504 = vmatmul.mubr.bf16.gmra.mrb[68].mxu0 %v2760_v40  ;;  %1222 = vmatprep.mubr.bf16.mxu1 %v2761_v41 }
  0xcb   :  { %1511 = vmatprep.mubr.bf16.mxu0 %v2763_v42  ;;  %v2826_v42 = vld [vmem:[%s3544_s0 + $0x388] ss:$16 sps:$4 sm:$0xff]  }
  0xd1   :  { %1223 = vmatmul.mubr.bf16.gmra.mrb[72].mxu1 %v2765_v43  ;;  %v2827_v43 = vld [vmem:[%s3544_s0 + $0x3a4] ss:$16 sps:$4 sm:$0xff]  }
  0xd2   :  { %1512 = vmatmul.mubr.bf16.gmra.mrb[72].mxu0 %v2766_v44  ;;  %1230 = vmatprep.mubr.bf16.mxu1 %v2767_v45 }
  0xd3   :  { %1519 = vmatprep.mubr.bf16.mxu0 %v2769_v46 }
  0xd9   :  { %1231 = vmatmul.mubr.bf16.gmra.mrb[76].mxu1 %v2771_v47 }
  0xda   :  { %1520 = vmatmul.mubr.bf16.gmra.mrb[76].mxu0 %v2772_v48  ;;  %1238 = vmatprep.mubr.bf16.mxu1 %v2773_v49  ;;  %v2829_v48 = vld [vmem:[%s3544_s0 + $0x3ac] ss:$16 sps:$4 sm:$0xff]  }
  0xdb   :  { %1527 = vmatprep.mubr.bf16.mxu0 %v2775_v50 }
  0xe1   :  { %1239 = vmatmul.mubr.bf16.gmra.mrb[80].mxu1 %v2777_v51 }
  0xe2   :  { %1528 = vmatmul.mubr.bf16.gmra.mrb[80].mxu0 %v2778_v52  ;;  %1246 = vmatprep.mubr.bf16.mxu1 %v2779_v53 }
  0xe3   :  { %1535 = vmatprep.mubr.bf16.mxu0 %v2781_v54 }
  0xe9   :  { %1247 = vmatmul.mubr.bf16.gmra.mrb[84].mxu1 %v2783_v55 }
  0xea   :  { %1536 = vmatmul.mubr.bf16.gmra.mrb[84].mxu0 %v2784_v56  ;;  %1254 = vmatprep.mubr.bf16.mxu1 %v2785_v57 }
  0xeb   :  { %1543 = vmatprep.mubr.bf16.mxu0 %v2787_v58  ;;  %v2831_v58 = vld [vmem:[%s3544_s0 + $0x3a0] ss:$16 sps:$4 sm:$0xff]  }
  0xf1   :  { %1255 = vmatmul.mubr.bf16.gmra.mrb[88].mxu1 %v2789_v59 }
  0xf2   :  { %1544 = vmatmul.mubr.bf16.gmra.mrb[88].mxu0 %v2790_v60  ;;  %1262 = vmatprep.mubr.bf16.mxu1 %v2791_v61  ;;  %v2832_v61 = vld [vmem:[%s3544_s0 + $0x3a8] ss:$16 sps:$4 sm:$0xff]  }
  0xf3   :  { %1551 = vmatprep.mubr.bf16.mxu0 %v2793_v62  ;;  %v2833_v62 = vld [vmem:[%s3544_s0 + $0x3c4] ss:$16 sps:$4 sm:$0xff]  }
  0xf9   :  { %1263 = vmatmul.mubr.bf16.gmra.mrb[92].mxu1 %v2795_v63 }
  0xfa   :  { %1552 = vmatmul.mubr.bf16.gmra.mrb[92].mxu0 %v2796_v0  ;;  %1270 = vmatprep.mubr.bf16.mxu1 %v2797_v1 }
  0xfb   :  { %1559 = vmatprep.mubr.bf16.mxu0 %v2799_v2 }
 0x101   :  { %1271 = vmatmul.mubr.bf16.gmra.mrb[96].mxu1 %v2801_v3  ;;  %v2835_v3 = vld [vmem:[%s3544_s0 + $0x3cc] ss:$16 sps:$4 sm:$0xff]  }
 0x102   :  { %1560 = vmatmul.mubr.bf16.gmra.mrb[96].mxu0 %v2802_v4  ;;  %1278 = vmatprep.mubr.bf16.mxu1 %v2803_v5 }
 0x103   :  { %1567 = vmatprep.mubr.bf16.mxu0 %v2805_v6 }
 0x109   :  { %1279 = vmatmul.mubr.bf16.gmra.mrb[100].mxu1 %v2807_v7 }
 0x10a   :  { %1568 = vmatmul.mubr.bf16.gmra.mrb[100].mxu0 %v2808_v8  ;;  %1286 = vmatprep.mubr.bf16.mxu1 %v2809_v9 }
 0x10b   :  { %1575 = vmatprep.mubr.bf16.mxu0 %v2811_v10 }
 0x111   :  { %1287 = vmatmul.mubr.bf16.gmra.mrb[104].mxu1 %v2813_v11 }
 0x112   :  { %1576 = vmatmul.mubr.bf16.gmra.mrb[104].mxu0 %v2814_v12  ;;  %1294 = vmatprep.mubr.bf16.mxu1 %v2815_v13  ;;  %v2837_v13 = vld [vmem:[%s3544_s0 + $0x3c0] ss:$16 sps:$4 sm:$0xff]  }
 0x113   :  { %1583 = vmatprep.mubr.bf16.mxu0 %v2817_v14 }
 0x114   :  { %v1080_v16 = vpop.f32.mrb[0].mxu1 }
 0x115   :  { %v1081_v17 = vadd.f32 %v3328_v15, %v1080_v16  ;;  %v1369_v18 = vpop.f32.mrb[0].mxu0  ;;  %v1082_v19 = vpop.f32.mrb[1].mxu1 }
 0x116   :  { %v1371_v21 = vpop.f32.mrb[1].mxu0  ;;  %v1083_v22 = vpop.f32.mrb[2].mxu1 }
 0x117   :  { %v1370_v25 = vadd.f32 %v1369_v18, %v1081_v17  ;;  %v1084_v26 = vadd.f32 %v3328_v15, %v1083_v22  ;;  %v1372_v27 = vpop.f32.mrb[2].mxu0  ;;  %v1085_v28 = vpop.f32.mrb[3].mxu1  ;;  %v2838_v17 = vld [vmem:[%s3544_s0 + $0x3c8] ss:$16 sps:$4 sm:$0xff]   ;;  %v2839_v18 = vld [vmem:[%s3544_s0 + $0x3e4] ss:$16 sps:$4 sm:$0xff]  }
 0x118   :  { %v1374_v30 = vpop.f32.mrb[3].mxu0 }
 0x119   :  { %v1373_v31 = vadd.f32 %v1372_v27, %v1084_v26  ;;  %1295 = vmatmul.mubr.bf16.gmra.mrb[108].mxu1 %v2819_v20  ;;  %v1624_v32 = vmax.f32 %v1370_v25, 0.0 }
 0x11a   :  { %1584 = vmatmul.mubr.bf16.gmra.mrb[108].mxu0 %v2820_v23  ;;  %1302 = vmatprep.mubr.bf16.mxu1 %v2821_v24  ;;  %v2841_v23 = vld [vmem:[%s3544_s0 + $0x3ec] ss:$16 sps:$4 sm:$0xff]  }
 0x11b   :  { %v1625_v33 = vmax.f32 %v1373_v31, 0.0  ;;  %1591 = vmatprep.mubr.bf16.mxu0 %v2823_v29 }
 0x11c   :  { %v1088_v34 = vpop.f32.mrb[4].mxu1 }
 0x11d   :  { %v2304_v35 = vpack.c.bf16 %v1625_v33, %v1624_v32  ;;  %v1089_v36 = vadd.f32 %v3328_v15, %v1088_v34  ;;  %v1377_v37 = vpop.f32.mrb[4].mxu0  ;;  %v1090_v38 = vpop.f32.mrb[5].mxu1  ;;  %v2843_v33 = vld [vmem:[%s3544_s0 + $0x3e0] ss:$16 sps:$4 sm:$0xff]  }
 0x11e   :  { %v1379_v40 = vpop.f32.mrb[5].mxu0  ;;  %v1091_v41 = vpop.f32.mrb[6].mxu1 }
 0x11f   :  { %2305 = vst [vmem:[%s3546_s3] sm:$0xff] %v2304_v35   ;;  %v1378_v44 = vadd.f32 %v1377_v37, %v1089_v36  ;;  %v1092_v45 = vadd.f32 %v3328_v15, %v1091_v41  ;;  %v1380_v46 = vpop.f32.mrb[6].mxu0  ;;  %v1093_v47 = vpop.f32.mrb[7].mxu1  ;;  %v2844_v36 = vld [vmem:[%s3544_s0 + $0x3e8] ss:$16 sps:$4 sm:$0xff]  }
 0x120   :  { %v1382_v49 = vpop.f32.mrb[7].mxu0 }
 0x121   :  { %v1381_v50 = vadd.f32 %v1380_v46, %v1092_v45  ;;  %1303 = vmatmul.mubr.bf16.gmra.mrb[112].mxu1 %v2825_v39  ;;  %v1626_v51 = vmax.f32 %v1378_v44, 0.0 }
 0x122   :  { %1592 = vmatmul.mubr.bf16.gmra.mrb[112].mxu0 %v2826_v42  ;;  %1310 = vmatprep.mubr.bf16.mxu1 %v2827_v43 }
 0x123   :  { %v1627_v52 = vmax.f32 %v1381_v50, 0.0  ;;  %1599 = vmatprep.mubr.bf16.mxu0 %v2829_v48 }
 0x124   :  { %v1096_v53 = vpop.f32.mrb[8].mxu1 }
 0x125   :  { %v2309_v54 = vpack.c.bf16 %v1627_v52, %v1626_v51  ;;  %v1097_v55 = vadd.f32 %v3328_v15, %v1096_v53  ;;  %v1385_v56 = vpop.f32.mrb[8].mxu0  ;;  %v1098_v57 = vpop.f32.mrb[9].mxu1 }
 0x126   :  { %v1387_v59 = vpop.f32.mrb[9].mxu0  ;;  %v1099_v60 = vpop.f32.mrb[10].mxu1 }
 0x127   :  { %2461 = vst [vmem:[%s3546_s3 + $0x8] sm:$0xff] %v2309_v54   ;;  %v1386_v63 = vadd.f32 %v1385_v56, %v1097_v55  ;;  %v1100_v0 = vadd.f32 %v3328_v15, %v1099_v60  ;;  %v1388_v1 = vpop.f32.mrb[10].mxu0  ;;  %v1101_v2 = vpop.f32.mrb[11].mxu1 }
 0x128   :  { %v1390_v4 = vpop.f32.mrb[11].mxu0 }
 0x129   :  { %v1389_v5 = vadd.f32 %v1388_v1, %v1100_v0  ;;  %1311 = vmatmul.mubr.bf16.gmra.mrb[116].mxu1 %v2831_v58  ;;  %v1628_v6 = vmax.f32 %v1386_v63, 0.0 }
 0x12a   :  { %1600 = vmatmul.mubr.bf16.gmra.mrb[116].mxu0 %v2832_v61  ;;  %1318 = vmatprep.mubr.bf16.mxu1 %v2833_v62 }
 0x12b   :  { %v1629_v7 = vmax.f32 %v1389_v5, 0.0  ;;  %1607 = vmatprep.mubr.bf16.mxu0 %v2835_v3 }
 0x12c   :  { %v1104_v8 = vpop.f32.mrb[12].mxu1 }
 0x12d   :  { %v2314_v9 = vpack.c.bf16 %v1629_v7, %v1628_v6  ;;  %v1105_v10 = vadd.f32 %v3328_v15, %v1104_v8  ;;  %v1393_v11 = vpop.f32.mrb[12].mxu0  ;;  %v1106_v12 = vpop.f32.mrb[13].mxu1 }
 0x12e   :  { %v1395_v14 = vpop.f32.mrb[13].mxu0  ;;  %v1107_v16 = vpop.f32.mrb[14].mxu1 }
 0x12f   :  { %2462 = vst [vmem:[%s3546_s3 + $0x10] sm:$0xff] %v2314_v9   ;;  %v1394_v19 = vadd.f32 %v1393_v11, %v1105_v10  ;;  %v1108_v20 = vadd.f32 %v3328_v15, %v1107_v16  ;;  %v1396_v21 = vpop.f32.mrb[14].mxu0  ;;  %v1109_v22 = vpop.f32.mrb[15].mxu1 }
 0x130   :  { %v1398_v24 = vpop.f32.mrb[15].mxu0 }
 0x131   :  { %v1397_v25 = vadd.f32 %v1396_v21, %v1108_v20  ;;  %1319 = vmatmul.mubr.bf16.gmra.mrb[120].mxu1 %v2837_v13  ;;  %v1630_v26 = vmax.f32 %v1394_v19, 0.0 }
 0x132   :  { %1608 = vmatmul.mubr.bf16.gmra.mrb[120].mxu0 %v2838_v17  ;;  %1326 = vmatprep.mubr.bf16.mxu1 %v2839_v18 }
 0x133   :  { %v1631_v27 = vmax.f32 %v1397_v25, 0.0  ;;  %1615 = vmatprep.mubr.bf16.mxu0 %v2841_v23 }
 0x134   :  { %v1112_v28 = vpop.f32.mrb[16].mxu1 }
 0x135   :  { %v2319_v29 = vpack.c.bf16 %v1631_v27, %v1630_v26  ;;  %v1113_v30 = vadd.f32 %v3328_v15, %v1112_v28  ;;  %v1401_v31 = vpop.f32.mrb[16].mxu0  ;;  %v1114_v32 = vpop.f32.mrb[17].mxu1 }
 0x136   :  { %v1403_v34 = vpop.f32.mrb[17].mxu0  ;;  %v1115_v35 = vpop.f32.mrb[18].mxu1 }
 0x137   :  { %2463 = vst [vmem:[%s3546_s3 + $0x18] sm:$0xff] %v2319_v29   ;;  %v1402_v37 = vadd.f32 %v1401_v31, %v1113_v30  ;;  %v1116_v38 = vadd.f32 %v3328_v15, %v1115_v35  ;;  %v1404_v39 = vpop.f32.mrb[18].mxu0  ;;  %v1117_v40 = vpop.f32.mrb[19].mxu1 }
 0x138   :  { %v1406_v41 = vpop.f32.mrb[19].mxu0 }
 0x139   :  { %v1405_v42 = vadd.f32 %v1404_v39, %v1116_v38  ;;  %1327 = vmatmul.mubr.bf16.gmra.mrb[124].mxu1 %v2843_v33  ;;  %v1632_v43 = vmax.f32 %v1402_v37, 0.0 }
 0x13a   :  { %1616 = vmatmul.mubr.bf16.gmra.mrb[124].mxu0 %v2844_v36 }
 0x13b   :  { %v1633_v44 = vmax.f32 %v1405_v42, 0.0 }
 0x13c   :  { %v1120_v45 = vpop.f32.mrb[20].mxu1 }
 0x13d   :  { %v2324_v46 = vpack.c.bf16 %v1633_v44, %v1632_v43  ;;  %v1121_v47 = vadd.f32 %v3328_v15, %v1120_v45  ;;  %v1409_v48 = vpop.f32.mrb[20].mxu0  ;;  %v1122_v49 = vpop.f32.mrb[21].mxu1 }
 0x13e   :  { %v1411_v50 = vpop.f32.mrb[21].mxu0  ;;  %v1123_v51 = vpop.f32.mrb[22].mxu1 }
 0x13f   :  { %2464 = vst [vmem:[%s3546_s3 + $0x20] sm:$0xff] %v2324_v46   ;;  %v1410_v52 = vadd.f32 %v1409_v48, %v1121_v47  ;;  %v1124_v53 = vadd.f32 %v3328_v15, %v1123_v51  ;;  %v1412_v54 = vpop.f32.mrb[22].mxu0  ;;  %v1125_v55 = vpop.f32.mrb[23].mxu1 }
 0x140   :  { %v1414_v56 = vpop.f32.mrb[23].mxu0 }
 0x141   :  { %v1413_v57 = vadd.f32 %v1412_v54, %v1124_v53  ;;  %v1634_v58 = vmax.f32 %v1410_v52, 0.0 }
 0x143   :  { %v1635_v59 = vmax.f32 %v1413_v57, 0.0 }
 0x144   :  { %v1128_v60 = vpop.f32.mrb[24].mxu1 }
 0x145   :  { %v2329_v61 = vpack.c.bf16 %v1635_v59, %v1634_v58  ;;  %v1129_v62 = vadd.f32 %v3328_v15, %v1128_v60  ;;  %v1417_v63 = vpop.f32.mrb[24].mxu0  ;;  %v1130_v0 = vpop.f32.mrb[25].mxu1 }
 0x146   :  { %v1419_v1 = vpop.f32.mrb[25].mxu0  ;;  %v1131_v2 = vpop.f32.mrb[26].mxu1 }
 0x147   :  { %2465 = vst [vmem:[%s3546_s3 + $0x28] sm:$0xff] %v2329_v61   ;;  %v1418_v3 = vadd.f32 %v1417_v63, %v1129_v62  ;;  %v1132_v4 = vadd.f32 %v3328_v15, %v1131_v2  ;;  %v1420_v5 = vpop.f32.mrb[26].mxu0  ;;  %v1133_v6 = vpop.f32.mrb[27].mxu1 }
 0x148   :  { %v1422_v7 = vpop.f32.mrb[27].mxu0 }
 0x149   :  { %v1421_v8 = vadd.f32 %v1420_v5, %v1132_v4  ;;  %v1636_v9 = vmax.f32 %v1418_v3, 0.0 }
 0x14b   :  { %v1637_v10 = vmax.f32 %v1421_v8, 0.0 }
 0x14c   :  { %v1136_v11 = vpop.f32.mrb[28].mxu1 }
 0x14d   :  { %v2334_v12 = vpack.c.bf16 %v1637_v10, %v1636_v9  ;;  %v1137_v13 = vadd.f32 %v3328_v15, %v1136_v11  ;;  %v1425_v14 = vpop.f32.mrb[28].mxu0  ;;  %v1138_v16 = vpop.f32.mrb[29].mxu1 }
 0x14e   :  { %v1427_v17 = vpop.f32.mrb[29].mxu0  ;;  %v1139_v18 = vpop.f32.mrb[30].mxu1 }
 0x14f   :  { %2466 = vst [vmem:[%s3546_s3 + $0x30] sm:$0xff] %v2334_v12   ;;  %v1426_v19 = vadd.f32 %v1425_v14, %v1137_v13  ;;  %v1140_v20 = vadd.f32 %v3328_v15, %v1139_v18  ;;  %v1428_v21 = vpop.f32.mrb[30].mxu0  ;;  %v1141_v22 = vpop.f32.mrb[31].mxu1 }
 0x150   :  { %v1430_v23 = vpop.f32.mrb[31].mxu0 }
 0x151   :  { %v1429_v24 = vadd.f32 %v1428_v21, %v1140_v20  ;;  %v1638_v25 = vmax.f32 %v1426_v19, 0.0 }
 0x153   :  { %v1639_v26 = vmax.f32 %v1429_v24, 0.0 }
 0x154   :  { %v1144_v27 = vpop.f32.mrb[32].mxu1 }
 0x155   :  { %v2339_v28 = vpack.c.bf16 %v1639_v26, %v1638_v25  ;;  %v1145_v29 = vadd.f32 %v3328_v15, %v1144_v27  ;;  %v1433_v30 = vpop.f32.mrb[32].mxu0  ;;  %v1146_v31 = vpop.f32.mrb[33].mxu1 }
 0x156   :  { %v1435_v32 = vpop.f32.mrb[33].mxu0  ;;  %v1147_v33 = vpop.f32.mrb[34].mxu1 }
 0x157   :  { %2467 = vst [vmem:[%s3546_s3 + $0x38] sm:$0xff] %v2339_v28   ;;  %v1434_v34 = vadd.f32 %v1433_v30, %v1145_v29  ;;  %v1148_v35 = vadd.f32 %v3328_v15, %v1147_v33  ;;  %v1436_v36 = vpop.f32.mrb[34].mxu0  ;;  %v1149_v37 = vpop.f32.mrb[35].mxu1 }
 0x158   :  { %v1438_v38 = vpop.f32.mrb[35].mxu0 }
 0x159   :  { %v1437_v39 = vadd.f32 %v1436_v36, %v1148_v35  ;;  %v1640_v40 = vmax.f32 %v1434_v34, 0.0 }
 0x15b   :  { %v1641_v41 = vmax.f32 %v1437_v39, 0.0 }
 0x15c   :  { %v1152_v42 = vpop.f32.mrb[36].mxu1 }
 0x15d   :  { %v2344_v43 = vpack.c.bf16 %v1641_v41, %v1640_v40  ;;  %v1153_v44 = vadd.f32 %v3328_v15, %v1152_v42  ;;  %v1441_v45 = vpop.f32.mrb[36].mxu0  ;;  %v1154_v46 = vpop.f32.mrb[37].mxu1 }
 0x15e   :  { %v1443_v47 = vpop.f32.mrb[37].mxu0  ;;  %v1155_v48 = vpop.f32.mrb[38].mxu1 }
 0x15f   :  { %2468 = vst [vmem:[%s3546_s3 + $0x40] sm:$0xff] %v2344_v43   ;;  %v1442_v49 = vadd.f32 %v1441_v45, %v1153_v44  ;;  %v1156_v50 = vadd.f32 %v3328_v15, %v1155_v48  ;;  %v1444_v51 = vpop.f32.mrb[38].mxu0  ;;  %v1157_v52 = vpop.f32.mrb[39].mxu1 }
 0x160   :  { %v1446_v53 = vpop.f32.mrb[39].mxu0 }
 0x161   :  { %v1445_v54 = vadd.f32 %v1444_v51, %v1156_v50  ;;  %v1642_v55 = vmax.f32 %v1442_v49, 0.0 }
 0x163   :  { %v1643_v56 = vmax.f32 %v1445_v54, 0.0 }
 0x164   :  { %v1160_v57 = vpop.f32.mrb[40].mxu1 }
 0x165   :  { %v2349_v58 = vpack.c.bf16 %v1643_v56, %v1642_v55  ;;  %v1161_v59 = vadd.f32 %v3328_v15, %v1160_v57  ;;  %v1449_v60 = vpop.f32.mrb[40].mxu0  ;;  %v1162_v61 = vpop.f32.mrb[41].mxu1 }
 0x166   :  { %v1451_v62 = vpop.f32.mrb[41].mxu0  ;;  %v1163_v63 = vpop.f32.mrb[42].mxu1 }
 0x167   :  { %2469 = vst [vmem:[%s3546_s3 + $0x48] sm:$0xff] %v2349_v58   ;;  %v1450_v0 = vadd.f32 %v1449_v60, %v1161_v59  ;;  %v1164_v1 = vadd.f32 %v3328_v15, %v1163_v63  ;;  %v1452_v2 = vpop.f32.mrb[42].mxu0  ;;  %v1165_v3 = vpop.f32.mrb[43].mxu1 }
 0x168   :  { %v1454_v4 = vpop.f32.mrb[43].mxu0 }
 0x169   :  { %v1453_v5 = vadd.f32 %v1452_v2, %v1164_v1  ;;  %v1644_v6 = vmax.f32 %v1450_v0, 0.0 }
 0x16b   :  { %v1645_v7 = vmax.f32 %v1453_v5, 0.0 }
 0x16c   :  { %v1168_v8 = vpop.f32.mrb[44].mxu1 }
 0x16d   :  { %v2354_v9 = vpack.c.bf16 %v1645_v7, %v1644_v6  ;;  %v1169_v10 = vadd.f32 %v3328_v15, %v1168_v8  ;;  %v1457_v11 = vpop.f32.mrb[44].mxu0  ;;  %v1170_v12 = vpop.f32.mrb[45].mxu1 }
 0x16e   :  { %v1459_v13 = vpop.f32.mrb[45].mxu0  ;;  %v1171_v14 = vpop.f32.mrb[46].mxu1 }
 0x16f   :  { %2470 = vst [vmem:[%s3546_s3 + $0x50] sm:$0xff] %v2354_v9   ;;  %v1458_v16 = vadd.f32 %v1457_v11, %v1169_v10  ;;  %v1172_v17 = vadd.f32 %v3328_v15, %v1171_v14  ;;  %v1460_v18 = vpop.f32.mrb[46].mxu0  ;;  %v1173_v19 = vpop.f32.mrb[47].mxu1 }
 0x170   :  { %v1462_v20 = vpop.f32.mrb[47].mxu0 }
 0x171   :  { %v1461_v21 = vadd.f32 %v1460_v18, %v1172_v17  ;;  %v1646_v22 = vmax.f32 %v1458_v16, 0.0 }
 0x173   :  { %v1647_v23 = vmax.f32 %v1461_v21, 0.0 }
 0x174   :  { %v1176_v24 = vpop.f32.mrb[48].mxu1 }
 0x175   :  { %v2359_v25 = vpack.c.bf16 %v1647_v23, %v1646_v22  ;;  %v1177_v26 = vadd.f32 %v3328_v15, %v1176_v24  ;;  %v1465_v27 = vpop.f32.mrb[48].mxu0  ;;  %v1178_v28 = vpop.f32.mrb[49].mxu1 }
 0x176   :  { %v1467_v29 = vpop.f32.mrb[49].mxu0  ;;  %v1179_v30 = vpop.f32.mrb[50].mxu1 }
 0x177   :  { %2471 = vst [vmem:[%s3546_s3 + $0x58] sm:$0xff] %v2359_v25   ;;  %v1466_v31 = vadd.f32 %v1465_v27, %v1177_v26  ;;  %v1180_v32 = vadd.f32 %v3328_v15, %v1179_v30  ;;  %v1468_v33 = vpop.f32.mrb[50].mxu0  ;;  %v1181_v34 = vpop.f32.mrb[51].mxu1 }
 0x178   :  { %v1470_v35 = vpop.f32.mrb[51].mxu0 }
 0x179   :  { %v1469_v36 = vadd.f32 %v1468_v33, %v1180_v32  ;;  %v1648_v37 = vmax.f32 %v1466_v31, 0.0 }
 0x17b   :  { %v1649_v38 = vmax.f32 %v1469_v36, 0.0 }
 0x17c   :  { %v1184_v39 = vpop.f32.mrb[52].mxu1 }
 0x17d   :  { %v2364_v40 = vpack.c.bf16 %v1649_v38, %v1648_v37  ;;  %v1185_v41 = vadd.f32 %v3328_v15, %v1184_v39  ;;  %v1473_v42 = vpop.f32.mrb[52].mxu0  ;;  %v1186_v43 = vpop.f32.mrb[53].mxu1 }
 0x17e   :  { %v1475_v44 = vpop.f32.mrb[53].mxu0  ;;  %v1187_v45 = vpop.f32.mrb[54].mxu1 }
 0x17f   :  { %2472 = vst [vmem:[%s3546_s3 + $0x60] sm:$0xff] %v2364_v40   ;;  %v1474_v46 = vadd.f32 %v1473_v42, %v1185_v41  ;;  %v1188_v47 = vadd.f32 %v3328_v15, %v1187_v45  ;;  %v1476_v48 = vpop.f32.mrb[54].mxu0  ;;  %v1189_v49 = vpop.f32.mrb[55].mxu1 }
 0x180   :  { %v1478_v50 = vpop.f32.mrb[55].mxu0 }
 0x181   :  { %v1477_v51 = vadd.f32 %v1476_v48, %v1188_v47  ;;  %v1650_v52 = vmax.f32 %v1474_v46, 0.0 }
 0x183   :  { %v1651_v53 = vmax.f32 %v1477_v51, 0.0 }
 0x184   :  { %v1192_v54 = vpop.f32.mrb[56].mxu1 }
 0x185   :  { %v2369_v55 = vpack.c.bf16 %v1651_v53, %v1650_v52  ;;  %v1193_v56 = vadd.f32 %v3328_v15, %v1192_v54  ;;  %v1481_v57 = vpop.f32.mrb[56].mxu0  ;;  %v1194_v58 = vpop.f32.mrb[57].mxu1 }
 0x186   :  { %v1483_v59 = vpop.f32.mrb[57].mxu0  ;;  %v1195_v60 = vpop.f32.mrb[58].mxu1 }
 0x187   :  { %2473 = vst [vmem:[%s3546_s3 + $0x68] sm:$0xff] %v2369_v55   ;;  %v1482_v61 = vadd.f32 %v1481_v57, %v1193_v56  ;;  %v1196_v62 = vadd.f32 %v3328_v15, %v1195_v60  ;;  %v1484_v63 = vpop.f32.mrb[58].mxu0  ;;  %v1197_v0 = vpop.f32.mrb[59].mxu1 }
 0x188   :  { %v1486_v1 = vpop.f32.mrb[59].mxu0 }
 0x189   :  { %v1485_v2 = vadd.f32 %v1484_v63, %v1196_v62  ;;  %v1652_v3 = vmax.f32 %v1482_v61, 0.0 }
 0x18b   :  { %v1653_v4 = vmax.f32 %v1485_v2, 0.0 }
 0x18c   :  { %v1200_v5 = vpop.f32.mrb[60].mxu1 }
 0x18d   :  { %v2374_v6 = vpack.c.bf16 %v1653_v4, %v1652_v3  ;;  %v1201_v7 = vadd.f32 %v3328_v15, %v1200_v5  ;;  %v1489_v8 = vpop.f32.mrb[60].mxu0  ;;  %v1202_v9 = vpop.f32.mrb[61].mxu1 }
 0x18e   :  { %v1491_v10 = vpop.f32.mrb[61].mxu0  ;;  %v1203_v11 = vpop.f32.mrb[62].mxu1 }
 0x18f   :  { %2474 = vst [vmem:[%s3546_s3 + $0x70] sm:$0xff] %v2374_v6   ;;  %v1490_v12 = vadd.f32 %v1489_v8, %v1201_v7  ;;  %v1204_v13 = vadd.f32 %v3328_v15, %v1203_v11  ;;  %v1492_v14 = vpop.f32.mrb[62].mxu0  ;;  %v1205_v16 = vpop.f32.mrb[63].mxu1 }
 0x190   :  { %v1494_v17 = vpop.f32.mrb[63].mxu0 }
 0x191   :  { %v1493_v18 = vadd.f32 %v1492_v14, %v1204_v13  ;;  %v1654_v19 = vmax.f32 %v1490_v12, 0.0 }
 0x193   :  { %v1655_v20 = vmax.f32 %v1493_v18, 0.0 }
 0x194   :  { %v1208_v21 = vpop.f32.mrb[64].mxu1 }
 0x195   :  { %v2379_v22 = vpack.c.bf16 %v1655_v20, %v1654_v19  ;;  %v1209_v23 = vadd.f32 %v3328_v15, %v1208_v21  ;;  %v1497_v24 = vpop.f32.mrb[64].mxu0  ;;  %v1210_v25 = vpop.f32.mrb[65].mxu1 }
 0x196   :  { %v1499_v26 = vpop.f32.mrb[65].mxu0  ;;  %v1211_v27 = vpop.f32.mrb[66].mxu1 }
 0x197   :  { %2475 = vst [vmem:[%s3546_s3 + $0x78] sm:$0xff] %v2379_v22   ;;  %v1498_v28 = vadd.f32 %v1497_v24, %v1209_v23  ;;  %v1212_v29 = vadd.f32 %v3328_v15, %v1211_v27  ;;  %v1500_v30 = vpop.f32.mrb[66].mxu0  ;;  %v1213_v31 = vpop.f32.mrb[67].mxu1 }
 0x198   :  { %v1502_v32 = vpop.f32.mrb[67].mxu0 }
 0x199   :  { %v1501_v33 = vadd.f32 %v1500_v30, %v1212_v29  ;;  %v1656_v34 = vmax.f32 %v1498_v28, 0.0 }
 0x19b   :  { %v1657_v35 = vmax.f32 %v1501_v33, 0.0 }
 0x19c   :  { %v1216_v36 = vpop.f32.mrb[68].mxu1 }
 0x19d   :  { %v2384_v37 = vpack.c.bf16 %v1657_v35, %v1656_v34  ;;  %v1217_v38 = vadd.f32 %v3328_v15, %v1216_v36  ;;  %v1505_v39 = vpop.f32.mrb[68].mxu0  ;;  %v1218_v40 = vpop.f32.mrb[69].mxu1 }
 0x19e   :  { %v1507_v41 = vpop.f32.mrb[69].mxu0  ;;  %v1219_v42 = vpop.f32.mrb[70].mxu1 }
 0x19f   :  { %2476 = vst [vmem:[%s3546_s3 + $0x80] sm:$0xff] %v2384_v37   ;;  %v1506_v43 = vadd.f32 %v1505_v39, %v1217_v38  ;;  %v1220_v44 = vadd.f32 %v3328_v15, %v1219_v42  ;;  %v1508_v45 = vpop.f32.mrb[70].mxu0  ;;  %v1221_v46 = vpop.f32.mrb[71].mxu1 }
 0x1a0   :  { %v1510_v47 = vpop.f32.mrb[71].mxu0 }
 0x1a1   :  { %v1509_v48 = vadd.f32 %v1508_v45, %v1220_v44  ;;  %v1658_v49 = vmax.f32 %v1506_v43, 0.0 }
 0x1a3   :  { %v1659_v50 = vmax.f32 %v1509_v48, 0.0 }
 0x1a4   :  { %v1224_v51 = vpop.f32.mrb[72].mxu1 }
 0x1a5   :  { %v2389_v52 = vpack.c.bf16 %v1659_v50, %v1658_v49  ;;  %v1225_v53 = vadd.f32 %v3328_v15, %v1224_v51  ;;  %v1513_v54 = vpop.f32.mrb[72].mxu0  ;;  %v1226_v55 = vpop.f32.mrb[73].mxu1 }
 0x1a6   :  { %v1515_v56 = vpop.f32.mrb[73].mxu0  ;;  %v1227_v57 = vpop.f32.mrb[74].mxu1 }
 0x1a7   :  { %2477 = vst [vmem:[%s3546_s3 + $0x88] sm:$0xff] %v2389_v52   ;;  %v1514_v58 = vadd.f32 %v1513_v54, %v1225_v53  ;;  %v1228_v59 = vadd.f32 %v3328_v15, %v1227_v57  ;;  %v1516_v60 = vpop.f32.mrb[74].mxu0  ;;  %v1229_v61 = vpop.f32.mrb[75].mxu1 }
 0x1a8   :  { %v1518_v62 = vpop.f32.mrb[75].mxu0 }
 0x1a9   :  { %v1517_v63 = vadd.f32 %v1516_v60, %v1228_v59  ;;  %v1660_v0 = vmax.f32 %v1514_v58, 0.0 }
 0x1ab   :  { %v1661_v1 = vmax.f32 %v1517_v63, 0.0 }
 0x1ac   :  { %v1232_v2 = vpop.f32.mrb[76].mxu1 }
 0x1ad   :  { %v2394_v3 = vpack.c.bf16 %v1661_v1, %v1660_v0  ;;  %v1233_v4 = vadd.f32 %v3328_v15, %v1232_v2  ;;  %v1521_v5 = vpop.f32.mrb[76].mxu0  ;;  %v1234_v6 = vpop.f32.mrb[77].mxu1 }
 0x1ae   :  { %v1523_v7 = vpop.f32.mrb[77].mxu0  ;;  %v1235_v8 = vpop.f32.mrb[78].mxu1 }
 0x1af   :  { %2478 = vst [vmem:[%s3546_s3 + $0x90] sm:$0xff] %v2394_v3   ;;  %v1522_v9 = vadd.f32 %v1521_v5, %v1233_v4  ;;  %v1236_v10 = vadd.f32 %v3328_v15, %v1235_v8  ;;  %v1524_v11 = vpop.f32.mrb[78].mxu0  ;;  %v1237_v12 = vpop.f32.mrb[79].mxu1 }
 0x1b0   :  { %v1526_v13 = vpop.f32.mrb[79].mxu0 }
 0x1b1   :  { %v1525_v14 = vadd.f32 %v1524_v11, %v1236_v10  ;;  %v1662_v16 = vmax.f32 %v1522_v9, 0.0 }
 0x1b3   :  { %v1663_v17 = vmax.f32 %v1525_v14, 0.0 }
 0x1b4   :  { %v1240_v18 = vpop.f32.mrb[80].mxu1 }
 0x1b5   :  { %v2399_v19 = vpack.c.bf16 %v1663_v17, %v1662_v16  ;;  %v1241_v20 = vadd.f32 %v3328_v15, %v1240_v18  ;;  %v1529_v21 = vpop.f32.mrb[80].mxu0  ;;  %v1242_v22 = vpop.f32.mrb[81].mxu1 }
 0x1b6   :  { %v1531_v23 = vpop.f32.mrb[81].mxu0  ;;  %v1243_v24 = vpop.f32.mrb[82].mxu1 }
 0x1b7   :  { %2479 = vst [vmem:[%s3546_s3 + $0x98] sm:$0xff] %v2399_v19   ;;  %v1530_v25 = vadd.f32 %v1529_v21, %v1241_v20  ;;  %v1244_v26 = vadd.f32 %v3328_v15, %v1243_v24  ;;  %v1532_v27 = vpop.f32.mrb[82].mxu0  ;;  %v1245_v28 = vpop.f32.mrb[83].mxu1 }
 0x1b8   :  { %v1534_v29 = vpop.f32.mrb[83].mxu0 }
 0x1b9   :  { %v1533_v30 = vadd.f32 %v1532_v27, %v1244_v26  ;;  %v1664_v31 = vmax.f32 %v1530_v25, 0.0 }
 0x1bb   :  { %v1665_v32 = vmax.f32 %v1533_v30, 0.0 }
 0x1bc   :  { %v1248_v33 = vpop.f32.mrb[84].mxu1 }
 0x1bd   :  { %v2404_v34 = vpack.c.bf16 %v1665_v32, %v1664_v31  ;;  %v1249_v35 = vadd.f32 %v3328_v15, %v1248_v33  ;;  %v1537_v36 = vpop.f32.mrb[84].mxu0  ;;  %v1250_v37 = vpop.f32.mrb[85].mxu1 }
 0x1be   :  { %v1539_v38 = vpop.f32.mrb[85].mxu0  ;;  %v1251_v39 = vpop.f32.mrb[86].mxu1 }
 0x1bf   :  { %2480 = vst [vmem:[%s3546_s3 + $0xa0] sm:$0xff] %v2404_v34   ;;  %v1538_v40 = vadd.f32 %v1537_v36, %v1249_v35  ;;  %v1252_v41 = vadd.f32 %v3328_v15, %v1251_v39  ;;  %v1540_v42 = vpop.f32.mrb[86].mxu0  ;;  %v1253_v43 = vpop.f32.mrb[87].mxu1 }
 0x1c0   :  { %v1542_v44 = vpop.f32.mrb[87].mxu0 }
 0x1c1   :  { %v1541_v45 = vadd.f32 %v1540_v42, %v1252_v41  ;;  %v1666_v46 = vmax.f32 %v1538_v40, 0.0 }
 0x1c3   :  { %v1667_v47 = vmax.f32 %v1541_v45, 0.0 }
 0x1c4   :  { %v1256_v48 = vpop.f32.mrb[88].mxu1 }
 0x1c5   :  { %v2409_v49 = vpack.c.bf16 %v1667_v47, %v1666_v46  ;;  %v1257_v50 = vadd.f32 %v3328_v15, %v1256_v48  ;;  %v1545_v51 = vpop.f32.mrb[88].mxu0  ;;  %v1258_v52 = vpop.f32.mrb[89].mxu1 }
 0x1c6   :  { %v1547_v53 = vpop.f32.mrb[89].mxu0  ;;  %v1259_v54 = vpop.f32.mrb[90].mxu1 }
 0x1c7   :  { %2481 = vst [vmem:[%s3546_s3 + $0xa8] sm:$0xff] %v2409_v49   ;;  %v1546_v55 = vadd.f32 %v1545_v51, %v1257_v50  ;;  %v1260_v56 = vadd.f32 %v3328_v15, %v1259_v54  ;;  %v1548_v57 = vpop.f32.mrb[90].mxu0  ;;  %v1261_v58 = vpop.f32.mrb[91].mxu1 }
 0x1c8   :  { %v1550_v59 = vpop.f32.mrb[91].mxu0 }
 0x1c9   :  { %v1549_v60 = vadd.f32 %v1548_v57, %v1260_v56  ;;  %v1668_v61 = vmax.f32 %v1546_v55, 0.0 }
 0x1cb   :  { %v1669_v62 = vmax.f32 %v1549_v60, 0.0 }
 0x1cc   :  { %v1264_v63 = vpop.f32.mrb[92].mxu1 }
 0x1cd   :  { %v2414_v0 = vpack.c.bf16 %v1669_v62, %v1668_v61  ;;  %v1265_v1 = vadd.f32 %v3328_v15, %v1264_v63  ;;  %v1553_v2 = vpop.f32.mrb[92].mxu0  ;;  %v1266_v3 = vpop.f32.mrb[93].mxu1 }
 0x1ce   :  { %v1555_v4 = vpop.f32.mrb[93].mxu0  ;;  %v1267_v5 = vpop.f32.mrb[94].mxu1 }
 0x1cf   :  { %2482 = vst [vmem:[%s3546_s3 + $0xb0] sm:$0xff] %v2414_v0   ;;  %v1554_v6 = vadd.f32 %v1553_v2, %v1265_v1  ;;  %v1268_v7 = vadd.f32 %v3328_v15, %v1267_v5  ;;  %v1556_v8 = vpop.f32.mrb[94].mxu0  ;;  %v1269_v9 = vpop.f32.mrb[95].mxu1 }
 0x1d0   :  { %v1558_v10 = vpop.f32.mrb[95].mxu0 }
 0x1d1   :  { %v1557_v11 = vadd.f32 %v1556_v8, %v1268_v7  ;;  %v1670_v12 = vmax.f32 %v1554_v6, 0.0 }
 0x1d3   :  { %v1671_v13 = vmax.f32 %v1557_v11, 0.0 }
 0x1d4   :  { %v1272_v14 = vpop.f32.mrb[96].mxu1 }
 0x1d5   :  { %v2419_v16 = vpack.c.bf16 %v1671_v13, %v1670_v12  ;;  %v1273_v17 = vadd.f32 %v3328_v15, %v1272_v14  ;;  %v1561_v18 = vpop.f32.mrb[96].mxu0  ;;  %v1274_v19 = vpop.f32.mrb[97].mxu1 }
 0x1d6   :  { %v1563_v20 = vpop.f32.mrb[97].mxu0  ;;  %v1275_v21 = vpop.f32.mrb[98].mxu1 }
 0x1d7   :  { %2483 = vst [vmem:[%s3546_s3 + $0xb8] sm:$0xff] %v2419_v16   ;;  %v1562_v22 = vadd.f32 %v1561_v18, %v1273_v17  ;;  %v1276_v23 = vadd.f32 %v3328_v15, %v1275_v21  ;;  %v1564_v24 = vpop.f32.mrb[98].mxu0  ;;  %v1277_v25 = vpop.f32.mrb[99].mxu1 }
 0x1d8   :  { %v1566_v26 = vpop.f32.mrb[99].mxu0 }
 0x1d9   :  { %v1565_v27 = vadd.f32 %v1564_v24, %v1276_v23  ;;  %v1672_v28 = vmax.f32 %v1562_v22, 0.0 }
 0x1db   :  { %v1673_v29 = vmax.f32 %v1565_v27, 0.0 }
 0x1dc   :  { %v1280_v30 = vpop.f32.mrb[100].mxu1 }
 0x1dd   :  { %v2424_v31 = vpack.c.bf16 %v1673_v29, %v1672_v28  ;;  %v1281_v32 = vadd.f32 %v3328_v15, %v1280_v30  ;;  %v1569_v33 = vpop.f32.mrb[100].mxu0  ;;  %v1282_v34 = vpop.f32.mrb[101].mxu1 }
 0x1de   :  { %v1571_v35 = vpop.f32.mrb[101].mxu0  ;;  %v1283_v36 = vpop.f32.mrb[102].mxu1 }
 0x1df   :  { %2484 = vst [vmem:[%s3546_s3 + $0xc0] sm:$0xff] %v2424_v31   ;;  %v1570_v37 = vadd.f32 %v1569_v33, %v1281_v32  ;;  %v1284_v38 = vadd.f32 %v3328_v15, %v1283_v36  ;;  %v1572_v39 = vpop.f32.mrb[102].mxu0  ;;  %v1285_v40 = vpop.f32.mrb[103].mxu1 }
 0x1e0   :  { %v1574_v41 = vpop.f32.mrb[103].mxu0 }
 0x1e1   :  { %v1573_v42 = vadd.f32 %v1572_v39, %v1284_v38  ;;  %v1674_v43 = vmax.f32 %v1570_v37, 0.0 }
 0x1e3   :  { %v1675_v44 = vmax.f32 %v1573_v42, 0.0 }
 0x1e4   :  { %v1288_v45 = vpop.f32.mrb[104].mxu1 }
 0x1e5   :  { %v2429_v46 = vpack.c.bf16 %v1675_v44, %v1674_v43  ;;  %v1289_v47 = vadd.f32 %v3328_v15, %v1288_v45  ;;  %v1577_v48 = vpop.f32.mrb[104].mxu0  ;;  %v1290_v49 = vpop.f32.mrb[105].mxu1  ;;  %v2845_v44 = vld [vmem:[%s3545_s2] ss:$0 sm:$0xff] }
 0x1e6   :  { %v1579_v50 = vpop.f32.mrb[105].mxu0  ;;  %v1291_v51 = vpop.f32.mrb[106].mxu1 }
 0x1e7   :  { %2485 = vst [vmem:[%s3546_s3 + $0xc8] sm:$0xff] %v2429_v46   ;;  %v1578_v52 = vadd.f32 %v1577_v48, %v1289_v47  ;;  %v1292_v53 = vadd.f32 %v3328_v15, %v1291_v51  ;;  %v1580_v54 = vpop.f32.mrb[106].mxu0  ;;  %v1293_v55 = vpop.f32.mrb[107].mxu1 }
 0x1e8   :  { %v1582_v56 = vpop.f32.mrb[107].mxu0 }
 0x1e9   :  { %v1581_v57 = vadd.f32 %v1580_v54, %v1292_v53  ;;  %v1676_v58 = vmax.f32 %v1578_v52, 0.0 }
 0x1eb   :  { %v1677_v59 = vmax.f32 %v1581_v57, 0.0 }
 0x1ec   :  { %v1296_v60 = vpop.f32.mrb[108].mxu1 }
 0x1ed   :  { %v2434_v61 = vpack.c.bf16 %v1677_v59, %v1676_v58  ;;  %v1297_v62 = vadd.f32 %v3328_v15, %v1296_v60  ;;  %v1585_v63 = vpop.f32.mrb[108].mxu0  ;;  %v1298_v0 = vpop.f32.mrb[109].mxu1 }
 0x1ee   :  { %v1587_v1 = vpop.f32.mrb[109].mxu0  ;;  %v1299_v2 = vpop.f32.mrb[110].mxu1 }
 0x1ef   :  { %2486 = vst [vmem:[%s3546_s3 + $0xd0] sm:$0xff] %v2434_v61   ;;  %v1586_v3 = vadd.f32 %v1585_v63, %v1297_v62  ;;  %v1300_v4 = vadd.f32 %v3328_v15, %v1299_v2  ;;  %v1588_v5 = vpop.f32.mrb[110].mxu0  ;;  %v1301_v6 = vpop.f32.mrb[111].mxu1 }
 0x1f0   :  { %v1590_v7 = vpop.f32.mrb[111].mxu0 }
 0x1f1   :  { %v1589_v8 = vadd.f32 %v1588_v5, %v1300_v4  ;;  %v1678_v9 = vmax.f32 %v1586_v3, 0.0 }
 0x1f3   :  { %v1679_v10 = vmax.f32 %v1589_v8, 0.0 }
 0x1f4   :  { %v1304_v11 = vpop.f32.mrb[112].mxu1 }
 0x1f5   :  { %v2439_v12 = vpack.c.bf16 %v1679_v10, %v1678_v9  ;;  %v1305_v13 = vadd.f32 %v3328_v15, %v1304_v11  ;;  %v1593_v14 = vpop.f32.mrb[112].mxu0  ;;  %v1306_v16 = vpop.f32.mrb[113].mxu1 }
 0x1f6   :  { %v1595_v17 = vpop.f32.mrb[113].mxu0  ;;  %v1307_v18 = vpop.f32.mrb[114].mxu1 }
 0x1f7   :  { %2487 = vst [vmem:[%s3546_s3 + $0xd8] sm:$0xff] %v2439_v12   ;;  %v1594_v19 = vadd.f32 %v1593_v14, %v1305_v13  ;;  %v1308_v20 = vadd.f32 %v3328_v15, %v1307_v18  ;;  %v1596_v21 = vpop.f32.mrb[114].mxu0  ;;  %v1309_v22 = vpop.f32.mrb[115].mxu1 }
 0x1f8   :  { %v1598_v23 = vpop.f32.mrb[115].mxu0 }
 0x1f9   :  { %v1597_v24 = vadd.f32 %v1596_v21, %v1308_v20  ;;  %v1680_v25 = vmax.f32 %v1594_v19, 0.0 }
 0x1fb   :  { %v1681_v26 = vmax.f32 %v1597_v24, 0.0 }
 0x1fc   :  { %v1312_v27 = vpop.f32.mrb[116].mxu1 }
 0x1fd   :  { %v2444_v28 = vpack.c.bf16 %v1681_v26, %v1680_v25  ;;  %v1313_v29 = vadd.f32 %v3328_v15, %v1312_v27  ;;  %v1601_v30 = vpop.f32.mrb[116].mxu0  ;;  %v1314_v31 = vpop.f32.mrb[117].mxu1 }
 0x1fe   :  { %v1603_v32 = vpop.f32.mrb[117].mxu0  ;;  %v1315_v33 = vpop.f32.mrb[118].mxu1 }
 0x1ff   :  { %2488 = vst [vmem:[%s3546_s3 + $0xe0] sm:$0xff] %v2444_v28   ;;  %v1602_v34 = vadd.f32 %v1601_v30, %v1313_v29  ;;  %v1316_v35 = vadd.f32 %v3328_v15, %v1315_v33  ;;  %v1604_v36 = vpop.f32.mrb[118].mxu0  ;;  %v1317_v37 = vpop.f32.mrb[119].mxu1 }
 0x200   :  { %v1606_v38 = vpop.f32.mrb[119].mxu0 }
 0x201   :  { %v1605_v39 = vadd.f32 %v1604_v36, %v1316_v35  ;;  %v1682_v40 = vmax.f32 %v1602_v34, 0.0 }
 0x203   :  { %v1683_v41 = vmax.f32 %v1605_v39, 0.0 }
 0x204   :  { %v1320_v42 = vpop.f32.mrb[120].mxu1 }
 0x205   :  { %v2449_v43 = vpack.c.bf16 %v1683_v41, %v1682_v40  ;;  %v1321_v45 = vadd.f32 %v2845_v44, %v1320_v42  ;;  %v1609_v46 = vpop.f32.mrb[120].mxu0  ;;  %v1322_v47 = vpop.f32.mrb[121].mxu1 }
 0x206   :  { %v1611_v48 = vpop.f32.mrb[121].mxu0  ;;  %v1323_v49 = vpop.f32.mrb[122].mxu1 }
 0x207   :  { %2489 = vst [vmem:[%s3546_s3 + $0xe8] sm:$0xff] %v2449_v43   ;;  %v1610_v15 = vadd.f32 %v1609_v46, %v1321_v45  ;;  %v1324_v50 = vadd.f32 %v2845_v44, %v1323_v49  ;;  %v1612_v51 = vpop.f32.mrb[122].mxu0  ;;  %v1325_v52 = vpop.f32.mrb[123].mxu1 }
 0x208   :  { %v1614_v53 = vpop.f32.mrb[123].mxu0 }
 0x209   :  { %v1613_v54 = vadd.f32 %v1612_v51, %v1324_v50  ;;  %v1684_v55 = vmax.f32 %v1610_v15, 0.0 }
 0x20b   :  { %v1685_v56 = vmax.f32 %v1613_v54, 0.0 }
 0x20c   :  { %v1328_v57 = vpop.f32.mrb[124].mxu1 }
 0x20d   :  { %v2454_v58 = vpack.c.bf16 %v1685_v56, %v1684_v55  ;;  %v1329_v59 = vadd.f32 %v2845_v44, %v1328_v57  ;;  %v1617_v60 = vpop.f32.mrb[124].mxu0  ;;  %v1330_v61 = vpop.f32.mrb[125].mxu1 }
 0x20e   :  { %v1619_v62 = vpop.f32.mrb[125].mxu0  ;;  %v1331_v63 = vpop.f32.mrb[126].mxu1 }
 0x20f   :  { %2490 = vst [vmem:[%s3546_s3 + $0xf0] sm:$0xff] %v2454_v58   ;;  %v1618_v0 = vadd.f32 %v1617_v60, %v1329_v59  ;;  %v1332_v1 = vadd.f32 %v2845_v44, %v1331_v63  ;;  %v1620_v2 = vpop.f32.mrb[126].mxu0  ;;  %v1333_v3 = vpop.f32.mrb[127].mxu1 }
 0x210   :  { %v1622_v4 = vpop.f32.mrb[127].mxu0 }
 0x211   :  { %v1621_v5 = vadd.f32 %v1620_v2, %v1332_v1  ;;  %v1686_v6 = vmax.f32 %v1618_v0, 0.0 }
 0x213   :  { %v1687_v7 = vmax.f32 %v1621_v5, 0.0 }
 0x215   :  { %v2459_v8 = vpack.c.bf16 %v1687_v7, %v1686_v6 }
 0x217   :  { %2491 = vst [vmem:[%s3546_s3 + $0xf8] sm:$0xff] %v2459_v8  }

// kernel: reg3d_forward.14
= control target key start
LH: loop header
LB: loop body
LE: loop exit
PB: predicated region body
PF: predicated region fallthrough
CT: control target
= control target key end

     0   :  { %s969_s1 = inlined_call_operand.vmem [shape: bf16[512,128], index: 1, kind: input, shape index: {}]   ;;  %s970_s0 = inlined_call_operand.vmem [shape: bf16[64,512], index: 0, kind: input, shape index: {}]   ;;  %s971_s2 = inlined_call_operand.vmem [shape: f32[1,128], index: 2, kind: input, shape index: {}]   ;;  %s972_s3 = inlined_call_operand.vmem [shape: bf16[64,128], index: 3, kind: output, shape index: {}]  }
   0x1   :  { %v724_v0 = vld [vmem:[%s969_s1 + $0x40] sm:$0xff]   ;;  %v728_v4 = vld [vmem:[%s969_s1 + $0x48] sm:$0xff]   ;;  %v732_v8 = vld [vmem:[%s969_s1 + $0x50] sm:$0xff]  }
   0x2   :  { %v725_v1 = vld [vmem:[%s969_s1 + $0xc0] sm:$0xff]   ;;  %644 = vmatprep.subr.bf16.mxu0 %v724_v0  ;;  %v729_v5 = vld [vmem:[%s969_s1 + $0xc8] sm:$0xff]   ;;  %v733_v9 = vld [vmem:[%s969_s1 + $0xd0] sm:$0xff]  }
   0x3   :  { %v726_v2 = vld [vmem:[%s969_s1] sm:$0xff]   ;;  %684 = vmatprep.subr.bf16.mxu1 %v725_v1  ;;  %v730_v6 = vld [vmem:[%s969_s1 + $0x8] sm:$0xff]   ;;  %v734_v10 = vld [vmem:[%s969_s1 + $0x10] sm:$0xff]  }
   0x4   :  { %v727_v3 = vld [vmem:[%s969_s1 + $0x80] sm:$0xff]   ;;  %645 = vmatpush3.bf16.msra.mxu0 %v726_v2  ;;  %v731_v7 = vld [vmem:[%s969_s1 + $0x88] sm:$0xff]   ;;  %v735_v11 = vld [vmem:[%s969_s1 + $0x90] sm:$0xff]  }
   0x5   :  { %685 = vmatpush3.bf16.msra.mxu1 %v727_v3  ;;  %646 = vmatprep.subr.bf16.mxu0 %v728_v4  ;;  %v736_v12 = vld [vmem:[%s969_s1 + $0x58] sm:$0xff]   ;;  %v740_v16 = vld [vmem:[%s969_s1 + $0x60] sm:$0xff]   ;;  %v744_v20 = vld [vmem:[%s969_s1 + $0x68] sm:$0xff]  }
   0x6   :  { %686 = vmatprep.subr.bf16.mxu1 %v729_v5  ;;  %v737_v13 = vld [vmem:[%s969_s1 + $0xd8] sm:$0xff]   ;;  %v741_v17 = vld [vmem:[%s969_s1 + $0xe0] sm:$0xff]   ;;  %v745_v21 = vld [vmem:[%s969_s1 + $0xe8] sm:$0xff]  }
   0x7   :  { %v738_v14 = vld [vmem:[%s969_s1 + $0x18] sm:$0xff]   ;;  %v742_v18 = vld [vmem:[%s969_s1 + $0x20] sm:$0xff]   ;;  %v746_v22 = vld [vmem:[%s969_s1 + $0x28] sm:$0xff]  }
   0x8   :  { %647 = vmatpush3.bf16.msra.mxu0 %v730_v6  ;;  %v739_v15 = vld [vmem:[%s969_s1 + $0x98] sm:$0xff]   ;;  %v743_v19 = vld [vmem:[%s969_s1 + $0xa0] sm:$0xff]   ;;  %v747_v23 = vld [vmem:[%s969_s1 + $0xa8] sm:$0xff]  }
   0x9   :  { %687 = vmatpush3.bf16.msra.mxu1 %v731_v7  ;;  %648 = vmatprep.subr.bf16.mxu0 %v732_v8  ;;  %v748_v24 = vld [vmem:[%s969_s1 + $0x70] sm:$0xff]   ;;  %v752_v28 = vld [vmem:[%s969_s1 + $0x78] sm:$0xff]   ;;  %v947_v50 = vld [vmem:[%s971_s2] ss:$0 sm:$0xff] }
   0xa   :  { %688 = vmatprep.subr.bf16.mxu1 %v733_v9  ;;  %v749_v25 = vld [vmem:[%s969_s1 + $0xf0] sm:$0xff]   ;;  %v753_v29 = vld [vmem:[%s969_s1 + $0xf8] sm:$0xff]  }
   0xb   :  { %v750_v26 = vld [vmem:[%s969_s1 + $0x30] sm:$0xff]   ;;  %v754_v30 = vld [vmem:[%s969_s1 + $0x38] sm:$0xff]  }
   0xc   :  { %649 = vmatpush3.bf16.msra.mxu0 %v734_v10  ;;  %v751_v27 = vld [vmem:[%s969_s1 + $0xb0] sm:$0xff]   ;;  %v755_v31 = vld [vmem:[%s969_s1 + $0xb8] sm:$0xff]  }
   0xd   :  { %689 = vmatpush3.bf16.msra.mxu1 %v735_v11  ;;  %650 = vmatprep.subr.bf16.mxu0 %v736_v12  ;;  %v756_v32 = vld [vmem:[%s970_s0] ss:$16 sps:$4 sm:$0xff]   ;;  %v758_v33 = vld [vmem:[%s970_s0 + $0x4] ss:$16 sps:$4 sm:$0xff]   ;;  %v759_v34 = vld [vmem:[%s970_s0 + $0x8] ss:$16 sps:$4 sm:$0xff]  }
   0xe   :  { %690 = vmatprep.subr.bf16.mxu1 %v737_v13  ;;  %v761_v35 = vld [vmem:[%s970_s0 + $0xc] ss:$16 sps:$4 sm:$0xff]   ;;  %406 = vmatprep.mubr.bf16.mxu0 %v758_v33  ;;  %v762_v36 = vld [vmem:[%s970_s0 + $0x24] ss:$16 sps:$4 sm:$0xff]   ;;  %v766_v38 = vld [vmem:[%s970_s0 + $0x20] ss:$16 sps:$4 sm:$0xff]  }
   0xf   :  { %471 = vmatprep.mubr.bf16.mxu1 %v761_v35  ;;  %v764_v37 = vld [vmem:[%s970_s0 + $0x2c] ss:$16 sps:$4 sm:$0xff]   ;;  %v767_v39 = vld [vmem:[%s970_s0 + $0x28] ss:$16 sps:$4 sm:$0xff]   ;;  %v768_v40 = vld [vmem:[%s970_s0 + $0x44] ss:$16 sps:$4 sm:$0xff]  }
  0x10   :  { %651 = vmatpush3.bf16.msra.mxu0 %v738_v14  ;;  %v770_v41 = vld [vmem:[%s970_s0 + $0x4c] ss:$16 sps:$4 sm:$0xff]   ;;  %v772_v42 = vld [vmem:[%s970_s0 + $0x40] ss:$16 sps:$4 sm:$0xff]   ;;  %v773_v43 = vld [vmem:[%s970_s0 + $0x48] ss:$16 sps:$4 sm:$0xff]  }
  0x11   :  { %691 = vmatpush3.bf16.msra.mxu1 %v739_v15  ;;  %652 = vmatprep.subr.bf16.mxu0 %v740_v16  ;;  %v774_v44 = vld [vmem:[%s970_s0 + $0x64] ss:$16 sps:$4 sm:$0xff]   ;;  %v776_v45 = vld [vmem:[%s970_s0 + $0x6c] ss:$16 sps:$4 sm:$0xff]   ;;  %v778_v46 = vld [vmem:[%s970_s0 + $0x60] ss:$16 sps:$4 sm:$0xff]  }
  0x12   :  { %692 = vmatprep.subr.bf16.mxu1 %v741_v17  ;;  %v779_v47 = vld [vmem:[%s970_s0 + $0x68] ss:$16 sps:$4 sm:$0xff]  }
  0x14   :  { %653 = vmatpush3.bf16.msra.mxu0 %v742_v18 }
  0x15   :  { %693 = vmatpush3.bf16.msra.mxu1 %v743_v19  ;;  %654 = vmatprep.subr.bf16.mxu0 %v744_v20 }
  0x16   :  { %694 = vmatprep.subr.bf16.mxu1 %v745_v21 }
  0x18   :  { %655 = vmatpush3.bf16.msra.mxu0 %v746_v22 }
  0x19   :  { %695 = vmatpush3.bf16.msra.mxu1 %v747_v23  ;;  %656 = vmatprep.subr.bf16.mxu0 %v748_v24 }
  0x1a   :  { %696 = vmatprep.subr.bf16.mxu1 %v749_v25 }
  0x1c   :  { %657 = vmatpush3.bf16.msra.mxu0 %v750_v26 }
  0x1d   :  { %697 = vmatpush3.bf16.msra.mxu1 %v751_v27  ;;  %658 = vmatprep.subr.bf16.mxu0 %v752_v28 }
  0x1e   :  { %698 = vmatprep.subr.bf16.mxu1 %v753_v29 }
  0x20   :  { %659 = vmatpush3.bf16.msra.mxu0 %v754_v30 }
  0x21   :  { %699 = vmatpush3.bf16.msra.mxu1 %v755_v31 }
  0x23   :  { %407 = vmatmul.mubr.bf16.vlgmr.msra.gmra.mrb[0].mxu0 %v756_v32 }
  0x24   :  { %472 = vmatmul.mubr.bf16.vlgmr.msra.gmra.mrb[0].mxu1 %v759_v34  ;;  %414 = vmatprep.mubr.bf16.mxu0 %v762_v36 }
  0x25   :  { %479 = vmatprep.mubr.bf16.mxu1 %v764_v37 }
  0x2b   :  { %415 = vmatmul.mubr.bf16.gmra.mrb[4].mxu0 %v766_v38 }
  0x2c   :  { %480 = vmatmul.mubr.bf16.gmra.mrb[4].mxu1 %v767_v39  ;;  %422 = vmatprep.mubr.bf16.mxu0 %v768_v40 }
  0x2d   :  { %487 = vmatprep.mubr.bf16.mxu1 %v770_v41 }
  0x33   :  { %423 = vmatmul.mubr.bf16.gmra.mrb[8].mxu0 %v772_v42 }
  0x34   :  { %488 = vmatmul.mubr.bf16.gmra.mrb[8].mxu1 %v773_v43  ;;  %430 = vmatprep.mubr.bf16.mxu0 %v774_v44 }
  0x35   :  { %495 = vmatprep.mubr.bf16.mxu1 %v776_v45 }
  0x3b   :  { %431 = vmatmul.mubr.bf16.gmra.mrb[12].mxu0 %v778_v46 }
  0x3c   :  { %496 = vmatmul.mubr.bf16.gmra.mrb[12].mxu1 %v779_v47 }
  0xf6   :  { %v660_v48 = vpop.f32.mrb[0].mxu0 }
  0xf7   :  { %v700_v49 = vpop.f32.mrb[0].mxu1  ;;  %v661_v51 = vpop.f32.mrb[1].mxu0 }
  0xf8   :  { %v662_v52 = vadd.f32 %v661_v51, %v660_v48  ;;  %v701_v53 = vpop.f32.mrb[1].mxu1  ;;  %v663_v54 = vpop.f32.mrb[2].mxu0 }
  0xf9   :  { %v702_v55 = vadd.f32 %v701_v53, %v700_v49  ;;  %v703_v56 = vpop.f32.mrb[2].mxu1  ;;  %v664_v57 = vpop.f32.mrb[3].mxu0 }
  0xfa   :  { %v409_v58 = vadd.f32 %v662_v52, %v947_v50  ;;  %v665_v59 = vadd.f32 %v664_v57, %v663_v54  ;;  %v704_v60 = vpop.f32.mrb[3].mxu1 }
  0xfb   :  { %v705_v61 = vadd.f32 %v704_v60, %v703_v56 }
  0xfc   :  { %v474_v62 = vadd.f32 %v702_v55, %v409_v58  ;;  %v412_v63 = vadd.f32 %v665_v59, %v947_v50 }
  0xfe   :  { %v477_v0 = vadd.f32 %v705_v61, %v412_v63  ;;  %v666_v1 = vpop.f32.mrb[4].mxu0  ;;  %v504_v4 = vmax.f32 %v474_v62, 0.0 }
  0xff   :  { %v706_v2 = vpop.f32.mrb[4].mxu1  ;;  %v667_v3 = vpop.f32.mrb[5].mxu0 }
 0x100   :  { %v505_v5 = vmax.f32 %v477_v0, 0.0  ;;  %v668_v6 = vadd.f32 %v667_v3, %v666_v1  ;;  %v707_v7 = vpop.f32.mrb[5].mxu1  ;;  %v669_v8 = vpop.f32.mrb[6].mxu0 }
 0x101   :  { %v708_v9 = vadd.f32 %v707_v7, %v706_v2  ;;  %v709_v10 = vpop.f32.mrb[6].mxu1  ;;  %v670_v11 = vpop.f32.mrb[7].mxu0 }
 0x102   :  { %v624_v12 = vpack.c.bf16 %v505_v5, %v504_v4  ;;  %v417_v13 = vadd.f32 %v668_v6, %v947_v50  ;;  %v671_v14 = vadd.f32 %v670_v11, %v669_v8  ;;  %v710_v15 = vpop.f32.mrb[7].mxu1 }
 0x103   :  { %v711_v16 = vadd.f32 %v710_v15, %v709_v10 }
 0x104   :  { %625 = vst [vmem:[%s972_s3] sm:$0xff] %v624_v12   ;;  %v482_v17 = vadd.f32 %v708_v9, %v417_v13  ;;  %v420_v18 = vadd.f32 %v671_v14, %v947_v50 }
 0x106   :  { %v485_v19 = vadd.f32 %v711_v16, %v420_v18  ;;  %v672_v20 = vpop.f32.mrb[8].mxu0  ;;  %v506_v23 = vmax.f32 %v482_v17, 0.0 }
 0x107   :  { %v712_v21 = vpop.f32.mrb[8].mxu1  ;;  %v673_v22 = vpop.f32.mrb[9].mxu0 }
 0x108   :  { %v507_v24 = vmax.f32 %v485_v19, 0.0  ;;  %v674_v25 = vadd.f32 %v673_v22, %v672_v20  ;;  %v713_v26 = vpop.f32.mrb[9].mxu1  ;;  %v675_v27 = vpop.f32.mrb[10].mxu0 }
 0x109   :  { %v714_v28 = vadd.f32 %v713_v26, %v712_v21  ;;  %v715_v29 = vpop.f32.mrb[10].mxu1  ;;  %v676_v30 = vpop.f32.mrb[11].mxu0 }
 0x10a   :  { %v629_v31 = vpack.c.bf16 %v507_v24, %v506_v23  ;;  %v425_v32 = vadd.f32 %v674_v25, %v947_v50  ;;  %v677_v33 = vadd.f32 %v676_v30, %v675_v27  ;;  %v716_v34 = vpop.f32.mrb[11].mxu1 }
 0x10b   :  { %v717_v35 = vadd.f32 %v716_v34, %v715_v29 }
 0x10c   :  { %641 = vst [vmem:[%s972_s3 + $0x8] sm:$0xff] %v629_v31   ;;  %v490_v36 = vadd.f32 %v714_v28, %v425_v32  ;;  %v428_v37 = vadd.f32 %v677_v33, %v947_v50 }
 0x10e   :  { %v493_v38 = vadd.f32 %v717_v35, %v428_v37  ;;  %v678_v39 = vpop.f32.mrb[12].mxu0  ;;  %v508_v42 = vmax.f32 %v490_v36, 0.0 }
 0x10f   :  { %v718_v40 = vpop.f32.mrb[12].mxu1  ;;  %v679_v41 = vpop.f32.mrb[13].mxu0 }
 0x110   :  { %v509_v43 = vmax.f32 %v493_v38, 0.0  ;;  %v680_v44 = vadd.f32 %v679_v41, %v678_v39  ;;  %v719_v45 = vpop.f32.mrb[13].mxu1  ;;  %v681_v46 = vpop.f32.mrb[14].mxu0 }
 0x111   :  { %v720_v47 = vadd.f32 %v719_v45, %v718_v40  ;;  %v721_v48 = vpop.f32.mrb[14].mxu1  ;;  %v682_v49 = vpop.f32.mrb[15].mxu0 }
 0x112   :  { %v634_v51 = vpack.c.bf16 %v509_v43, %v508_v42  ;;  %v433_v52 = vadd.f32 %v680_v44, %v947_v50  ;;  %v683_v53 = vadd.f32 %v682_v49, %v681_v46  ;;  %v722_v54 = vpop.f32.mrb[15].mxu1 }
 0x113   :  { %v723_v55 = vadd.f32 %v722_v54, %v721_v48 }
 0x114   :  { %642 = vst [vmem:[%s972_s3 + $0x10] sm:$0xff] %v634_v51   ;;  %v498_v56 = vadd.f32 %v720_v47, %v433_v52  ;;  %v436_v57 = vadd.f32 %v683_v53, %v947_v50 }
 0x116   :  { %v501_v58 = vadd.f32 %v723_v55, %v436_v57  ;;  %v510_v59 = vmax.f32 %v498_v56, 0.0 }
 0x118   :  { %v511_v60 = vmax.f32 %v501_v58, 0.0 }
 0x11a   :  { %v639_v61 = vpack.c.bf16 %v511_v60, %v510_v59 }
 0x11c   :  { %643 = vst [vmem:[%s972_s3 + $0x18] sm:$0xff] %v639_v61  }

// kernel: reg3d_forward.15
= control target key start
LH: loop header
LB: loop body
LE: loop exit
PB: predicated region body
PF: predicated region fallthrough
CT: control target
= control target key end

     0   :  { %s1621_s1 = inlined_call_operand.vmem [shape: bf16[896,128], index: 1, kind: input, shape index: {}]   ;;  %s1622_s0 = inlined_call_operand.vmem [shape: bf16[64,896], index: 0, kind: input, shape index: {}]   ;;  %s1623_s2 = inlined_call_operand.vmem [shape: f32[1,128], index: 2, kind: input, shape index: {}]   ;;  %s1624_s3 = inlined_call_operand.vmem [shape: bf16[64,128], index: 3, kind: output, shape index: {}]  }
   0x1   :  { %v1238_v0 = vld [vmem:[%s1621_s1 + $0x40] sm:$0xff]   ;;  %v1242_v4 = vld [vmem:[%s1621_s1 + $0x48] sm:$0xff]   ;;  %v1246_v8 = vld [vmem:[%s1621_s1 + $0x50] sm:$0xff]  }
   0x2   :  { %v1239_v1 = vld [vmem:[%s1621_s1] sm:$0xff]   ;;  %1082 = vmatprep.subr.bf16.mxu0 %v1238_v0  ;;  %v1243_v5 = vld [vmem:[%s1621_s1 + $0x8] sm:$0xff]   ;;  %v1247_v9 = vld [vmem:[%s1621_s1 + $0x10] sm:$0xff]  }
   0x3   :  { %v1240_v2 = vld [vmem:[%s1621_s1 + $0xc0] sm:$0xff]   ;;  %1083 = vmatpush3.bf16.msra.mxu0 %v1239_v1  ;;  %v1244_v6 = vld [vmem:[%s1621_s1 + $0xc8] sm:$0xff]   ;;  %v1248_v10 = vld [vmem:[%s1621_s1 + $0xd0] sm:$0xff]  }
   0x4   :  { %v1241_v3 = vld [vmem:[%s1621_s1 + $0x80] sm:$0xff]   ;;  %1122 = vmatprep.subr.bf16.mxu1 %v1240_v2  ;;  %1084 = vmatprep.subr.bf16.mxu0 %v1242_v4  ;;  %v1245_v7 = vld [vmem:[%s1621_s1 + $0x88] sm:$0xff]   ;;  %v1249_v11 = vld [vmem:[%s1621_s1 + $0x90] sm:$0xff]  }
   0x5   :  { %1123 = vmatpush3.bf16.msra.mxu1 %v1241_v3  ;;  %v1250_v12 = vld [vmem:[%s1621_s1 + $0x58] sm:$0xff]   ;;  %v1254_v16 = vld [vmem:[%s1621_s1 + $0x60] sm:$0xff]   ;;  %v1258_v20 = vld [vmem:[%s1621_s1 + $0x68] sm:$0xff]  }
   0x6   :  { %1124 = vmatprep.subr.bf16.mxu1 %v1244_v6  ;;  %v1251_v13 = vld [vmem:[%s1621_s1 + $0x18] sm:$0xff]   ;;  %v1255_v17 = vld [vmem:[%s1621_s1 + $0x20] sm:$0xff]   ;;  %v1259_v21 = vld [vmem:[%s1621_s1 + $0x28] sm:$0xff]  }
   0x7   :  { %1085 = vmatpush3.bf16.msra.mxu0 %v1243_v5  ;;  %v1252_v14 = vld [vmem:[%s1621_s1 + $0xd8] sm:$0xff]   ;;  %v1256_v18 = vld [vmem:[%s1621_s1 + $0xe0] sm:$0xff]   ;;  %v1260_v22 = vld [vmem:[%s1621_s1 + $0xe8] sm:$0xff]  }
   0x8   :  { %1086 = vmatprep.subr.bf16.mxu0 %v1246_v8  ;;  %v1253_v15 = vld [vmem:[%s1621_s1 + $0x98] sm:$0xff]   ;;  %v1257_v19 = vld [vmem:[%s1621_s1 + $0xa0] sm:$0xff]   ;;  %v1261_v23 = vld [vmem:[%s1621_s1 + $0xa8] sm:$0xff]  }
   0x9   :  { %1125 = vmatpush3.bf16.msra.mxu1 %v1245_v7  ;;  %v1262_v24 = vld [vmem:[%s1621_s1 + $0x70] sm:$0xff]   ;;  %v1266_v28 = vld [vmem:[%s1621_s1 + $0x78] sm:$0xff]   ;;  %v1271_v32 = vld [vmem:[%s1622_s0 + $0x4] ss:$28 sps:$4 sm:$0xff]  }
   0xa   :  { %1126 = vmatprep.subr.bf16.mxu1 %v1248_v10  ;;  %v1263_v25 = vld [vmem:[%s1621_s1 + $0x30] sm:$0xff]   ;;  %v1267_v29 = vld [vmem:[%s1621_s1 + $0x38] sm:$0xff]   ;;  %678 = vmatprep.mubr.bf16.mxu0 %v1271_v32  ;;  %v1273_v34 = vld [vmem:[%s1621_s1 + $0x140] sm:$0xff]  }
   0xb   :  { %1087 = vmatpush3.bf16.msra.mxu0 %v1247_v9  ;;  %v1264_v26 = vld [vmem:[%s1621_s1 + $0xf0] sm:$0xff]   ;;  %v1268_v30 = vld [vmem:[%s1621_s1 + $0xf8] sm:$0xff]   ;;  %v1274_v35 = vld [vmem:[%s1622_s0 + $0x8] ss:$28 sps:$4 sm:$0xff]  }
   0xc   :  { %1088 = vmatprep.subr.bf16.mxu0 %v1250_v12  ;;  %v1265_v27 = vld [vmem:[%s1621_s1 + $0xb0] sm:$0xff]   ;;  %v1269_v31 = vld [vmem:[%s1622_s0] ss:$28 sps:$4 sm:$0xff]   ;;  %v1276_v36 = vld [vmem:[%s1622_s0 + $0xc] ss:$28 sps:$4 sm:$0xff]  }
   0xd   :  { %1127 = vmatpush3.bf16.msra.mxu1 %v1249_v11  ;;  %v1272_v33 = vld [vmem:[%s1621_s1 + $0xb8] sm:$0xff]   ;;  %v1277_v37 = vld [vmem:[%s1621_s1 + $0x100] sm:$0xff]   ;;  %743 = vmatprep.mubr.bf16.mxu1 %v1276_v36  ;;  %v1278_v38 = vld [vmem:[%s1621_s1 + $0x148] sm:$0xff]  }
   0xe   :  { %1128 = vmatprep.subr.bf16.mxu1 %v1252_v14  ;;  %v1279_v39 = vld [vmem:[%s1621_s1 + $0x180] sm:$0xff]   ;;  %v1280_v40 = vld [vmem:[%s1621_s1 + $0x108] sm:$0xff]   ;;  %v1281_v41 = vld [vmem:[%s1622_s0 + $0x3c] ss:$28 sps:$4 sm:$0xff]  }
   0xf   :  { %1089 = vmatpush3.bf16.msra.mxu0 %v1251_v13  ;;  %v1283_v42 = vld [vmem:[%s1622_s0 + $0x38] ss:$28 sps:$4 sm:$0xff]   ;;  %v1285_v44 = vld [vmem:[%s1621_s1 + $0x188] sm:$0xff]   ;;  %v1286_v45 = vld [vmem:[%s1622_s0 + $0x44] ss:$28 sps:$4 sm:$0xff]  }
  0x10   :  { %1090 = vmatprep.subr.bf16.mxu0 %v1254_v16  ;;  %v1284_v43 = vld [vmem:[%s1621_s1 + $0x150] sm:$0xff]   ;;  %v1289_v47 = vld [vmem:[%s1622_s0 + $0x40] ss:$28 sps:$4 sm:$0xff]   ;;  %v1302_v58 = vld [vmem:[%s1621_s1 + $0x168] sm:$0xff]  }
  0x11   :  { %1129 = vmatpush3.bf16.msra.mxu1 %v1253_v15  ;;  %v1288_v46 = vld [vmem:[%s1621_s1 + $0x110] sm:$0xff]   ;;  %v1290_v48 = vld [vmem:[%s1621_s1 + $0x158] sm:$0xff]   ;;  %v1296_v53 = vld [vmem:[%s1621_s1 + $0x160] sm:$0xff]  }
  0x12   :  { %1130 = vmatprep.subr.bf16.mxu1 %v1256_v18  ;;  %v1291_v49 = vld [vmem:[%s1621_s1 + $0x190] sm:$0xff]   ;;  %v1292_v50 = vld [vmem:[%s1621_s1 + $0x118] sm:$0xff]   ;;  %v1300_v56 = vld [vmem:[%s1621_s1 + $0x120] sm:$0xff]  }
  0x13   :  { %1091 = vmatpush3.bf16.msra.mxu0 %v1255_v17  ;;  %v1293_v51 = vld [vmem:[%s1622_s0 + $0x74] ss:$28 sps:$4 sm:$0xff]   ;;  %v1297_v54 = vld [vmem:[%s1621_s1 + $0x198] sm:$0xff]   ;;  %v1303_v59 = vld [vmem:[%s1621_s1 + $0x1a0] sm:$0xff]  }
  0x14   :  { %1092 = vmatprep.subr.bf16.mxu0 %v1258_v20  ;;  %v1295_v52 = vld [vmem:[%s1622_s0 + $0x70] ss:$28 sps:$4 sm:$0xff]   ;;  %v1298_v55 = vld [vmem:[%s1622_s0 + $0x7c] ss:$28 sps:$4 sm:$0xff]   ;;  %v1307_v62 = vld [vmem:[%s1622_s0 + $0xa8] ss:$28 sps:$4 sm:$0xff]  }
  0x15   :  { %1131 = vmatpush3.bf16.msra.mxu1 %v1257_v19  ;;  %v1301_v57 = vld [vmem:[%s1622_s0 + $0x78] ss:$28 sps:$4 sm:$0xff]   ;;  %v1304_v60 = vld [vmem:[%s1621_s1 + $0x128] sm:$0xff]   ;;  %v1326_v15 = vld [vmem:[%s1622_s0 + $0x84] ss:$28 sps:$4 sm:$0xff]  }
  0x16   :  { %1132 = vmatprep.subr.bf16.mxu1 %v1260_v22  ;;  %v1305_v61 = vld [vmem:[%s1622_s0 + $0xac] ss:$28 sps:$4 sm:$0xff]   ;;  %v1308_v63 = vld [vmem:[%s1621_s1 + $0x170] sm:$0xff]   ;;  %v1314_v4 = vld [vmem:[%s1621_s1 + $0x178] sm:$0xff]  }
  0x17   :  { %1093 = vmatpush3.bf16.msra.mxu0 %v1259_v21  ;;  %v1309_v0 = vld [vmem:[%s1621_s1 + $0x1a8] sm:$0xff]   ;;  %v1310_v1 = vld [vmem:[%s1622_s0 + $0xb4] ss:$28 sps:$4 sm:$0xff]   ;;  %v1316_v6 = vld [vmem:[%s1621_s1 + $0x138] sm:$0xff]  }
  0x18   :  { %1094 = vmatprep.subr.bf16.mxu0 %v1262_v24  ;;  %v1312_v2 = vld [vmem:[%s1621_s1 + $0x130] sm:$0xff]   ;;  %v1320_v9 = vld [vmem:[%s1621_s1 + $0x1b8] sm:$0xff]   ;;  %v1323_v12 = vld [vmem:[%s1622_s0 + $0x4c] ss:$28 sps:$4 sm:$0xff]  }
  0x19   :  { %1133 = vmatpush3.bf16.msra.mxu1 %v1261_v23  ;;  %v1313_v3 = vld [vmem:[%s1622_s0 + $0xb0] ss:$28 sps:$4 sm:$0xff]   ;;  %v1321_v10 = vld [vmem:[%s1622_s0 + $0x18] ss:$28 sps:$4 sm:$0xff]   ;;  %v1329_v13 = vld [vmem:[%s1622_s0 + $0x88] ss:$28 sps:$4 sm:$0xff]  }
  0x1a   :  { %1134 = vmatprep.subr.bf16.mxu1 %v1264_v26  ;;  %v1315_v5 = vld [vmem:[%s1621_s1 + $0x1b0] sm:$0xff]   ;;  %v1325_v14 = vld [vmem:[%s1622_s0 + $0x48] ss:$28 sps:$4 sm:$0xff]   ;;  %v1330_v16 = vld [vmem:[%s1622_s0 + $0xc0] ss:$28 sps:$4 sm:$0xff]  }
  0x1b   :  { %1095 = vmatpush3.bf16.msra.mxu0 %v1263_v25  ;;  %v1317_v7 = vld [vmem:[%s1622_s0 + $0x10] ss:$28 sps:$4 sm:$0xff]   ;;  %v1328_v17 = vld [vmem:[%s1622_s0 + $0x80] ss:$28 sps:$4 sm:$0xff]   ;;  %v1333_v19 = vld [vmem:[%s1622_s0 + $0xb8] ss:$28 sps:$4 sm:$0xff]  }
  0x1c   :  { %1096 = vmatprep.subr.bf16.mxu0 %v1266_v28  ;;  %v1319_v8 = vld [vmem:[%s1622_s0 + $0x14] ss:$28 sps:$4 sm:$0xff]   ;;  %v1331_v18 = vld [vmem:[%s1622_s0 + $0xbc] ss:$28 sps:$4 sm:$0xff]   ;;  %v958_v21 = vld [vmem:[%s1623_s2] ss:$0 sm:$0xff] }
  0x1d   :  { %1135 = vmatpush3.bf16.msra.mxu1 %v1265_v27  ;;  %v1322_v11 = vld [vmem:[%s1622_s0 + $0x50] ss:$28 sps:$4 sm:$0xff]  }
  0x1e   :  { %1136 = vmatprep.subr.bf16.mxu1 %v1268_v30 }
  0x1f   :  { %1097 = vmatpush3.bf16.msra.mxu0 %v1267_v29 }
  0x20   :  { %1162 = vmatprep.subr.bf16.mxu0 %v1273_v34 }
  0x21   :  { %1137 = vmatpush3.bf16.msra.mxu1 %v1272_v33 }
  0x22   :  { %679 = vmatmul.mubr.bf16.vlgmr.msra.gmra.mrb[0].mxu0 %v1269_v31  ;;  %1214 = vmatprep.subr.bf16.mxu1 %v1279_v39 }
  0x23   :  { %1163 = vmatpush3.bf16.msra.mxu0 %v1277_v37  ;;  %686 = vmatprep.mubr.bf16.mxu0 %v1281_v41 }
  0x24   :  { %744 = vmatmul.mubr.bf16.vlgmr.msra.gmra.mrb[0].mxu1 %v1274_v35  ;;  %1164 = vmatprep.subr.bf16.mxu0 %v1278_v38 }
  0x25   :  { %1215 = vmatpush3.bf16.msra.mxu1 %v1279_v39  ;;  %751 = vmatprep.mubr.bf16.mxu1 %v1286_v45 }
  0x26   :  { %1216 = vmatprep.subr.bf16.mxu1 %v1285_v44 }
  0x27   :  { %1165 = vmatpush3.bf16.msra.mxu0 %v1280_v40 }
  0x28   :  { %1166 = vmatprep.subr.bf16.mxu0 %v1284_v43 }
  0x29   :  { %1217 = vmatpush3.bf16.msra.mxu1 %v1285_v44 }
  0x2a   :  { %687 = vmatmul.mubr.bf16.gmra.mrb[4].mxu0 %v1283_v42  ;;  %1218 = vmatprep.subr.bf16.mxu1 %v1291_v49 }
  0x2b   :  { %1167 = vmatpush3.bf16.msra.mxu0 %v1288_v46  ;;  %694 = vmatprep.mubr.bf16.mxu0 %v1293_v51 }
  0x2c   :  { %752 = vmatmul.mubr.bf16.gmra.mrb[4].mxu1 %v1289_v47  ;;  %1168 = vmatprep.subr.bf16.mxu0 %v1290_v48 }
  0x2d   :  { %1219 = vmatpush3.bf16.msra.mxu1 %v1291_v49  ;;  %759 = vmatprep.mubr.bf16.mxu1 %v1298_v55 }
  0x2e   :  { %1220 = vmatprep.subr.bf16.mxu1 %v1297_v54 }
  0x2f   :  { %1169 = vmatpush3.bf16.msra.mxu0 %v1292_v50 }
  0x30   :  { %1170 = vmatprep.subr.bf16.mxu0 %v1296_v53 }
  0x31   :  { %1221 = vmatpush3.bf16.msra.mxu1 %v1297_v54 }
  0x32   :  { %695 = vmatmul.mubr.bf16.gmra.mrb[8].mxu0 %v1295_v52  ;;  %1222 = vmatprep.subr.bf16.mxu1 %v1303_v59 }
  0x33   :  { %1171 = vmatpush3.bf16.msra.mxu0 %v1300_v56  ;;  %702 = vmatprep.mubr.bf16.mxu0 %v1305_v61 }
  0x34   :  { %760 = vmatmul.mubr.bf16.gmra.mrb[8].mxu1 %v1301_v57  ;;  %1172 = vmatprep.subr.bf16.mxu0 %v1302_v58 }
  0x35   :  { %1223 = vmatpush3.bf16.msra.mxu1 %v1303_v59  ;;  %767 = vmatprep.mubr.bf16.mxu1 %v1310_v1 }
  0x36   :  { %1224 = vmatprep.subr.bf16.mxu1 %v1309_v0 }
  0x37   :  { %1173 = vmatpush3.bf16.msra.mxu0 %v1304_v60 }
  0x38   :  { %1174 = vmatprep.subr.bf16.mxu0 %v1308_v63 }
  0x39   :  { %1225 = vmatpush3.bf16.msra.mxu1 %v1309_v0 }
  0x3a   :  { %703 = vmatmul.mubr.bf16.gmra.mrb[12].mxu0 %v1307_v62  ;;  %1226 = vmatprep.subr.bf16.mxu1 %v1315_v5 }
  0x3b   :  { %1175 = vmatpush3.bf16.msra.mxu0 %v1312_v2  ;;  %808 = vmatprep.mubr.bf16.mxu0 %v1319_v8 }
  0x3c   :  { %768 = vmatmul.mubr.bf16.gmra.mrb[12].mxu1 %v1313_v3  ;;  %1176 = vmatprep.subr.bf16.mxu0 %v1314_v4 }
  0x3d   :  { %1227 = vmatpush3.bf16.msra.mxu1 %v1315_v5  ;;  %1230 = vmatprep.mubr.bf16.mxu1 %v1321_v10 }
  0x3e   :  { %1228 = vmatprep.subr.bf16.mxu1 %v1320_v9 }
  0x3f   :  { %1177 = vmatpush3.bf16.msra.mxu0 %v1316_v6 }
  0x41   :  { %1229 = vmatpush3.bf16.msra.mxu1 %v1320_v9 }
  0x42   :  { %809 = vmatmul.mubr.bf16.vlgmr.msra.gmra.mrb[16].mxu0 %v1317_v7 }
  0x43   :  { %816 = vmatprep.mubr.bf16.mxu0 %v1323_v12 }
  0x44   :  { %1231 = vmatmul.mubr.bf16.vlgmr.msra.gmra.mrb[16].mxu1 %v1322_v11 }
  0x45   :  { %1234 = vmatprep.mubr.bf16.mxu1 %v1329_v13 }
  0x4a   :  { %817 = vmatmul.mubr.bf16.gmra.mrb[20].mxu0 %v1325_v14 }
  0x4b   :  { %824 = vmatprep.mubr.bf16.mxu0 %v1326_v15 }
  0x4c   :  { %1235 = vmatmul.mubr.bf16.gmra.mrb[20].mxu1 %v1330_v16 }
  0x52   :  { %825 = vmatmul.mubr.bf16.gmra.mrb[24].mxu0 %v1328_v17 }
  0x53   :  { %832 = vmatprep.mubr.bf16.mxu0 %v1331_v18 }
  0x5a   :  { %833 = vmatmul.mubr.bf16.gmra.mrb[28].mxu0 %v1333_v19 }
  0xf5   :  { %v1098_v20 = vpop.f32.mrb[0].mxu0 }
  0xf6   :  { %v1099_v22 = vpop.f32.mrb[1].mxu0 }
  0xf7   :  { %v1100_v23 = vadd.f32 %v1099_v22, %v1098_v20  ;;  %v1101_v24 = vpop.f32.mrb[2].mxu0  ;;  %v1138_v25 = vpop.f32.mrb[0].mxu1 }
  0xf8   :  { %v1102_v26 = vpop.f32.mrb[3].mxu0  ;;  %v1139_v29 = vpop.f32.mrb[1].mxu1 }
  0xf9   :  { %v681_v27 = vadd.f32 %v1100_v23, %v958_v21  ;;  %v1103_v28 = vadd.f32 %v1102_v26, %v1101_v24  ;;  %v1140_v30 = vadd.f32 %v1139_v29, %v1138_v25  ;;  %v1141_v31 = vpop.f32.mrb[2].mxu1 }
  0xfa   :  { %v1142_v33 = vpop.f32.mrb[3].mxu1 }
  0xfb   :  { %v684_v32 = vadd.f32 %v1103_v28, %v958_v21  ;;  %v746_v34 = vadd.f32 %v1140_v30, %v681_v27  ;;  %v1143_v35 = vadd.f32 %v1142_v33, %v1141_v31 }
  0xfd   :  { %v1104_v36 = vpop.f32.mrb[4].mxu0  ;;  %v749_v37 = vadd.f32 %v1143_v35, %v684_v32 }
  0xfe   :  { %v1105_v38 = vpop.f32.mrb[5].mxu0 }
  0xff   :  { %v1106_v39 = vadd.f32 %v1105_v38, %v1104_v36  ;;  %v1107_v40 = vpop.f32.mrb[6].mxu0  ;;  %v1144_v43 = vpop.f32.mrb[4].mxu1 }
 0x100   :  { %v1108_v41 = vpop.f32.mrb[7].mxu0  ;;  %v1145_v45 = vpop.f32.mrb[5].mxu1 }
 0x101   :  { %v689_v42 = vadd.f32 %v1106_v39, %v958_v21  ;;  %v1109_v44 = vadd.f32 %v1108_v41, %v1107_v40  ;;  %v1146_v47 = vadd.f32 %v1145_v45, %v1144_v43  ;;  %v1147_v48 = vpop.f32.mrb[6].mxu1 }
 0x102   :  { %v1148_v49 = vpop.f32.mrb[7].mxu1 }
 0x103   :  { %v692_v46 = vadd.f32 %v1109_v44, %v958_v21  ;;  %v754_v50 = vadd.f32 %v1146_v47, %v689_v42  ;;  %v1149_v51 = vadd.f32 %v1148_v49, %v1147_v48 }
 0x105   :  { %v1110_v52 = vpop.f32.mrb[8].mxu0  ;;  %v757_v53 = vadd.f32 %v1149_v51, %v692_v46 }
 0x106   :  { %v1111_v54 = vpop.f32.mrb[9].mxu0 }
 0x107   :  { %v1112_v55 = vadd.f32 %v1111_v54, %v1110_v52  ;;  %v1113_v56 = vpop.f32.mrb[10].mxu0  ;;  %v1150_v57 = vpop.f32.mrb[8].mxu1 }
 0x108   :  { %v1114_v58 = vpop.f32.mrb[11].mxu0  ;;  %v1151_v61 = vpop.f32.mrb[9].mxu1 }
 0x109   :  { %v697_v59 = vadd.f32 %v1112_v55, %v958_v21  ;;  %v1115_v60 = vadd.f32 %v1114_v58, %v1113_v56  ;;  %v1152_v62 = vadd.f32 %v1151_v61, %v1150_v57  ;;  %v1153_v63 = vpop.f32.mrb[10].mxu1 }
 0x10a   :  { %v1154_v1 = vpop.f32.mrb[11].mxu1 }
 0x10b   :  { %v700_v0 = vadd.f32 %v1115_v60, %v958_v21  ;;  %v762_v2 = vadd.f32 %v1152_v62, %v697_v59  ;;  %v1155_v3 = vadd.f32 %v1154_v1, %v1153_v63 }
 0x10d   :  { %v1116_v4 = vpop.f32.mrb[12].mxu0  ;;  %v765_v5 = vadd.f32 %v1155_v3, %v700_v0 }
 0x10e   :  { %v1117_v6 = vpop.f32.mrb[13].mxu0 }
 0x10f   :  { %v1118_v7 = vadd.f32 %v1117_v6, %v1116_v4  ;;  %v1119_v8 = vpop.f32.mrb[14].mxu0  ;;  %v1156_v11 = vpop.f32.mrb[12].mxu1 }
 0x110   :  { %v1120_v9 = vpop.f32.mrb[15].mxu0  ;;  %v1157_v13 = vpop.f32.mrb[13].mxu1 }
 0x111   :  { %v705_v10 = vadd.f32 %v1118_v7, %v958_v21  ;;  %v1121_v12 = vadd.f32 %v1120_v9, %v1119_v8  ;;  %v1158_v15 = vadd.f32 %v1157_v13, %v1156_v11  ;;  %v1159_v16 = vpop.f32.mrb[14].mxu1 }
 0x112   :  { %v1160_v17 = vpop.f32.mrb[15].mxu1 }
 0x113   :  { %v708_v14 = vadd.f32 %v1121_v12, %v958_v21  ;;  %v770_v18 = vadd.f32 %v1158_v15, %v705_v10  ;;  %v1161_v19 = vadd.f32 %v1160_v17, %v1159_v16 }
 0x115   :  { %v773_v20 = vadd.f32 %v1161_v19, %v708_v14  ;;  %v1178_v22 = vpop.f32.mrb[16].mxu0 }
 0x116   :  { %v1179_v23 = vpop.f32.mrb[17].mxu0 }
 0x117   :  { %v1180_v24 = vadd.f32 %v1179_v23, %v1178_v22  ;;  %v1181_v25 = vpop.f32.mrb[18].mxu0  ;;  %v1232_v27 = vpop.f32.mrb[16].mxu1 }
 0x118   :  { %v1182_v26 = vpop.f32.mrb[19].mxu0  ;;  %v875_v30 = vpop.f32.mrb[17].mxu1 }
 0x119   :  { %v1183_v28 = vadd.f32 %v1182_v26, %v1181_v25  ;;  %v811_v29 = vadd.f32 %v1180_v24, %v746_v34  ;;  %v1233_v31 = vpop.f32.mrb[18].mxu1 }
 0x11a   :  { %v878_v35 = vpop.f32.mrb[19].mxu1 }
 0x11b   :  { %v876_v32 = vadd.f32 %v875_v30, %v811_v29  ;;  %v814_v33 = vadd.f32 %v1183_v28, %v749_v37 }
 0x11d   :  { %v879_v21 = vadd.f32 %v878_v35, %v814_v33  ;;  %v1184_v36 = vpop.f32.mrb[20].mxu0  ;;  %v906_v39 = vmax.f32 %v876_v32, 0.0 }
 0x11e   :  { %v1185_v38 = vpop.f32.mrb[21].mxu0 }
 0x11f   :  { %v907_v40 = vmax.f32 %v879_v21, 0.0  ;;  %v1186_v41 = vadd.f32 %v1185_v38, %v1184_v36  ;;  %v1187_v42 = vpop.f32.mrb[22].mxu0  ;;  %v1236_v44 = vpop.f32.mrb[20].mxu1 }
 0x120   :  { %v1188_v43 = vpop.f32.mrb[23].mxu0  ;;  %v891_v48 = vpop.f32.mrb[21].mxu1 }
 0x121   :  { %v1062_v45 = vpack.c.bf16 %v907_v40, %v906_v39  ;;  %v819_v46 = vadd.f32 %v1186_v41, %v754_v50  ;;  %v1189_v47 = vadd.f32 %v1188_v43, %v1187_v42  ;;  %v1237_v49 = vpop.f32.mrb[22].mxu1 }
 0x122   :  { %v894_v51 = vpop.f32.mrb[23].mxu1 }
 0x123   :  { %1063 = vst [vmem:[%s1624_s3] sm:$0xff] %v1062_v45   ;;  %v884_v34 = vadd.f32 %v1232_v27, %v819_v46  ;;  %v822_v37 = vadd.f32 %v1189_v47, %v757_v53 }
 0x125   :  { %v887_v52 = vadd.f32 %v1233_v31, %v822_v37  ;;  %v1190_v54 = vpop.f32.mrb[24].mxu0  ;;  %v908_v56 = vmax.f32 %v884_v34, 0.0 }
 0x126   :  { %v1191_v55 = vpop.f32.mrb[25].mxu0 }
 0x127   :  { %v909_v57 = vmax.f32 %v887_v52, 0.0  ;;  %v1192_v58 = vadd.f32 %v1191_v55, %v1190_v54  ;;  %v1193_v59 = vpop.f32.mrb[26].mxu0 }
 0x128   :  { %v1194_v60 = vpop.f32.mrb[27].mxu0 }
 0x129   :  { %v1067_v61 = vpack.c.bf16 %v909_v57, %v908_v56  ;;  %v1195_v50 = vadd.f32 %v1194_v60, %v1193_v59  ;;  %v827_v62 = vadd.f32 %v1192_v58, %v762_v2 }
 0x12b   :  { %1079 = vst [vmem:[%s1624_s3 + $0x8] sm:$0xff] %v1067_v61   ;;  %v892_v63 = vadd.f32 %v891_v48, %v827_v62  ;;  %v830_v0 = vadd.f32 %v1195_v50, %v765_v5 }
 0x12d   :  { %v895_v1 = vadd.f32 %v894_v51, %v830_v0  ;;  %v1196_v53 = vpop.f32.mrb[28].mxu0  ;;  %v910_v4 = vmax.f32 %v892_v63, 0.0 }
 0x12e   :  { %v1197_v3 = vpop.f32.mrb[29].mxu0 }
 0x12f   :  { %v911_v6 = vmax.f32 %v895_v1, 0.0  ;;  %v1198_v7 = vadd.f32 %v1197_v3, %v1196_v53  ;;  %v1199_v8 = vpop.f32.mrb[30].mxu0 }
 0x130   :  { %v1200_v9 = vpop.f32.mrb[31].mxu0 }
 0x131   :  { %v1072_v10 = vpack.c.bf16 %v911_v6, %v910_v4  ;;  %v835_v11 = vadd.f32 %v1198_v7, %v770_v18  ;;  %v1201_v12 = vadd.f32 %v1200_v9, %v1199_v8 }
 0x133   :  { %1080 = vst [vmem:[%s1624_s3 + $0x10] sm:$0xff] %v1072_v10   ;;  %v900_v2 = vadd.f32 %v1236_v44, %v835_v11  ;;  %v838_v13 = vadd.f32 %v1201_v12, %v773_v20 }
 0x135   :  { %v903_v14 = vadd.f32 %v1237_v49, %v838_v13  ;;  %v912_v15 = vmax.f32 %v900_v2, 0.0 }
 0x137   :  { %v913_v5 = vmax.f32 %v903_v14, 0.0 }
 0x139   :  { %v1077_v16 = vpack.c.bf16 %v913_v5, %v912_v15 }
 0x13b   :  { %1081 = vst [vmem:[%s1624_s3 + $0x18] sm:$0xff] %v1077_v16  }

// kernel: reg3d_forward.16
= control target key start
LH: loop header
LB: loop body
LE: loop exit
PB: predicated region body
PF: predicated region fallthrough
CT: control target
= control target key end

     0   :  { %v890_v42 = vmov 0.0   ;;  %vm891_vm0 = vmmov 0   ;;  %s1098_s1 = inlined_call_operand.vmem [shape: bf16[896,128], index: 1, kind: input, shape index: {}]   ;;  %s1099_s0 = inlined_call_operand.vmem [shape: bf16[8,896], index: 0, kind: input, shape index: {}]   ;;  %s1100_s2 = inlined_call_operand.vmem [shape: f32[1,128], index: 2, kind: input, shape index: {}]   ;;  %s1101_s3 = inlined_call_operand.vmem [shape: bf16[8,128], index: 3, kind: output, shape index: {}]  }
   0x1   :  { %v827_v0 = vld [vmem:[%s1098_s1 + $0x40] sm:$0xff]   ;;  %v831_v4 = vld [vmem:[%s1098_s1 + $0x48] sm:$0xff]   ;;  %v835_v8 = vld [vmem:[%s1098_s1 + $0x50] sm:$0xff]  }
   0x2   :  { %v828_v1 = vld [vmem:[%s1098_s1] sm:$0xff]   ;;  %730 = vmatprep.subr.bf16.mxu0 %v827_v0  ;;  %v832_v5 = vld [vmem:[%s1098_s1 + $0x8] sm:$0xff]   ;;  %v836_v9 = vld [vmem:[%s1098_s1 + $0x10] sm:$0xff]  }
   0x3   :  { %v829_v2 = vld [vmem:[%s1098_s1 + $0xc0] sm:$0xff]   ;;  %731 = vmatpush3.bf16.msra.mxu0 %v828_v1  ;;  %v833_v6 = vld [vmem:[%s1098_s1 + $0xc8] sm:$0xff]   ;;  %v837_v10 = vld [vmem:[%s1098_s1 + $0xd0] sm:$0xff]  }
   0x4   :  { %v830_v3 = vld [vmem:[%s1098_s1 + $0x80] sm:$0xff]   ;;  %752 = vmatprep.subr.bf16.mxu1 %v829_v2  ;;  %732 = vmatprep.subr.bf16.mxu0 %v831_v4  ;;  %v834_v7 = vld [vmem:[%s1098_s1 + $0x88] sm:$0xff]   ;;  %v838_v11 = vld [vmem:[%s1098_s1 + $0x90] sm:$0xff]  }
   0x5   :  { %753 = vmatpush3.bf16.msra.mxu1 %v830_v3  ;;  %v839_v12 = vld [vmem:[%s1098_s1 + $0x58] sm:$0xff]   ;;  %v843_v16 = vld [vmem:[%s1098_s1 + $0x60] sm:$0xff]   ;;  %v847_v20 = vld [vmem:[%s1098_s1 + $0x68] sm:$0xff]  }
   0x6   :  { %754 = vmatprep.subr.bf16.mxu1 %v833_v6  ;;  %v840_v13 = vld [vmem:[%s1098_s1 + $0x18] sm:$0xff]   ;;  %v844_v17 = vld [vmem:[%s1098_s1 + $0x20] sm:$0xff]   ;;  %v848_v21 = vld [vmem:[%s1098_s1 + $0x28] sm:$0xff]  }
   0x7   :  { %733 = vmatpush3.bf16.msra.mxu0 %v832_v5  ;;  %v841_v14 = vld [vmem:[%s1098_s1 + $0xd8] sm:$0xff]   ;;  %v845_v18 = vld [vmem:[%s1098_s1 + $0xe0] sm:$0xff]   ;;  %v849_v22 = vld [vmem:[%s1098_s1 + $0xe8] sm:$0xff]  }
   0x8   :  { %734 = vmatprep.subr.bf16.mxu0 %v835_v8  ;;  %v842_v15 = vld [vmem:[%s1098_s1 + $0x98] sm:$0xff]   ;;  %v846_v19 = vld [vmem:[%s1098_s1 + $0xa0] sm:$0xff]   ;;  %v850_v23 = vld [vmem:[%s1098_s1 + $0xa8] sm:$0xff]  }
   0x9   :  { %755 = vmatpush3.bf16.msra.mxu1 %v834_v7  ;;  %v851_v24 = vld [vmem:[%s1098_s1 + $0x70] sm:$0xff]   ;;  %v855_v28 = vld [vmem:[%s1098_s1 + $0x78] sm:$0xff]   ;;  %v15_v31 = vld [vmem:[%s1099_s0] sm:$0xff] }
   0xa   :  { %756 = vmatprep.subr.bf16.mxu1 %v837_v10  ;;  %v852_v25 = vld [vmem:[%s1098_s1 + $0x30] sm:$0xff]   ;;  %v856_v29 = vld [vmem:[%s1098_s1 + $0x38] sm:$0xff]   ;;  %v667_v32 = vcombine.low %v15_v31, %v15_v31  ;;  %v668_v33 = vcombine.high %v15_v31, %v15_v31  ;;  %v861_v35 = vld [vmem:[%s1098_s1 + $0x140] sm:$0xff]  }
   0xb   :  { %735 = vmatpush3.bf16.msra.mxu0 %v836_v9  ;;  %v853_v26 = vld [vmem:[%s1098_s1 + $0xf0] sm:$0xff]   ;;  %v857_v30 = vld [vmem:[%s1098_s1 + $0xf8] sm:$0xff]   ;;  %v16_v36 = vld [vmem:[%s1099_s0 + $0x8] sm:$0xff] }
   0xc   :  { %736 = vmatprep.subr.bf16.mxu0 %v839_v12  ;;  %v854_v27 = vld [vmem:[%s1098_s1 + $0xb0] sm:$0xff]   ;;  %v860_v34 = vld [vmem:[%s1098_s1 + $0xb8] sm:$0xff]   ;;  %531 = vmatprep.mubr.bf16.mxu0 %v668_v33  ;;  %v669_v37 = vcombine.low %v16_v36, %v16_v36  ;;  %v670_v38 = vcombine.high %v16_v36, %v16_v36  ;;  %v864_v39 = vld [vmem:[%s1098_s1 + $0x100] sm:$0xff]  }
   0xd   :  { %757 = vmatpush3.bf16.msra.mxu1 %v838_v11  ;;  %v865_v40 = vld [vmem:[%s1098_s1 + $0x180] sm:$0xff]   ;;  %v866_v41 = vld [vmem:[%s1098_s1 + $0x148] sm:$0xff]   ;;  %v869_v45 = vld [vmem:[%s1098_s1 + $0x150] sm:$0xff]  }
   0xe   :  { %758 = vmatprep.subr.bf16.mxu1 %v841_v14  ;;  %571 = vmatprep.mubr.bf16.mxu1 %v670_v38  ;;  %v867_v43 = vld [vmem:[%s1098_s1 + $0x108] sm:$0xff]   ;;  %v870_v46 = vld [vmem:[%s1098_s1 + $0x110] sm:$0xff]   ;;  %v872_v48 = vld [vmem:[%s1098_s1 + $0x158] sm:$0xff]  }
   0xf   :  { %737 = vmatpush3.bf16.msra.mxu0 %v840_v13  ;;  %v868_v44 = vld [vmem:[%s1098_s1 + $0x188] sm:$0xff]   ;;  %v871_v47 = vld [vmem:[%s1098_s1 + $0x190] sm:$0xff]   ;;  %v873_v49 = vld [vmem:[%s1098_s1 + $0x118] sm:$0xff]  }
  0x10   :  { %738 = vmatprep.subr.bf16.mxu0 %v843_v16  ;;  %v875_v50 = vld [vmem:[%s1098_s1 + $0x160] sm:$0xff]   ;;  %v874_v51 = vld [vmem:[%s1098_s1 + $0x198] sm:$0xff]   ;;  %v878_v53 = vld [vmem:[%s1098_s1 + $0x168] sm:$0xff]  }
  0x11   :  { %759 = vmatpush3.bf16.msra.mxu1 %v842_v15  ;;  %v876_v52 = vld [vmem:[%s1098_s1 + $0x120] sm:$0xff]   ;;  %v879_v55 = vld [vmem:[%s1098_s1 + $0x128] sm:$0xff]   ;;  %v881_v56 = vld [vmem:[%s1098_s1 + $0x170] sm:$0xff]  }
  0x12   :  { %760 = vmatprep.subr.bf16.mxu1 %v845_v18  ;;  %v877_v54 = vld [vmem:[%s1098_s1 + $0x1a0] sm:$0xff]   ;;  %v880_v57 = vld [vmem:[%s1098_s1 + $0x1a8] sm:$0xff]   ;;  %v17_v58 = vld [vmem:[%s1099_s0 + $0x10] sm:$0xff] }
  0x13   :  { %739 = vmatpush3.bf16.msra.mxu0 %v844_v17  ;;  %v882_v59 = vld [vmem:[%s1098_s1 + $0x130] sm:$0xff]   ;;  %v672_v60 = vcombine.high %v17_v58, %v17_v58  ;;  %v884_v61 = vld [vmem:[%s1098_s1 + $0x178] sm:$0xff]   ;;  %v671_v1 = vcombine.low %v17_v58, %v17_v58  ;;  %v666_v4 = vld [vmem:[%s1100_s2] ss:$0 sm:$0xff] }
  0x14   :  { %740 = vmatprep.subr.bf16.mxu0 %v847_v20  ;;  %v883_v62 = vld [vmem:[%s1098_s1 + $0x1b0] sm:$0xff]   ;;  %v885_v63 = vld [vmem:[%s1098_s1 + $0x138] sm:$0xff]  }
  0x15   :  { %761 = vmatpush3.bf16.msra.mxu1 %v846_v19  ;;  %v888_v0 = vld [vmem:[%s1098_s1 + $0x1b8] sm:$0xff]  }
  0x16   :  { %762 = vmatprep.subr.bf16.mxu1 %v849_v22  ;;  %v889_v2 = vld [vmem:[%s1099_s0 + $0x18] ss:$0 sps:$4 sm:$0xff]  }
  0x17   :  { %741 = vmatpush3.bf16.msra.mxu0 %v848_v21 }
  0x18   :  { %742 = vmatprep.subr.bf16.mxu0 %v851_v24 }
  0x19   :  { %763 = vmatpush3.bf16.msra.mxu1 %v850_v23 }
  0x1a   :  { %764 = vmatprep.subr.bf16.mxu1 %v853_v26 }
  0x1b   :  { %743 = vmatpush3.bf16.msra.mxu0 %v852_v25 }
  0x1c   :  { %744 = vmatprep.subr.bf16.mxu0 %v855_v28 }
  0x1d   :  { %765 = vmatpush3.bf16.msra.mxu1 %v854_v27 }
  0x1e   :  { %766 = vmatprep.subr.bf16.mxu1 %v857_v30 }
  0x1f   :  { %745 = vmatpush3.bf16.msra.mxu0 %v856_v29 }
  0x20   :  { %774 = vmatprep.subr.bf16.mxu0 %v861_v35 }
  0x21   :  { %767 = vmatpush3.bf16.msra.mxu1 %v860_v34 }
  0x22   :  { %532 = vmatmul.mubr.bf16.vlgmr.msra.gmra.mrb[0].mxu0 %v667_v32  ;;  %805 = vmatprep.subr.bf16.mxu1 %v890_v42 }
  0x23   :  { %775 = vmatpush3.bf16.msra.mxu0 %v864_v39  ;;  %611 = vmatprep.mubr.bf16.mxu0 %v672_v60 }
  0x24   :  { %572 = vmatmul.mubr.bf16.vlgmr.msra.gmra.mrb[0].mxu1 %v669_v37  ;;  %776 = vmatprep.subr.bf16.mxu0 %v866_v41 }
  0x25   :  { %806 = vmatpush3.bf16.msra.mxu1 %v865_v40  ;;  %821 = vmatprep.mubr.msk.bf16.mxu1 %vm891_vm0, %v890_v42 }
  0x26   :  { %807 = vmatprep.subr.bf16.mxu1 %v890_v42 }
  0x27   :  { %777 = vmatpush3.bf16.msra.mxu0 %v867_v43 }
  0x28   :  { %778 = vmatprep.subr.bf16.mxu0 %v869_v45 }
  0x29   :  { %808 = vmatpush3.bf16.msra.mxu1 %v868_v44 }
  0x2a   :  { %809 = vmatprep.subr.bf16.mxu1 %v890_v42 }
  0x2b   :  { %779 = vmatpush3.bf16.msra.mxu0 %v870_v46 }
  0x2c   :  { %780 = vmatprep.subr.bf16.mxu0 %v872_v48 }
  0x2d   :  { %810 = vmatpush3.bf16.msra.mxu1 %v871_v47 }
  0x2e   :  { %811 = vmatprep.subr.bf16.mxu1 %v890_v42 }
  0x2f   :  { %781 = vmatpush3.bf16.msra.mxu0 %v873_v49 }
  0x30   :  { %782 = vmatprep.subr.bf16.mxu0 %v875_v50 }
  0x31   :  { %812 = vmatpush3.bf16.msra.mxu1 %v874_v51 }
  0x32   :  { %813 = vmatprep.subr.bf16.mxu1 %v890_v42 }
  0x33   :  { %783 = vmatpush3.bf16.msra.mxu0 %v876_v52 }
  0x34   :  { %784 = vmatprep.subr.bf16.mxu0 %v878_v53 }
  0x35   :  { %814 = vmatpush3.bf16.msra.mxu1 %v877_v54 }
  0x36   :  { %815 = vmatprep.subr.bf16.mxu1 %v890_v42 }
  0x37   :  { %785 = vmatpush3.bf16.msra.mxu0 %v879_v55 }
  0x38   :  { %786 = vmatprep.subr.bf16.mxu0 %v881_v56 }
  0x39   :  { %816 = vmatpush3.bf16.msra.mxu1 %v880_v57 }
  0x3a   :  { %817 = vmatprep.subr.bf16.mxu1 %v890_v42 }
  0x3b   :  { %787 = vmatpush3.bf16.msra.mxu0 %v882_v59 }
  0x3c   :  { %788 = vmatprep.subr.bf16.mxu0 %v884_v61 }
  0x3d   :  { %818 = vmatpush3.bf16.msra.mxu1 %v883_v62 }
  0x3e   :  { %819 = vmatprep.subr.bf16.mxu1 %v890_v42 }
  0x3f   :  { %789 = vmatpush3.bf16.msra.mxu0 %v885_v63 }
  0x41   :  { %820 = vmatpush3.bf16.msra.mxu1 %v888_v0 }
  0x42   :  { %612 = vmatmul.mubr.bf16.vlgmr.msra.gmra.mrb[4].mxu0 %v671_v1 }
  0x44   :  { %822 = vmatmul.mubr.bf16.vlgmr.msra.gmra.mrb[4].mxu1 %v889_v2 }
  0xf5   :  { %v746_v3 = vpop.f32.mrb[0].mxu0 }
  0xf6   :  { %v747_v5 = vpop.f32.mrb[1].mxu0 }
  0xf7   :  { %v748_v6 = vadd.f32 %v747_v5, %v746_v3  ;;  %v749_v7 = vpop.f32.mrb[2].mxu0  ;;  %v768_v8 = vpop.f32.mrb[0].mxu1 }
  0xf8   :  { %v750_v9 = vpop.f32.mrb[3].mxu0  ;;  %v769_v10 = vpop.f32.mrb[1].mxu1 }
  0xf9   :  { %v534_v11 = vadd.f32 %v748_v6, %v666_v4  ;;  %v770_v12 = vadd.f32 %v769_v10, %v768_v8  ;;  %v771_v13 = vpop.f32.mrb[2].mxu1 }
  0xfa   :  { %v772_v14 = vpop.f32.mrb[3].mxu1 }
  0xfb   :  { %v574_v15 = vadd.f32 %v770_v12, %v534_v11 }
 0x115   :  { %v790_v16 = vpop.f32.mrb[4].mxu0 }
 0x116   :  { %v791_v17 = vpop.f32.mrb[5].mxu0 }
 0x117   :  { %v792_v18 = vadd.f32 %v791_v17, %v790_v16  ;;  %v793_v19 = vpop.f32.mrb[6].mxu0  ;;  %v653_v20 = vpop.f32.mrb[4].mxu1 }
 0x118   :  { %v794_v21 = vpop.f32.mrb[7].mxu0  ;;  %v823_v22 = vpop.f32.mrb[5].mxu1 }
 0x119   :  { %v614_v23 = vadd.f32 %v792_v18, %v574_v15  ;;  %v656_v24 = vpop.f32.mrb[6].mxu1 }
 0x11a   :  { %v824_v25 = vpop.f32.mrb[7].mxu1 }
 0x11b   :  { %v654_v26 = vadd.f32 %v653_v20, %v614_v23 }
 0x11d   :  { %v659_v27 = vmax.f32 %v654_v26, 0.0 }
 0x11f   :  { %v660_v28 = vpack.c.bf16 %v659_v27, %v659_v27 }
 0x121   :  { %661 = vst [vmem:[%s1101_s3] sm:$0xf] %v660_v28 }

// kernel: reg3d_forward.17
= control target key start
LH: loop header
LB: loop body
LE: loop exit
PB: predicated region body
PF: predicated region fallthrough
CT: control target
= control target key end

     0   :  { %s2051_s1 = inlined_call_operand.vmem [shape: bf16[1792,128], index: 1, kind: input, shape index: {}]   ;;  %s2052_s0 = inlined_call_operand.vmem [shape: bf16[8,1792], index: 0, kind: input, shape index: {}]   ;;  %s2053_s2 = inlined_call_operand.vmem [shape: f32[1,128], index: 2, kind: input, shape index: {}]   ;;  %s2054_s3 = inlined_call_operand.vmem [shape: bf16[8,128], index: 3, kind: output, shape index: {}]  }
   0x1   :  { %v1542_v0 = vld [vmem:[%s2051_s1 + $0x40] sm:$0xff]   ;;  %v1546_v4 = vld [vmem:[%s2051_s1 + $0x48] sm:$0xff]   ;;  %v1550_v8 = vld [vmem:[%s2051_s1 + $0x50] sm:$0xff]  }
   0x2   :  { %v1543_v1 = vld [vmem:[%s2051_s1] sm:$0xff]   ;;  %1388 = vmatprep.subr.bf16.mxu0 %v1542_v0  ;;  %v1547_v5 = vld [vmem:[%s2051_s1 + $0x8] sm:$0xff]   ;;  %v1551_v9 = vld [vmem:[%s2051_s1 + $0x10] sm:$0xff]  }
   0x3   :  { %v1544_v2 = vld [vmem:[%s2051_s1 + $0xc0] sm:$0xff]   ;;  %1389 = vmatpush3.bf16.msra.mxu0 %v1543_v1  ;;  %v1548_v6 = vld [vmem:[%s2051_s1 + $0xc8] sm:$0xff]   ;;  %v1552_v10 = vld [vmem:[%s2051_s1 + $0xd0] sm:$0xff]  }
   0x4   :  { %v1545_v3 = vld [vmem:[%s2051_s1 + $0x80] sm:$0xff]   ;;  %1410 = vmatprep.subr.bf16.mxu1 %v1544_v2  ;;  %1390 = vmatprep.subr.bf16.mxu0 %v1546_v4  ;;  %v1549_v7 = vld [vmem:[%s2051_s1 + $0x88] sm:$0xff]   ;;  %v1553_v11 = vld [vmem:[%s2051_s1 + $0x90] sm:$0xff]  }
   0x5   :  { %1411 = vmatpush3.bf16.msra.mxu1 %v1545_v3  ;;  %v1554_v12 = vld [vmem:[%s2051_s1 + $0x58] sm:$0xff]   ;;  %v1558_v16 = vld [vmem:[%s2051_s1 + $0x60] sm:$0xff]   ;;  %v1562_v20 = vld [vmem:[%s2051_s1 + $0x68] sm:$0xff]  }
   0x6   :  { %1412 = vmatprep.subr.bf16.mxu1 %v1548_v6  ;;  %v1555_v13 = vld [vmem:[%s2051_s1 + $0x18] sm:$0xff]   ;;  %v1559_v17 = vld [vmem:[%s2051_s1 + $0x20] sm:$0xff]   ;;  %v1563_v21 = vld [vmem:[%s2051_s1 + $0x28] sm:$0xff]  }
   0x7   :  { %1391 = vmatpush3.bf16.msra.mxu0 %v1547_v5  ;;  %v1556_v14 = vld [vmem:[%s2051_s1 + $0xd8] sm:$0xff]   ;;  %v1560_v18 = vld [vmem:[%s2051_s1 + $0xe0] sm:$0xff]   ;;  %v1564_v22 = vld [vmem:[%s2051_s1 + $0xe8] sm:$0xff]  }
   0x8   :  { %1392 = vmatprep.subr.bf16.mxu0 %v1550_v8  ;;  %v1557_v15 = vld [vmem:[%s2051_s1 + $0x98] sm:$0xff]   ;;  %v1561_v19 = vld [vmem:[%s2051_s1 + $0xa0] sm:$0xff]   ;;  %v1565_v23 = vld [vmem:[%s2051_s1 + $0xa8] sm:$0xff]  }
   0x9   :  { %1413 = vmatpush3.bf16.msra.mxu1 %v1549_v7  ;;  %v1566_v24 = vld [vmem:[%s2051_s1 + $0x70] sm:$0xff]   ;;  %v1570_v28 = vld [vmem:[%s2051_s1 + $0x78] sm:$0xff]   ;;  %v15_v31 = vld [vmem:[%s2052_s0] sm:$0xff] }
   0xa   :  { %1414 = vmatprep.subr.bf16.mxu1 %v1552_v10  ;;  %v1567_v25 = vld [vmem:[%s2051_s1 + $0x30] sm:$0xff]   ;;  %v1571_v29 = vld [vmem:[%s2051_s1 + $0x38] sm:$0xff]   ;;  %v1262_v32 = vcombine.low %v15_v31, %v15_v31  ;;  %v1263_v33 = vcombine.high %v15_v31, %v15_v31  ;;  %v1576_v35 = vld [vmem:[%s2051_s1 + $0x140] sm:$0xff]  }
   0xb   :  { %1393 = vmatpush3.bf16.msra.mxu0 %v1551_v9  ;;  %v1568_v26 = vld [vmem:[%s2051_s1 + $0xf0] sm:$0xff]   ;;  %v1572_v30 = vld [vmem:[%s2051_s1 + $0xf8] sm:$0xff]   ;;  %v16_v36 = vld [vmem:[%s2052_s0 + $0x8] sm:$0xff] }
   0xc   :  { %1394 = vmatprep.subr.bf16.mxu0 %v1554_v12  ;;  %v1569_v27 = vld [vmem:[%s2051_s1 + $0xb0] sm:$0xff]   ;;  %v1575_v34 = vld [vmem:[%s2051_s1 + $0xb8] sm:$0xff]   ;;  %1006 = vmatprep.mubr.bf16.mxu0 %v1263_v33  ;;  %v1264_v37 = vcombine.low %v16_v36, %v16_v36  ;;  %v1265_v38 = vcombine.high %v16_v36, %v16_v36  ;;  %v1579_v39 = vld [vmem:[%s2051_s1 + $0x100] sm:$0xff]  }
   0xd   :  { %1415 = vmatpush3.bf16.msra.mxu1 %v1553_v11  ;;  %v1580_v40 = vld [vmem:[%s2051_s1 + $0x1c0] sm:$0xff]   ;;  %v1582_v42 = vld [vmem:[%s2051_s1 + $0x148] sm:$0xff]   ;;  %v1586_v46 = vld [vmem:[%s2051_s1 + $0x150] sm:$0xff]  }
   0xe   :  { %1416 = vmatprep.subr.bf16.mxu1 %v1556_v14  ;;  %1046 = vmatprep.mubr.bf16.mxu1 %v1265_v38  ;;  %v1581_v41 = vld [vmem:[%s2051_s1 + $0x180] sm:$0xff]   ;;  %v1583_v43 = vld [vmem:[%s2051_s1 + $0x108] sm:$0xff]   ;;  %v1587_v47 = vld [vmem:[%s2051_s1 + $0x110] sm:$0xff]  }
   0xf   :  { %1395 = vmatpush3.bf16.msra.mxu0 %v1555_v13  ;;  %v1584_v44 = vld [vmem:[%s2051_s1 + $0x1c8] sm:$0xff]   ;;  %v1588_v48 = vld [vmem:[%s2051_s1 + $0x1d0] sm:$0xff]   ;;  %v1590_v50 = vld [vmem:[%s2051_s1 + $0x158] sm:$0xff]  }
  0x10   :  { %1396 = vmatprep.subr.bf16.mxu0 %v1558_v16  ;;  %v1585_v45 = vld [vmem:[%s2051_s1 + $0x188] sm:$0xff]   ;;  %v1589_v49 = vld [vmem:[%s2051_s1 + $0x190] sm:$0xff]   ;;  %v1591_v51 = vld [vmem:[%s2051_s1 + $0x118] sm:$0xff]  }
  0x11   :  { %1417 = vmatpush3.bf16.msra.mxu1 %v1557_v15  ;;  %v1592_v52 = vld [vmem:[%s2051_s1 + $0x1d8] sm:$0xff]   ;;  %v1594_v54 = vld [vmem:[%s2051_s1 + $0x160] sm:$0xff]   ;;  %v1598_v58 = vld [vmem:[%s2051_s1 + $0x168] sm:$0xff]  }
  0x12   :  { %1418 = vmatprep.subr.bf16.mxu1 %v1560_v18  ;;  %v1593_v53 = vld [vmem:[%s2051_s1 + $0x198] sm:$0xff]   ;;  %v1595_v55 = vld [vmem:[%s2051_s1 + $0x120] sm:$0xff]   ;;  %v1599_v59 = vld [vmem:[%s2051_s1 + $0x128] sm:$0xff]  }
  0x13   :  { %1397 = vmatpush3.bf16.msra.mxu0 %v1559_v17  ;;  %v1596_v56 = vld [vmem:[%s2051_s1 + $0x1e0] sm:$0xff]   ;;  %v1600_v60 = vld [vmem:[%s2051_s1 + $0x1e8] sm:$0xff]   ;;  %v1602_v62 = vld [vmem:[%s2051_s1 + $0x170] sm:$0xff]  }
  0x14   :  { %1398 = vmatprep.subr.bf16.mxu0 %v1562_v20  ;;  %v1597_v57 = vld [vmem:[%s2051_s1 + $0x1a0] sm:$0xff]   ;;  %v1601_v61 = vld [vmem:[%s2051_s1 + $0x1a8] sm:$0xff]   ;;  %v1603_v63 = vld [vmem:[%s2051_s1 + $0x130] sm:$0xff]  }
  0x15   :  { %1419 = vmatpush3.bf16.msra.mxu1 %v1561_v19  ;;  %v1604_v0 = vld [vmem:[%s2051_s1 + $0x1f0] sm:$0xff]   ;;  %v1606_v2 = vld [vmem:[%s2051_s1 + $0x178] sm:$0xff]   ;;  %v1612_v9 = vld [vmem:[%s2051_s1 + $0x240] sm:$0xff]  }
  0x16   :  { %1420 = vmatprep.subr.bf16.mxu1 %v1564_v22  ;;  %v1605_v1 = vld [vmem:[%s2051_s1 + $0x1b0] sm:$0xff]   ;;  %v1607_v3 = vld [vmem:[%s2051_s1 + $0x138] sm:$0xff]   ;;  %v1615_v13 = vld [vmem:[%s2051_s1 + $0x200] sm:$0xff]  }
  0x17   :  { %1399 = vmatpush3.bf16.msra.mxu0 %v1563_v21  ;;  %v1608_v4 = vld [vmem:[%s2051_s1 + $0x1f8] sm:$0xff]   ;;  %v17_v5 = vld [vmem:[%s2052_s0 + $0x10] sm:$0xff]  ;;  %v1616_v14 = vld [vmem:[%s2051_s1 + $0x2c0] sm:$0xff]  }
  0x18   :  { %1400 = vmatprep.subr.bf16.mxu0 %v1566_v24  ;;  %v1266_v6 = vcombine.low %v17_v5, %v17_v5  ;;  %v1267_v7 = vcombine.high %v17_v5, %v17_v5  ;;  %v1611_v8 = vld [vmem:[%s2051_s1 + $0x1b8] sm:$0xff]   ;;  %v1617_v15 = vld [vmem:[%s2051_s1 + $0x280] sm:$0xff]   ;;  %v1618_v16 = vld [vmem:[%s2051_s1 + $0x248] sm:$0xff]  }
  0x19   :  { %1421 = vmatpush3.bf16.msra.mxu1 %v1565_v23  ;;  %v18_v10 = vld [vmem:[%s2052_s0 + $0x18] sm:$0xff]  ;;  %v1619_v17 = vld [vmem:[%s2051_s1 + $0x208] sm:$0xff]   ;;  %v1622_v20 = vld [vmem:[%s2051_s1 + $0x250] sm:$0xff]  }
  0x1a   :  { %1422 = vmatprep.subr.bf16.mxu1 %v1568_v26  ;;  %v1268_v11 = vcombine.low %v18_v10, %v18_v10  ;;  %v1269_v12 = vcombine.high %v18_v10, %v18_v10  ;;  %v1620_v18 = vld [vmem:[%s2051_s1 + $0x2c8] sm:$0xff]   ;;  %v1623_v21 = vld [vmem:[%s2051_s1 + $0x210] sm:$0xff]   ;;  %v1626_v24 = vld [vmem:[%s2051_s1 + $0x258] sm:$0xff]  }
  0x1b   :  { %1401 = vmatpush3.bf16.msra.mxu0 %v1567_v25  ;;  %v1621_v19 = vld [vmem:[%s2051_s1 + $0x288] sm:$0xff]   ;;  %v1624_v22 = vld [vmem:[%s2051_s1 + $0x2d0] sm:$0xff]   ;;  %v1627_v25 = vld [vmem:[%s2051_s1 + $0x218] sm:$0xff]  }
  0x1c   :  { %1402 = vmatprep.subr.bf16.mxu0 %v1570_v28  ;;  %v1625_v23 = vld [vmem:[%s2051_s1 + $0x290] sm:$0xff]   ;;  %v1628_v26 = vld [vmem:[%s2051_s1 + $0x2d8] sm:$0xff]   ;;  %v1630_v28 = vld [vmem:[%s2051_s1 + $0x260] sm:$0xff]  }
  0x1d   :  { %1423 = vmatpush3.bf16.msra.mxu1 %v1569_v27  ;;  %v1629_v27 = vld [vmem:[%s2051_s1 + $0x298] sm:$0xff]   ;;  %v1633_v31 = vld [vmem:[%s2051_s1 + $0x2a0] sm:$0xff]   ;;  %v1635_v33 = vld [vmem:[%s2051_s1 + $0x228] sm:$0xff]  }
  0x1e   :  { %1424 = vmatprep.subr.bf16.mxu1 %v1572_v30  ;;  %v1632_v30 = vld [vmem:[%s2051_s1 + $0x2e0] sm:$0xff]   ;;  %v1638_v36 = vld [vmem:[%s2051_s1 + $0x270] sm:$0xff]  }
  0x1f   :  { %1403 = vmatpush3.bf16.msra.mxu0 %v1571_v29  ;;  %v1631_v29 = vld [vmem:[%s2051_s1 + $0x220] sm:$0xff]   ;;  %v1640_v38 = vld [vmem:[%s2051_s1 + $0x2f0] sm:$0xff]  }
  0x20   :  { %1432 = vmatprep.subr.bf16.mxu0 %v1576_v35  ;;  %v1637_v35 = vld [vmem:[%s2051_s1 + $0x2a8] sm:$0xff]  }
  0x21   :  { %1425 = vmatpush3.bf16.msra.mxu1 %v1575_v34  ;;  %v1636_v34 = vld [vmem:[%s2051_s1 + $0x2e8] sm:$0xff]  }
  0x22   :  { %1007 = vmatmul.mubr.bf16.vlgmr.msra.gmra.mrb[0].mxu0 %v1262_v32  ;;  %1454 = vmatprep.subr.bf16.mxu1 %v1580_v40  ;;  %v1634_v32 = vld [vmem:[%s2051_s1 + $0x268] sm:$0xff]   ;;  %v1642_v40 = vld [vmem:[%s2051_s1 + $0x278] sm:$0xff]  }
  0x23   :  { %1433 = vmatpush3.bf16.msra.mxu0 %v1579_v39  ;;  %1086 = vmatprep.mubr.bf16.mxu0 %v1267_v7  ;;  %v1641_v39 = vld [vmem:[%s2051_s1 + $0x2b0] sm:$0xff]  }
  0x24   :  { %1047 = vmatmul.mubr.bf16.vlgmr.msra.gmra.mrb[0].mxu1 %v1264_v37  ;;  %1434 = vmatprep.subr.bf16.mxu0 %v1582_v42  ;;  %v1639_v37 = vld [vmem:[%s2051_s1 + $0x230] sm:$0xff]   ;;  %v1644_v42 = vld [vmem:[%s2051_s1 + $0x2f8] sm:$0xff]  }
  0x25   :  { %1455 = vmatpush3.bf16.msra.mxu1 %v1581_v41  ;;  %1126 = vmatprep.mubr.bf16.mxu1 %v1269_v12  ;;  %v1643_v41 = vld [vmem:[%s2051_s1 + $0x238] sm:$0xff]  }
  0x26   :  { %1456 = vmatprep.subr.bf16.mxu1 %v1584_v44 }
  0x27   :  { %1435 = vmatpush3.bf16.msra.mxu0 %v1583_v43  ;;  %v19_v43 = vld [vmem:[%s2052_s0 + $0x20] sm:$0xff] }
  0x28   :  { %1436 = vmatprep.subr.bf16.mxu0 %v1586_v46  ;;  %v1270_v44 = vcombine.low %v19_v43, %v19_v43  ;;  %v1647_v46 = vld [vmem:[%s2051_s1 + $0x2b8] sm:$0xff]  }
  0x29   :  { %1457 = vmatpush3.bf16.msra.mxu1 %v1585_v45  ;;  %v1271_v45 = vcombine.high %v19_v43, %v19_v43 }
  0x2a   :  { %1458 = vmatprep.subr.bf16.mxu1 %v1588_v48  ;;  %v20_v48 = vld [vmem:[%s2052_s0 + $0x28] sm:$0xff] }
  0x2b   :  { %1437 = vmatpush3.bf16.msra.mxu0 %v1587_v47  ;;  %v1648_v47 = vld [vmem:[%s2051_s1 + $0x340] sm:$0xff]  }
  0x2c   :  { %1438 = vmatprep.subr.bf16.mxu0 %v1590_v50  ;;  %v1273_v50 = vcombine.high %v20_v48, %v20_v48 }
  0x2d   :  { %1459 = vmatpush3.bf16.msra.mxu1 %v1589_v49  ;;  %v1272_v49 = vcombine.low %v20_v48, %v20_v48 }
  0x2e   :  { %1460 = vmatprep.subr.bf16.mxu1 %v1592_v52  ;;  %v1652_v52 = vld [vmem:[%s2051_s1 + $0x348] sm:$0xff]  }
  0x2f   :  { %1439 = vmatpush3.bf16.msra.mxu0 %v1591_v51  ;;  %v1651_v51 = vld [vmem:[%s2051_s1 + $0x300] sm:$0xff]  }
  0x30   :  { %1440 = vmatprep.subr.bf16.mxu0 %v1594_v54  ;;  %v1654_v54 = vld [vmem:[%s2051_s1 + $0x350] sm:$0xff]  }
  0x31   :  { %1461 = vmatpush3.bf16.msra.mxu1 %v1593_v53  ;;  %v1653_v53 = vld [vmem:[%s2051_s1 + $0x308] sm:$0xff]  }
  0x32   :  { %1462 = vmatprep.subr.bf16.mxu1 %v1596_v56  ;;  %v1656_v56 = vld [vmem:[%s2051_s1 + $0x358] sm:$0xff]  }
  0x33   :  { %1441 = vmatpush3.bf16.msra.mxu0 %v1595_v55  ;;  %v1655_v55 = vld [vmem:[%s2051_s1 + $0x310] sm:$0xff]  }
  0x34   :  { %1442 = vmatprep.subr.bf16.mxu0 %v1598_v58  ;;  %v1658_v58 = vld [vmem:[%s2051_s1 + $0x360] sm:$0xff]  }
  0x35   :  { %1463 = vmatpush3.bf16.msra.mxu1 %v1597_v57  ;;  %v1657_v57 = vld [vmem:[%s2051_s1 + $0x318] sm:$0xff]  }
  0x36   :  { %1464 = vmatprep.subr.bf16.mxu1 %v1600_v60  ;;  %v1660_v60 = vld [vmem:[%s2051_s1 + $0x368] sm:$0xff]  }
  0x37   :  { %1443 = vmatpush3.bf16.msra.mxu0 %v1599_v59  ;;  %v1659_v59 = vld [vmem:[%s2051_s1 + $0x320] sm:$0xff]  }
  0x38   :  { %1444 = vmatprep.subr.bf16.mxu0 %v1602_v62 }
  0x39   :  { %1465 = vmatpush3.bf16.msra.mxu1 %v1601_v61  ;;  %v21_v61 = vld [vmem:[%s2052_s0 + $0x30] sm:$0xff] }
  0x3a   :  { %1466 = vmatprep.subr.bf16.mxu1 %v1604_v0  ;;  %v1275_v62 = vcombine.high %v21_v61, %v21_v61  ;;  %v1662_v0 = vld [vmem:[%s2051_s1 + $0x370] sm:$0xff]  }
  0x3b   :  { %1445 = vmatpush3.bf16.msra.mxu0 %v1603_v63  ;;  %v1661_v63 = vld [vmem:[%s2051_s1 + $0x328] sm:$0xff]  }
  0x3c   :  { %1446 = vmatprep.subr.bf16.mxu0 %v1606_v2  ;;  %v1664_v2 = vld [vmem:[%s2051_s1 + $0x378] sm:$0xff]  }
  0x3d   :  { %1467 = vmatpush3.bf16.msra.mxu1 %v1605_v1  ;;  %v1663_v1 = vld [vmem:[%s2051_s1 + $0x330] sm:$0xff]  }
  0x3e   :  { %1468 = vmatprep.subr.bf16.mxu1 %v1608_v4  ;;  %v1274_v4 = vcombine.low %v21_v61, %v21_v61 }
  0x3f   :  { %1447 = vmatpush3.bf16.msra.mxu0 %v1607_v3  ;;  %v1665_v3 = vld [vmem:[%s2051_s1 + $0x338] sm:$0xff]  }
  0x40   :  { %1476 = vmatprep.subr.bf16.mxu0 %v1612_v9 }
  0x41   :  { %1469 = vmatpush3.bf16.msra.mxu1 %v1611_v8 }
  0x42   :  { %1087 = vmatmul.mubr.bf16.vlgmr.msra.gmra.mrb[4].mxu0 %v1266_v6  ;;  %1498 = vmatprep.subr.bf16.mxu1 %v1616_v14  ;;  %v1261_v6 = vld [vmem:[%s2053_s2] ss:$0 sm:$0xff] }
  0x43   :  { %1477 = vmatpush3.bf16.msra.mxu0 %v1615_v13  ;;  %1166 = vmatprep.mubr.bf16.mxu0 %v1271_v45 }
  0x44   :  { %1127 = vmatmul.mubr.bf16.vlgmr.msra.gmra.mrb[4].mxu1 %v1268_v11  ;;  %1478 = vmatprep.subr.bf16.mxu0 %v1618_v16 }
  0x45   :  { %1499 = vmatpush3.bf16.msra.mxu1 %v1617_v15  ;;  %1206 = vmatprep.mubr.bf16.mxu1 %v1273_v50 }
  0x46   :  { %1500 = vmatprep.subr.bf16.mxu1 %v1620_v18 }
  0x47   :  { %1479 = vmatpush3.bf16.msra.mxu0 %v1619_v17 }
  0x48   :  { %1480 = vmatprep.subr.bf16.mxu0 %v1622_v20 }
  0x49   :  { %1501 = vmatpush3.bf16.msra.mxu1 %v1621_v19 }
  0x4a   :  { %1502 = vmatprep.subr.bf16.mxu1 %v1624_v22 }
  0x4b   :  { %1481 = vmatpush3.bf16.msra.mxu0 %v1623_v21 }
  0x4c   :  { %1482 = vmatprep.subr.bf16.mxu0 %v1626_v24 }
  0x4d   :  { %1503 = vmatpush3.bf16.msra.mxu1 %v1625_v23 }
  0x4e   :  { %1504 = vmatprep.subr.bf16.mxu1 %v1628_v26 }
  0x4f   :  { %1483 = vmatpush3.bf16.msra.mxu0 %v1627_v25 }
  0x50   :  { %1484 = vmatprep.subr.bf16.mxu0 %v1630_v28 }
  0x51   :  { %1505 = vmatpush3.bf16.msra.mxu1 %v1629_v27 }
  0x52   :  { %1506 = vmatprep.subr.bf16.mxu1 %v1632_v30 }
  0x53   :  { %1485 = vmatpush3.bf16.msra.mxu0 %v1631_v29 }
  0x54   :  { %1486 = vmatprep.subr.bf16.mxu0 %v1634_v32 }
  0x55   :  { %1507 = vmatpush3.bf16.msra.mxu1 %v1633_v31 }
  0x56   :  { %1508 = vmatprep.subr.bf16.mxu1 %v1636_v34 }
  0x57   :  { %1487 = vmatpush3.bf16.msra.mxu0 %v1635_v33 }
  0x58   :  { %1488 = vmatprep.subr.bf16.mxu0 %v1638_v36 }
  0x59   :  { %1509 = vmatpush3.bf16.msra.mxu1 %v1637_v35 }
  0x5a   :  { %1510 = vmatprep.subr.bf16.mxu1 %v1640_v38 }
  0x5b   :  { %1489 = vmatpush3.bf16.msra.mxu0 %v1639_v37 }
  0x5c   :  { %1490 = vmatprep.subr.bf16.mxu0 %v1642_v40 }
  0x5d   :  { %1511 = vmatpush3.bf16.msra.mxu1 %v1641_v39 }
  0x5e   :  { %1512 = vmatprep.subr.bf16.mxu1 %v1644_v42 }
  0x5f   :  { %1491 = vmatpush3.bf16.msra.mxu0 %v1643_v41 }
  0x60   :  { %1520 = vmatprep.subr.bf16.mxu0 %v1648_v47 }
  0x61   :  { %1513 = vmatpush3.bf16.msra.mxu1 %v1647_v46 }
  0x62   :  { %1167 = vmatmul.mubr.bf16.vlgmr.msra.gmra.mrb[8].mxu0 %v1270_v44 }
  0x63   :  { %1521 = vmatpush3.bf16.msra.mxu0 %v1651_v51  ;;  %1246 = vmatprep.mubr.bf16.mxu0 %v1275_v62 }
  0x64   :  { %1207 = vmatmul.mubr.bf16.vlgmr.msra.gmra.mrb[8].mxu1 %v1272_v49  ;;  %1522 = vmatprep.subr.bf16.mxu0 %v1652_v52 }
  0x67   :  { %1523 = vmatpush3.bf16.msra.mxu0 %v1653_v53 }
  0x68   :  { %1524 = vmatprep.subr.bf16.mxu0 %v1654_v54 }
  0x6b   :  { %1525 = vmatpush3.bf16.msra.mxu0 %v1655_v55 }
  0x6c   :  { %1526 = vmatprep.subr.bf16.mxu0 %v1656_v56 }
  0x6f   :  { %1527 = vmatpush3.bf16.msra.mxu0 %v1657_v57 }
  0x70   :  { %1528 = vmatprep.subr.bf16.mxu0 %v1658_v58 }
  0x73   :  { %1529 = vmatpush3.bf16.msra.mxu0 %v1659_v59 }
  0x74   :  { %1530 = vmatprep.subr.bf16.mxu0 %v1660_v60 }
  0x77   :  { %1531 = vmatpush3.bf16.msra.mxu0 %v1661_v63 }
  0x78   :  { %1532 = vmatprep.subr.bf16.mxu0 %v1662_v0 }
  0x7b   :  { %1533 = vmatpush3.bf16.msra.mxu0 %v1663_v1 }
  0x7c   :  { %1534 = vmatprep.subr.bf16.mxu0 %v1664_v2 }
  0x7f   :  { %1535 = vmatpush3.bf16.msra.mxu0 %v1665_v3 }
  0x82   :  { %1247 = vmatmul.mubr.bf16.vlgmr.msra.gmra.mrb[12].mxu0 %v1274_v4 }
  0xf5   :  { %v1404_v5 = vpop.f32.mrb[0].mxu0 }
  0xf6   :  { %v1405_v7 = vpop.f32.mrb[1].mxu0 }
  0xf7   :  { %v1406_v8 = vadd.f32 %v1405_v7, %v1404_v5  ;;  %v1407_v9 = vpop.f32.mrb[2].mxu0  ;;  %v1426_v10 = vpop.f32.mrb[0].mxu1 }
  0xf8   :  { %v1408_v11 = vpop.f32.mrb[3].mxu0  ;;  %v1427_v12 = vpop.f32.mrb[1].mxu1 }
  0xf9   :  { %v1009_v13 = vadd.f32 %v1406_v8, %v1261_v6  ;;  %v1428_v14 = vadd.f32 %v1427_v12, %v1426_v10  ;;  %v1429_v15 = vpop.f32.mrb[2].mxu1 }
  0xfa   :  { %v1430_v16 = vpop.f32.mrb[3].mxu1 }
  0xfb   :  { %v1049_v17 = vadd.f32 %v1428_v14, %v1009_v13 }
 0x115   :  { %v1448_v18 = vpop.f32.mrb[4].mxu0 }
 0x116   :  { %v1449_v19 = vpop.f32.mrb[5].mxu0 }
 0x117   :  { %v1450_v20 = vadd.f32 %v1449_v19, %v1448_v18  ;;  %v1451_v21 = vpop.f32.mrb[6].mxu0  ;;  %v1470_v22 = vpop.f32.mrb[4].mxu1 }
 0x118   :  { %v1452_v23 = vpop.f32.mrb[7].mxu0  ;;  %v1471_v25 = vpop.f32.mrb[5].mxu1 }
 0x119   :  { %v1089_v24 = vadd.f32 %v1450_v20, %v1049_v17  ;;  %v1472_v26 = vadd.f32 %v1471_v25, %v1470_v22  ;;  %v1473_v27 = vpop.f32.mrb[6].mxu1 }
 0x11a   :  { %v1474_v28 = vpop.f32.mrb[7].mxu1 }
 0x11b   :  { %v1129_v29 = vadd.f32 %v1472_v26, %v1089_v24 }
 0x135   :  { %v1492_v30 = vpop.f32.mrb[8].mxu0 }
 0x136   :  { %v1493_v31 = vpop.f32.mrb[9].mxu0 }
 0x137   :  { %v1494_v32 = vadd.f32 %v1493_v31, %v1492_v30  ;;  %v1495_v33 = vpop.f32.mrb[10].mxu0  ;;  %v1514_v34 = vpop.f32.mrb[8].mxu1 }
 0x138   :  { %v1496_v35 = vpop.f32.mrb[11].mxu0  ;;  %v1515_v36 = vpop.f32.mrb[9].mxu1 }
 0x139   :  { %v1169_v37 = vadd.f32 %v1494_v32, %v1129_v29  ;;  %v1516_v38 = vadd.f32 %v1515_v36, %v1514_v34  ;;  %v1517_v39 = vpop.f32.mrb[10].mxu1 }
 0x13a   :  { %v1518_v40 = vpop.f32.mrb[11].mxu1 }
 0x13b   :  { %v1209_v41 = vadd.f32 %v1516_v38, %v1169_v37 }
 0x155   :  { %v1536_v42 = vpop.f32.mrb[12].mxu0 }
 0x156   :  { %v1537_v43 = vpop.f32.mrb[13].mxu0 }
 0x157   :  { %v1538_v44 = vadd.f32 %v1537_v43, %v1536_v42  ;;  %v1539_v45 = vpop.f32.mrb[14].mxu0 }
 0x158   :  { %v1540_v46 = vpop.f32.mrb[15].mxu0 }
 0x159   :  { %v1249_v47 = vadd.f32 %v1538_v44, %v1209_v41 }
 0x15b   :  { %v1254_v48 = vmax.f32 %v1249_v47, 0.0 }
 0x15d   :  { %v1255_v49 = vpack.c.bf16 %v1254_v48, %v1254_v48 }
 0x15f   :  { %1256 = vst [vmem:[%s2054_s3] sm:$0xf] %v1255_v49 }

// kernel: reg3d_forward.18
= control target key start
LH: loop header
LB: loop body
LE: loop exit
PB: predicated region body
PF: predicated region fallthrough
CT: control target
= control target key end

     0   :  { %s937_s1 = inlined_call_operand.vmem [shape: bf16[512,256], index: 1, kind: input, shape index: {}]   ;;  %s938_s0 = inlined_call_operand.vmem [shape: bf16[8,512], index: 0, kind: input, shape index: {}]   ;;  %s939_s2 = inlined_call_operand.vmem [shape: f32[1,256], index: 2, kind: input, shape index: {}]   ;;  %s940_s3 = inlined_call_operand.vmem [shape: bf16[8,256], index: 3, kind: input, shape index: {}]   ;;  %s941_s4 = inlined_call_operand.vmem [shape: bf16[8,256], index: 4, kind: output, shape index: {}]  }
   0x1   :  { %v605_v0 = vld [vmem:[%s937_s1 + $0x4] ss:$8 sps:$4 sm:$0xff]   ;;  %v609_v2 = vld [vmem:[%s937_s1] ss:$8 sps:$4 sm:$0xff]   ;;  %v611_v4 = vld [vmem:[%s937_s1 + $0x14] ss:$8 sps:$4 sm:$0xff]  }
   0x2   :  { %v607_v1 = vld [vmem:[%s937_s1 + $0x104] ss:$8 sps:$4 sm:$0xff]   ;;  %429 = vmatprep.subr.bf16.mxu1 %v605_v0  ;;  %v610_v3 = vld [vmem:[%s937_s1 + $0x100] ss:$8 sps:$4 sm:$0xff]   ;;  %v613_v5 = vld [vmem:[%s937_s1 + $0x114] ss:$8 sps:$4 sm:$0xff]  }
   0x3   :  { %470 = vmatprep.subr.bf16.mxu0 %v607_v1  ;;  %430 = vmatpush1.bf16.msra.mxu1 %v609_v2  ;;  %v615_v6 = vld [vmem:[%s937_s1 + $0x10] ss:$8 sps:$4 sm:$0xff]   ;;  %v617_v8 = vld [vmem:[%s937_s1 + $0x24] ss:$8 sps:$4 sm:$0xff]   ;;  %v621_v10 = vld [vmem:[%s937_s1 + $0x20] ss:$8 sps:$4 sm:$0xff]  }
   0x4   :  { %471 = vmatpush1.bf16.msra.mxu0 %v610_v3  ;;  %431 = vmatprep.subr.bf16.mxu1 %v611_v4  ;;  %v616_v7 = vld [vmem:[%s937_s1 + $0x110] ss:$8 sps:$4 sm:$0xff]   ;;  %v619_v9 = vld [vmem:[%s937_s1 + $0x124] ss:$8 sps:$4 sm:$0xff]   ;;  %v622_v11 = vld [vmem:[%s937_s1 + $0x120] ss:$8 sps:$4 sm:$0xff]  }
   0x5   :  { %472 = vmatprep.subr.bf16.mxu0 %v613_v5  ;;  %v623_v12 = vld [vmem:[%s937_s1 + $0x34] ss:$8 sps:$4 sm:$0xff]   ;;  %v627_v14 = vld [vmem:[%s937_s1 + $0x30] ss:$8 sps:$4 sm:$0xff]   ;;  %v629_v16 = vld [vmem:[%s937_s1 + $0x44] ss:$8 sps:$4 sm:$0xff]  }
   0x6   :  { %v625_v13 = vld [vmem:[%s937_s1 + $0x134] ss:$8 sps:$4 sm:$0xff]   ;;  %v628_v15 = vld [vmem:[%s937_s1 + $0x130] ss:$8 sps:$4 sm:$0xff]   ;;  %v631_v17 = vld [vmem:[%s937_s1 + $0x144] ss:$8 sps:$4 sm:$0xff]  }
   0x7   :  { %432 = vmatpush1.bf16.msra.mxu1 %v615_v6  ;;  %v633_v18 = vld [vmem:[%s937_s1 + $0x40] ss:$8 sps:$4 sm:$0xff]   ;;  %v635_v20 = vld [vmem:[%s937_s1 + $0x54] ss:$8 sps:$4 sm:$0xff]   ;;  %v639_v22 = vld [vmem:[%s937_s1 + $0x50] ss:$8 sps:$4 sm:$0xff]   ;;  %v85_v6 = vlaneseq }
   0x8   :  { %473 = vmatpush1.bf16.msra.mxu0 %v616_v7  ;;  %433 = vmatprep.subr.bf16.mxu1 %v617_v8  ;;  %v634_v19 = vld [vmem:[%s937_s1 + $0x140] ss:$8 sps:$4 sm:$0xff]   ;;  %v637_v21 = vld [vmem:[%s937_s1 + $0x154] ss:$8 sps:$4 sm:$0xff]   ;;  %v640_v23 = vld [vmem:[%s937_s1 + $0x150] ss:$8 sps:$4 sm:$0xff]  }
   0x9   :  { %474 = vmatprep.subr.bf16.mxu0 %v619_v9  ;;  %v641_v24 = vld [vmem:[%s937_s1 + $0x64] ss:$8 sps:$4 sm:$0xff]   ;;  %v645_v26 = vld [vmem:[%s937_s1 + $0x60] ss:$8 sps:$4 sm:$0xff]   ;;  %v647_v28 = vld [vmem:[%s937_s1 + $0x74] ss:$8 sps:$4 sm:$0xff]  }
   0xa   :  { %v643_v25 = vld [vmem:[%s937_s1 + $0x164] ss:$8 sps:$4 sm:$0xff]   ;;  %v646_v27 = vld [vmem:[%s937_s1 + $0x160] ss:$8 sps:$4 sm:$0xff]   ;;  %v649_v29 = vld [vmem:[%s937_s1 + $0x174] ss:$8 sps:$4 sm:$0xff]  }
   0xb   :  { %434 = vmatpush1.bf16.msra.mxu1 %v621_v10  ;;  %v651_v30 = vld [vmem:[%s937_s1 + $0x70] ss:$8 sps:$4 sm:$0xff]   ;;  %v653_v32 = vld [vmem:[%s937_s1 + $0x84] ss:$8 sps:$4 sm:$0xff]   ;;  %v657_v34 = vld [vmem:[%s937_s1 + $0x80] ss:$8 sps:$4 sm:$0xff]  }
   0xc   :  { %475 = vmatpush1.bf16.msra.mxu0 %v622_v11  ;;  %435 = vmatprep.subr.bf16.mxu1 %v623_v12  ;;  %v652_v31 = vld [vmem:[%s937_s1 + $0x170] ss:$8 sps:$4 sm:$0xff]   ;;  %v655_v33 = vld [vmem:[%s937_s1 + $0x184] ss:$8 sps:$4 sm:$0xff]   ;;  %v658_v35 = vld [vmem:[%s937_s1 + $0x180] ss:$8 sps:$4 sm:$0xff]  }
   0xd   :  { %476 = vmatprep.subr.bf16.mxu0 %v625_v13  ;;  %v659_v36 = vld [vmem:[%s937_s1 + $0x94] ss:$8 sps:$4 sm:$0xff]   ;;  %v663_v38 = vld [vmem:[%s937_s1 + $0x90] ss:$8 sps:$4 sm:$0xff]   ;;  %v665_v40 = vld [vmem:[%s937_s1 + $0xa4] ss:$8 sps:$4 sm:$0xff]  }
   0xe   :  { %v661_v37 = vld [vmem:[%s937_s1 + $0x194] ss:$8 sps:$4 sm:$0xff]   ;;  %v664_v39 = vld [vmem:[%s937_s1 + $0x190] ss:$8 sps:$4 sm:$0xff]   ;;  %v667_v41 = vld [vmem:[%s937_s1 + $0x1a4] ss:$8 sps:$4 sm:$0xff]  }
   0xf   :  { %436 = vmatpush1.bf16.msra.mxu1 %v627_v14  ;;  %v669_v42 = vld [vmem:[%s937_s1 + $0xa0] ss:$8 sps:$4 sm:$0xff]   ;;  %v671_v44 = vld [vmem:[%s937_s1 + $0xb4] ss:$8 sps:$4 sm:$0xff]   ;;  %v675_v49 = vld [vmem:[%s937_s1 + $0xb0] ss:$8 sps:$4 sm:$0xff]  }
  0x10   :  { %477 = vmatpush1.bf16.msra.mxu0 %v628_v15  ;;  %437 = vmatprep.subr.bf16.mxu1 %v629_v16  ;;  %v670_v43 = vld [vmem:[%s937_s1 + $0x1a0] ss:$8 sps:$4 sm:$0xff]   ;;  %v673_v45 = vld [vmem:[%s937_s1 + $0x1b4] ss:$8 sps:$4 sm:$0xff]   ;;  %v676_v50 = vld [vmem:[%s937_s1 + $0x1b0] ss:$8 sps:$4 sm:$0xff]  }
  0x11   :  { %478 = vmatprep.subr.bf16.mxu0 %v631_v17  ;;  %v17_v46 = vld [vmem:[%s938_s0] sm:$0xff]  ;;  %v18_v48 = vld [vmem:[%s938_s0 + $0x8] sm:$0xff]  ;;  %v683_v56 = vld [vmem:[%s937_s1 + $0xd4] ss:$8 sps:$4 sm:$0xff]   ;;  %v86_v7 = vshrl.u32 %v85_v6, 7 }
  0x12   :  { %v532_v47 = vcombine.high %v17_v46, %v17_v46  ;;  %v534_v51 = vcombine.high %v18_v48, %v18_v48  ;;  %v677_v52 = vld [vmem:[%s937_s1 + $0xc4] ss:$8 sps:$4 sm:$0xff]   ;;  %v681_v54 = vld [vmem:[%s937_s1 + $0xc0] ss:$8 sps:$4 sm:$0xff]   ;;  %v685_v57 = vld [vmem:[%s937_s1 + $0x1d4] ss:$8 sps:$4 sm:$0xff]   ;;  %v531_v4 = vcombine.low %v17_v46, %v17_v46  ;;  %v533_v5 = vcombine.low %v18_v48, %v18_v48 }
  0x13   :  { %438 = vmatpush1.bf16.msra.mxu1 %v633_v18  ;;  %v679_v53 = vld [vmem:[%s937_s1 + $0x1c4] ss:$8 sps:$4 sm:$0xff]   ;;  %v682_v55 = vld [vmem:[%s937_s1 + $0x1c0] ss:$8 sps:$4 sm:$0xff]   ;;  %v687_v58 = vld [vmem:[%s937_s1 + $0xd0] ss:$8 sps:$4 sm:$0xff]  }
  0x14   :  { %479 = vmatpush1.bf16.msra.mxu0 %v634_v19  ;;  %439 = vmatprep.subr.bf16.mxu1 %v635_v20  ;;  %v688_v59 = vld [vmem:[%s937_s1 + $0x1d0] ss:$8 sps:$4 sm:$0xff]   ;;  %v689_v60 = vld [vmem:[%s937_s1 + $0xe4] ss:$8 sps:$4 sm:$0xff]   ;;  %v693_v62 = vld [vmem:[%s937_s1 + $0xe0] ss:$8 sps:$4 sm:$0xff]  }
  0x15   :  { %480 = vmatprep.subr.bf16.mxu0 %v637_v21  ;;  %461 = vmatprep.mubr.bf16.mxu1 %v532_v47  ;;  %v691_v61 = vld [vmem:[%s937_s1 + $0x1e4] ss:$8 sps:$4 sm:$0xff]   ;;  %v694_v63 = vld [vmem:[%s937_s1 + $0x1e0] ss:$8 sps:$4 sm:$0xff]   ;;  %v695_v0 = vld [vmem:[%s937_s1 + $0xf4] ss:$8 sps:$4 sm:$0xff]  }
  0x16   :  { %502 = vmatprep.mubr.bf16.mxu0 %v534_v51  ;;  %v697_v1 = vld [vmem:[%s937_s1 + $0x1f4] ss:$8 sps:$4 sm:$0xff]   ;;  %v699_v2 = vld [vmem:[%s937_s1 + $0xf0] ss:$8 sps:$4 sm:$0xff]   ;;  %v87_v8 = vsub.s32 0, %v86_v7  ;;  %v91_v10 = vsub.s32 1, %v86_v7 }
  0x17   :  { %440 = vmatpush1.bf16.msra.mxu1 %v639_v22  ;;  %v700_v3 = vld [vmem:[%s937_s1 + $0x1f0] ss:$8 sps:$4 sm:$0xff]   ;;  %v83_v9 = vld [vmem:[%s939_s2] sm:$0x3] }
  0x18   :  { %481 = vmatpush1.bf16.msra.mxu0 %v640_v23  ;;  %441 = vmatprep.subr.bf16.mxu1 %v641_v24  ;;  %v88_v11 = vrot.slane %v83_v9, %v87_v8  ;;  %v92_v12 = vrot.slane %v83_v9, %v91_v10  ;;  %v513_v15 = vld [vmem:[%s940_s3] sm:$0xff] }
  0x19   :  { %482 = vmatprep.subr.bf16.mxu0 %v643_v25  ;;  %v514_v23 = vunpack.c.l.bf16 %v513_v15 }
  0x1b   :  { %442 = vmatpush1.bf16.msra.mxu1 %v645_v26 }
  0x1c   :  { %483 = vmatpush1.bf16.msra.mxu0 %v646_v27  ;;  %443 = vmatprep.subr.bf16.mxu1 %v647_v28  ;;  %v515_v27 = vunpack.c.h.bf16 %v513_v15 }
  0x1d   :  { %484 = vmatprep.subr.bf16.mxu0 %v649_v29 }
  0x1f   :  { %444 = vmatpush1.bf16.msra.mxu1 %v651_v30 }
  0x20   :  { %485 = vmatpush1.bf16.msra.mxu0 %v652_v31  ;;  %445 = vmatprep.subr.bf16.mxu1 %v653_v32 }
  0x21   :  { %486 = vmatprep.subr.bf16.mxu0 %v655_v33 }
  0x23   :  { %446 = vmatpush1.bf16.msra.mxu1 %v657_v34 }
  0x24   :  { %487 = vmatpush1.bf16.msra.mxu0 %v658_v35  ;;  %447 = vmatprep.subr.bf16.mxu1 %v659_v36 }
  0x25   :  { %488 = vmatprep.subr.bf16.mxu0 %v661_v37 }
  0x27   :  { %448 = vmatpush1.bf16.msra.mxu1 %v663_v38 }
  0x28   :  { %489 = vmatpush1.bf16.msra.mxu0 %v664_v39  ;;  %449 = vmatprep.subr.bf16.mxu1 %v665_v40 }
  0x29   :  { %490 = vmatprep.subr.bf16.mxu0 %v667_v41 }
  0x2b   :  { %450 = vmatpush1.bf16.msra.mxu1 %v669_v42 }
  0x2c   :  { %491 = vmatpush1.bf16.msra.mxu0 %v670_v43  ;;  %451 = vmatprep.subr.bf16.mxu1 %v671_v44 }
  0x2d   :  { %492 = vmatprep.subr.bf16.mxu0 %v673_v45 }
  0x2f   :  { %452 = vmatpush1.bf16.msra.mxu1 %v675_v49 }
  0x30   :  { %493 = vmatpush1.bf16.msra.mxu0 %v676_v50  ;;  %453 = vmatprep.subr.bf16.mxu1 %v677_v52 }
  0x31   :  { %494 = vmatprep.subr.bf16.mxu0 %v679_v53 }
  0x33   :  { %454 = vmatpush1.bf16.msra.mxu1 %v681_v54 }
  0x34   :  { %495 = vmatpush1.bf16.msra.mxu0 %v682_v55  ;;  %455 = vmatprep.subr.bf16.mxu1 %v683_v56 }
  0x35   :  { %496 = vmatprep.subr.bf16.mxu0 %v685_v57 }
  0x37   :  { %456 = vmatpush1.bf16.msra.mxu1 %v687_v58 }
  0x38   :  { %497 = vmatpush1.bf16.msra.mxu0 %v688_v59  ;;  %457 = vmatprep.subr.bf16.mxu1 %v689_v60 }
  0x39   :  { %498 = vmatprep.subr.bf16.mxu0 %v691_v61 }
  0x3b   :  { %458 = vmatpush1.bf16.msra.mxu1 %v693_v62 }
  0x3c   :  { %499 = vmatpush1.bf16.msra.mxu0 %v694_v63  ;;  %459 = vmatprep.subr.bf16.mxu1 %v695_v0 }
  0x3d   :  { %500 = vmatprep.subr.bf16.mxu0 %v697_v1 }
  0x3f   :  { %460 = vmatpush1.bf16.msra.mxu1 %v699_v2 }
  0x40   :  { %501 = vmatpush1.bf16.msra.mxu0 %v700_v3 }
  0x42   :  { %462 = vmatmul.mubr.bf16.vlgmr.msra.gmra.mrb[0].mxu1 %v531_v4 }
  0x43   :  { %503 = vmatmul.mubr.bf16.vlgmr.msra.gmra.mrb[0].mxu0 %v533_v5 }
 0x115   :  { %v463_v13 = vpop.f32.mrb[0].mxu1 }
 0x116   :  { %v504_v14 = vpop.f32.mrb[0].mxu0  ;;  %v464_v16 = vadd.f32 %v463_v13, %v88_v11  ;;  %v465_v17 = vpop.f32.mrb[1].mxu1 }
 0x117   :  { %v506_v18 = vpop.f32.mrb[1].mxu0  ;;  %v466_v19 = vadd.f32 %v465_v17, %v92_v12  ;;  %v467_v20 = vpop.f32.mrb[2].mxu1 }
 0x118   :  { %v508_v21 = vpop.f32.mrb[2].mxu0  ;;  %v505_v22 = vadd.f32 %v504_v14, %v464_v16  ;;  %v468_v24 = vpop.f32.mrb[3].mxu1 }
 0x119   :  { %v509_v25 = vpop.f32.mrb[3].mxu0  ;;  %v507_v26 = vadd.f32 %v506_v18, %v466_v19 }
 0x11a   :  { %v511_v28 = vmax.f32 %v505_v22, 0.0 }
 0x11b   :  { %v512_v29 = vmax.f32 %v507_v26, 0.0 }
 0x11c   :  { %v516_v30 = vadd.f32 %v514_v23, %v511_v28 }
 0x11d   :  { %v517_v31 = vadd.f32 %v515_v27, %v512_v29 }
 0x11f   :  { %v600_v32 = vpack.c.bf16 %v517_v31, %v516_v30 }
 0x121   :  { %526 = vst [vmem:[%s941_s4] sm:$0xff] %v600_v32 }

// kernel: reg3d_forward.19
= control target key start
LH: loop header
LB: loop body
LE: loop exit
PB: predicated region body
PF: predicated region fallthrough
CT: control target
= control target key end

     0   :  { %s633_s1 = inlined_call_operand.vmem [shape: bf16[256,128], index: 1, kind: input, shape index: {}]   ;;  %s634_s0 = inlined_call_operand.vmem [shape: bf16[64,256], index: 0, kind: input, shape index: {}]   ;;  %s635_s2 = inlined_call_operand.vmem [shape: f32[1,128], index: 2, kind: input, shape index: {}]   ;;  %s636_s3 = inlined_call_operand.vmem [shape: bf16[64,128], index: 3, kind: input, shape index: {}]   ;;  %s637_s4 = inlined_call_operand.vmem [shape: bf16[64,128], index: 4, kind: output, shape index: {}]  }
   0x1   :  { %v481_v0 = vld [vmem:[%s633_s1 + $0x40] sm:$0xff]   ;;  %v483_v2 = vld [vmem:[%s633_s1 + $0x48] sm:$0xff]   ;;  %v485_v4 = vld [vmem:[%s633_s1 + $0x50] sm:$0xff]  }
   0x2   :  { %v482_v1 = vld [vmem:[%s633_s1] sm:$0xff]   ;;  %425 = vmatprep.subr.bf16.mxu0 %v481_v0  ;;  %465 = vmatprep.subr.bf16.mxu1 %v481_v0  ;;  %v484_v3 = vld [vmem:[%s633_s1 + $0x8] sm:$0xff]   ;;  %v486_v5 = vld [vmem:[%s633_s1 + $0x10] sm:$0xff]  }
   0x3   :  { %426 = vmatpush3.bf16.msra.mxu0 %v482_v1  ;;  %473 = vmatpush3.bf16.msra.mxu1 %v482_v1  ;;  %v487_v6 = vld [vmem:[%s633_s1 + $0x58] sm:$0xff]   ;;  %v489_v8 = vld [vmem:[%s633_s1 + $0x60] sm:$0xff]   ;;  %v491_v10 = vld [vmem:[%s633_s1 + $0x68] sm:$0xff]  }
   0x4   :  { %427 = vmatprep.subr.bf16.mxu0 %v483_v2  ;;  %466 = vmatprep.subr.bf16.mxu1 %v483_v2  ;;  %v488_v7 = vld [vmem:[%s633_s1 + $0x18] sm:$0xff]   ;;  %v490_v9 = vld [vmem:[%s633_s1 + $0x20] sm:$0xff]   ;;  %v492_v13 = vld [vmem:[%s633_s1 + $0x28] sm:$0xff]  }
   0x5   :  { %v499_v11 = vld [vmem:[%s634_s0 + $0x4] ss:$8 sps:$4 sm:$0xff]   ;;  %v493_v14 = vld [vmem:[%s633_s1 + $0x70] sm:$0xff]   ;;  %v495_v16 = vld [vmem:[%s633_s1 + $0x78] sm:$0xff]  }
   0x6   :  { %v502_v12 = vld [vmem:[%s634_s0 + $0x24] ss:$8 sps:$4 sm:$0xff]   ;;  %233 = vmatprep.mubr.bf16.mxu0 %v499_v11  ;;  %v494_v15 = vld [vmem:[%s633_s1 + $0x30] sm:$0xff]   ;;  %v496_v17 = vld [vmem:[%s633_s1 + $0x38] sm:$0xff]  }
   0x7   :  { %428 = vmatpush3.bf16.msra.mxu0 %v484_v3  ;;  %474 = vmatpush3.bf16.msra.mxu1 %v484_v3  ;;  %v497_v18 = vld [vmem:[%s634_s0] ss:$8 sps:$4 sm:$0xff]   ;;  %v503_v20 = vld [vmem:[%s634_s0 + $0x14] ss:$8 sps:$4 sm:$0xff]   ;;  %v507_v22 = vld [vmem:[%s634_s0 + $0x10] ss:$8 sps:$4 sm:$0xff]  }
   0x8   :  { %429 = vmatprep.subr.bf16.mxu0 %v485_v4  ;;  %467 = vmatprep.subr.bf16.mxu1 %v485_v4  ;;  %v500_v19 = vld [vmem:[%s634_s0 + $0x20] ss:$8 sps:$4 sm:$0xff]   ;;  %v505_v21 = vld [vmem:[%s634_s0 + $0x34] ss:$8 sps:$4 sm:$0xff]   ;;  %v508_v23 = vld [vmem:[%s634_s0 + $0x30] ss:$8 sps:$4 sm:$0xff]  }
   0x9   :  { %249 = vmatprep.mubr.bf16.mxu1 %v502_v12  ;;  %v342_v26 = vld [vmem:[%s635_s2] ss:$0 sm:$0xff]  ;;  %v420_v32 = vld [vmem:[%s636_s3 + $0x10] sm:$0xff]   ;;  %v419_v63 = vld [vmem:[%s636_s3 + $0x8] sm:$0xff]  }
   0xa   :  { %v384_v30 = vld [vmem:[%s636_s3] sm:$0xff]   ;;  %v393_v42 = vunpack.c.l.bf16 %v420_v32  ;;  %v394_v44 = vunpack.c.h.bf16 %v420_v32  ;;  %v421_v0 = vld [vmem:[%s636_s3 + $0x18] sm:$0xff]   ;;  %v390_v11 = vunpack.c.h.bf16 %v419_v63 }
   0xb   :  { %430 = vmatpush3.bf16.msra.mxu0 %v486_v5  ;;  %475 = vmatpush3.bf16.msra.mxu1 %v486_v5  ;;  %v385_v41 = vunpack.c.l.bf16 %v384_v30  ;;  %v386_v43 = vunpack.c.h.bf16 %v384_v30  ;;  %v398_v12 = vunpack.c.h.bf16 %v421_v0 }
   0xc   :  { %431 = vmatprep.subr.bf16.mxu0 %v487_v6  ;;  %468 = vmatprep.subr.bf16.mxu1 %v487_v6 }
   0xf   :  { %432 = vmatpush3.bf16.msra.mxu0 %v488_v7  ;;  %476 = vmatpush3.bf16.msra.mxu1 %v488_v7 }
  0x10   :  { %433 = vmatprep.subr.bf16.mxu0 %v489_v8  ;;  %469 = vmatprep.subr.bf16.mxu1 %v489_v8 }
  0x13   :  { %434 = vmatpush3.bf16.msra.mxu0 %v490_v9  ;;  %477 = vmatpush3.bf16.msra.mxu1 %v490_v9  ;;  %v389_v9 = vunpack.c.l.bf16 %v419_v63 }
  0x14   :  { %435 = vmatprep.subr.bf16.mxu0 %v491_v10  ;;  %470 = vmatprep.subr.bf16.mxu1 %v491_v10  ;;  %v397_v10 = vunpack.c.l.bf16 %v421_v0 }
  0x17   :  { %436 = vmatpush3.bf16.msra.mxu0 %v492_v13  ;;  %478 = vmatpush3.bf16.msra.mxu1 %v492_v13 }
  0x18   :  { %437 = vmatprep.subr.bf16.mxu0 %v493_v14  ;;  %471 = vmatprep.subr.bf16.mxu1 %v493_v14 }
  0x1b   :  { %438 = vmatpush3.bf16.msra.mxu0 %v494_v15  ;;  %479 = vmatpush3.bf16.msra.mxu1 %v494_v15 }
  0x1c   :  { %439 = vmatprep.subr.bf16.mxu0 %v495_v16  ;;  %472 = vmatprep.subr.bf16.mxu1 %v495_v16 }
  0x1f   :  { %440 = vmatpush3.bf16.msra.mxu0 %v496_v17  ;;  %480 = vmatpush3.bf16.msra.mxu1 %v496_v17 }
  0x22   :  { %234 = vmatmul.mubr.bf16.vlgmr.msra.gmra.mrb[0].mxu0 %v497_v18  ;;  %250 = vmatmul.mubr.bf16.vlgmr.msra.gmra.mrb[0].mxu1 %v500_v19 }
  0x23   :  { %241 = vmatprep.mubr.bf16.mxu0 %v503_v20  ;;  %257 = vmatprep.mubr.bf16.mxu1 %v505_v21 }
  0x2a   :  { %242 = vmatmul.mubr.bf16.gmra.mrb[4].mxu0 %v507_v22  ;;  %258 = vmatmul.mubr.bf16.gmra.mrb[4].mxu1 %v508_v23 }
  0xf5   :  { %v441_v24 = vpop.f32.mrb[0].mxu0  ;;  %v453_v25 = vpop.f32.mrb[0].mxu1 }
  0xf6   :  { %v442_v27 = vpop.f32.mrb[1].mxu0  ;;  %v454_v28 = vpop.f32.mrb[1].mxu1 }
  0xf7   :  { %v443_v29 = vadd.f32 %v442_v27, %v441_v24  ;;  %v455_v31 = vadd.f32 %v454_v28, %v453_v25  ;;  %v444_v33 = vpop.f32.mrb[2].mxu0  ;;  %v456_v34 = vpop.f32.mrb[2].mxu1 }
  0xf8   :  { %v445_v35 = vpop.f32.mrb[3].mxu0  ;;  %v457_v36 = vpop.f32.mrb[3].mxu1 }
  0xf9   :  { %v236_v37 = vadd.f32 %v443_v29, %v342_v26  ;;  %v252_v38 = vadd.f32 %v455_v31, %v342_v26  ;;  %v446_v39 = vadd.f32 %v445_v35, %v444_v33  ;;  %v458_v40 = vadd.f32 %v457_v36, %v456_v34 }
  0xfb   :  { %v266_v45 = vmax.f32 %v236_v37, 0.0  ;;  %v270_v46 = vmax.f32 %v252_v38, 0.0  ;;  %v239_v47 = vadd.f32 %v446_v39, %v342_v26  ;;  %v255_v48 = vadd.f32 %v458_v40, %v342_v26 }
  0xfd   :  { %v267_v49 = vmax.f32 %v239_v47, 0.0  ;;  %v271_v50 = vmax.f32 %v255_v48, 0.0  ;;  %v447_v51 = vpop.f32.mrb[4].mxu0  ;;  %v459_v52 = vpop.f32.mrb[4].mxu1  ;;  %v290_v53 = vadd.f32 %v385_v41, %v266_v45  ;;  %v294_v54 = vadd.f32 %v393_v42, %v270_v46 }
  0xfe   :  { %v448_v55 = vpop.f32.mrb[5].mxu0  ;;  %v460_v56 = vpop.f32.mrb[5].mxu1 }
  0xff   :  { %v291_v57 = vadd.f32 %v386_v43, %v267_v49  ;;  %v295_v58 = vadd.f32 %v394_v44, %v271_v50  ;;  %v449_v59 = vadd.f32 %v448_v55, %v447_v51  ;;  %v461_v60 = vadd.f32 %v460_v56, %v459_v52  ;;  %v450_v61 = vpop.f32.mrb[6].mxu0  ;;  %v462_v62 = vpop.f32.mrb[6].mxu1 }
 0x100   :  { %v451_v1 = vpop.f32.mrb[7].mxu0  ;;  %v463_v2 = vpop.f32.mrb[7].mxu1 }
 0x101   :  { %v402_v3 = vpack.c.bf16 %v291_v57, %v290_v53  ;;  %v412_v4 = vpack.c.bf16 %v295_v58, %v294_v54  ;;  %v244_v5 = vadd.f32 %v449_v59, %v342_v26  ;;  %v260_v6 = vadd.f32 %v461_v60, %v342_v26 }
 0x102   :  { %v452_v7 = vadd.f32 %v451_v1, %v450_v61  ;;  %v464_v8 = vadd.f32 %v463_v2, %v462_v62 }
 0x103   :  { %403 = vst [vmem:[%s637_s4] sm:$0xff] %v402_v3   ;;  %423 = vst [vmem:[%s637_s4 + $0x10] sm:$0xff] %v412_v4   ;;  %v268_v13 = vmax.f32 %v244_v5, 0.0  ;;  %v272_v14 = vmax.f32 %v260_v6, 0.0 }
 0x104   :  { %v247_v15 = vadd.f32 %v452_v7, %v342_v26  ;;  %v263_v16 = vadd.f32 %v464_v8, %v342_v26 }
 0x105   :  { %v292_v19 = vadd.f32 %v389_v9, %v268_v13  ;;  %v296_v20 = vadd.f32 %v397_v10, %v272_v14 }
 0x106   :  { %v269_v17 = vmax.f32 %v247_v15, 0.0  ;;  %v273_v18 = vmax.f32 %v263_v16, 0.0 }
 0x108   :  { %v293_v21 = vadd.f32 %v390_v11, %v269_v17  ;;  %v297_v22 = vadd.f32 %v398_v12, %v273_v18 }
 0x10a   :  { %v407_v23 = vpack.c.bf16 %v293_v21, %v292_v19  ;;  %v417_v24 = vpack.c.bf16 %v297_v22, %v296_v20 }
 0x10c   :  { %422 = vst [vmem:[%s637_s4 + $0x8] sm:$0xff] %v407_v23   ;;  %424 = vst [vmem:[%s637_s4 + $0x18] sm:$0xff] %v417_v24  }

// kernel: reg3d_forward.20
= control target key start
LH: loop header
LB: loop body
LE: loop exit
PB: predicated region body
PF: predicated region fallthrough
CT: control target
= control target key end

     0   :  { %s2563_s1 = inlined_call_operand.vmem [shape: bf16[128,128], index: 1, kind: input, shape index: {}]   ;;  %s2564_s0 = inlined_call_operand.vmem [shape: bf16[512,128], index: 0, kind: input, shape index: {}]   ;;  %s2565_s3 = inlined_call_operand.vmem [shape: bf16[512,128], index: 3, kind: input, shape index: {}]   ;;  %s2566_s2 = inlined_call_operand.vmem [shape: f32[1,128], index: 2, kind: input, shape index: {}]   ;;  %s2567_s4 = inlined_call_operand.vmem [shape: bf16[512,128], index: 4, kind: output, shape index: {}]  }
   0x1   :  { %v1869_v0 = vld [vmem:[%s2563_s1] sm:$0xff]   ;;  %v1870_v1 = vld [vmem:[%s2563_s1 + $0x8] sm:$0xff]   ;;  %v1871_v2 = vld [vmem:[%s2563_s1 + $0x10] sm:$0xff]  }
   0x2   :  { %1773 = vmatprep.subr.bf16.mxu0 %v1869_v0  ;;  %1853 = vmatprep.subr.bf16.mxu1 %v1869_v0  ;;  %v1872_v3 = vld [vmem:[%s2563_s1 + $0x18] sm:$0xff]   ;;  %v1877_v4 = vld [vmem:[%s2564_s0] sm:$0xff]   ;;  %v1874_v7 = vld [vmem:[%s2563_s1 + $0x28] sm:$0xff]  }
   0x3   :  { %1774 = vmatpush3.bf16.msra.mxu0 %v1869_v0  ;;  %1861 = vmatpush3.bf16.msra.mxu1 %v1869_v0  ;;  %v1878_v5 = vld [vmem:[%s2564_s0 + $0x80] sm:$0xff]   ;;  %v1875_v8 = vld [vmem:[%s2563_s1 + $0x30] sm:$0xff]   ;;  %v1876_v9 = vld [vmem:[%s2563_s1 + $0x38] sm:$0xff]  }
   0x4   :  { %1775 = vmatprep.subr.bf16.mxu0 %v1870_v1  ;;  %1854 = vmatprep.subr.bf16.mxu1 %v1870_v1  ;;  %v1873_v6 = vld [vmem:[%s2563_s1 + $0x20] sm:$0xff]   ;;  %v1879_v10 = vld [vmem:[%s2564_s0 + $0x8] sm:$0xff]   ;;  %v1881_v12 = vld [vmem:[%s2564_s0 + $0x10] sm:$0xff]  }
   0x5   :  { %1789 = vmatprep.mubr.bf16.mxu0 %v1877_v4  ;;  %1821 = vmatprep.mubr.bf16.mxu1 %v1878_v5  ;;  %v1880_v11 = vld [vmem:[%s2564_s0 + $0x88] sm:$0xff]   ;;  %v1882_v13 = vld [vmem:[%s2564_s0 + $0x90] sm:$0xff]   ;;  %v1883_v14 = vld [vmem:[%s2564_s0 + $0x18] sm:$0xff]  }
   0x6   :  { %v1884_v15 = vld [vmem:[%s2564_s0 + $0x98] sm:$0xff]   ;;  %v1885_v16 = vld [vmem:[%s2564_s0 + $0x20] sm:$0xff]   ;;  %v1887_v18 = vld [vmem:[%s2564_s0 + $0x28] sm:$0xff]  }
   0x7   :  { %1776 = vmatpush3.bf16.msra.mxu0 %v1870_v1  ;;  %1862 = vmatpush3.bf16.msra.mxu1 %v1870_v1  ;;  %v1886_v17 = vld [vmem:[%s2564_s0 + $0xa0] sm:$0xff]   ;;  %v1888_v19 = vld [vmem:[%s2564_s0 + $0xa8] sm:$0xff]   ;;  %v1889_v20 = vld [vmem:[%s2564_s0 + $0x30] sm:$0xff]  }
   0x8   :  { %1777 = vmatprep.subr.bf16.mxu0 %v1871_v2  ;;  %1855 = vmatprep.subr.bf16.mxu1 %v1871_v2  ;;  %v1890_v21 = vld [vmem:[%s2564_s0 + $0xb0] sm:$0xff]   ;;  %v1891_v22 = vld [vmem:[%s2564_s0 + $0x38] sm:$0xff]   ;;  %v1893_v24 = vld [vmem:[%s2564_s0 + $0x40] sm:$0xff]  }
   0x9   :  { %v1892_v23 = vld [vmem:[%s2564_s0 + $0xb8] sm:$0xff]   ;;  %v1894_v25 = vld [vmem:[%s2564_s0 + $0xc0] sm:$0xff]   ;;  %v1895_v26 = vld [vmem:[%s2564_s0 + $0x48] sm:$0xff]  }
   0xa   :  { %v1896_v27 = vld [vmem:[%s2564_s0 + $0xc8] sm:$0xff]   ;;  %v1897_v28 = vld [vmem:[%s2564_s0 + $0x50] sm:$0xff]   ;;  %v1899_v30 = vld [vmem:[%s2564_s0 + $0x58] sm:$0xff]  }
   0xb   :  { %1778 = vmatpush3.bf16.msra.mxu0 %v1871_v2  ;;  %1863 = vmatpush3.bf16.msra.mxu1 %v1871_v2  ;;  %v1898_v29 = vld [vmem:[%s2564_s0 + $0xd0] sm:$0xff]   ;;  %v1900_v31 = vld [vmem:[%s2564_s0 + $0xd8] sm:$0xff]   ;;  %v1901_v32 = vld [vmem:[%s2564_s0 + $0x60] sm:$0xff]  }
   0xc   :  { %1779 = vmatprep.subr.bf16.mxu0 %v1872_v3  ;;  %1856 = vmatprep.subr.bf16.mxu1 %v1872_v3  ;;  %v1902_v33 = vld [vmem:[%s2564_s0 + $0xe0] sm:$0xff]   ;;  %v1903_v34 = vld [vmem:[%s2564_s0 + $0x68] sm:$0xff]   ;;  %v1905_v36 = vld [vmem:[%s2564_s0 + $0x70] sm:$0xff]  }
   0xd   :  { %v1904_v35 = vld [vmem:[%s2564_s0 + $0xe8] sm:$0xff]   ;;  %v1906_v37 = vld [vmem:[%s2564_s0 + $0xf0] sm:$0xff]   ;;  %v1907_v38 = vld [vmem:[%s2564_s0 + $0x78] sm:$0xff]  }
   0xe   :  { %v1908_v39 = vld [vmem:[%s2564_s0 + $0xf8] sm:$0xff]   ;;  %v2057_v40 = vld [vmem:[%s2565_s3 + $0x8] sm:$0xff]   ;;  %v2067_v42 = vld [vmem:[%s2565_s3] sm:$0xff]  }
   0xf   :  { %1780 = vmatpush3.bf16.msra.mxu0 %v1872_v3  ;;  %1864 = vmatpush3.bf16.msra.mxu1 %v1872_v3  ;;  %v2062_v41 = vld [vmem:[%s2565_s3 + $0x88] sm:$0xff]   ;;  %v2072_v43 = vld [vmem:[%s2565_s3 + $0x80] sm:$0xff]   ;;  %v2077_v44 = vld [vmem:[%s2565_s3 + $0x18] sm:$0xff]   ;;  %v1389_v48 = vunpack.c.l.bf16 %v2057_v40  ;;  %v1385_v50 = vunpack.c.l.bf16 %v2067_v42  ;;  %v1390_v53 = vunpack.c.h.bf16 %v2057_v40  ;;  %v1386_v55 = vunpack.c.h.bf16 %v2067_v42 }
  0x10   :  { %1781 = vmatprep.subr.bf16.mxu0 %v1873_v6  ;;  %1857 = vmatprep.subr.bf16.mxu1 %v1873_v6  ;;  %v2082_v45 = vld [vmem:[%s2565_s3 + $0x98] sm:$0xff]   ;;  %v2087_v46 = vld [vmem:[%s2565_s3 + $0x10] sm:$0xff]   ;;  %v1453_v49 = vunpack.c.l.bf16 %v2062_v41  ;;  %v1449_v51 = vunpack.c.l.bf16 %v2072_v43  ;;  %v2101_v52 = vld [vmem:[%s2565_s3 + $0x28] sm:$0xff]   ;;  %v1454_v54 = vunpack.c.h.bf16 %v2062_v41  ;;  %v1450_v56 = vunpack.c.h.bf16 %v2072_v43 }
  0x11   :  { %v2092_v47 = vld [vmem:[%s2565_s3 + $0x90] sm:$0xff]   ;;  %v2110_v57 = vld [vmem:[%s2565_s3 + $0xa8] sm:$0xff]   ;;  %v2115_v58 = vld [vmem:[%s2565_s3 + $0x20] sm:$0xff]   ;;  %v1397_v60 = vunpack.c.l.bf16 %v2077_v44  ;;  %v1461_v61 = vunpack.c.l.bf16 %v2082_v45  ;;  %v1393_v62 = vunpack.c.l.bf16 %v2087_v46  ;;  %v1398_v1 = vunpack.c.h.bf16 %v2077_v44 }
  0x12   :  { %v2120_v59 = vld [vmem:[%s2565_s3 + $0xa0] sm:$0xff]   ;;  %v1457_v63 = vunpack.c.l.bf16 %v2092_v47  ;;  %v2129_v0 = vld [vmem:[%s2565_s3 + $0x38] sm:$0xff]   ;;  %v1462_v2 = vunpack.c.h.bf16 %v2082_v45  ;;  %v1394_v3 = vunpack.c.h.bf16 %v2087_v46  ;;  %v1458_v4 = vunpack.c.h.bf16 %v2092_v47 }
  0x13   :  { %1782 = vmatpush3.bf16.msra.mxu0 %v1873_v6  ;;  %1865 = vmatpush3.bf16.msra.mxu1 %v1873_v6  ;;  %v2138_v5 = vld [vmem:[%s2565_s3 + $0xb8] sm:$0xff]   ;;  %v2143_v6 = vld [vmem:[%s2565_s3 + $0x30] sm:$0xff]  }
  0x14   :  { %1783 = vmatprep.subr.bf16.mxu0 %v1874_v7  ;;  %1858 = vmatprep.subr.bf16.mxu1 %v1874_v7  ;;  %v2230_v43 = vld [vmem:[%s2565_s3 + $0x58] sm:$0xff]  }
  0x17   :  { %1784 = vmatpush3.bf16.msra.mxu0 %v1874_v7  ;;  %1866 = vmatpush3.bf16.msra.mxu1 %v1874_v7  ;;  %v2148_v7 = vld [vmem:[%s2565_s3 + $0xb0] sm:$0xff]  }
  0x18   :  { %1785 = vmatprep.subr.bf16.mxu0 %v1875_v8  ;;  %1859 = vmatprep.subr.bf16.mxu1 %v1875_v8 }
  0x1b   :  { %1786 = vmatpush3.bf16.msra.mxu0 %v1875_v8  ;;  %1867 = vmatpush3.bf16.msra.mxu1 %v1875_v8  ;;  %v1405_v8 = vunpack.c.l.bf16 %v2101_v52 }
  0x1c   :  { %1787 = vmatprep.subr.bf16.mxu0 %v1876_v9  ;;  %1860 = vmatprep.subr.bf16.mxu1 %v1876_v9 }
  0x1f   :  { %1788 = vmatpush3.bf16.msra.mxu0 %v1876_v9  ;;  %1868 = vmatpush3.bf16.msra.mxu1 %v1876_v9  ;;  %v1469_v9 = vunpack.c.l.bf16 %v2110_v57 }
  0x22   :  { %1790 = vmatmul.mubr.bf16.vlgmr.msra.gmra.mrb[0].mxu0 %v1879_v10  ;;  %1822 = vmatmul.mubr.bf16.vlgmr.msra.gmra.mrb[0].mxu1 %v1880_v11  ;;  %v1401_v10 = vunpack.c.l.bf16 %v2115_v58  ;;  %v1465_v11 = vunpack.c.l.bf16 %v2120_v59 }
  0x23   :  { %1793 = vmatprep.mubr.bf16.mxu0 %v1881_v12  ;;  %1825 = vmatprep.mubr.bf16.mxu1 %v1882_v13  ;;  %v2157_v12 = vld [vmem:[%s2566_s2] ss:$0 sm:$0xff]  ;;  %v1406_v13 = vunpack.c.h.bf16 %v2101_v52 }
  0x2a   :  { %1794 = vmatmul.mubr.bf16.gmra.mrb[4].mxu0 %v1883_v14  ;;  %1826 = vmatmul.mubr.bf16.gmra.mrb[4].mxu1 %v1884_v15  ;;  %v1470_v14 = vunpack.c.h.bf16 %v2110_v57  ;;  %v1402_v15 = vunpack.c.h.bf16 %v2115_v58 }
  0x2b   :  { %1797 = vmatprep.mubr.bf16.mxu0 %v1885_v16  ;;  %1829 = vmatprep.mubr.bf16.mxu1 %v1886_v17  ;;  %v2166_v17 = vld [vmem:[%s2565_s3 + $0x48] sm:$0xff]  }
  0x32   :  { %1798 = vmatmul.mubr.bf16.gmra.mrb[8].mxu0 %v1887_v18  ;;  %1830 = vmatmul.mubr.bf16.gmra.mrb[8].mxu1 %v1888_v19  ;;  %v2171_v18 = vld [vmem:[%s2565_s3 + $0xc8] sm:$0xff]  }
  0x33   :  { %1801 = vmatprep.mubr.bf16.mxu0 %v1889_v20  ;;  %1833 = vmatprep.mubr.bf16.mxu1 %v1890_v21 }
  0x3a   :  { %1802 = vmatmul.mubr.bf16.gmra.mrb[12].mxu0 %v1891_v22  ;;  %1834 = vmatmul.mubr.bf16.gmra.mrb[12].mxu1 %v1892_v23  ;;  %v2180_v23 = vld [vmem:[%s2565_s3 + $0x40] sm:$0xff]  }
  0x3b   :  { %1805 = vmatprep.mubr.bf16.mxu0 %v1893_v24  ;;  %1837 = vmatprep.mubr.bf16.mxu1 %v1894_v25  ;;  %v2185_v24 = vld [vmem:[%s2565_s3 + $0xc0] sm:$0xff]  }
  0x42   :  { %1806 = vmatmul.mubr.bf16.gmra.mrb[16].mxu0 %v1895_v26  ;;  %1838 = vmatmul.mubr.bf16.gmra.mrb[16].mxu1 %v1896_v27 }
  0x43   :  { %1809 = vmatprep.mubr.bf16.mxu0 %v1897_v28  ;;  %1841 = vmatprep.mubr.bf16.mxu1 %v1898_v29  ;;  %v1422_v29 = vunpack.c.h.bf16 %v2166_v17 }
  0x4a   :  { %1810 = vmatmul.mubr.bf16.gmra.mrb[20].mxu0 %v1899_v30  ;;  %1842 = vmatmul.mubr.bf16.gmra.mrb[20].mxu1 %v1900_v31  ;;  %v1486_v30 = vunpack.c.h.bf16 %v2171_v18 }
  0x4b   :  { %1813 = vmatprep.mubr.bf16.mxu0 %v1901_v32  ;;  %1845 = vmatprep.mubr.bf16.mxu1 %v1902_v33 }
  0x52   :  { %1814 = vmatmul.mubr.bf16.gmra.mrb[24].mxu0 %v1903_v34  ;;  %1846 = vmatmul.mubr.bf16.gmra.mrb[24].mxu1 %v1904_v35 }
  0x53   :  { %1817 = vmatprep.mubr.bf16.mxu0 %v1905_v36  ;;  %1849 = vmatprep.mubr.bf16.mxu1 %v1906_v37 }
  0x5a   :  { %1818 = vmatmul.mubr.bf16.gmra.mrb[28].mxu0 %v1907_v38  ;;  %1850 = vmatmul.mubr.bf16.gmra.mrb[28].mxu1 %v1908_v39 }
  0xf5   :  { %v1791_v25 = vpop.f32.mrb[0].mxu0  ;;  %v1823_v26 = vpop.f32.mrb[0].mxu1 }
  0xf6   :  { %v388_v31 = vadd.f32 %v1791_v25, %v2157_v12  ;;  %v516_v32 = vadd.f32 %v1823_v26, %v2157_v12  ;;  %v379_v33 = vpop.f32.mrb[1].mxu0  ;;  %v507_v34 = vpop.f32.mrb[1].mxu1 }
  0xf7   :  { %v380_v37 = vadd.f32 %v2157_v12, %v379_v33  ;;  %v508_v38 = vadd.f32 %v2157_v12, %v507_v34  ;;  %v1792_v39 = vpop.f32.mrb[2].mxu0  ;;  %v1824_v22 = vpop.f32.mrb[2].mxu1 }
  0xf8   :  { %v636_v21 = vmax.f32 %v388_v31, 0.0  ;;  %v668_v25 = vmax.f32 %v516_v32, 0.0  ;;  %v391_v26 = vadd.f32 %v1792_v39, %v2157_v12  ;;  %v519_v28 = vadd.f32 %v1824_v22, %v2157_v12  ;;  %v382_v27 = vpop.f32.mrb[3].mxu0  ;;  %v510_v35 = vpop.f32.mrb[3].mxu1 }
  0xf9   :  { %v634_v20 = vmax.f32 %v380_v37, 0.0  ;;  %v666_v36 = vmax.f32 %v508_v38, 0.0  ;;  %v383_v33 = vadd.f32 %v2157_v12, %v382_v27  ;;  %v511_v34 = vadd.f32 %v2157_v12, %v510_v35 }
  0xfa   :  { %v637_v19 = vmax.f32 %v391_v26, 0.0  ;;  %v669_v16 = vmax.f32 %v519_v28, 0.0  ;;  %v1418_v39 = vunpack.c.h.bf16 %v2180_v23  ;;  %v1482_v22 = vunpack.c.h.bf16 %v2185_v24 }
  0xfb   :  { %v635_v31 = vmax.f32 %v383_v33, 0.0  ;;  %v667_v32 = vmax.f32 %v511_v34, 0.0  ;;  %v828_v37 = vadd.f32 %v1389_v48, %v636_v21  ;;  %v860_v27 = vadd.f32 %v1453_v49, %v668_v25 }
  0xfc   :  { %v829_v35 = vadd.f32 %v1390_v53, %v637_v19  ;;  %v861_v28 = vadd.f32 %v1454_v54, %v669_v16  ;;  %v826_v38 = vadd.f32 %v1385_v50, %v634_v20  ;;  %v858_v26 = vadd.f32 %v1449_v51, %v666_v36 }
  0xfd   :  { %v827_v33 = vadd.f32 %v1386_v55, %v635_v31  ;;  %v859_v48 = vadd.f32 %v1450_v56, %v667_v32  ;;  %v1795_v21 = vpop.f32.mrb[4].mxu0  ;;  %v1827_v49 = vpop.f32.mrb[4].mxu1  ;;  %v2235_v56 = vld [vmem:[%s2565_s3 + $0xd8] sm:$0xff]  }
  0xfe   :  { %v1519_v25 = vpack.c.bf16 %v829_v35, %v828_v37  ;;  %v1599_v40 = vpack.c.bf16 %v861_v28, %v860_v27  ;;  %v404_v53 = vadd.f32 %v1795_v21, %v2157_v12  ;;  %v532_v41 = vadd.f32 %v1827_v49, %v2157_v12  ;;  %v395_v54 = vpop.f32.mrb[5].mxu0  ;;  %v523_v16 = vpop.f32.mrb[5].mxu1  ;;  %v2248_v35 = vld [vmem:[%s2565_s3 + $0x50] sm:$0xff]  }
  0xff   :  { %v1514_v50 = vpack.c.bf16 %v827_v33, %v826_v38  ;;  %v1594_v19 = vpack.c.bf16 %v859_v48, %v858_v26  ;;  %v396_v51 = vadd.f32 %v2157_v12, %v395_v54  ;;  %v524_v42 = vadd.f32 %v2157_v12, %v523_v16  ;;  %v1796_v55 = vpop.f32.mrb[6].mxu0  ;;  %v1828_v20 = vpop.f32.mrb[6].mxu1  ;;  %v2253_v28 = vld [vmem:[%s2565_s3 + $0xd0] sm:$0xff]  }
 0x100   :  { %1702 = vst [vmem:[%s2567_s4 + $0x8] sm:$0xff] %v1519_v25   ;;  %1718 = vst [vmem:[%s2567_s4 + $0x88] sm:$0xff] %v1599_v40   ;;  %v640_v36 = vmax.f32 %v404_v53, 0.0  ;;  %v672_v34 = vmax.f32 %v532_v41, 0.0  ;;  %v407_v31 = vadd.f32 %v1796_v55, %v2157_v12  ;;  %v535_v32 = vadd.f32 %v1828_v20, %v2157_v12  ;;  %v398_v37 = vpop.f32.mrb[7].mxu0  ;;  %v526_v27 = vpop.f32.mrb[7].mxu1 }
 0x101   :  { %1515 = vst [vmem:[%s2567_s4] sm:$0xff] %v1514_v50   ;;  %1717 = vst [vmem:[%s2567_s4 + $0x80] sm:$0xff] %v1594_v19   ;;  %v638_v38 = vmax.f32 %v396_v51, 0.0  ;;  %v670_v26 = vmax.f32 %v524_v42, 0.0  ;;  %v399_v33 = vadd.f32 %v2157_v12, %v398_v37  ;;  %v527_v48 = vadd.f32 %v2157_v12, %v526_v27 }
 0x102   :  { %v641_v21 = vmax.f32 %v407_v31, 0.0  ;;  %v673_v49 = vmax.f32 %v535_v32, 0.0  ;;  %v1429_v25 = vunpack.c.l.bf16 %v2230_v43  ;;  %v1493_v40 = vunpack.c.l.bf16 %v2235_v56 }
 0x103   :  { %v639_v53 = vmax.f32 %v399_v33, 0.0  ;;  %v671_v41 = vmax.f32 %v527_v48, 0.0  ;;  %v1425_v54 = vunpack.c.l.bf16 %v2248_v35  ;;  %v1489_v16 = vunpack.c.l.bf16 %v2253_v28 }
 0x104   :  { %v832_v50 = vadd.f32 %v1397_v60, %v640_v36  ;;  %v864_v19 = vadd.f32 %v1461_v61, %v672_v34  ;;  %v833_v51 = vadd.f32 %v1398_v1, %v641_v21  ;;  %v865_v42 = vadd.f32 %v1462_v2, %v673_v49 }
 0x105   :  { %v830_v55 = vadd.f32 %v1393_v62, %v638_v38  ;;  %v862_v20 = vadd.f32 %v1457_v63, %v670_v26  ;;  %v831_v31 = vadd.f32 %v1394_v3, %v639_v53  ;;  %v863_v60 = vadd.f32 %v1458_v4, %v671_v41  ;;  %v1799_v36 = vpop.f32.mrb[8].mxu0  ;;  %v1831_v61 = vpop.f32.mrb[8].mxu1 }
 0x106   :  { %v1529_v34 = vpack.c.bf16 %v833_v51, %v832_v50  ;;  %v1609_v44 = vpack.c.bf16 %v865_v42, %v864_v19  ;;  %v420_v1 = vadd.f32 %v1799_v36, %v2157_v12  ;;  %v548_v45 = vadd.f32 %v1831_v61, %v2157_v12  ;;  %v411_v2 = vpop.f32.mrb[9].mxu0  ;;  %v539_v32 = vpop.f32.mrb[9].mxu1 }
 0x107   :  { %v1524_v62 = vpack.c.bf16 %v831_v31, %v830_v55  ;;  %v1604_v37 = vpack.c.bf16 %v863_v60, %v862_v20  ;;  %v412_v63 = vadd.f32 %v2157_v12, %v411_v2  ;;  %v540_v46 = vadd.f32 %v2157_v12, %v539_v32  ;;  %v1800_v3 = vpop.f32.mrb[10].mxu0  ;;  %v1832_v27 = vpop.f32.mrb[10].mxu1 }
 0x108   :  { %1704 = vst [vmem:[%s2567_s4 + $0x18] sm:$0xff] %v1529_v34   ;;  %1720 = vst [vmem:[%s2567_s4 + $0x98] sm:$0xff] %v1609_v44   ;;  %v644_v47 = vmax.f32 %v420_v1, 0.0  ;;  %v676_v4 = vmax.f32 %v548_v45, 0.0  ;;  %v423_v38 = vadd.f32 %v1800_v3, %v2157_v12  ;;  %v551_v26 = vadd.f32 %v1832_v27, %v2157_v12  ;;  %v414_v33 = vpop.f32.mrb[11].mxu0  ;;  %v542_v48 = vpop.f32.mrb[11].mxu1 }
 0x109   :  { %1703 = vst [vmem:[%s2567_s4 + $0x10] sm:$0xff] %v1524_v62   ;;  %1719 = vst [vmem:[%s2567_s4 + $0x90] sm:$0xff] %v1604_v37   ;;  %v642_v21 = vmax.f32 %v412_v63, 0.0  ;;  %v674_v49 = vmax.f32 %v540_v46, 0.0  ;;  %v415_v53 = vadd.f32 %v2157_v12, %v414_v33  ;;  %v543_v41 = vadd.f32 %v2157_v12, %v542_v48  ;;  %v2335_v27 = vld [vmem:[%s2565_s3 + $0xe8] sm:$0xff]  }
 0x10a   :  { %v645_v50 = vmax.f32 %v423_v38, 0.0  ;;  %v677_v19 = vmax.f32 %v551_v26, 0.0  ;;  %v1430_v51 = vunpack.c.h.bf16 %v2230_v43  ;;  %v1494_v42 = vunpack.c.h.bf16 %v2235_v56 }
 0x10b   :  { %v643_v55 = vmax.f32 %v415_v53, 0.0  ;;  %v675_v20 = vmax.f32 %v543_v41, 0.0  ;;  %v1426_v31 = vunpack.c.h.bf16 %v2248_v35  ;;  %v1490_v60 = vunpack.c.h.bf16 %v2253_v28 }
 0x10c   :  { %v836_v36 = vadd.f32 %v1405_v8, %v644_v47  ;;  %v868_v61 = vadd.f32 %v1469_v9, %v676_v4  ;;  %v837_v34 = vadd.f32 %v1406_v13, %v645_v50  ;;  %v869_v44 = vadd.f32 %v1470_v14, %v677_v19 }
 0x10d   :  { %v834_v1 = vadd.f32 %v1401_v10, %v642_v21  ;;  %v866_v45 = vadd.f32 %v1465_v11, %v674_v49  ;;  %v835_v2 = vadd.f32 %v1402_v15, %v643_v55  ;;  %v2568_v8 = vunpack.c.h.bf16 %v2120_v59  ;;  %v1803_v62 = vpop.f32.mrb[12].mxu0  ;;  %v1835_v9 = vpop.f32.mrb[12].mxu1  ;;  %v2330_v59 = vld [vmem:[%s2565_s3 + $0x68] sm:$0xff]   ;;  %v2348_v21 = vld [vmem:[%s2565_s3 + $0x60] sm:$0xff]  }
 0x10e   :  { %v1539_v37 = vpack.c.bf16 %v837_v34, %v836_v36  ;;  %v1619_v52 = vpack.c.bf16 %v869_v44, %v868_v61  ;;  %v436_v13 = vadd.f32 %v1803_v62, %v2157_v12  ;;  %v564_v57 = vadd.f32 %v1835_v9, %v2157_v12  ;;  %v427_v14 = vpop.f32.mrb[13].mxu0  ;;  %v555_v63 = vpop.f32.mrb[13].mxu1  ;;  %v2353_v49 = vld [vmem:[%s2565_s3 + $0xe0] sm:$0xff]  }
 0x10f   :  { %v867_v32 = vadd.f32 %v2568_v8, %v675_v20  ;;  %v1534_v10 = vpack.c.bf16 %v835_v2, %v834_v1  ;;  %v428_v11 = vadd.f32 %v2157_v12, %v427_v14  ;;  %v556_v58 = vadd.f32 %v2157_v12, %v555_v63  ;;  %v1804_v15 = vpop.f32.mrb[14].mxu0  ;;  %v1836_v3 = vpop.f32.mrb[14].mxu1 }
 0x110   :  { %1706 = vst [vmem:[%s2567_s4 + $0x28] sm:$0xff] %v1539_v37   ;;  %1722 = vst [vmem:[%s2567_s4 + $0xa8] sm:$0xff] %v1619_v52   ;;  %v648_v47 = vmax.f32 %v436_v13, 0.0  ;;  %v680_v4 = vmax.f32 %v564_v57, 0.0  ;;  %v439_v38 = vadd.f32 %v1804_v15, %v2157_v12  ;;  %v567_v26 = vadd.f32 %v1836_v3, %v2157_v12  ;;  %v430_v33 = vpop.f32.mrb[15].mxu0  ;;  %v558_v48 = vpop.f32.mrb[15].mxu1 }
 0x111   :  { %v1614_v46 = vpack.c.bf16 %v867_v32, %v866_v45  ;;  %1705 = vst [vmem:[%s2567_s4 + $0x20] sm:$0xff] %v1534_v10   ;;  %v646_v53 = vmax.f32 %v428_v11, 0.0  ;;  %v678_v41 = vmax.f32 %v556_v58, 0.0  ;;  %v431_v50 = vadd.f32 %v2157_v12, %v430_v33 }
 0x112   :  { %v559_v19 = vadd.f32 %v2157_v12, %v558_v48  ;;  %v649_v55 = vmax.f32 %v439_v38, 0.0  ;;  %v681_v20 = vmax.f32 %v567_v26, 0.0  ;;  %v1437_v36 = vunpack.c.l.bf16 %v2330_v59 }
 0x113   :  { %1721 = vst [vmem:[%s2567_s4 + $0xa0] sm:$0xff] %v1614_v46   ;;  %v1501_v61 = vunpack.c.l.bf16 %v2335_v27  ;;  %v647_v34 = vmax.f32 %v431_v50, 0.0  ;;  %v1433_v1 = vunpack.c.l.bf16 %v2348_v21  ;;  %v1497_v45 = vunpack.c.l.bf16 %v2353_v49 }
 0x114   :  { %v679_v44 = vmax.f32 %v559_v19, 0.0  ;;  %v2569_v2 = vunpack.c.l.bf16 %v2129_v0  ;;  %v2570_v32 = vunpack.c.l.bf16 %v2138_v5  ;;  %v2571_v9 = vunpack.c.h.bf16 %v2129_v0 }
 0x115   :  { %v2572_v52 = vunpack.c.h.bf16 %v2138_v5  ;;  %v2573_v57 = vunpack.c.l.bf16 %v2143_v6  ;;  %v2574_v63 = vunpack.c.l.bf16 %v2148_v7  ;;  %v2575_v46 = vunpack.c.h.bf16 %v2143_v6  ;;  %v1807_v3 = vpop.f32.mrb[16].mxu0 }
 0x116   :  { %v840_v8 = vadd.f32 %v2569_v2, %v648_v47  ;;  %v872_v62 = vadd.f32 %v2570_v32, %v680_v4  ;;  %v841_v37 = vadd.f32 %v2571_v9, %v649_v55  ;;  %v2576_v58 = vunpack.c.h.bf16 %v2148_v7  ;;  %v1839_v47 = vpop.f32.mrb[16].mxu1  ;;  %v443_v26 = vpop.f32.mrb[17].mxu0 }
 0x117   :  { %v873_v13 = vadd.f32 %v2572_v52, %v681_v20  ;;  %v838_v14 = vadd.f32 %v2573_v57, %v646_v53  ;;  %v870_v10 = vadd.f32 %v2574_v63, %v678_v41  ;;  %v839_v11 = vadd.f32 %v2575_v46, %v647_v34  ;;  %v571_v33 = vpop.f32.mrb[17].mxu1  ;;  %v1808_v50 = vpop.f32.mrb[18].mxu0 }
 0x118   :  { %v871_v15 = vadd.f32 %v2576_v58, %v679_v44  ;;  %v1549_v4 = vpack.c.bf16 %v841_v37, %v840_v8  ;;  %v452_v38 = vadd.f32 %v1807_v3, %v2157_v12  ;;  %v580_v5 = vadd.f32 %v1839_v47, %v2157_v12  ;;  %v1840_v19 = vpop.f32.mrb[18].mxu1  ;;  %v446_v44 = vpop.f32.mrb[19].mxu0 }
 0x119   :  { %v1629_v0 = vpack.c.bf16 %v873_v13, %v872_v62  ;;  %v1544_v48 = vpack.c.bf16 %v839_v11, %v838_v14  ;;  %v444_v41 = vadd.f32 %v2157_v12, %v443_v26  ;;  %v572_v6 = vadd.f32 %v2157_v12, %v571_v33  ;;  %v574_v2 = vpop.f32.mrb[19].mxu1 }
 0x11a   :  { %v1624_v53 = vpack.c.bf16 %v871_v15, %v870_v10  ;;  %1708 = vst [vmem:[%s2567_s4 + $0x38] sm:$0xff] %v1549_v4   ;;  %v652_v7 = vmax.f32 %v452_v38, 0.0  ;;  %v684_v55 = vmax.f32 %v580_v5, 0.0  ;;  %v455_v20 = vadd.f32 %v1808_v50, %v2157_v12 }
 0x11b   :  { %1724 = vst [vmem:[%s2567_s4 + $0xb8] sm:$0xff] %v1629_v0   ;;  %v583_v34 = vadd.f32 %v1840_v19, %v2157_v12  ;;  %1707 = vst [vmem:[%s2567_s4 + $0x30] sm:$0xff] %v1544_v48   ;;  %v650_v8 = vmax.f32 %v444_v41, 0.0  ;;  %v682_v32 = vmax.f32 %v572_v6, 0.0  ;;  %v447_v62 = vadd.f32 %v2157_v12, %v446_v44 }
 0x11c   :  { %1723 = vst [vmem:[%s2567_s4 + $0xb0] sm:$0xff] %v1624_v53   ;;  %v575_v9 = vadd.f32 %v2157_v12, %v574_v2  ;;  %v653_v37 = vmax.f32 %v455_v20, 0.0  ;;  %v1438_v13 = vunpack.c.h.bf16 %v2330_v59  ;;  %v1502_v57 = vunpack.c.h.bf16 %v2335_v27 }
 0x11d   :  { %v685_v52 = vmax.f32 %v583_v34, 0.0  ;;  %v651_v14 = vmax.f32 %v447_v62, 0.0  ;;  %v1434_v10 = vunpack.c.h.bf16 %v2348_v21  ;;  %v1498_v46 = vunpack.c.h.bf16 %v2353_v49  ;;  %v1811_v53 = vpop.f32.mrb[20].mxu0  ;;  %v1843_v41 = vpop.f32.mrb[20].mxu1 }
 0x11e   :  { %v683_v63 = vmax.f32 %v575_v9, 0.0  ;;  %v2577_v11 = vunpack.c.l.bf16 %v2166_v17  ;;  %v2578_v15 = vunpack.c.l.bf16 %v2171_v18  ;;  %v845_v47 = vadd.f32 %v1422_v29, %v653_v37  ;;  %v587_v50 = vpop.f32.mrb[21].mxu1  ;;  %v2448_v9 = vld [vmem:[%s2565_s3 + $0x70] sm:$0xff]  }
 0x11f   :  { %v877_v4 = vadd.f32 %v1486_v30, %v685_v52  ;;  %v2579_v0 = vunpack.c.l.bf16 %v2180_v23  ;;  %v2580_v5 = vunpack.c.l.bf16 %v2185_v24  ;;  %v843_v33 = vadd.f32 %v1418_v39, %v651_v14  ;;  %v459_v30 = vpop.f32.mrb[21].mxu0  ;;  %v1844_v20 = vpop.f32.mrb[22].mxu1  ;;  %v2430_v24 = vld [vmem:[%s2565_s3 + $0x78] sm:$0xff]   ;;  %v2453_v37 = vld [vmem:[%s2565_s3 + $0xf0] sm:$0xff]  }
 0x120   :  { %v844_v58 = vadd.f32 %v2577_v11, %v652_v7  ;;  %v876_v3 = vadd.f32 %v2578_v15, %v684_v55  ;;  %v875_v48 = vadd.f32 %v1482_v22, %v683_v63  ;;  %v468_v29 = vadd.f32 %v1811_v53, %v2157_v12  ;;  %v1812_v39 = vpop.f32.mrb[22].mxu0  ;;  %v2435_v22 = vld [vmem:[%s2565_s3 + $0xf8] sm:$0xff]   ;;  %v590_v62 = vpop.f32.mrb[23].mxu1 }
 0x121   :  { %v842_v38 = vadd.f32 %v2579_v0, %v650_v8  ;;  %v874_v26 = vadd.f32 %v2580_v5, %v682_v32  ;;  %v596_v18 = vadd.f32 %v1843_v41, %v2157_v12  ;;  %v460_v55 = vadd.f32 %v2157_v12, %v459_v30  ;;  %v462_v32 = vpop.f32.mrb[23].mxu0 }
 0x122   :  { %v1559_v6 = vpack.c.bf16 %v845_v47, %v844_v58  ;;  %v1639_v17 = vpack.c.bf16 %v877_v4, %v876_v3  ;;  %v588_v23 = vadd.f32 %v2157_v12, %v587_v50  ;;  %v656_v34 = vmax.f32 %v468_v29, 0.0 }
 0x123   :  { %v1554_v19 = vpack.c.bf16 %v843_v33, %v842_v38  ;;  %v1634_v7 = vpack.c.bf16 %v875_v48, %v874_v26  ;;  %v688_v44 = vmax.f32 %v596_v18, 0.0  ;;  %v471_v2 = vadd.f32 %v1812_v39, %v2157_v12 }
 0x124   :  { %1710 = vst [vmem:[%s2567_s4 + $0x48] sm:$0xff] %v1559_v6   ;;  %1726 = vst [vmem:[%s2567_s4 + $0xc8] sm:$0xff] %v1639_v17   ;;  %v599_v8 = vadd.f32 %v1844_v20, %v2157_v12  ;;  %v654_v52 = vmax.f32 %v460_v55, 0.0  ;;  %v686_v14 = vmax.f32 %v588_v23, 0.0  ;;  %v463_v63 = vadd.f32 %v2157_v12, %v462_v32 }
 0x125   :  { %1709 = vst [vmem:[%s2567_s4 + $0x40] sm:$0xff] %v1554_v19   ;;  %1725 = vst [vmem:[%s2567_s4 + $0xc0] sm:$0xff] %v1634_v7   ;;  %v591_v11 = vadd.f32 %v2157_v12, %v590_v62  ;;  %v657_v58 = vmax.f32 %v471_v2, 0.0  ;;  %v1445_v3 = vunpack.c.l.bf16 %v2430_v24  ;;  %v1509_v47 = vunpack.c.l.bf16 %v2435_v22  ;;  %v1815_v29 = vpop.f32.mrb[24].mxu0 }
 0x126   :  { %v689_v15 = vmax.f32 %v599_v8, 0.0  ;;  %v655_v4 = vmax.f32 %v463_v63, 0.0  ;;  %v1441_v38 = vunpack.c.l.bf16 %v2448_v9  ;;  %v1505_v5 = vunpack.c.l.bf16 %v2453_v37 }
 0x127   :  { %v687_v0 = vmax.f32 %v591_v11, 0.0  ;;  %v848_v26 = vadd.f32 %v1429_v25, %v656_v34  ;;  %v880_v33 = vadd.f32 %v1493_v40, %v688_v44  ;;  %v849_v48 = vadd.f32 %v1430_v51, %v657_v58  ;;  %v1847_v40 = vpop.f32.mrb[24].mxu1 }
 0x128   :  { %v881_v53 = vadd.f32 %v1494_v42, %v689_v15  ;;  %v846_v41 = vadd.f32 %v1425_v54, %v654_v52  ;;  %v878_v6 = vadd.f32 %v1489_v16, %v686_v14  ;;  %v847_v17 = vadd.f32 %v1426_v31, %v655_v4  ;;  %v475_v42 = vpop.f32.mrb[25].mxu0  ;;  %v603_v30 = vpop.f32.mrb[25].mxu1 }
 0x129   :  { %v879_v25 = vadd.f32 %v1490_v60, %v687_v0  ;;  %v1569_v18 = vpack.c.bf16 %v849_v48, %v848_v26  ;;  %v484_v51 = vadd.f32 %v1815_v29, %v2157_v12  ;;  %v612_v56 = vadd.f32 %v1847_v40, %v2157_v12  ;;  %v1816_v31 = vpop.f32.mrb[26].mxu0  ;;  %v1848_v19 = vpop.f32.mrb[26].mxu1 }
 0x12a   :  { %v1649_v43 = vpack.c.bf16 %v881_v53, %v880_v33  ;;  %v1564_v54 = vpack.c.bf16 %v847_v17, %v846_v41  ;;  %v476_v16 = vadd.f32 %v2157_v12, %v475_v42  ;;  %v604_v35 = vadd.f32 %v2157_v12, %v603_v30  ;;  %v478_v23 = vpop.f32.mrb[27].mxu0  ;;  %v606_v39 = vpop.f32.mrb[27].mxu1 }
 0x12b   :  { %v1644_v50 = vpack.c.bf16 %v879_v25, %v878_v6  ;;  %1712 = vst [vmem:[%s2567_s4 + $0x58] sm:$0xff] %v1569_v18   ;;  %v660_v28 = vmax.f32 %v484_v51, 0.0  ;;  %v692_v60 = vmax.f32 %v612_v56, 0.0  ;;  %v487_v7 = vadd.f32 %v1816_v31, %v2157_v12 }
 0x12c   :  { %1728 = vst [vmem:[%s2567_s4 + $0xd8] sm:$0xff] %v1649_v43   ;;  %v615_v55 = vadd.f32 %v1848_v19, %v2157_v12  ;;  %1711 = vst [vmem:[%s2567_s4 + $0x50] sm:$0xff] %v1564_v54   ;;  %v658_v20 = vmax.f32 %v476_v16, 0.0  ;;  %v690_v34 = vmax.f32 %v604_v35, 0.0  ;;  %v479_v44 = vadd.f32 %v2157_v12, %v478_v23 }
 0x12d   :  { %1727 = vst [vmem:[%s2567_s4 + $0xd0] sm:$0xff] %v1644_v50   ;;  %v607_v2 = vadd.f32 %v2157_v12, %v606_v39  ;;  %v661_v8 = vmax.f32 %v487_v7, 0.0  ;;  %v1446_v62 = vunpack.c.h.bf16 %v2430_v24  ;;  %v1510_v52 = vunpack.c.h.bf16 %v2435_v22  ;;  %v1819_v41 = vpop.f32.mrb[28].mxu0 }
 0x12e   :  { %v693_v32 = vmax.f32 %v615_v55, 0.0  ;;  %v659_v14 = vmax.f32 %v479_v44, 0.0  ;;  %v1442_v11 = vunpack.c.h.bf16 %v2448_v9  ;;  %v1506_v58 = vunpack.c.h.bf16 %v2453_v37 }
 0x12f   :  { %v691_v63 = vmax.f32 %v607_v2, 0.0  ;;  %v852_v15 = vadd.f32 %v1437_v36, %v660_v28  ;;  %v884_v4 = vadd.f32 %v1501_v61, %v692_v60  ;;  %v853_v0 = vadd.f32 %v1438_v13, %v661_v8  ;;  %v1851_v61 = vpop.f32.mrb[28].mxu1 }
 0x130   :  { %v885_v26 = vadd.f32 %v1502_v57, %v693_v32  ;;  %v850_v33 = vadd.f32 %v1433_v1, %v658_v20  ;;  %v882_v48 = vadd.f32 %v1497_v45, %v690_v34  ;;  %v851_v53 = vadd.f32 %v1434_v10, %v659_v14  ;;  %v491_v57 = vpop.f32.mrb[29].mxu0  ;;  %v619_v17 = vpop.f32.mrb[29].mxu1 }
 0x131   :  { %v883_v36 = vadd.f32 %v1498_v46, %v691_v63  ;;  %v1579_v6 = vpack.c.bf16 %v853_v0, %v852_v15  ;;  %v500_v13 = vadd.f32 %v1819_v41, %v2157_v12  ;;  %v628_v27 = vadd.f32 %v1851_v61, %v2157_v12  ;;  %v1820_v10 = vpop.f32.mrb[30].mxu0  ;;  %v1852_v29 = vpop.f32.mrb[30].mxu1 }
 0x132   :  { %v1659_v59 = vpack.c.bf16 %v885_v26, %v884_v4  ;;  %v1574_v1 = vpack.c.bf16 %v851_v53, %v850_v33  ;;  %v492_v45 = vadd.f32 %v2157_v12, %v491_v57  ;;  %v620_v21 = vadd.f32 %v2157_v12, %v619_v17  ;;  %v494_v43 = vpop.f32.mrb[31].mxu0  ;;  %v622_v51 = vpop.f32.mrb[31].mxu1 }
 0x133   :  { %v1654_v25 = vpack.c.bf16 %v883_v36, %v882_v48  ;;  %1714 = vst [vmem:[%s2567_s4 + $0x68] sm:$0xff] %v1579_v6   ;;  %v664_v49 = vmax.f32 %v500_v13, 0.0  ;;  %v696_v46 = vmax.f32 %v628_v27, 0.0  ;;  %v503_v40 = vadd.f32 %v1820_v10, %v2157_v12 }
 0x134   :  { %1730 = vst [vmem:[%s2567_s4 + $0xe8] sm:$0xff] %v1659_v59   ;;  %v631_v18 = vadd.f32 %v1852_v29, %v2157_v12  ;;  %1713 = vst [vmem:[%s2567_s4 + $0x60] sm:$0xff] %v1574_v1   ;;  %v662_v56 = vmax.f32 %v492_v45, 0.0  ;;  %v694_v42 = vmax.f32 %v620_v21, 0.0  ;;  %v495_v30 = vadd.f32 %v2157_v12, %v494_v43 }
 0x135   :  { %1729 = vst [vmem:[%s2567_s4 + $0xe0] sm:$0xff] %v1654_v25   ;;  %v623_v54 = vadd.f32 %v2157_v12, %v622_v51  ;;  %v665_v50 = vmax.f32 %v503_v40, 0.0  ;;  %v856_v19 = vadd.f32 %v1445_v3, %v664_v49  ;;  %v888_v28 = vadd.f32 %v1509_v47, %v696_v46 }
 0x136   :  { %v697_v16 = vmax.f32 %v631_v18, 0.0  ;;  %v663_v35 = vmax.f32 %v495_v30, 0.0  ;;  %v854_v55 = vadd.f32 %v1441_v38, %v662_v56  ;;  %v886_v23 = vadd.f32 %v1505_v5, %v694_v42 }
 0x137   :  { %v695_v31 = vmax.f32 %v623_v54, 0.0  ;;  %v857_v60 = vadd.f32 %v1446_v62, %v665_v50 }
 0x138   :  { %v889_v7 = vadd.f32 %v1510_v52, %v697_v16  ;;  %v855_v39 = vadd.f32 %v1442_v11, %v663_v35 }
 0x139   :  { %v887_v12 = vadd.f32 %v1506_v58, %v695_v31  ;;  %v1589_v20 = vpack.c.bf16 %v857_v60, %v856_v19 }
 0x13a   :  { %v1669_v34 = vpack.c.bf16 %v889_v7, %v888_v28  ;;  %v1584_v44 = vpack.c.bf16 %v855_v39, %v854_v55 }
 0x13b   :  { %v1664_v2 = vpack.c.bf16 %v887_v12, %v886_v23  ;;  %1716 = vst [vmem:[%s2567_s4 + $0x78] sm:$0xff] %v1589_v20  }
 0x13c   :  { %1732 = vst [vmem:[%s2567_s4 + $0xf8] sm:$0xff] %v1669_v34   ;;  %1715 = vst [vmem:[%s2567_s4 + $0x70] sm:$0xff] %v1584_v44  }
 0x13d   :  { %1731 = vst [vmem:[%s2567_s4 + $0xf0] sm:$0xff] %v1664_v2  }

// kernel: reg3d_forward.21
= control target key start
LH: loop header
LB: loop body
LE: loop exit
PB: predicated region body
PF: predicated region fallthrough
CT: control target
= control target key end

     0   :  { %s1382_s12 = smov 0   ;;  %s1687_s0 = inlined_call_operand.vmem [shape: bf16[4096,256], index: 0, kind: input, shape index: {}]   ;;  %s1688_s1 = inlined_call_operand.vmem [shape: bf16[256,128], index: 1, kind: input, shape index: {}]   ;;  %s1689_s2 = inlined_call_operand.vmem [shape: f32[1,128], index: 2, kind: input, shape index: {}]   ;;  %s1690_s3 = inlined_call_operand.vmem [shape: f32[4096,128], index: 3, kind: output, shape index: {}]  }
   0x1 LB: > { %s1106_s13 = sadd.s32 4294967295, %s1359_s12   ;;  %p1110_p0 = scmp.ge.s32.totalorder %s1359_s12, 1  ;;  %s1359_s12 = sphi %s1382_s12, %s13_s12  }
   0x2   : > { %p139_p1 = scmp.lt.s32.totalorder %s1359_s12, 9 }
   0x4   : > { %p140_p2 = pnand %p1110_p0, %p139_p1 }
   0x5   : > { %v1241_v0 = vld [vmem:[%s1688_s1] sm:$0xff] (!%p140_p2)   ;;  %v1361_v1 = vmov (!%p140_p2), 0   ;;  %s1111_s16 = sshll.u32 (!%p140_p2), %s1106_s13, 6  ;;  %v1242_v2 = vld [vmem:[%s1688_s1 + $0x8] sm:$0xff] (!%p140_p2)   ;;  %v1243_v3 = vld [vmem:[%s1688_s1 + $0x10] sm:$0xff] (!%p140_p2)  }
   0x6   : > { %143 = sbr.rel (%p140_p2) target bundleno = 407 (0x197), region = 32  ;;  %697 = vmatprep.subr.bf16.mxu0 (!%p140_p2), %v1361_v1  ;;  %1200 = vmatprep.subr.bf16.mxu1 (!%p140_p2), %v1361_v1  ;;  %p165_p3 = scmp.lt.s32.totalorder (!%p140_p2), %s1111_s16, 511  ;;  %v1244_v4 = vld [vmem:[%s1688_s1 + $0x18] sm:$0xff] (!%p140_p2)   ;;  %v1245_v5 = vld [vmem:[%s1688_s1 + $0x20] sm:$0xff] (!%p140_p2)   ;;  %v1246_v7 = vld [vmem:[%s1688_s1 + $0x28] sm:$0xff] (!%p140_p2)  }
   0x7   : > { %698 = vmatpush1.bf16.msra.mxu0 (!%p140_p2), %v1241_v0  ;;  %1216 = vmatpush1.bf16.msra.mxu1 (!%p140_p2), %v1241_v0  ;;  %v1247_v9 = vld [vmem:[%s1688_s1 + $0x30] sm:$0xff] (!%p140_p2)   ;;  %v1248_v10 = vld [vmem:[%s1688_s1 + $0x38] sm:$0xff] (!%p140_p2)   ;;  %v1249_v11 = vld [vmem:[%s1688_s1 + $0x40] sm:$0xff] (!%p140_p2)  }
   0x8   : > { %699 = vmatprep.subr.bf16.mxu0 (!%p140_p2), %v1361_v1  ;;  %1201 = vmatprep.subr.bf16.mxu1 (!%p140_p2), %v1361_v1  ;;  %v1250_v12 = vld [vmem:[%s1688_s1 + $0x48] sm:$0xff] (!%p140_p2)   ;;  %v1251_v13 = vld [vmem:[%s1688_s1 + $0x50] sm:$0xff] (!%p140_p2)   ;;  %v1252_v14 = vld [vmem:[%s1688_s1 + $0x58] sm:$0xff] (!%p140_p2)  }
   0x9   : > { %v1253_v15 = vld [vmem:[%s1688_s1 + $0x60] sm:$0xff] (!%p140_p2)   ;;  %v1254_v16 = vld [vmem:[%s1688_s1 + $0x68] sm:$0xff] (!%p140_p2)   ;;  %v1255_v17 = vld [vmem:[%s1688_s1 + $0x70] sm:$0xff] (!%p140_p2)  }
   0xa   : > { %v1256_v18 = vld [vmem:[%s1688_s1 + $0x78] sm:$0xff] (!%p140_p2)  }
   0xb   : > { %700 = vmatpush1.bf16.msra.mxu0 (!%p140_p2), %v1242_v2  ;;  %1217 = vmatpush1.bf16.msra.mxu1 (!%p140_p2), %v1242_v2 }
   0xc   : > { %701 = vmatprep.subr.bf16.mxu0 (!%p140_p2), %v1361_v1  ;;  %1202 = vmatprep.subr.bf16.mxu1 (!%p140_p2), %v1361_v1 }
   0xd   : > { %s1692_s16 = smov (!%p165_p3, %s1111_s16), 511 }
   0xe   : > { %s1199_s23 = sshll.u32 %s1692_s16, 3 }
   0xf   : > { %702 = vmatpush1.bf16.msra.mxu0 %v1243_v3  ;;  %1218 = vmatpush1.bf16.msra.mxu1 %v1243_v3  ;;  %s1421_s28 = scalar_lea.vmem %s1687_s0, %s1199_s23  ;;  %s1554_s5 = scalar_lea.vmem %s1690_s3, %s1199_s23 }
  0x10   : > { %703 = vmatprep.subr.bf16.mxu0 %v1361_v1  ;;  %1203 = vmatprep.subr.bf16.mxu1 %v1361_v1  ;;  %v1259_v6 = vld [vmem:[%s1421_s28 + $0x4] ss:$8 sps:$4 sm:$0xff]   ;;  %v1257_v19 = vld [vmem:[%s1421_s28] ss:$8 sps:$4 sm:$0xff]   ;;  %v1263_v21 = vld [vmem:[%s1421_s28 + $0x14] ss:$8 sps:$4 sm:$0xff]  }
  0x11   : > { %v1262_v8 = vld [vmem:[%s1421_s28 + $0x104] ss:$8 sps:$4 sm:$0xff]   ;;  %729 = vmatprep.mubr.bf16.mxu0 %v1259_v6  ;;  %v1260_v20 = vld [vmem:[%s1421_s28 + $0x100] ss:$8 sps:$4 sm:$0xff]   ;;  %v1265_v22 = vld [vmem:[%s1421_s28 + $0x114] ss:$8 sps:$4 sm:$0xff]  }
  0x12   : > { %857 = vmatprep.mubr.bf16.mxu1 %v1262_v8  ;;  %v1267_v23 = vld [vmem:[%s1421_s28 + $0x10] ss:$8 sps:$4 sm:$0xff]   ;;  %v1269_v25 = vld [vmem:[%s1421_s28 + $0x24] ss:$8 sps:$4 sm:$0xff]   ;;  %v1273_v27 = vld [vmem:[%s1421_s28 + $0x20] ss:$8 sps:$4 sm:$0xff]  }
  0x13   : > { %704 = vmatpush1.bf16.msra.mxu0 %v1244_v4  ;;  %1219 = vmatpush1.bf16.msra.mxu1 %v1244_v4  ;;  %v1268_v24 = vld [vmem:[%s1421_s28 + $0x110] ss:$8 sps:$4 sm:$0xff]   ;;  %v1271_v26 = vld [vmem:[%s1421_s28 + $0x124] ss:$8 sps:$4 sm:$0xff]   ;;  %v1274_v28 = vld [vmem:[%s1421_s28 + $0x120] ss:$8 sps:$4 sm:$0xff]  }
  0x14   : > { %705 = vmatprep.subr.bf16.mxu0 %v1361_v1  ;;  %1204 = vmatprep.subr.bf16.mxu1 %v1361_v1  ;;  %v1275_v29 = vld [vmem:[%s1421_s28 + $0x34] ss:$8 sps:$4 sm:$0xff]   ;;  %v1279_v31 = vld [vmem:[%s1421_s28 + $0x30] ss:$8 sps:$4 sm:$0xff]   ;;  %v1281_v33 = vld [vmem:[%s1421_s28 + $0x44] ss:$8 sps:$4 sm:$0xff]  }
  0x15   : > { %v1277_v30 = vld [vmem:[%s1421_s28 + $0x134] ss:$8 sps:$4 sm:$0xff]   ;;  %v1280_v32 = vld [vmem:[%s1421_s28 + $0x130] ss:$8 sps:$4 sm:$0xff]   ;;  %v1283_v34 = vld [vmem:[%s1421_s28 + $0x144] ss:$8 sps:$4 sm:$0xff]  }
  0x16   : > { %v1285_v35 = vld [vmem:[%s1421_s28 + $0x40] ss:$8 sps:$4 sm:$0xff]   ;;  %v1287_v37 = vld [vmem:[%s1421_s28 + $0x54] ss:$8 sps:$4 sm:$0xff]   ;;  %v1291_v39 = vld [vmem:[%s1421_s28 + $0x50] ss:$8 sps:$4 sm:$0xff]  }
  0x17   : > { %706 = vmatpush1.bf16.msra.mxu0 %v1245_v5  ;;  %1220 = vmatpush1.bf16.msra.mxu1 %v1245_v5  ;;  %v1286_v36 = vld [vmem:[%s1421_s28 + $0x140] ss:$8 sps:$4 sm:$0xff]   ;;  %v1289_v38 = vld [vmem:[%s1421_s28 + $0x154] ss:$8 sps:$4 sm:$0xff]   ;;  %v1292_v40 = vld [vmem:[%s1421_s28 + $0x150] ss:$8 sps:$4 sm:$0xff]  }
  0x18   : > { %707 = vmatprep.subr.bf16.mxu0 %v1361_v1  ;;  %1205 = vmatprep.subr.bf16.mxu1 %v1361_v1  ;;  %v1293_v41 = vld [vmem:[%s1421_s28 + $0x64] ss:$8 sps:$4 sm:$0xff]   ;;  %v1297_v43 = vld [vmem:[%s1421_s28 + $0x60] ss:$8 sps:$4 sm:$0xff]   ;;  %v1299_v45 = vld [vmem:[%s1421_s28 + $0x74] ss:$8 sps:$4 sm:$0xff]  }
  0x19   : > { %v1295_v42 = vld [vmem:[%s1421_s28 + $0x164] ss:$8 sps:$4 sm:$0xff]   ;;  %v1298_v44 = vld [vmem:[%s1421_s28 + $0x160] ss:$8 sps:$4 sm:$0xff]   ;;  %v1301_v46 = vld [vmem:[%s1421_s28 + $0x174] ss:$8 sps:$4 sm:$0xff]  }
  0x1a   : > { %v1303_v47 = vld [vmem:[%s1421_s28 + $0x70] ss:$8 sps:$4 sm:$0xff]   ;;  %v1305_v49 = vld [vmem:[%s1421_s28 + $0x84] ss:$8 sps:$4 sm:$0xff]   ;;  %v1309_v51 = vld [vmem:[%s1421_s28 + $0x80] ss:$8 sps:$4 sm:$0xff]  }
  0x1b   : > { %708 = vmatpush1.bf16.msra.mxu0 %v1246_v7  ;;  %1221 = vmatpush1.bf16.msra.mxu1 %v1246_v7  ;;  %v1304_v48 = vld [vmem:[%s1421_s28 + $0x170] ss:$8 sps:$4 sm:$0xff]   ;;  %v1307_v50 = vld [vmem:[%s1421_s28 + $0x184] ss:$8 sps:$4 sm:$0xff]   ;;  %v1310_v52 = vld [vmem:[%s1421_s28 + $0x180] ss:$8 sps:$4 sm:$0xff]  }
  0x1c   : > { %709 = vmatprep.subr.bf16.mxu0 %v1361_v1  ;;  %1206 = vmatprep.subr.bf16.mxu1 %v1361_v1  ;;  %v1311_v53 = vld [vmem:[%s1421_s28 + $0x94] ss:$8 sps:$4 sm:$0xff]   ;;  %v1315_v55 = vld [vmem:[%s1421_s28 + $0x90] ss:$8 sps:$4 sm:$0xff]   ;;  %v1317_v57 = vld [vmem:[%s1421_s28 + $0xa4] ss:$8 sps:$4 sm:$0xff]  }
  0x1d   : > { %v1313_v54 = vld [vmem:[%s1421_s28 + $0x194] ss:$8 sps:$4 sm:$0xff]   ;;  %v1316_v56 = vld [vmem:[%s1421_s28 + $0x190] ss:$8 sps:$4 sm:$0xff]   ;;  %v1319_v58 = vld [vmem:[%s1421_s28 + $0x1a4] ss:$8 sps:$4 sm:$0xff]  }
  0x1e   : > { %v1321_v59 = vld [vmem:[%s1421_s28 + $0xa0] ss:$8 sps:$4 sm:$0xff]   ;;  %v1323_v61 = vld [vmem:[%s1421_s28 + $0xb4] ss:$8 sps:$4 sm:$0xff]   ;;  %v1327_v63 = vld [vmem:[%s1421_s28 + $0xb0] ss:$8 sps:$4 sm:$0xff]  }
  0x1f   : > { %710 = vmatpush1.bf16.msra.mxu0 %v1247_v9  ;;  %1222 = vmatpush1.bf16.msra.mxu1 %v1247_v9  ;;  %v1322_v60 = vld [vmem:[%s1421_s28 + $0x1a0] ss:$8 sps:$4 sm:$0xff]   ;;  %v1325_v62 = vld [vmem:[%s1421_s28 + $0x1b4] ss:$8 sps:$4 sm:$0xff]   ;;  %v1328_v0 = vld [vmem:[%s1421_s28 + $0x1b0] ss:$8 sps:$4 sm:$0xff]  }
  0x20   : > { %711 = vmatprep.subr.bf16.mxu0 %v1361_v1  ;;  %1207 = vmatprep.subr.bf16.mxu1 %v1361_v1  ;;  %v1331_v2 = vld [vmem:[%s1421_s28 + $0x1c4] ss:$8 sps:$4 sm:$0xff]   ;;  %v1333_v3 = vld [vmem:[%s1421_s28 + $0xc0] ss:$8 sps:$4 sm:$0xff]   ;;  %v1335_v5 = vld [vmem:[%s1421_s28 + $0xd4] ss:$8 sps:$4 sm:$0xff]  }
  0x21   : > { %v1334_v4 = vld [vmem:[%s1421_s28 + $0x1c0] ss:$8 sps:$4 sm:$0xff]   ;;  %v1337_v6 = vld [vmem:[%s1421_s28 + $0x1d4] ss:$8 sps:$4 sm:$0xff]   ;;  %v1339_v7 = vld [vmem:[%s1421_s28 + $0xd0] ss:$8 sps:$4 sm:$0xff]  }
  0x22   : > { %v1340_v8 = vld [vmem:[%s1421_s28 + $0x1d0] ss:$8 sps:$4 sm:$0xff]   ;;  %v1341_v9 = vld [vmem:[%s1421_s28 + $0xe4] ss:$8 sps:$4 sm:$0xff]  }
  0x23   : > { %712 = vmatpush1.bf16.msra.mxu0 %v1248_v10  ;;  %1223 = vmatpush1.bf16.msra.mxu1 %v1248_v10  ;;  %v1343_v10 = vld [vmem:[%s1421_s28 + $0x1e4] ss:$8 sps:$4 sm:$0xff]  }
  0x24   : > { %713 = vmatprep.subr.bf16.mxu0 %v1361_v1  ;;  %1208 = vmatprep.subr.bf16.mxu1 %v1361_v1 }
  0x27   : > { %714 = vmatpush1.bf16.msra.mxu0 %v1249_v11  ;;  %1224 = vmatpush1.bf16.msra.mxu1 %v1249_v11  ;;  %v1345_v11 = vld [vmem:[%s1421_s28 + $0xe0] ss:$8 sps:$4 sm:$0xff]  }
  0x28   : > { %715 = vmatprep.subr.bf16.mxu0 %v1361_v1  ;;  %1209 = vmatprep.subr.bf16.mxu1 %v1361_v1 }
  0x2b   : > { %716 = vmatpush1.bf16.msra.mxu0 %v1250_v12  ;;  %1225 = vmatpush1.bf16.msra.mxu1 %v1250_v12  ;;  %v1346_v12 = vld [vmem:[%s1421_s28 + $0x1e0] ss:$8 sps:$4 sm:$0xff]  }
  0x2c   : > { %717 = vmatprep.subr.bf16.mxu0 %v1361_v1  ;;  %1210 = vmatprep.subr.bf16.mxu1 %v1361_v1 }
  0x2f   : > { %718 = vmatpush1.bf16.msra.mxu0 %v1251_v13  ;;  %1226 = vmatpush1.bf16.msra.mxu1 %v1251_v13  ;;  %v1347_v13 = vld [vmem:[%s1421_s28 + $0xf4] ss:$8 sps:$4 sm:$0xff]  }
  0x30   : > { %719 = vmatprep.subr.bf16.mxu0 %v1361_v1  ;;  %1211 = vmatprep.subr.bf16.mxu1 %v1361_v1 }
  0x33   : > { %720 = vmatpush1.bf16.msra.mxu0 %v1252_v14  ;;  %1227 = vmatpush1.bf16.msra.mxu1 %v1252_v14  ;;  %v1349_v14 = vld [vmem:[%s1421_s28 + $0x1f4] ss:$8 sps:$4 sm:$0xff]  }
  0x34   : > { %721 = vmatprep.subr.bf16.mxu0 %v1361_v1  ;;  %1212 = vmatprep.subr.bf16.mxu1 %v1361_v1 }
  0x37   : > { %722 = vmatpush1.bf16.msra.mxu0 %v1253_v15  ;;  %1228 = vmatpush1.bf16.msra.mxu1 %v1253_v15  ;;  %v1351_v15 = vld [vmem:[%s1421_s28 + $0xf0] ss:$8 sps:$4 sm:$0xff]  }
  0x38   : > { %723 = vmatprep.subr.bf16.mxu0 %v1361_v1  ;;  %1213 = vmatprep.subr.bf16.mxu1 %v1361_v1 }
  0x3b   : > { %724 = vmatpush1.bf16.msra.mxu0 %v1254_v16  ;;  %1229 = vmatpush1.bf16.msra.mxu1 %v1254_v16  ;;  %v1352_v16 = vld [vmem:[%s1421_s28 + $0x1f0] ss:$8 sps:$4 sm:$0xff]  }
  0x3c   : > { %725 = vmatprep.subr.bf16.mxu0 %v1361_v1  ;;  %1214 = vmatprep.subr.bf16.mxu1 %v1361_v1 }
  0x3f   : > { %726 = vmatpush1.bf16.msra.mxu0 %v1255_v17  ;;  %1230 = vmatpush1.bf16.msra.mxu1 %v1255_v17  ;;  %v1547_v17 = vld [vmem:[%s1689_s2] ss:$0 sm:$0xff] }
  0x40   : > { %727 = vmatprep.subr.bf16.mxu0 %v1361_v1  ;;  %1215 = vmatprep.subr.bf16.mxu1 %v1361_v1  ;;  %v1329_v1 = vld [vmem:[%s1421_s28 + $0xc4] ss:$8 sps:$4 sm:$0xff]  }
  0x43   : > { %728 = vmatpush1.bf16.msra.mxu0 %v1256_v18  ;;  %1231 = vmatpush1.bf16.msra.mxu1 %v1256_v18 }
  0x46   : > { %730 = vmatmul.mubr.bf16.vlgmr.msra.gmra.mrb[0].mxu0 %v1257_v19  ;;  %858 = vmatmul.mubr.bf16.vlgmr.msra.gmra.mrb[0].mxu1 %v1260_v20 }
  0x47   : > { %737 = vmatprep.mubr.bf16.mxu0 %v1263_v21  ;;  %865 = vmatprep.mubr.bf16.mxu1 %v1265_v22 }
  0x4e   : > { %738 = vmatmul.mubr.bf16.gmra.mrb[4].mxu0 %v1267_v23  ;;  %866 = vmatmul.mubr.bf16.gmra.mrb[4].mxu1 %v1268_v24 }
  0x4f   : > { %745 = vmatprep.mubr.bf16.mxu0 %v1269_v25  ;;  %873 = vmatprep.mubr.bf16.mxu1 %v1271_v26 }
  0x56   : > { %746 = vmatmul.mubr.bf16.gmra.mrb[8].mxu0 %v1273_v27  ;;  %874 = vmatmul.mubr.bf16.gmra.mrb[8].mxu1 %v1274_v28 }
  0x57   : > { %753 = vmatprep.mubr.bf16.mxu0 %v1275_v29  ;;  %881 = vmatprep.mubr.bf16.mxu1 %v1277_v30 }
  0x5e   : > { %754 = vmatmul.mubr.bf16.gmra.mrb[12].mxu0 %v1279_v31  ;;  %882 = vmatmul.mubr.bf16.gmra.mrb[12].mxu1 %v1280_v32 }
  0x5f   : > { %761 = vmatprep.mubr.bf16.mxu0 %v1281_v33  ;;  %889 = vmatprep.mubr.bf16.mxu1 %v1283_v34 }
  0x66   : > { %762 = vmatmul.mubr.bf16.gmra.mrb[16].mxu0 %v1285_v35  ;;  %890 = vmatmul.mubr.bf16.gmra.mrb[16].mxu1 %v1286_v36 }
  0x67   : > { %769 = vmatprep.mubr.bf16.mxu0 %v1287_v37  ;;  %897 = vmatprep.mubr.bf16.mxu1 %v1289_v38 }
  0x6e   : > { %770 = vmatmul.mubr.bf16.gmra.mrb[20].mxu0 %v1291_v39  ;;  %898 = vmatmul.mubr.bf16.gmra.mrb[20].mxu1 %v1292_v40 }
  0x6f   : > { %777 = vmatprep.mubr.bf16.mxu0 %v1293_v41  ;;  %905 = vmatprep.mubr.bf16.mxu1 %v1295_v42 }
  0x76   : > { %778 = vmatmul.mubr.bf16.gmra.mrb[24].mxu0 %v1297_v43  ;;  %906 = vmatmul.mubr.bf16.gmra.mrb[24].mxu1 %v1298_v44 }
  0x77   : > { %785 = vmatprep.mubr.bf16.mxu0 %v1299_v45  ;;  %913 = vmatprep.mubr.bf16.mxu1 %v1301_v46 }
  0x7e   : > { %786 = vmatmul.mubr.bf16.gmra.mrb[28].mxu0 %v1303_v47  ;;  %914 = vmatmul.mubr.bf16.gmra.mrb[28].mxu1 %v1304_v48 }
  0x7f   : > { %793 = vmatprep.mubr.bf16.mxu0 %v1305_v49  ;;  %921 = vmatprep.mubr.bf16.mxu1 %v1307_v50 }
  0x86   : > { %794 = vmatmul.mubr.bf16.gmra.mrb[32].mxu0 %v1309_v51  ;;  %922 = vmatmul.mubr.bf16.gmra.mrb[32].mxu1 %v1310_v52 }
  0x87   : > { %801 = vmatprep.mubr.bf16.mxu0 %v1311_v53  ;;  %929 = vmatprep.mubr.bf16.mxu1 %v1313_v54 }
  0x8e   : > { %802 = vmatmul.mubr.bf16.gmra.mrb[36].mxu0 %v1315_v55  ;;  %930 = vmatmul.mubr.bf16.gmra.mrb[36].mxu1 %v1316_v56 }
  0x8f   : > { %809 = vmatprep.mubr.bf16.mxu0 %v1317_v57  ;;  %937 = vmatprep.mubr.bf16.mxu1 %v1319_v58 }
  0x96   : > { %810 = vmatmul.mubr.bf16.gmra.mrb[40].mxu0 %v1321_v59  ;;  %938 = vmatmul.mubr.bf16.gmra.mrb[40].mxu1 %v1322_v60 }
  0x97   : > { %817 = vmatprep.mubr.bf16.mxu0 %v1323_v61  ;;  %945 = vmatprep.mubr.bf16.mxu1 %v1325_v62 }
  0x9e   : > { %818 = vmatmul.mubr.bf16.gmra.mrb[44].mxu0 %v1327_v63  ;;  %946 = vmatmul.mubr.bf16.gmra.mrb[44].mxu1 %v1328_v0 }
  0x9f   : > { %825 = vmatprep.mubr.bf16.mxu0 %v1329_v1  ;;  %953 = vmatprep.mubr.bf16.mxu1 %v1331_v2 }
  0xa6   : > { %826 = vmatmul.mubr.bf16.gmra.mrb[48].mxu0 %v1333_v3  ;;  %954 = vmatmul.mubr.bf16.gmra.mrb[48].mxu1 %v1334_v4 }
  0xa7   : > { %833 = vmatprep.mubr.bf16.mxu0 %v1335_v5  ;;  %961 = vmatprep.mubr.bf16.mxu1 %v1337_v6 }
  0xae   : > { %834 = vmatmul.mubr.bf16.gmra.mrb[52].mxu0 %v1339_v7  ;;  %962 = vmatmul.mubr.bf16.gmra.mrb[52].mxu1 %v1340_v8 }
  0xaf   : > { %841 = vmatprep.mubr.bf16.mxu0 %v1341_v9  ;;  %969 = vmatprep.mubr.bf16.mxu1 %v1343_v10 }
  0xb6   : > { %842 = vmatmul.mubr.bf16.gmra.mrb[56].mxu0 %v1345_v11  ;;  %970 = vmatmul.mubr.bf16.gmra.mrb[56].mxu1 %v1346_v12 }
  0xb7   : > { %849 = vmatprep.mubr.bf16.mxu0 %v1347_v13  ;;  %977 = vmatprep.mubr.bf16.mxu1 %v1349_v14 }
  0xbe   : > { %850 = vmatmul.mubr.bf16.gmra.mrb[60].mxu0 %v1351_v15  ;;  %978 = vmatmul.mubr.bf16.gmra.mrb[60].mxu1 %v1352_v16 }
 0x119   : > { %v731_v18 = vpop.f32.mrb[0].mxu0  ;;  %v859_v19 = vpop.f32.mrb[0].mxu1 }
 0x11a   : > { %v732_v20 = vadd.f32 %v1547_v17, %v731_v18  ;;  %v860_v21 = vadd.f32 %v1547_v17, %v859_v19  ;;  %v733_v22 = vpop.f32.mrb[1].mxu0  ;;  %v861_v23 = vpop.f32.mrb[1].mxu1 }
 0x11b   : > { %v734_v24 = vpop.f32.mrb[2].mxu0  ;;  %v862_v25 = vpop.f32.mrb[2].mxu1 }
 0x11c   : > { %986 = vst [vmem:[%s1554_s5] sm:$0xff] %v732_v20  ;;  %1018 = vst [vmem:[%s1554_s5 + $0x100] sm:$0xff] %v860_v21  ;;  %v735_v26 = vadd.f32 %v1547_v17, %v734_v24  ;;  %v863_v27 = vadd.f32 %v1547_v17, %v862_v25  ;;  %v736_v28 = vpop.f32.mrb[3].mxu0  ;;  %v864_v29 = vpop.f32.mrb[3].mxu1 }
 0x11e   : > { %987 = vst [vmem:[%s1554_s5 + $0x8] sm:$0xff] %v735_v26  ;;  %1019 = vst [vmem:[%s1554_s5 + $0x108] sm:$0xff] %v863_v27 }
 0x121   : > { %v739_v30 = vpop.f32.mrb[4].mxu0  ;;  %v867_v31 = vpop.f32.mrb[4].mxu1 }
 0x122   : > { %v740_v32 = vadd.f32 %v1547_v17, %v739_v30  ;;  %v868_v33 = vadd.f32 %v1547_v17, %v867_v31  ;;  %v741_v34 = vpop.f32.mrb[5].mxu0  ;;  %v869_v35 = vpop.f32.mrb[5].mxu1 }
 0x123   : > { %v742_v36 = vpop.f32.mrb[6].mxu0  ;;  %v870_v37 = vpop.f32.mrb[6].mxu1 }
 0x124   : > { %988 = vst [vmem:[%s1554_s5 + $0x10] sm:$0xff] %v740_v32  ;;  %1020 = vst [vmem:[%s1554_s5 + $0x110] sm:$0xff] %v868_v33  ;;  %v743_v38 = vadd.f32 %v1547_v17, %v742_v36  ;;  %v871_v39 = vadd.f32 %v1547_v17, %v870_v37  ;;  %v744_v40 = vpop.f32.mrb[7].mxu0  ;;  %v872_v41 = vpop.f32.mrb[7].mxu1 }
 0x126   : > { %989 = vst [vmem:[%s1554_s5 + $0x18] sm:$0xff] %v743_v38  ;;  %1021 = vst [vmem:[%s1554_s5 + $0x118] sm:$0xff] %v871_v39 }
 0x129   : > { %v747_v42 = vpop.f32.mrb[8].mxu0  ;;  %v875_v43 = vpop.f32.mrb[8].mxu1 }
 0x12a   : > { %v748_v44 = vadd.f32 %v1547_v17, %v747_v42  ;;  %v876_v45 = vadd.f32 %v1547_v17, %v875_v43  ;;  %v749_v46 = vpop.f32.mrb[9].mxu0  ;;  %v877_v47 = vpop.f32.mrb[9].mxu1 }
 0x12b   : > { %v750_v48 = vpop.f32.mrb[10].mxu0  ;;  %v878_v49 = vpop.f32.mrb[10].mxu1 }
 0x12c   : > { %990 = vst [vmem:[%s1554_s5 + $0x20] sm:$0xff] %v748_v44  ;;  %1022 = vst [vmem:[%s1554_s5 + $0x120] sm:$0xff] %v876_v45  ;;  %v751_v50 = vadd.f32 %v1547_v17, %v750_v48  ;;  %v879_v51 = vadd.f32 %v1547_v17, %v878_v49  ;;  %v752_v52 = vpop.f32.mrb[11].mxu0  ;;  %v880_v53 = vpop.f32.mrb[11].mxu1 }
 0x12e   : > { %991 = vst [vmem:[%s1554_s5 + $0x28] sm:$0xff] %v751_v50  ;;  %1023 = vst [vmem:[%s1554_s5 + $0x128] sm:$0xff] %v879_v51 }
 0x131   : > { %v755_v54 = vpop.f32.mrb[12].mxu0  ;;  %v883_v55 = vpop.f32.mrb[12].mxu1 }
 0x132   : > { %v756_v56 = vadd.f32 %v1547_v17, %v755_v54  ;;  %v884_v57 = vadd.f32 %v1547_v17, %v883_v55  ;;  %v757_v58 = vpop.f32.mrb[13].mxu0  ;;  %v885_v59 = vpop.f32.mrb[13].mxu1 }
 0x133   : > { %v758_v60 = vpop.f32.mrb[14].mxu0  ;;  %v886_v61 = vpop.f32.mrb[14].mxu1 }
 0x134   : > { %992 = vst [vmem:[%s1554_s5 + $0x30] sm:$0xff] %v756_v56  ;;  %1024 = vst [vmem:[%s1554_s5 + $0x130] sm:$0xff] %v884_v57  ;;  %v759_v62 = vadd.f32 %v1547_v17, %v758_v60  ;;  %v887_v63 = vadd.f32 %v1547_v17, %v886_v61  ;;  %v760_v0 = vpop.f32.mrb[15].mxu0  ;;  %v888_v1 = vpop.f32.mrb[15].mxu1 }
 0x136   : > { %993 = vst [vmem:[%s1554_s5 + $0x38] sm:$0xff] %v759_v62  ;;  %1025 = vst [vmem:[%s1554_s5 + $0x138] sm:$0xff] %v887_v63 }
 0x139   : > { %v763_v2 = vpop.f32.mrb[16].mxu0  ;;  %v891_v3 = vpop.f32.mrb[16].mxu1 }
 0x13a   : > { %v764_v4 = vadd.f32 %v1547_v17, %v763_v2  ;;  %v892_v5 = vadd.f32 %v1547_v17, %v891_v3  ;;  %v765_v6 = vpop.f32.mrb[17].mxu0  ;;  %v893_v7 = vpop.f32.mrb[17].mxu1 }
 0x13b   : > { %v766_v8 = vpop.f32.mrb[18].mxu0  ;;  %v894_v9 = vpop.f32.mrb[18].mxu1 }
 0x13c   : > { %994 = vst [vmem:[%s1554_s5 + $0x40] sm:$0xff] %v764_v4  ;;  %1026 = vst [vmem:[%s1554_s5 + $0x140] sm:$0xff] %v892_v5  ;;  %v767_v10 = vadd.f32 %v1547_v17, %v766_v8  ;;  %v895_v11 = vadd.f32 %v1547_v17, %v894_v9  ;;  %v768_v12 = vpop.f32.mrb[19].mxu0  ;;  %v896_v13 = vpop.f32.mrb[19].mxu1 }
 0x13e   : > { %995 = vst [vmem:[%s1554_s5 + $0x48] sm:$0xff] %v767_v10  ;;  %1027 = vst [vmem:[%s1554_s5 + $0x148] sm:$0xff] %v895_v11 }
 0x141   : > { %v771_v14 = vpop.f32.mrb[20].mxu0  ;;  %v899_v15 = vpop.f32.mrb[20].mxu1 }
 0x142   : > { %v772_v16 = vadd.f32 %v1547_v17, %v771_v14  ;;  %v900_v18 = vadd.f32 %v1547_v17, %v899_v15  ;;  %v773_v19 = vpop.f32.mrb[21].mxu0  ;;  %v901_v20 = vpop.f32.mrb[21].mxu1 }
 0x143   : > { %v774_v21 = vpop.f32.mrb[22].mxu0  ;;  %v902_v22 = vpop.f32.mrb[22].mxu1 }
 0x144   : > { %996 = vst [vmem:[%s1554_s5 + $0x50] sm:$0xff] %v772_v16  ;;  %1028 = vst [vmem:[%s1554_s5 + $0x150] sm:$0xff] %v900_v18  ;;  %v775_v23 = vadd.f32 %v1547_v17, %v774_v21  ;;  %v903_v24 = vadd.f32 %v1547_v17, %v902_v22  ;;  %v776_v25 = vpop.f32.mrb[23].mxu0  ;;  %v904_v26 = vpop.f32.mrb[23].mxu1 }
 0x146   : > { %997 = vst [vmem:[%s1554_s5 + $0x58] sm:$0xff] %v775_v23  ;;  %1029 = vst [vmem:[%s1554_s5 + $0x158] sm:$0xff] %v903_v24 }
 0x149   : > { %v779_v27 = vpop.f32.mrb[24].mxu0  ;;  %v907_v28 = vpop.f32.mrb[24].mxu1 }
 0x14a   : > { %v780_v29 = vadd.f32 %v1547_v17, %v779_v27  ;;  %v908_v30 = vadd.f32 %v1547_v17, %v907_v28  ;;  %v781_v31 = vpop.f32.mrb[25].mxu0  ;;  %v909_v32 = vpop.f32.mrb[25].mxu1 }
 0x14b   : > { %v782_v33 = vpop.f32.mrb[26].mxu0  ;;  %v910_v34 = vpop.f32.mrb[26].mxu1 }
 0x14c   : > { %998 = vst [vmem:[%s1554_s5 + $0x60] sm:$0xff] %v780_v29  ;;  %1030 = vst [vmem:[%s1554_s5 + $0x160] sm:$0xff] %v908_v30  ;;  %v783_v35 = vadd.f32 %v1547_v17, %v782_v33  ;;  %v911_v36 = vadd.f32 %v1547_v17, %v910_v34  ;;  %v784_v37 = vpop.f32.mrb[27].mxu0  ;;  %v912_v38 = vpop.f32.mrb[27].mxu1 }
 0x14e   : > { %999 = vst [vmem:[%s1554_s5 + $0x68] sm:$0xff] %v783_v35  ;;  %1031 = vst [vmem:[%s1554_s5 + $0x168] sm:$0xff] %v911_v36 }
 0x151   : > { %v787_v39 = vpop.f32.mrb[28].mxu0  ;;  %v915_v40 = vpop.f32.mrb[28].mxu1 }
 0x152   : > { %v788_v41 = vadd.f32 %v1547_v17, %v787_v39  ;;  %v916_v42 = vadd.f32 %v1547_v17, %v915_v40  ;;  %v789_v43 = vpop.f32.mrb[29].mxu0  ;;  %v917_v44 = vpop.f32.mrb[29].mxu1 }
 0x153   : > { %v790_v45 = vpop.f32.mrb[30].mxu0  ;;  %v918_v46 = vpop.f32.mrb[30].mxu1 }
 0x154   : > { %1000 = vst [vmem:[%s1554_s5 + $0x70] sm:$0xff] %v788_v41  ;;  %1032 = vst [vmem:[%s1554_s5 + $0x170] sm:$0xff] %v916_v42  ;;  %v791_v47 = vadd.f32 %v1547_v17, %v790_v45  ;;  %v919_v48 = vadd.f32 %v1547_v17, %v918_v46  ;;  %v792_v49 = vpop.f32.mrb[31].mxu0  ;;  %v920_v50 = vpop.f32.mrb[31].mxu1 }
 0x156   : > { %1001 = vst [vmem:[%s1554_s5 + $0x78] sm:$0xff] %v791_v47  ;;  %1033 = vst [vmem:[%s1554_s5 + $0x178] sm:$0xff] %v919_v48 }
 0x159   : > { %v795_v51 = vpop.f32.mrb[32].mxu0  ;;  %v923_v52 = vpop.f32.mrb[32].mxu1 }
 0x15a   : > { %v796_v53 = vadd.f32 %v1547_v17, %v795_v51  ;;  %v924_v54 = vadd.f32 %v1547_v17, %v923_v52  ;;  %v797_v55 = vpop.f32.mrb[33].mxu0  ;;  %v925_v56 = vpop.f32.mrb[33].mxu1 }
 0x15b   : > { %v798_v57 = vpop.f32.mrb[34].mxu0  ;;  %v926_v58 = vpop.f32.mrb[34].mxu1 }
 0x15c   : > { %1002 = vst [vmem:[%s1554_s5 + $0x80] sm:$0xff] %v796_v53  ;;  %1034 = vst [vmem:[%s1554_s5 + $0x180] sm:$0xff] %v924_v54  ;;  %v799_v59 = vadd.f32 %v1547_v17, %v798_v57  ;;  %v927_v60 = vadd.f32 %v1547_v17, %v926_v58  ;;  %v800_v61 = vpop.f32.mrb[35].mxu0  ;;  %v928_v62 = vpop.f32.mrb[35].mxu1 }
 0x15e   : > { %1003 = vst [vmem:[%s1554_s5 + $0x88] sm:$0xff] %v799_v59  ;;  %1035 = vst [vmem:[%s1554_s5 + $0x188] sm:$0xff] %v927_v60 }
 0x161   : > { %v803_v63 = vpop.f32.mrb[36].mxu0  ;;  %v931_v0 = vpop.f32.mrb[36].mxu1 }
 0x162   : > { %v804_v1 = vadd.f32 %v1547_v17, %v803_v63  ;;  %v932_v2 = vadd.f32 %v1547_v17, %v931_v0  ;;  %v805_v3 = vpop.f32.mrb[37].mxu0  ;;  %v933_v4 = vpop.f32.mrb[37].mxu1 }
 0x163   : > { %v806_v5 = vpop.f32.mrb[38].mxu0  ;;  %v934_v6 = vpop.f32.mrb[38].mxu1 }
 0x164   : > { %1004 = vst [vmem:[%s1554_s5 + $0x90] sm:$0xff] %v804_v1  ;;  %1036 = vst [vmem:[%s1554_s5 + $0x190] sm:$0xff] %v932_v2  ;;  %v807_v7 = vadd.f32 %v1547_v17, %v806_v5  ;;  %v935_v8 = vadd.f32 %v1547_v17, %v934_v6  ;;  %v808_v9 = vpop.f32.mrb[39].mxu0  ;;  %v936_v10 = vpop.f32.mrb[39].mxu1 }
 0x166   : > { %1005 = vst [vmem:[%s1554_s5 + $0x98] sm:$0xff] %v807_v7  ;;  %1037 = vst [vmem:[%s1554_s5 + $0x198] sm:$0xff] %v935_v8 }
 0x169   : > { %v811_v11 = vpop.f32.mrb[40].mxu0  ;;  %v939_v12 = vpop.f32.mrb[40].mxu1 }
 0x16a   : > { %v812_v13 = vadd.f32 %v1547_v17, %v811_v11  ;;  %v940_v14 = vadd.f32 %v1547_v17, %v939_v12  ;;  %v813_v15 = vpop.f32.mrb[41].mxu0  ;;  %v941_v16 = vpop.f32.mrb[41].mxu1 }
 0x16b   : > { %v814_v18 = vpop.f32.mrb[42].mxu0  ;;  %v942_v19 = vpop.f32.mrb[42].mxu1 }
 0x16c   : > { %1006 = vst [vmem:[%s1554_s5 + $0xa0] sm:$0xff] %v812_v13  ;;  %1038 = vst [vmem:[%s1554_s5 + $0x1a0] sm:$0xff] %v940_v14  ;;  %v815_v20 = vadd.f32 %v1547_v17, %v814_v18  ;;  %v943_v21 = vadd.f32 %v1547_v17, %v942_v19  ;;  %v816_v22 = vpop.f32.mrb[43].mxu0  ;;  %v944_v23 = vpop.f32.mrb[43].mxu1 }
 0x16e   : > { %1007 = vst [vmem:[%s1554_s5 + $0xa8] sm:$0xff] %v815_v20  ;;  %1039 = vst [vmem:[%s1554_s5 + $0x1a8] sm:$0xff] %v943_v21 }
 0x171   : > { %v819_v24 = vpop.f32.mrb[44].mxu0  ;;  %v947_v25 = vpop.f32.mrb[44].mxu1 }
 0x172   : > { %v820_v26 = vadd.f32 %v1547_v17, %v819_v24  ;;  %v948_v27 = vadd.f32 %v1547_v17, %v947_v25  ;;  %v821_v28 = vpop.f32.mrb[45].mxu0  ;;  %v949_v29 = vpop.f32.mrb[45].mxu1 }
 0x173   : > { %v822_v30 = vpop.f32.mrb[46].mxu0  ;;  %v950_v31 = vpop.f32.mrb[46].mxu1 }
 0x174   : > { %1008 = vst [vmem:[%s1554_s5 + $0xb0] sm:$0xff] %v820_v26  ;;  %1040 = vst [vmem:[%s1554_s5 + $0x1b0] sm:$0xff] %v948_v27  ;;  %v823_v32 = vadd.f32 %v1547_v17, %v822_v30  ;;  %v951_v33 = vadd.f32 %v1547_v17, %v950_v31  ;;  %v824_v34 = vpop.f32.mrb[47].mxu0  ;;  %v952_v35 = vpop.f32.mrb[47].mxu1 }
 0x176   : > { %1009 = vst [vmem:[%s1554_s5 + $0xb8] sm:$0xff] %v823_v32  ;;  %1041 = vst [vmem:[%s1554_s5 + $0x1b8] sm:$0xff] %v951_v33 }
 0x179   : > { %v827_v36 = vpop.f32.mrb[48].mxu0  ;;  %v955_v37 = vpop.f32.mrb[48].mxu1 }
 0x17a   : > { %v828_v38 = vadd.f32 %v1547_v17, %v827_v36  ;;  %v956_v39 = vadd.f32 %v1547_v17, %v955_v37  ;;  %v829_v40 = vpop.f32.mrb[49].mxu0  ;;  %v957_v41 = vpop.f32.mrb[49].mxu1 }
 0x17b   : > { %v830_v42 = vpop.f32.mrb[50].mxu0  ;;  %v958_v43 = vpop.f32.mrb[50].mxu1 }
 0x17c   : > { %1010 = vst [vmem:[%s1554_s5 + $0xc0] sm:$0xff] %v828_v38  ;;  %1042 = vst [vmem:[%s1554_s5 + $0x1c0] sm:$0xff] %v956_v39  ;;  %v831_v44 = vadd.f32 %v1547_v17, %v830_v42  ;;  %v959_v45 = vadd.f32 %v1547_v17, %v958_v43  ;;  %v832_v46 = vpop.f32.mrb[51].mxu0  ;;  %v960_v47 = vpop.f32.mrb[51].mxu1 }
 0x17e   : > { %1011 = vst [vmem:[%s1554_s5 + $0xc8] sm:$0xff] %v831_v44  ;;  %1043 = vst [vmem:[%s1554_s5 + $0x1c8] sm:$0xff] %v959_v45 }
 0x181   : > { %v835_v48 = vpop.f32.mrb[52].mxu0  ;;  %v963_v49 = vpop.f32.mrb[52].mxu1 }
 0x182   : > { %v836_v50 = vadd.f32 %v1547_v17, %v835_v48  ;;  %v964_v51 = vadd.f32 %v1547_v17, %v963_v49  ;;  %v837_v52 = vpop.f32.mrb[53].mxu0  ;;  %v965_v53 = vpop.f32.mrb[53].mxu1 }
 0x183   : > { %v838_v54 = vpop.f32.mrb[54].mxu0  ;;  %v966_v55 = vpop.f32.mrb[54].mxu1 }
 0x184   : > { %1012 = vst [vmem:[%s1554_s5 + $0xd0] sm:$0xff] %v836_v50  ;;  %1044 = vst [vmem:[%s1554_s5 + $0x1d0] sm:$0xff] %v964_v51  ;;  %v839_v56 = vadd.f32 %v1547_v17, %v838_v54  ;;  %v967_v57 = vadd.f32 %v1547_v17, %v966_v55  ;;  %v840_v58 = vpop.f32.mrb[55].mxu0  ;;  %v968_v59 = vpop.f32.mrb[55].mxu1 }
 0x186   : > { %1013 = vst [vmem:[%s1554_s5 + $0xd8] sm:$0xff] %v839_v56  ;;  %1045 = vst [vmem:[%s1554_s5 + $0x1d8] sm:$0xff] %v967_v57 }
 0x189   : > { %v843_v60 = vpop.f32.mrb[56].mxu0  ;;  %v971_v61 = vpop.f32.mrb[56].mxu1 }
 0x18a   : > { %v844_v62 = vadd.f32 %v1547_v17, %v843_v60  ;;  %v972_v63 = vadd.f32 %v1547_v17, %v971_v61  ;;  %v845_v0 = vpop.f32.mrb[57].mxu0  ;;  %v973_v1 = vpop.f32.mrb[57].mxu1 }
 0x18b   : > { %v846_v2 = vpop.f32.mrb[58].mxu0  ;;  %v974_v3 = vpop.f32.mrb[58].mxu1 }
 0x18c   : > { %1014 = vst [vmem:[%s1554_s5 + $0xe0] sm:$0xff] %v844_v62  ;;  %1046 = vst [vmem:[%s1554_s5 + $0x1e0] sm:$0xff] %v972_v63  ;;  %v847_v4 = vadd.f32 %v1547_v17, %v846_v2  ;;  %v975_v5 = vadd.f32 %v1547_v17, %v974_v3  ;;  %v848_v6 = vpop.f32.mrb[59].mxu0  ;;  %v976_v7 = vpop.f32.mrb[59].mxu1 }
 0x18e   : > { %1015 = vst [vmem:[%s1554_s5 + $0xe8] sm:$0xff] %v847_v4  ;;  %1047 = vst [vmem:[%s1554_s5 + $0x1e8] sm:$0xff] %v975_v5 }
 0x191   : > { %v851_v8 = vpop.f32.mrb[60].mxu0  ;;  %v979_v9 = vpop.f32.mrb[60].mxu1 }
 0x192   : > { %v852_v10 = vadd.f32 %v1547_v17, %v851_v8  ;;  %v980_v11 = vadd.f32 %v1547_v17, %v979_v9  ;;  %v853_v12 = vpop.f32.mrb[61].mxu0  ;;  %v981_v13 = vpop.f32.mrb[61].mxu1 }
 0x193   : > { %v854_v14 = vpop.f32.mrb[62].mxu0  ;;  %v982_v15 = vpop.f32.mrb[62].mxu1 }
 0x194   : > { %1016 = vst [vmem:[%s1554_s5 + $0xf0] sm:$0xff] %v852_v10  ;;  %1048 = vst [vmem:[%s1554_s5 + $0x1f0] sm:$0xff] %v980_v11  ;;  %v855_v16 = vadd.f32 %v1547_v17, %v854_v14  ;;  %v983_v18 = vadd.f32 %v1547_v17, %v982_v15  ;;  %v856_v19 = vpop.f32.mrb[63].mxu0  ;;  %v984_v20 = vpop.f32.mrb[63].mxu1 }
 0x196   : > { %1017 = vst [vmem:[%s1554_s5 + $0xf8] sm:$0xff] %v855_v16  ;;  %1049 = vst [vmem:[%s1554_s5 + $0x1f8] sm:$0xff] %v983_v18 }
 0x197 PF: > { %s13_s12 = sadd.s32 1, %s1359_s12  }
 0x198   : > { %p10_p4 = scmp.ge.s32.totalorder %s13_s12, 10  }
 0x19a   :  { %12 = sbr.rel (!%p10_p4) target bundleno = 1 (0x1), region = 62 }

</bundles_post_ra>
